<compile_context>
chip_gen: v7x
topology: tpu7x:2x2x1
jax: 0.10.0
libtpu: 0.0.40
codegen_flags: <defaults>
</compile_context>

<pallas_src>
import functools
import math

import jax
import jax.numpy as jnp
import numpy as np
from jax.experimental import pallas as pl
from jax.experimental.pallas import tpu as pltpu


# ------------------------------ fused kernel -------------------------------

def _lenet_kernel(x_ref, t1_ref, b1_ref, t2_ref, b2_ref,
                  f1w_ref, f1b_ref, f2w_ref, f2b_ref, f3w_ref, f3b_ref,
                  out_ref):
    f32 = jnp.float32
    bf16 = jnp.bfloat16
    nb = out_ref.shape[0]                       # samples per grid step

    # Hoist bias loads (JAX does not CSE broadcast_in_dim).
    b1 = b1_ref[...]                            # (1, 512) f32
    b2 = b2_ref[...]                            # (1, 512) f32
    f1b = f1b_ref[...]                          # (1, 128) f32
    f2b = f2b_ref[...]
    f3b = f3b_ref[...]

    # ---- conv1 (5x5, 3->16) + ReLU + 2x2 maxpool,  M = 7*nb ----------------
    # x_ref rows are ordered (h%4, h//4, sample): row index = (8*(h%4)+h//4)*nb + n,
    # so the 7 rows {s+4t} needed by tap offset s are one contiguous slice for
    # all nb samples at once.
    pool1 = []                                  # per row-parity: (7*nb, 256) f32
    for c1b in range(2):
        hmax = None
        for p1 in range(2):
            acc = jnp.zeros((7 * nb, 512), f32)
            for i1 in range(5):
                s = 2 * c1b + p1 + i1           # input row offset 0..7
                r0 = 8 * (s % 4) + s // 4       # start row in reordered slab
                lhs = x_ref[r0 * nb:(r0 + 7) * nb, :].astype(bf16)
                acc = acc + jnp.dot(lhs, t1_ref[i1],
                                    preferred_element_type=f32)
            ph = jnp.maximum(acc + b1, 0.0)
            hmax = ph if hmax is None else jnp.maximum(hmax, ph)   # pool H
        pool1.append(jnp.maximum(hmax[:, :256], hmax[:, 256:]))    # pool W

    # ---- conv2 (5x5, 16->32) + ReLU + 2x2 maxpool,  M = 5*nb ---------------
    hmax = None
    for p2 in range(2):
        acc = jnp.zeros((5 * nb, 512), f32)
        for i2 in range(5):
            a2, par = divmod(p2 + i2, 2)
            lhs = pool1[par][a2 * nb:(a2 + 5) * nb, :].astype(bf16)
            acc = acc + jnp.dot(lhs, t2_ref[i2], preferred_element_type=f32)
        ph = jnp.maximum(acc + b2, 0.0)
        hmax = ph if hmax is None else jnp.maximum(hmax, ph)
    pool2 = jnp.maximum(hmax[:, :256], hmax[:, 256:])              # (5*nb, 256)

    # ---- fc1 (800->120) + ReLU, batched over the block (M = nb) ------------
    acc = jnp.zeros((nb, 128), f32)
    for r in range(5):
        acc = acc + jnp.dot(pool2[r * nb:(r + 1) * nb, :].astype(bf16),
                            f1w_ref[r], preferred_element_type=f32)
    y = jnp.maximum(acc + f1b, 0.0).astype(bf16)
    # ---- fc2 (120->84) + ReLU, fc3 (84->10) --------------------------------
    y = jnp.maximum(jnp.dot(y, f2w_ref[...], preferred_element_type=f32)
                    + f2b, 0.0).astype(bf16)
    y = jnp.dot(y, f3w_ref[...], preferred_element_type=f32) + f3b
    out_ref[...] = y.astype(out_ref.dtype)      # one full-tile (nb,128) store


# --------------------------- host-side weight pack --------------------------

def _conv_toeplitz(w, in_w, cin_pad, half_pad, k_pad):
    """Block-Toeplitz matmul weights, one (k_pad, 2*half_pad) matrix per
    kernel row i:  T[i, (ow+j)*cin_pad + ci, (ow%2)*half_pad + (ow//2)*cout + co]
    = w[i, j, ci, co].  (row-slab @ T[i]) yields the conv output for kernel
    row i with even/odd output columns split into two 128-aligned halves."""
    kh, kw, cin, cout = w.shape
    out_w = in_w - kw + 1
    t = np.zeros((kh, k_pad, 2 * half_pad), np.float32)
    for i in range(kh):
        for j in range(kw):
            for ow in range(out_w):
                r0 = (ow + j) * cin_pad
                c0 = (ow % 2) * half_pad + (ow // 2) * cout
                t[i, r0:r0 + cin, c0:c0 + cout] = w[i, j]
    return t


def _pool_bias(b, half_w, half_pad):
    row = np.zeros((1, 2 * half_pad), np.float32)
    tiled = np.tile(np.asarray(b, np.float32), half_w)
    row[0, :tiled.size] = tiled
    row[0, half_pad:half_pad + tiled.size] = tiled
    return row


def pack_params(params):
    """One-time repack of logical weights into the kernel's padded layout."""
    p = {k: np.asarray(v, np.float32) for k, v in params.items()}
    t1 = _conv_toeplitz(p["conv1_w"], in_w=32, cin_pad=4,
                        half_pad=256, k_pad=128)               # (5, 128, 512)
    t2 = _conv_toeplitz(p["conv2_w"], in_w=14, cin_pad=16,
                        half_pad=256, k_pad=256)               # (5, 256, 512)
    b1 = _pool_bias(p["conv1_b"], 14, 256)                     # (1, 512)
    b2 = _pool_bias(p["conv2_b"], 5, 256)                      # (1, 512)
    f1 = np.zeros((5, 256, 128), np.float32)
    f1[:, :160, :120] = p["fc1_w"].reshape(5, 160, 120)        # HWC flatten
    f1b = np.zeros((1, 128), np.float32); f1b[0, :120] = p["fc1_b"]
    f2 = np.zeros((128, 128), np.float32); f2[:120, :84] = p["fc2_w"]
    f2b = np.zeros((1, 128), np.float32); f2b[0, :84] = p["fc2_b"]
    f3 = np.zeros((128, 128), np.float32); f3[:84, :10] = p["fc3_w"]
    f3b = np.zeros((1, 128), np.float32); f3b[0, :10] = p["fc3_b"]
    wdt = jnp.bfloat16   # big matrices in bf16; biases stay f32
    return {
        "t1": jnp.asarray(t1, wdt), "b1": jnp.asarray(b1),
        "t2": jnp.asarray(t2, wdt), "b2": jnp.asarray(b2),
        "f1w": jnp.asarray(f1, wdt), "f1b": jnp.asarray(f1b),
        "f2w": jnp.asarray(f2, wdt), "f2b": jnp.asarray(f2b),
        "f3w": jnp.asarray(f3, wdt), "f3b": jnp.asarray(f3b),
    }


# ------------------------------ public forward ------------------------------

def lenet_forward(packed, x_nchw, block_batch=8):
    n = x_nchw.shape[0]
    nb = int(block_batch)
    assert nb % 8 == 0, "block_batch must be a multiple of 8"
    n_pad = ((n + nb - 1) // nb) * nb
    num_blocks = n_pad // nb

    # NCHW -> NHWC, pad batch to n_pad and Cin 3->4, reorder H by (h%4, h//4),
    # then lay out rows as (block, h_reordered, sample_in_block) so every conv
    # tap reads one contiguous (7*nb, 128) slab covering the whole block.
    x = jnp.transpose(x_nchw, (0, 2, 3, 1))                    # (N, 32, 32, 3)
    x = jnp.pad(x, ((0, n_pad - n), (0, 0), (0, 0), (0, 1)))   # (n_pad,32,32,4)
    m = jnp.arange(32)
    x = x[:, 4 * (m % 8) + m // 8, :, :]                       # H reorder
    x = x.reshape(n_pad, 32, 128)                              # W*C -> lanes
    x = x.reshape(num_blocks, nb, 32, 128).transpose(0, 2, 1, 3)
    x2d = x.reshape(num_blocks * 32 * nb, 128).astype(jnp.float32)

    full2 = lambda i: (0, 0)
    full3 = lambda i: (0, 0, 0)

    flops = 2 * n_pad * (28 * 28 * 16 * 75 + 10 * 10 * 32 * 400
                         + 800 * 120 + 120 * 84 + 84 * 10)
    w_bytes = sum(int(v.size) * v.dtype.itemsize for v in packed.values())
    bytes_accessed = int(x2d.size) * 4 + w_bytes + n_pad * 128 * 4

    out = pl.pallas_call(
        _lenet_kernel,
        out_shape=jax.ShapeDtypeStruct((n_pad, 128), jnp.float32),
        grid=(num_blocks,),
        in_specs=[
            pl.BlockSpec((32 * nb, 128), lambda i: (i, 0)),    # input slab
            pl.BlockSpec((5, 128, 512), full3),                # conv1 Toeplitz
            pl.BlockSpec((1, 512), full2),                     # conv1 bias
            pl.BlockSpec((5, 256, 512), full3),                # conv2 Toeplitz
            pl.BlockSpec((1, 512), full2),                     # conv2 bias
            pl.BlockSpec((5, 256, 128), full3),                # fc1 (per row)
            pl.BlockSpec((1, 128), full2),
            pl.BlockSpec((128, 128), full2),                   # fc2
            pl.BlockSpec((1, 128), full2),
            pl.BlockSpec((128, 128), full2),                   # fc3
            pl.BlockSpec((1, 128), full2),
        ],
        out_specs=pl.BlockSpec((nb, 128), lambda i: (i, 0)),
        compiler_params=pltpu.CompilerParams(
            dimension_semantics=("parallel",),
            vmem_limit_bytes=16 * 1024 * 1024,
        ),
        cost_estimate=pl.CostEstimate(
            flops=flops, transcendentals=0, bytes_accessed=bytes_accessed),
    )(x2d, packed["t1"], packed["b1"], packed["t2"], packed["b2"],
      packed["f1w"], packed["f1b"], packed["f2w"], packed["f2b"],
      packed["f3w"], packed["f3b"])
    return out[:n, :10]


# ------------------------------ init / reference ----------------------------

def init_params(key):
    keys = jax.random.split(key, 10)

    def u(k, shape, fan_in):
        bound = 1.0 / math.sqrt(fan_in)
        return jax.random.uniform(k, shape, jnp.float32, -bound, bound)

    return {
        "conv1_w": u(keys[0], (5, 5, 3, 16), 5 * 5 * 3),
        "conv1_b": u(keys[1], (16,), 5 * 5 * 3),
        "conv2_w": u(keys[2], (5, 5, 16, 32), 5 * 5 * 16),
        "conv2_b": u(keys[3], (32,), 5 * 5 * 16),
        "fc1_w":   u(keys[4], (32 * 5 * 5, 120), 32 * 5 * 5),
        "fc1_b":   u(keys[5], (120,), 32 * 5 * 5),
        "fc2_w":   u(keys[6], (120, 84), 120),
        "fc2_b":   u(keys[7], (84,), 120),
        "fc3_w":   u(keys[8], (84, 10), 84),
        "fc3_b":   u(keys[9], (10,), 84),
    }


def lenet_reference(params, x_nchw):
    """Pure-JAX f32 reference with identical layout/flatten conventions."""
    x = jnp.transpose(x_nchw, (0, 2, 3, 1))
    for wk, bk in (("conv1_w", "conv1_b"), ("conv2_w", "conv2_b")):
        dn = jax.lax.conv_dimension_numbers(
            x.shape, params[wk].shape, ("NHWC", "HWIO", "NHWC"))
        x = jax.lax.conv_general_dilated(
            x, params[wk], (1, 1), "VALID", dimension_numbers=dn)
        x = jax.nn.relu(x + params[bk])
        x = jax.lax.reduce_window(
            x, -jnp.inf, jax.lax.max, (1, 2, 2, 1), (1, 2, 2, 1), "VALID")
    x = x.reshape(x.shape[0], -1)
    x = jax.nn.relu(x @ params["fc1_w"] + params["fc1_b"])
    x = jax.nn.relu(x @ params["fc2_w"] + params["fc2_b"])
    return x @ params["fc3_w"] + params["fc3_b"]


if __name__ == "__main__":
    key = jax.random.PRNGKey(0)
    pkey, xkey = jax.random.split(key)
    params = init_params(pkey)
    x = jax.random.normal(xkey, (2, 3, 32, 32), dtype=jnp.float32)

    packed = pack_params(params)
    fwd = jax.jit(functools.partial(lenet_forward, block_batch=8))
    out = jax.block_until_ready(fwd(packed, x))

    ref = jax.block_until_ready(lenet_reference(params, x))
    assert out.shape == (2, 10), out.shape
    assert bool(jnp.all(jnp.isfinite(out)))
    max_err = float(jnp.max(jnp.abs(out - ref)))
    # bf16 weights/activation casts vs f32 reference -> loosened tolerance.
    assert bool(jnp.allclose(out, ref, atol=3e-2, rtol=3e-2)), max_err
    print("KERNEL_OK")
</pallas_src>

<mosaic_0001>
module attributes {stable_mosaic.version = 11 : i64} {
  func.func @_lenet_kernel(%arg0: i32, %arg1: memref<256x128xf32, #tpu.memory_space<vmem>>, %arg2: memref<5x128x512xbf16, #tpu.memory_space<vmem>>, %arg3: memref<1x512xf32, #tpu.memory_space<vmem>>, %arg4: memref<5x256x512xbf16, #tpu.memory_space<vmem>>, %arg5: memref<1x512xf32, #tpu.memory_space<vmem>>, %arg6: memref<5x256x128xbf16, #tpu.memory_space<vmem>>, %arg7: memref<1x128xf32, #tpu.memory_space<vmem>>, %arg8: memref<128x128xbf16, #tpu.memory_space<vmem>>, %arg9: memref<1x128xf32, #tpu.memory_space<vmem>>, %arg10: memref<128x128xbf16, #tpu.memory_space<vmem>>, %arg11: memref<1x128xf32, #tpu.memory_space<vmem>>, %arg12: memref<8x128xf32, #tpu.memory_space<vmem>>) attributes {dimension_semantics = [#tpu.dimension_semantics<parallel>], iteration_bounds = array<i64: 1>, scalar_prefetch = 0 : i64, scratch_operands = 0 : i64, tpu.core_type = #tpu.core_type<tc>, window_params = [{transform_indices = @transform_0, window_bounds = array<i64: 256, 128>}, {pipeline_mode = #tpu.pipeline_mode<synchronous>, transform_indices = @transform_1, window_bounds = array<i64: 5, 128, 512>}, {pipeline_mode = #tpu.pipeline_mode<synchronous>, transform_indices = @transform_2, window_bounds = array<i64: 1, 512>}, {pipeline_mode = #tpu.pipeline_mode<synchronous>, transform_indices = @transform_3, window_bounds = array<i64: 5, 256, 512>}, {pipeline_mode = #tpu.pipeline_mode<synchronous>, transform_indices = @transform_4, window_bounds = array<i64: 1, 512>}, {pipeline_mode = #tpu.pipeline_mode<synchronous>, transform_indices = @transform_5, window_bounds = array<i64: 5, 256, 128>}, {pipeline_mode = #tpu.pipeline_mode<synchronous>, transform_indices = @transform_6, window_bounds = array<i64: 1, 128>}, {pipeline_mode = #tpu.pipeline_mode<synchronous>, transform_indices = @transform_7, window_bounds = array<i64: 128, 128>}, {pipeline_mode = #tpu.pipeline_mode<synchronous>, transform_indices = @transform_8, window_bounds = array<i64: 1, 128>}, {pipeline_mode = #tpu.pipeline_mode<synchronous>, transform_indices = @transform_9, window_bounds = array<i64: 128, 128>}, {pipeline_mode = #tpu.pipeline_mode<synchronous>, transform_indices = @transform_10, window_bounds = array<i64: 1, 128>}, {transform_indices = @transform_11, window_bounds = array<i64: 8, 128>}]} {
    %c0 = arith.constant 0 : index
    %c0_0 = arith.constant 0 : index
    %0 = vector.load %arg3[%c0, %c0_0] : memref<1x512xf32, #tpu.memory_space<vmem>>, vector<1x512xf32>
    %c0_1 = arith.constant 0 : index
    %c0_2 = arith.constant 0 : index
    %1 = vector.load %arg5[%c0_1, %c0_2] : memref<1x512xf32, #tpu.memory_space<vmem>>, vector<1x512xf32>
    %c0_3 = arith.constant 0 : index
    %c0_4 = arith.constant 0 : index
    %2 = vector.load %arg7[%c0_3, %c0_4] : memref<1x128xf32, #tpu.memory_space<vmem>>, vector<1x128xf32>
    %c0_5 = arith.constant 0 : index
    %c0_6 = arith.constant 0 : index
    %3 = vector.load %arg9[%c0_5, %c0_6] : memref<1x128xf32, #tpu.memory_space<vmem>>, vector<1x128xf32>
    %c0_7 = arith.constant 0 : index
    %c0_8 = arith.constant 0 : index
    %4 = vector.load %arg11[%c0_7, %c0_8] : memref<1x128xf32, #tpu.memory_space<vmem>>, vector<1x128xf32>
    %cst = arith.constant 0.000000e+00 : f32
    %5 = vector.broadcast %cst : f32 to vector<56x512xf32>
    %c0_9 = arith.constant 0 : index
    %c0_10 = arith.constant 0 : index
    %6 = vector.load %arg1[%c0_9, %c0_10] : memref<256x128xf32, #tpu.memory_space<vmem>>, vector<56x128xf32>
    %7 = arith.truncf %6 : vector<56x128xf32> to vector<56x128xbf16>
    %c0_11 = arith.constant 0 : index
    %c0_12 = arith.constant 0 : index
    %c0_13 = arith.constant 0 : index
    %8 = vector.load %arg2[%c0_11, %c0_12, %c0_13] : memref<5x128x512xbf16, #tpu.memory_space<vmem>>, vector<1x128x512xbf16>
    %9 = vector.shape_cast %8 : vector<1x128x512xbf16> to vector<128x512xbf16>
    %cst_14 = arith.constant dense<0.000000e+00> : vector<56x512xf32>
    %10 = tpu.matmul %7, %9, %cst_14 {dimension_numbers = #tpu.dot_dimension_numbers<[1], [0], [0], [1], [0, 0, 1, 1], [], []>} : vector<56x128xbf16>, vector<128x512xbf16>, vector<56x512xf32> -> vector<56x512xf32>
    %11 = arith.addf %5, %10 : vector<56x512xf32>
    %c64 = arith.constant 64 : index
    %c0_15 = arith.constant 0 : index
    %12 = vector.load %arg1[%c64, %c0_15] : memref<256x128xf32, #tpu.memory_space<vmem>>, vector<56x128xf32>
    %13 = arith.truncf %12 : vector<56x128xf32> to vector<56x128xbf16>
    %c1 = arith.constant 1 : index
    %c0_16 = arith.constant 0 : index
    %c0_17 = arith.constant 0 : index
    %14 = vector.load %arg2[%c1, %c0_16, %c0_17] : memref<5x128x512xbf16, #tpu.memory_space<vmem>>, vector<1x128x512xbf16>
    %15 = vector.shape_cast %14 : vector<1x128x512xbf16> to vector<128x512xbf16>
    %cst_18 = arith.constant dense<0.000000e+00> : vector<56x512xf32>
    %16 = tpu.matmul %13, %15, %cst_18 {dimension_numbers = #tpu.dot_dimension_numbers<[1], [0], [0], [1], [0, 0, 1, 1], [], []>} : vector<56x128xbf16>, vector<128x512xbf16>, vector<56x512xf32> -> vector<56x512xf32>
    %17 = arith.addf %11, %16 : vector<56x512xf32>
    %c128 = arith.constant 128 : index
    %c0_19 = arith.constant 0 : index
    %18 = vector.load %arg1[%c128, %c0_19] : memref<256x128xf32, #tpu.memory_space<vmem>>, vector<56x128xf32>
    %19 = arith.truncf %18 : vector<56x128xf32> to vector<56x128xbf16>
    %c2 = arith.constant 2 : index
    %c0_20 = arith.constant 0 : index
    %c0_21 = arith.constant 0 : index
    %20 = vector.load %arg2[%c2, %c0_20, %c0_21] : memref<5x128x512xbf16, #tpu.memory_space<vmem>>, vector<1x128x512xbf16>
    %21 = vector.shape_cast %20 : vector<1x128x512xbf16> to vector<128x512xbf16>
    %cst_22 = arith.constant dense<0.000000e+00> : vector<56x512xf32>
    %22 = tpu.matmul %19, %21, %cst_22 {dimension_numbers = #tpu.dot_dimension_numbers<[1], [0], [0], [1], [0, 0, 1, 1], [], []>} : vector<56x128xbf16>, vector<128x512xbf16>, vector<56x512xf32> -> vector<56x512xf32>
    %23 = arith.addf %17, %22 : vector<56x512xf32>
    %c192 = arith.constant 192 : index
    %c0_23 = arith.constant 0 : index
    %24 = vector.load %arg1[%c192, %c0_23] : memref<256x128xf32, #tpu.memory_space<vmem>>, vector<56x128xf32>
    %25 = arith.truncf %24 : vector<56x128xf32> to vector<56x128xbf16>
    %c3 = arith.constant 3 : index
    %c0_24 = arith.constant 0 : index
    %c0_25 = arith.constant 0 : index
    %26 = vector.load %arg2[%c3, %c0_24, %c0_25] : memref<5x128x512xbf16, #tpu.memory_space<vmem>>, vector<1x128x512xbf16>
    %27 = vector.shape_cast %26 : vector<1x128x512xbf16> to vector<128x512xbf16>
    %cst_26 = arith.constant dense<0.000000e+00> : vector<56x512xf32>
    %28 = tpu.matmul %25, %27, %cst_26 {dimension_numbers = #tpu.dot_dimension_numbers<[1], [0], [0], [1], [0, 0, 1, 1], [], []>} : vector<56x128xbf16>, vector<128x512xbf16>, vector<56x512xf32> -> vector<56x512xf32>
    %29 = arith.addf %23, %28 : vector<56x512xf32>
    %c8 = arith.constant 8 : index
    %c0_27 = arith.constant 0 : index
    %30 = vector.load %arg1[%c8, %c0_27] : memref<256x128xf32, #tpu.memory_space<vmem>>, vector<56x128xf32>
    %31 = arith.truncf %30 : vector<56x128xf32> to vector<56x128xbf16>
    %c4 = arith.constant 4 : index
    %c0_28 = arith.constant 0 : index
    %c0_29 = arith.constant 0 : index
    %32 = vector.load %arg2[%c4, %c0_28, %c0_29] : memref<5x128x512xbf16, #tpu.memory_space<vmem>>, vector<1x128x512xbf16>
    %33 = vector.shape_cast %32 : vector<1x128x512xbf16> to vector<128x512xbf16>
    %cst_30 = arith.constant dense<0.000000e+00> : vector<56x512xf32>
    %34 = tpu.matmul %31, %33, %cst_30 {dimension_numbers = #tpu.dot_dimension_numbers<[1], [0], [0], [1], [0, 0, 1, 1], [], []>} : vector<56x128xbf16>, vector<128x512xbf16>, vector<56x512xf32> -> vector<56x512xf32>
    %35 = arith.addf %29, %34 : vector<56x512xf32>
    %36 = vector.broadcast %0 : vector<1x512xf32> to vector<56x512xf32>
    %37 = arith.addf %35, %36 : vector<56x512xf32>
    %cst_31 = arith.constant 0.000000e+00 : f32
    %38 = vector.broadcast %cst_31 : f32 to vector<56x512xf32>
    %39 = arith.maximumf %37, %38 : vector<56x512xf32>
    %cst_32 = arith.constant 0.000000e+00 : f32
    %40 = vector.broadcast %cst_32 : f32 to vector<56x512xf32>
    %c64_33 = arith.constant 64 : index
    %c0_34 = arith.constant 0 : index
    %41 = vector.load %arg1[%c64_33, %c0_34] : memref<256x128xf32, #tpu.memory_space<vmem>>, vector<56x128xf32>
    %42 = arith.truncf %41 : vector<56x128xf32> to vector<56x128xbf16>
    %c0_35 = arith.constant 0 : index
    %c0_36 = arith.constant 0 : index
    %c0_37 = arith.constant 0 : index
    %43 = vector.load %arg2[%c0_35, %c0_36, %c0_37] : memref<5x128x512xbf16, #tpu.memory_space<vmem>>, vector<1x128x512xbf16>
    %44 = vector.shape_cast %43 : vector<1x128x512xbf16> to vector<128x512xbf16>
    %cst_38 = arith.constant dense<0.000000e+00> : vector<56x512xf32>
    %45 = tpu.matmul %42, %44, %cst_38 {dimension_numbers = #tpu.dot_dimension_numbers<[1], [0], [0], [1], [0, 0, 1, 1], [], []>} : vector<56x128xbf16>, vector<128x512xbf16>, vector<56x512xf32> -> vector<56x512xf32>
    %46 = arith.addf %40, %45 : vector<56x512xf32>
    %c128_39 = arith.constant 128 : index
    %c0_40 = arith.constant 0 : index
    %47 = vector.load %arg1[%c128_39, %c0_40] : memref<256x128xf32, #tpu.memory_space<vmem>>, vector<56x128xf32>
    %48 = arith.truncf %47 : vector<56x128xf32> to vector<56x128xbf16>
    %c1_41 = arith.constant 1 : index
    %c0_42 = arith.constant 0 : index
    %c0_43 = arith.constant 0 : index
    %49 = vector.load %arg2[%c1_41, %c0_42, %c0_43] : memref<5x128x512xbf16, #tpu.memory_space<vmem>>, vector<1x128x512xbf16>
    %50 = vector.shape_cast %49 : vector<1x128x512xbf16> to vector<128x512xbf16>
    %cst_44 = arith.constant dense<0.000000e+00> : vector<56x512xf32>
    %51 = tpu.matmul %48, %50, %cst_44 {dimension_numbers = #tpu.dot_dimension_numbers<[1], [0], [0], [1], [0, 0, 1, 1], [], []>} : vector<56x128xbf16>, vector<128x512xbf16>, vector<56x512xf32> -> vector<56x512xf32>
    %52 = arith.addf %46, %51 : vector<56x512xf32>
    %c192_45 = arith.constant 192 : index
    %c0_46 = arith.constant 0 : index
    %53 = vector.load %arg1[%c192_45, %c0_46] : memref<256x128xf32, #tpu.memory_space<vmem>>, vector<56x128xf32>
    %54 = arith.truncf %53 : vector<56x128xf32> to vector<56x128xbf16>
    %c2_47 = arith.constant 2 : index
    %c0_48 = arith.constant 0 : index
    %c0_49 = arith.constant 0 : index
    %55 = vector.load %arg2[%c2_47, %c0_48, %c0_49] : memref<5x128x512xbf16, #tpu.memory_space<vmem>>, vector<1x128x512xbf16>
    %56 = vector.shape_cast %55 : vector<1x128x512xbf16> to vector<128x512xbf16>
    %cst_50 = arith.constant dense<0.000000e+00> : vector<56x512xf32>
    %57 = tpu.matmul %54, %56, %cst_50 {dimension_numbers = #tpu.dot_dimension_numbers<[1], [0], [0], [1], [0, 0, 1, 1], [], []>} : vector<56x128xbf16>, vector<128x512xbf16>, vector<56x512xf32> -> vector<56x512xf32>
    %58 = arith.addf %52, %57 : vector<56x512xf32>
    %c8_51 = arith.constant 8 : index
    %c0_52 = arith.constant 0 : index
    %59 = vector.load %arg1[%c8_51, %c0_52] : memref<256x128xf32, #tpu.memory_space<vmem>>, vector<56x128xf32>
    %60 = arith.truncf %59 : vector<56x128xf32> to vector<56x128xbf16>
    %c3_53 = arith.constant 3 : index
    %c0_54 = arith.constant 0 : index
    %c0_55 = arith.constant 0 : index
    %61 = vector.load %arg2[%c3_53, %c0_54, %c0_55] : memref<5x128x512xbf16, #tpu.memory_space<vmem>>, vector<1x128x512xbf16>
    %62 = vector.shape_cast %61 : vector<1x128x512xbf16> to vector<128x512xbf16>
    %cst_56 = arith.constant dense<0.000000e+00> : vector<56x512xf32>
    %63 = tpu.matmul %60, %62, %cst_56 {dimension_numbers = #tpu.dot_dimension_numbers<[1], [0], [0], [1], [0, 0, 1, 1], [], []>} : vector<56x128xbf16>, vector<128x512xbf16>, vector<56x512xf32> -> vector<56x512xf32>
    %64 = arith.addf %58, %63 : vector<56x512xf32>
    %c72 = arith.constant 72 : index
    %c0_57 = arith.constant 0 : index
    %65 = vector.load %arg1[%c72, %c0_57] : memref<256x128xf32, #tpu.memory_space<vmem>>, vector<56x128xf32>
    %66 = arith.truncf %65 : vector<56x128xf32> to vector<56x128xbf16>
    %c4_58 = arith.constant 4 : index
    %c0_59 = arith.constant 0 : index
    %c0_60 = arith.constant 0 : index
    %67 = vector.load %arg2[%c4_58, %c0_59, %c0_60] : memref<5x128x512xbf16, #tpu.memory_space<vmem>>, vector<1x128x512xbf16>
    %68 = vector.shape_cast %67 : vector<1x128x512xbf16> to vector<128x512xbf16>
    %cst_61 = arith.constant dense<0.000000e+00> : vector<56x512xf32>
    %69 = tpu.matmul %66, %68, %cst_61 {dimension_numbers = #tpu.dot_dimension_numbers<[1], [0], [0], [1], [0, 0, 1, 1], [], []>} : vector<56x128xbf16>, vector<128x512xbf16>, vector<56x512xf32> -> vector<56x512xf32>
    %70 = arith.addf %64, %69 : vector<56x512xf32>
    %71 = vector.broadcast %0 : vector<1x512xf32> to vector<56x512xf32>
    %72 = arith.addf %70, %71 : vector<56x512xf32>
    %cst_62 = arith.constant 0.000000e+00 : f32
    %73 = vector.broadcast %cst_62 : f32 to vector<56x512xf32>
    %74 = arith.maximumf %72, %73 : vector<56x512xf32>
    %75 = arith.maximumf %39, %74 : vector<56x512xf32>
    %76 = vector.extract_strided_slice %75 {offsets = [0, 0], sizes = [56, 256], strides = [1, 1]} : vector<56x512xf32> to vector<56x256xf32>
    %77 = vector.extract_strided_slice %75 {offsets = [0, 256], sizes = [56, 256], strides = [1, 1]} : vector<56x512xf32> to vector<56x256xf32>
    %78 = arith.maximumf %76, %77 : vector<56x256xf32>
    %cst_63 = arith.constant 0.000000e+00 : f32
    %79 = vector.broadcast %cst_63 : f32 to vector<56x512xf32>
    %c128_64 = arith.constant 128 : index
    %c0_65 = arith.constant 0 : index
    %80 = vector.load %arg1[%c128_64, %c0_65] : memref<256x128xf32, #tpu.memory_space<vmem>>, vector<56x128xf32>
    %81 = arith.truncf %80 : vector<56x128xf32> to vector<56x128xbf16>
    %c0_66 = arith.constant 0 : index
    %c0_67 = arith.constant 0 : index
    %c0_68 = arith.constant 0 : index
    %82 = vector.load %arg2[%c0_66, %c0_67, %c0_68] : memref<5x128x512xbf16, #tpu.memory_space<vmem>>, vector<1x128x512xbf16>
    %83 = vector.shape_cast %82 : vector<1x128x512xbf16> to vector<128x512xbf16>
    %cst_69 = arith.constant dense<0.000000e+00> : vector<56x512xf32>
    %84 = tpu.matmul %81, %83, %cst_69 {dimension_numbers = #tpu.dot_dimension_numbers<[1], [0], [0], [1], [0, 0, 1, 1], [], []>} : vector<56x128xbf16>, vector<128x512xbf16>, vector<56x512xf32> -> vector<56x512xf32>
    %85 = arith.addf %79, %84 : vector<56x512xf32>
    %c192_70 = arith.constant 192 : index
    %c0_71 = arith.constant 0 : index
    %86 = vector.load %arg1[%c192_70, %c0_71] : memref<256x128xf32, #tpu.memory_space<vmem>>, vector<56x128xf32>
    %87 = arith.truncf %86 : vector<56x128xf32> to vector<56x128xbf16>
    %c1_72 = arith.constant 1 : index
    %c0_73 = arith.constant 0 : index
    %c0_74 = arith.constant 0 : index
    %88 = vector.load %arg2[%c1_72, %c0_73, %c0_74] : memref<5x128x512xbf16, #tpu.memory_space<vmem>>, vector<1x128x512xbf16>
    %89 = vector.shape_cast %88 : vector<1x128x512xbf16> to vector<128x512xbf16>
    %cst_75 = arith.constant dense<0.000000e+00> : vector<56x512xf32>
    %90 = tpu.matmul %87, %89, %cst_75 {dimension_numbers = #tpu.dot_dimension_numbers<[1], [0], [0], [1], [0, 0, 1, 1], [], []>} : vector<56x128xbf16>, vector<128x512xbf16>, vector<56x512xf32> -> vector<56x512xf32>
    %91 = arith.addf %85, %90 : vector<56x512xf32>
    %c8_76 = arith.constant 8 : index
    %c0_77 = arith.constant 0 : index
    %92 = vector.load %arg1[%c8_76, %c0_77] : memref<256x128xf32, #tpu.memory_space<vmem>>, vector<56x128xf32>
    %93 = arith.truncf %92 : vector<56x128xf32> to vector<56x128xbf16>
    %c2_78 = arith.constant 2 : index
    %c0_79 = arith.constant 0 : index
    %c0_80 = arith.constant 0 : index
    %94 = vector.load %arg2[%c2_78, %c0_79, %c0_80] : memref<5x128x512xbf16, #tpu.memory_space<vmem>>, vector<1x128x512xbf16>
    %95 = vector.shape_cast %94 : vector<1x128x512xbf16> to vector<128x512xbf16>
    %cst_81 = arith.constant dense<0.000000e+00> : vector<56x512xf32>
    %96 = tpu.matmul %93, %95, %cst_81 {dimension_numbers = #tpu.dot_dimension_numbers<[1], [0], [0], [1], [0, 0, 1, 1], [], []>} : vector<56x128xbf16>, vector<128x512xbf16>, vector<56x512xf32> -> vector<56x512xf32>
    %97 = arith.addf %91, %96 : vector<56x512xf32>
    %c72_82 = arith.constant 72 : index
    %c0_83 = arith.constant 0 : index
    %98 = vector.load %arg1[%c72_82, %c0_83] : memref<256x128xf32, #tpu.memory_space<vmem>>, vector<56x128xf32>
    %99 = arith.truncf %98 : vector<56x128xf32> to vector<56x128xbf16>
    %c3_84 = arith.constant 3 : index
    %c0_85 = arith.constant 0 : index
    %c0_86 = arith.constant 0 : index
    %100 = vector.load %arg2[%c3_84, %c0_85, %c0_86] : memref<5x128x512xbf16, #tpu.memory_space<vmem>>, vector<1x128x512xbf16>
    %101 = vector.shape_cast %100 : vector<1x128x512xbf16> to vector<128x512xbf16>
    %cst_87 = arith.constant dense<0.000000e+00> : vector<56x512xf32>
    %102 = tpu.matmul %99, %101, %cst_87 {dimension_numbers = #tpu.dot_dimension_numbers<[1], [0], [0], [1], [0, 0, 1, 1], [], []>} : vector<56x128xbf16>, vector<128x512xbf16>, vector<56x512xf32> -> vector<56x512xf32>
    %103 = arith.addf %97, %102 : vector<56x512xf32>
    %c136 = arith.constant 136 : index
    %c0_88 = arith.constant 0 : index
    %104 = vector.load %arg1[%c136, %c0_88] : memref<256x128xf32, #tpu.memory_space<vmem>>, vector<56x128xf32>
    %105 = arith.truncf %104 : vector<56x128xf32> to vector<56x128xbf16>
    %c4_89 = arith.constant 4 : index
    %c0_90 = arith.constant 0 : index
    %c0_91 = arith.constant 0 : index
    %106 = vector.load %arg2[%c4_89, %c0_90, %c0_91] : memref<5x128x512xbf16, #tpu.memory_space<vmem>>, vector<1x128x512xbf16>
    %107 = vector.shape_cast %106 : vector<1x128x512xbf16> to vector<128x512xbf16>
    %cst_92 = arith.constant dense<0.000000e+00> : vector<56x512xf32>
    %108 = tpu.matmul %105, %107, %cst_92 {dimension_numbers = #tpu.dot_dimension_numbers<[1], [0], [0], [1], [0, 0, 1, 1], [], []>} : vector<56x128xbf16>, vector<128x512xbf16>, vector<56x512xf32> -> vector<56x512xf32>
    %109 = arith.addf %103, %108 : vector<56x512xf32>
    %110 = vector.broadcast %0 : vector<1x512xf32> to vector<56x512xf32>
    %111 = arith.addf %109, %110 : vector<56x512xf32>
    %cst_93 = arith.constant 0.000000e+00 : f32
    %112 = vector.broadcast %cst_93 : f32 to vector<56x512xf32>
    %113 = arith.maximumf %111, %112 : vector<56x512xf32>
    %cst_94 = arith.constant 0.000000e+00 : f32
    %114 = vector.broadcast %cst_94 : f32 to vector<56x512xf32>
    %c192_95 = arith.constant 192 : index
    %c0_96 = arith.constant 0 : index
    %115 = vector.load %arg1[%c192_95, %c0_96] : memref<256x128xf32, #tpu.memory_space<vmem>>, vector<56x128xf32>
    %116 = arith.truncf %115 : vector<56x128xf32> to vector<56x128xbf16>
    %c0_97 = arith.constant 0 : index
    %c0_98 = arith.constant 0 : index
    %c0_99 = arith.constant 0 : index
    %117 = vector.load %arg2[%c0_97, %c0_98, %c0_99] : memref<5x128x512xbf16, #tpu.memory_space<vmem>>, vector<1x128x512xbf16>
    %118 = vector.shape_cast %117 : vector<1x128x512xbf16> to vector<128x512xbf16>
    %cst_100 = arith.constant dense<0.000000e+00> : vector<56x512xf32>
    %119 = tpu.matmul %116, %118, %cst_100 {dimension_numbers = #tpu.dot_dimension_numbers<[1], [0], [0], [1], [0, 0, 1, 1], [], []>} : vector<56x128xbf16>, vector<128x512xbf16>, vector<56x512xf32> -> vector<56x512xf32>
    %120 = arith.addf %114, %119 : vector<56x512xf32>
    %c8_101 = arith.constant 8 : index
    %c0_102 = arith.constant 0 : index
    %121 = vector.load %arg1[%c8_101, %c0_102] : memref<256x128xf32, #tpu.memory_space<vmem>>, vector<56x128xf32>
    %122 = arith.truncf %121 : vector<56x128xf32> to vector<56x128xbf16>
    %c1_103 = arith.constant 1 : index
    %c0_104 = arith.constant 0 : index
    %c0_105 = arith.constant 0 : index
    %123 = vector.load %arg2[%c1_103, %c0_104, %c0_105] : memref<5x128x512xbf16, #tpu.memory_space<vmem>>, vector<1x128x512xbf16>
    %124 = vector.shape_cast %123 : vector<1x128x512xbf16> to vector<128x512xbf16>
    %cst_106 = arith.constant dense<0.000000e+00> : vector<56x512xf32>
    %125 = tpu.matmul %122, %124, %cst_106 {dimension_numbers = #tpu.dot_dimension_numbers<[1], [0], [0], [1], [0, 0, 1, 1], [], []>} : vector<56x128xbf16>, vector<128x512xbf16>, vector<56x512xf32> -> vector<56x512xf32>
    %126 = arith.addf %120, %125 : vector<56x512xf32>
    %c72_107 = arith.constant 72 : index
    %c0_108 = arith.constant 0 : index
    %127 = vector.load %arg1[%c72_107, %c0_108] : memref<256x128xf32, #tpu.memory_space<vmem>>, vector<56x128xf32>
    %128 = arith.truncf %127 : vector<56x128xf32> to vector<56x128xbf16>
    %c2_109 = arith.constant 2 : index
    %c0_110 = arith.constant 0 : index
    %c0_111 = arith.constant 0 : index
    %129 = vector.load %arg2[%c2_109, %c0_110, %c0_111] : memref<5x128x512xbf16, #tpu.memory_space<vmem>>, vector<1x128x512xbf16>
    %130 = vector.shape_cast %129 : vector<1x128x512xbf16> to vector<128x512xbf16>
    %cst_112 = arith.constant dense<0.000000e+00> : vector<56x512xf32>
    %131 = tpu.matmul %128, %130, %cst_112 {dimension_numbers = #tpu.dot_dimension_numbers<[1], [0], [0], [1], [0, 0, 1, 1], [], []>} : vector<56x128xbf16>, vector<128x512xbf16>, vector<56x512xf32> -> vector<56x512xf32>
    %132 = arith.addf %126, %131 : vector<56x512xf32>
    %c136_113 = arith.constant 136 : index
    %c0_114 = arith.constant 0 : index
    %133 = vector.load %arg1[%c136_113, %c0_114] : memref<256x128xf32, #tpu.memory_space<vmem>>, vector<56x128xf32>
    %134 = arith.truncf %133 : vector<56x128xf32> to vector<56x128xbf16>
    %c3_115 = arith.constant 3 : index
    %c0_116 = arith.constant 0 : index
    %c0_117 = arith.constant 0 : index
    %135 = vector.load %arg2[%c3_115, %c0_116, %c0_117] : memref<5x128x512xbf16, #tpu.memory_space<vmem>>, vector<1x128x512xbf16>
    %136 = vector.shape_cast %135 : vector<1x128x512xbf16> to vector<128x512xbf16>
    %cst_118 = arith.constant dense<0.000000e+00> : vector<56x512xf32>
    %137 = tpu.matmul %134, %136, %cst_118 {dimension_numbers = #tpu.dot_dimension_numbers<[1], [0], [0], [1], [0, 0, 1, 1], [], []>} : vector<56x128xbf16>, vector<128x512xbf16>, vector<56x512xf32> -> vector<56x512xf32>
    %138 = arith.addf %132, %137 : vector<56x512xf32>
    %c200 = arith.constant 200 : index
    %c0_119 = arith.constant 0 : index
    %139 = vector.load %arg1[%c200, %c0_119] : memref<256x128xf32, #tpu.memory_space<vmem>>, vector<56x128xf32>
    %140 = arith.truncf %139 : vector<56x128xf32> to vector<56x128xbf16>
    %c4_120 = arith.constant 4 : index
    %c0_121 = arith.constant 0 : index
    %c0_122 = arith.constant 0 : index
    %141 = vector.load %arg2[%c4_120, %c0_121, %c0_122] : memref<5x128x512xbf16, #tpu.memory_space<vmem>>, vector<1x128x512xbf16>
    %142 = vector.shape_cast %141 : vector<1x128x512xbf16> to vector<128x512xbf16>
    %cst_123 = arith.constant dense<0.000000e+00> : vector<56x512xf32>
    %143 = tpu.matmul %140, %142, %cst_123 {dimension_numbers = #tpu.dot_dimension_numbers<[1], [0], [0], [1], [0, 0, 1, 1], [], []>} : vector<56x128xbf16>, vector<128x512xbf16>, vector<56x512xf32> -> vector<56x512xf32>
    %144 = arith.addf %138, %143 : vector<56x512xf32>
    %145 = vector.broadcast %0 : vector<1x512xf32> to vector<56x512xf32>
    %146 = arith.addf %144, %145 : vector<56x512xf32>
    %cst_124 = arith.constant 0.000000e+00 : f32
    %147 = vector.broadcast %cst_124 : f32 to vector<56x512xf32>
    %148 = arith.maximumf %146, %147 : vector<56x512xf32>
    %149 = arith.maximumf %113, %148 : vector<56x512xf32>
    %150 = vector.extract_strided_slice %149 {offsets = [0, 0], sizes = [56, 256], strides = [1, 1]} : vector<56x512xf32> to vector<56x256xf32>
    %151 = vector.extract_strided_slice %149 {offsets = [0, 256], sizes = [56, 256], strides = [1, 1]} : vector<56x512xf32> to vector<56x256xf32>
    %152 = arith.maximumf %150, %151 : vector<56x256xf32>
    %cst_125 = arith.constant 0.000000e+00 : f32
    %153 = vector.broadcast %cst_125 : f32 to vector<40x512xf32>
    %154 = vector.extract_strided_slice %78 {offsets = [0, 0], sizes = [40, 256], strides = [1, 1]} : vector<56x256xf32> to vector<40x256xf32>
    %155 = arith.truncf %154 : vector<40x256xf32> to vector<40x256xbf16>
    %c0_126 = arith.constant 0 : index
    %c0_127 = arith.constant 0 : index
    %c0_128 = arith.constant 0 : index
    %156 = vector.load %arg4[%c0_126, %c0_127, %c0_128] : memref<5x256x512xbf16, #tpu.memory_space<vmem>>, vector<1x256x512xbf16>
    %157 = vector.shape_cast %156 : vector<1x256x512xbf16> to vector<256x512xbf16>
    %cst_129 = arith.constant dense<0.000000e+00> : vector<40x512xf32>
    %158 = tpu.matmul %155, %157, %cst_129 {dimension_numbers = #tpu.dot_dimension_numbers<[1], [0], [0], [1], [0, 0, 1, 1], [], []>} : vector<40x256xbf16>, vector<256x512xbf16>, vector<40x512xf32> -> vector<40x512xf32>
    %159 = arith.addf %153, %158 : vector<40x512xf32>
    %160 = vector.extract_strided_slice %152 {offsets = [0, 0], sizes = [40, 256], strides = [1, 1]} : vector<56x256xf32> to vector<40x256xf32>
    %161 = arith.truncf %160 : vector<40x256xf32> to vector<40x256xbf16>
    %c1_130 = arith.constant 1 : index
    %c0_131 = arith.constant 0 : index
    %c0_132 = arith.constant 0 : index
    %162 = vector.load %arg4[%c1_130, %c0_131, %c0_132] : memref<5x256x512xbf16, #tpu.memory_space<vmem>>, vector<1x256x512xbf16>
    %163 = vector.shape_cast %162 : vector<1x256x512xbf16> to vector<256x512xbf16>
    %cst_133 = arith.constant dense<0.000000e+00> : vector<40x512xf32>
    %164 = tpu.matmul %161, %163, %cst_133 {dimension_numbers = #tpu.dot_dimension_numbers<[1], [0], [0], [1], [0, 0, 1, 1], [], []>} : vector<40x256xbf16>, vector<256x512xbf16>, vector<40x512xf32> -> vector<40x512xf32>
    %165 = arith.addf %159, %164 : vector<40x512xf32>
    %166 = vector.extract_strided_slice %78 {offsets = [8, 0], sizes = [40, 256], strides = [1, 1]} : vector<56x256xf32> to vector<40x256xf32>
    %167 = arith.truncf %166 : vector<40x256xf32> to vector<40x256xbf16>
    %c2_134 = arith.constant 2 : index
    %c0_135 = arith.constant 0 : index
    %c0_136 = arith.constant 0 : index
    %168 = vector.load %arg4[%c2_134, %c0_135, %c0_136] : memref<5x256x512xbf16, #tpu.memory_space<vmem>>, vector<1x256x512xbf16>
    %169 = vector.shape_cast %168 : vector<1x256x512xbf16> to vector<256x512xbf16>
    %cst_137 = arith.constant dense<0.000000e+00> : vector<40x512xf32>
    %170 = tpu.matmul %167, %169, %cst_137 {dimension_numbers = #tpu.dot_dimension_numbers<[1], [0], [0], [1], [0, 0, 1, 1], [], []>} : vector<40x256xbf16>, vector<256x512xbf16>, vector<40x512xf32> -> vector<40x512xf32>
    %171 = arith.addf %165, %170 : vector<40x512xf32>
    %172 = vector.extract_strided_slice %152 {offsets = [8, 0], sizes = [40, 256], strides = [1, 1]} : vector<56x256xf32> to vector<40x256xf32>
    %173 = arith.truncf %172 : vector<40x256xf32> to vector<40x256xbf16>
    %c3_138 = arith.constant 3 : index
    %c0_139 = arith.constant 0 : index
    %c0_140 = arith.constant 0 : index
    %174 = vector.load %arg4[%c3_138, %c0_139, %c0_140] : memref<5x256x512xbf16, #tpu.memory_space<vmem>>, vector<1x256x512xbf16>
    %175 = vector.shape_cast %174 : vector<1x256x512xbf16> to vector<256x512xbf16>
    %cst_141 = arith.constant dense<0.000000e+00> : vector<40x512xf32>
    %176 = tpu.matmul %173, %175, %cst_141 {dimension_numbers = #tpu.dot_dimension_numbers<[1], [0], [0], [1], [0, 0, 1, 1], [], []>} : vector<40x256xbf16>, vector<256x512xbf16>, vector<40x512xf32> -> vector<40x512xf32>
    %177 = arith.addf %171, %176 : vector<40x512xf32>
    %178 = vector.extract_strided_slice %78 {offsets = [16, 0], sizes = [40, 256], strides = [1, 1]} : vector<56x256xf32> to vector<40x256xf32>
    %179 = arith.truncf %178 : vector<40x256xf32> to vector<40x256xbf16>
    %c4_142 = arith.constant 4 : index
    %c0_143 = arith.constant 0 : index
    %c0_144 = arith.constant 0 : index
    %180 = vector.load %arg4[%c4_142, %c0_143, %c0_144] : memref<5x256x512xbf16, #tpu.memory_space<vmem>>, vector<1x256x512xbf16>
    %181 = vector.shape_cast %180 : vector<1x256x512xbf16> to vector<256x512xbf16>
    %cst_145 = arith.constant dense<0.000000e+00> : vector<40x512xf32>
    %182 = tpu.matmul %179, %181, %cst_145 {dimension_numbers = #tpu.dot_dimension_numbers<[1], [0], [0], [1], [0, 0, 1, 1], [], []>} : vector<40x256xbf16>, vector<256x512xbf16>, vector<40x512xf32> -> vector<40x512xf32>
    %183 = arith.addf %177, %182 : vector<40x512xf32>
    %184 = vector.broadcast %1 : vector<1x512xf32> to vector<40x512xf32>
    %185 = arith.addf %183, %184 : vector<40x512xf32>
    %cst_146 = arith.constant 0.000000e+00 : f32
    %186 = vector.broadcast %cst_146 : f32 to vector<40x512xf32>
    %187 = arith.maximumf %185, %186 : vector<40x512xf32>
    %cst_147 = arith.constant 0.000000e+00 : f32
    %188 = vector.broadcast %cst_147 : f32 to vector<40x512xf32>
    %189 = vector.extract_strided_slice %152 {offsets = [0, 0], sizes = [40, 256], strides = [1, 1]} : vector<56x256xf32> to vector<40x256xf32>
    %190 = arith.truncf %189 : vector<40x256xf32> to vector<40x256xbf16>
    %c0_148 = arith.constant 0 : index
    %c0_149 = arith.constant 0 : index
    %c0_150 = arith.constant 0 : index
    %191 = vector.load %arg4[%c0_148, %c0_149, %c0_150] : memref<5x256x512xbf16, #tpu.memory_space<vmem>>, vector<1x256x512xbf16>
    %192 = vector.shape_cast %191 : vector<1x256x512xbf16> to vector<256x512xbf16>
    %cst_151 = arith.constant dense<0.000000e+00> : vector<40x512xf32>
    %193 = tpu.matmul %190, %192, %cst_151 {dimension_numbers = #tpu.dot_dimension_numbers<[1], [0], [0], [1], [0, 0, 1, 1], [], []>} : vector<40x256xbf16>, vector<256x512xbf16>, vector<40x512xf32> -> vector<40x512xf32>
    %194 = arith.addf %188, %193 : vector<40x512xf32>
    %195 = vector.extract_strided_slice %78 {offsets = [8, 0], sizes = [40, 256], strides = [1, 1]} : vector<56x256xf32> to vector<40x256xf32>
    %196 = arith.truncf %195 : vector<40x256xf32> to vector<40x256xbf16>
    %c1_152 = arith.constant 1 : index
    %c0_153 = arith.constant 0 : index
    %c0_154 = arith.constant 0 : index
    %197 = vector.load %arg4[%c1_152, %c0_153, %c0_154] : memref<5x256x512xbf16, #tpu.memory_space<vmem>>, vector<1x256x512xbf16>
    %198 = vector.shape_cast %197 : vector<1x256x512xbf16> to vector<256x512xbf16>
    %cst_155 = arith.constant dense<0.000000e+00> : vector<40x512xf32>
    %199 = tpu.matmul %196, %198, %cst_155 {dimension_numbers = #tpu.dot_dimension_numbers<[1], [0], [0], [1], [0, 0, 1, 1], [], []>} : vector<40x256xbf16>, vector<256x512xbf16>, vector<40x512xf32> -> vector<40x512xf32>
    %200 = arith.addf %194, %199 : vector<40x512xf32>
    %201 = vector.extract_strided_slice %152 {offsets = [8, 0], sizes = [40, 256], strides = [1, 1]} : vector<56x256xf32> to vector<40x256xf32>
    %202 = arith.truncf %201 : vector<40x256xf32> to vector<40x256xbf16>
    %c2_156 = arith.constant 2 : index
    %c0_157 = arith.constant 0 : index
    %c0_158 = arith.constant 0 : index
    %203 = vector.load %arg4[%c2_156, %c0_157, %c0_158] : memref<5x256x512xbf16, #tpu.memory_space<vmem>>, vector<1x256x512xbf16>
    %204 = vector.shape_cast %203 : vector<1x256x512xbf16> to vector<256x512xbf16>
    %cst_159 = arith.constant dense<0.000000e+00> : vector<40x512xf32>
    %205 = tpu.matmul %202, %204, %cst_159 {dimension_numbers = #tpu.dot_dimension_numbers<[1], [0], [0], [1], [0, 0, 1, 1], [], []>} : vector<40x256xbf16>, vector<256x512xbf16>, vector<40x512xf32> -> vector<40x512xf32>
    %206 = arith.addf %200, %205 : vector<40x512xf32>
    %207 = vector.extract_strided_slice %78 {offsets = [16, 0], sizes = [40, 256], strides = [1, 1]} : vector<56x256xf32> to vector<40x256xf32>
    %208 = arith.truncf %207 : vector<40x256xf32> to vector<40x256xbf16>
    %c3_160 = arith.constant 3 : index
    %c0_161 = arith.constant 0 : index
    %c0_162 = arith.constant 0 : index
    %209 = vector.load %arg4[%c3_160, %c0_161, %c0_162] : memref<5x256x512xbf16, #tpu.memory_space<vmem>>, vector<1x256x512xbf16>
    %210 = vector.shape_cast %209 : vector<1x256x512xbf16> to vector<256x512xbf16>
    %cst_163 = arith.constant dense<0.000000e+00> : vector<40x512xf32>
    %211 = tpu.matmul %208, %210, %cst_163 {dimension_numbers = #tpu.dot_dimension_numbers<[1], [0], [0], [1], [0, 0, 1, 1], [], []>} : vector<40x256xbf16>, vector<256x512xbf16>, vector<40x512xf32> -> vector<40x512xf32>
    %212 = arith.addf %206, %211 : vector<40x512xf32>
    %213 = vector.extract_strided_slice %152 {offsets = [16, 0], sizes = [40, 256], strides = [1, 1]} : vector<56x256xf32> to vector<40x256xf32>
    %214 = arith.truncf %213 : vector<40x256xf32> to vector<40x256xbf16>
    %c4_164 = arith.constant 4 : index
    %c0_165 = arith.constant 0 : index
    %c0_166 = arith.constant 0 : index
    %215 = vector.load %arg4[%c4_164, %c0_165, %c0_166] : memref<5x256x512xbf16, #tpu.memory_space<vmem>>, vector<1x256x512xbf16>
    %216 = vector.shape_cast %215 : vector<1x256x512xbf16> to vector<256x512xbf16>
    %cst_167 = arith.constant dense<0.000000e+00> : vector<40x512xf32>
    %217 = tpu.matmul %214, %216, %cst_167 {dimension_numbers = #tpu.dot_dimension_numbers<[1], [0], [0], [1], [0, 0, 1, 1], [], []>} : vector<40x256xbf16>, vector<256x512xbf16>, vector<40x512xf32> -> vector<40x512xf32>
    %218 = arith.addf %212, %217 : vector<40x512xf32>
    %219 = vector.broadcast %1 : vector<1x512xf32> to vector<40x512xf32>
    %220 = arith.addf %218, %219 : vector<40x512xf32>
    %cst_168 = arith.constant 0.000000e+00 : f32
    %221 = vector.broadcast %cst_168 : f32 to vector<40x512xf32>
    %222 = arith.maximumf %220, %221 : vector<40x512xf32>
    %223 = arith.maximumf %187, %222 : vector<40x512xf32>
    %224 = vector.extract_strided_slice %223 {offsets = [0, 0], sizes = [40, 256], strides = [1, 1]} : vector<40x512xf32> to vector<40x256xf32>
    %225 = vector.extract_strided_slice %223 {offsets = [0, 256], sizes = [40, 256], strides = [1, 1]} : vector<40x512xf32> to vector<40x256xf32>
    %226 = arith.maximumf %224, %225 : vector<40x256xf32>
    %cst_169 = arith.constant 0.000000e+00 : f32
    %227 = vector.broadcast %cst_169 : f32 to vector<8x128xf32>
    %228 = vector.extract_strided_slice %226 {offsets = [0, 0], sizes = [8, 256], strides = [1, 1]} : vector<40x256xf32> to vector<8x256xf32>
    %229 = arith.truncf %228 : vector<8x256xf32> to vector<8x256xbf16>
    %c0_170 = arith.constant 0 : index
    %c0_171 = arith.constant 0 : index
    %c0_172 = arith.constant 0 : index
    %230 = vector.load %arg6[%c0_170, %c0_171, %c0_172] : memref<5x256x128xbf16, #tpu.memory_space<vmem>>, vector<1x256x128xbf16>
    %231 = vector.shape_cast %230 : vector<1x256x128xbf16> to vector<256x128xbf16>
    %cst_173 = arith.constant dense<0.000000e+00> : vector<8x128xf32>
    %232 = tpu.matmul %229, %231, %cst_173 {dimension_numbers = #tpu.dot_dimension_numbers<[1], [0], [0], [1], [0, 0, 1, 1], [], []>} : vector<8x256xbf16>, vector<256x128xbf16>, vector<8x128xf32> -> vector<8x128xf32>
    %233 = arith.addf %227, %232 : vector<8x128xf32>
    %234 = vector.extract_strided_slice %226 {offsets = [8, 0], sizes = [8, 256], strides = [1, 1]} : vector<40x256xf32> to vector<8x256xf32>
    %235 = arith.truncf %234 : vector<8x256xf32> to vector<8x256xbf16>
    %c1_174 = arith.constant 1 : index
    %c0_175 = arith.constant 0 : index
    %c0_176 = arith.constant 0 : index
    %236 = vector.load %arg6[%c1_174, %c0_175, %c0_176] : memref<5x256x128xbf16, #tpu.memory_space<vmem>>, vector<1x256x128xbf16>
    %237 = vector.shape_cast %236 : vector<1x256x128xbf16> to vector<256x128xbf16>
    %cst_177 = arith.constant dense<0.000000e+00> : vector<8x128xf32>
    %238 = tpu.matmul %235, %237, %cst_177 {dimension_numbers = #tpu.dot_dimension_numbers<[1], [0], [0], [1], [0, 0, 1, 1], [], []>} : vector<8x256xbf16>, vector<256x128xbf16>, vector<8x128xf32> -> vector<8x128xf32>
    %239 = arith.addf %233, %238 : vector<8x128xf32>
    %240 = vector.extract_strided_slice %226 {offsets = [16, 0], sizes = [8, 256], strides = [1, 1]} : vector<40x256xf32> to vector<8x256xf32>
    %241 = arith.truncf %240 : vector<8x256xf32> to vector<8x256xbf16>
    %c2_178 = arith.constant 2 : index
    %c0_179 = arith.constant 0 : index
    %c0_180 = arith.constant 0 : index
    %242 = vector.load %arg6[%c2_178, %c0_179, %c0_180] : memref<5x256x128xbf16, #tpu.memory_space<vmem>>, vector<1x256x128xbf16>
    %243 = vector.shape_cast %242 : vector<1x256x128xbf16> to vector<256x128xbf16>
    %cst_181 = arith.constant dense<0.000000e+00> : vector<8x128xf32>
    %244 = tpu.matmul %241, %243, %cst_181 {dimension_numbers = #tpu.dot_dimension_numbers<[1], [0], [0], [1], [0, 0, 1, 1], [], []>} : vector<8x256xbf16>, vector<256x128xbf16>, vector<8x128xf32> -> vector<8x128xf32>
    %245 = arith.addf %239, %244 : vector<8x128xf32>
    %246 = vector.extract_strided_slice %226 {offsets = [24, 0], sizes = [8, 256], strides = [1, 1]} : vector<40x256xf32> to vector<8x256xf32>
    %247 = arith.truncf %246 : vector<8x256xf32> to vector<8x256xbf16>
    %c3_182 = arith.constant 3 : index
    %c0_183 = arith.constant 0 : index
    %c0_184 = arith.constant 0 : index
    %248 = vector.load %arg6[%c3_182, %c0_183, %c0_184] : memref<5x256x128xbf16, #tpu.memory_space<vmem>>, vector<1x256x128xbf16>
    %249 = vector.shape_cast %248 : vector<1x256x128xbf16> to vector<256x128xbf16>
    %cst_185 = arith.constant dense<0.000000e+00> : vector<8x128xf32>
    %250 = tpu.matmul %247, %249, %cst_185 {dimension_numbers = #tpu.dot_dimension_numbers<[1], [0], [0], [1], [0, 0, 1, 1], [], []>} : vector<8x256xbf16>, vector<256x128xbf16>, vector<8x128xf32> -> vector<8x128xf32>
    %251 = arith.addf %245, %250 : vector<8x128xf32>
    %252 = vector.extract_strided_slice %226 {offsets = [32, 0], sizes = [8, 256], strides = [1, 1]} : vector<40x256xf32> to vector<8x256xf32>
    %253 = arith.truncf %252 : vector<8x256xf32> to vector<8x256xbf16>
    %c4_186 = arith.constant 4 : index
    %c0_187 = arith.constant 0 : index
    %c0_188 = arith.constant 0 : index
    %254 = vector.load %arg6[%c4_186, %c0_187, %c0_188] : memref<5x256x128xbf16, #tpu.memory_space<vmem>>, vector<1x256x128xbf16>
    %255 = vector.shape_cast %254 : vector<1x256x128xbf16> to vector<256x128xbf16>
    %cst_189 = arith.constant dense<0.000000e+00> : vector<8x128xf32>
    %256 = tpu.matmul %253, %255, %cst_189 {dimension_numbers = #tpu.dot_dimension_numbers<[1], [0], [0], [1], [0, 0, 1, 1], [], []>} : vector<8x256xbf16>, vector<256x128xbf16>, vector<8x128xf32> -> vector<8x128xf32>
    %257 = arith.addf %251, %256 : vector<8x128xf32>
    %258 = vector.broadcast %2 : vector<1x128xf32> to vector<8x128xf32>
    %259 = arith.addf %257, %258 : vector<8x128xf32>
    %cst_190 = arith.constant 0.000000e+00 : f32
    %260 = vector.broadcast %cst_190 : f32 to vector<8x128xf32>
    %261 = arith.maximumf %259, %260 : vector<8x128xf32>
    %262 = arith.truncf %261 : vector<8x128xf32> to vector<8x128xbf16>
    %c0_191 = arith.constant 0 : index
    %c0_192 = arith.constant 0 : index
    %263 = vector.load %arg8[%c0_191, %c0_192] : memref<128x128xbf16, #tpu.memory_space<vmem>>, vector<128x128xbf16>
    %cst_193 = arith.constant dense<0.000000e+00> : vector<8x128xf32>
    %264 = tpu.matmul %262, %263, %cst_193 {dimension_numbers = #tpu.dot_dimension_numbers<[1], [0], [0], [1], [0, 0, 1, 1], [], []>} : vector<8x128xbf16>, vector<128x128xbf16>, vector<8x128xf32> -> vector<8x128xf32>
    %265 = vector.broadcast %3 : vector<1x128xf32> to vector<8x128xf32>
    %266 = arith.addf %264, %265 : vector<8x128xf32>
    %cst_194 = arith.constant 0.000000e+00 : f32
    %267 = vector.broadcast %cst_194 : f32 to vector<8x128xf32>
    %268 = arith.maximumf %266, %267 : vector<8x128xf32>
    %269 = arith.truncf %268 : vector<8x128xf32> to vector<8x128xbf16>
    %c0_195 = arith.constant 0 : index
    %c0_196 = arith.constant 0 : index
    %270 = vector.load %arg10[%c0_195, %c0_196] : memref<128x128xbf16, #tpu.memory_space<vmem>>, vector<128x128xbf16>
    %cst_197 = arith.constant dense<0.000000e+00> : vector<8x128xf32>
    %271 = tpu.matmul %269, %270, %cst_197 {dimension_numbers = #tpu.dot_dimension_numbers<[1], [0], [0], [1], [0, 0, 1, 1], [], []>} : vector<8x128xbf16>, vector<128x128xbf16>, vector<8x128xf32> -> vector<8x128xf32>
    %272 = vector.broadcast %4 : vector<1x128xf32> to vector<8x128xf32>
    %273 = arith.addf %271, %272 : vector<8x128xf32>
    %c0_198 = arith.constant 0 : index
    %c0_199 = arith.constant 0 : index
    %274 = vector.load %arg12[%c0_198, %c0_199] : memref<8x128xf32, #tpu.memory_space<vmem>>, vector<8x128xf32>
    tpu.vector_store %arg12[%c0_198, %c0_199], %273 {strides = array<i32>} : memref<8x128xf32, #tpu.memory_space<vmem>>, vector<8x128xf32>,
    return
  }
  func.func @transform_0(%arg0: i32) -> (i32, i32) {
    %c0_i32 = arith.constant 0 : i32
    %c0_i32_0 = arith.constant 0 : i32
    return %arg0, %c0_i32 : i32, i32
  }
  func.func @transform_1(%arg0: i32) -> (i32, i32, i32) {
    %c0_i32 = arith.constant 0 : i32
    %c0_i32_0 = arith.constant 0 : i32
    %c0_i32_1 = arith.constant 0 : i32
    %c0_i32_2 = arith.constant 0 : i32
    return %c0_i32, %c0_i32_0, %c0_i32_1 : i32, i32, i32
  }
  func.func @transform_2(%arg0: i32) -> (i32, i32) {
    %c0_i32 = arith.constant 0 : i32
    %c0_i32_0 = arith.constant 0 : i32
    %c0_i32_1 = arith.constant 0 : i32
    return %c0_i32, %c0_i32_0 : i32, i32
  }
  func.func @transform_3(%arg0: i32) -> (i32, i32, i32) {
    %c0_i32 = arith.constant 0 : i32
    %c0_i32_0 = arith.constant 0 : i32
    %c0_i32_1 = arith.constant 0 : i32
    %c0_i32_2 = arith.constant 0 : i32
    return %c0_i32, %c0_i32_0, %c0_i32_1 : i32, i32, i32
  }
  func.func @transform_4(%arg0: i32) -> (i32, i32) {
    %c0_i32 = arith.constant 0 : i32
    %c0_i32_0 = arith.constant 0 : i32
    %c0_i32_1 = arith.constant 0 : i32
    return %c0_i32, %c0_i32_0 : i32, i32
  }
  func.func @transform_5(%arg0: i32) -> (i32, i32, i32) {
    %c0_i32 = arith.constant 0 : i32
    %c0_i32_0 = arith.constant 0 : i32
    %c0_i32_1 = arith.constant 0 : i32
    %c0_i32_2 = arith.constant 0 : i32
    return %c0_i32, %c0_i32_0, %c0_i32_1 : i32, i32, i32
  }
  func.func @transform_6(%arg0: i32) -> (i32, i32) {
    %c0_i32 = arith.constant 0 : i32
    %c0_i32_0 = arith.constant 0 : i32
    %c0_i32_1 = arith.constant 0 : i32
    return %c0_i32, %c0_i32_0 : i32, i32
  }
  func.func @transform_7(%arg0: i32) -> (i32, i32) {
    %c0_i32 = arith.constant 0 : i32
    %c0_i32_0 = arith.constant 0 : i32
    %c0_i32_1 = arith.constant 0 : i32
    return %c0_i32, %c0_i32_0 : i32, i32
  }
  func.func @transform_8(%arg0: i32) -> (i32, i32) {
    %c0_i32 = arith.constant 0 : i32
    %c0_i32_0 = arith.constant 0 : i32
    %c0_i32_1 = arith.constant 0 : i32
    return %c0_i32, %c0_i32_0 : i32, i32
  }
  func.func @transform_9(%arg0: i32) -> (i32, i32) {
    %c0_i32 = arith.constant 0 : i32
    %c0_i32_0 = arith.constant 0 : i32
    %c0_i32_1 = arith.constant 0 : i32
    return %c0_i32, %c0_i32_0 : i32, i32
  }
  func.func @transform_10(%arg0: i32) -> (i32, i32) {
    %c0_i32 = arith.constant 0 : i32
    %c0_i32_0 = arith.constant 0 : i32
    %c0_i32_1 = arith.constant 0 : i32
    return %c0_i32, %c0_i32_0 : i32, i32
  }
  func.func @transform_11(%arg0: i32) -> (i32, i32) {
    %c0_i32 = arith.constant 0 : i32
    %c0_i32_0 = arith.constant 0 : i32
    return %arg0, %c0_i32 : i32, i32
  }
}

</mosaic_0001>

<bundles_post_ra>
// kernel: lenet_forward.1
= control target key start
LH: loop header
LB: loop body
LE: loop exit
PB: predicated region body
PF: predicated region fallthrough
CT: control target
= control target key end

     0   :  { %v18406_v1 = vmov 0   ;;  %vm12185_vm0 = vmmov 0   ;;  %s18394_s1 = inlined_call_operand.vmem [shape: bf16[5,128,512], index: 1, kind: input, shape index: {}]   ;;  %s18395_s0 = inlined_call_operand.vmem [shape: f32[256,128], index: 0, kind: input, shape index: {}]   ;;  %s18396_s2 = inlined_call_operand.vmem [shape: f32[1,512], index: 2, kind: input, shape index: {}]   ;;  %s18397_s3 = inlined_call_operand.vmem [shape: bf16[5,256,512], index: 3, kind: input, shape index: {}]   ;;  %s18398_s5 = inlined_call_operand.vmem [shape: bf16[5,256,128], index: 5, kind: input, shape index: {}]   ;;  %s18399_s4 = inlined_call_operand.vmem [shape: f32[1,512], index: 4, kind: input, shape index: {}]   ;;  %s18400_s7 = inlined_call_operand.vmem [shape: bf16[128,128], index: 7, kind: input, shape index: {}]   ;;  %s18401_s9 = inlined_call_operand.vmem [shape: bf16[128,128], index: 9, kind: input, shape index: {}]   ;;  %s18402_s6 = inlined_call_operand.vmem [shape: f32[1,128], index: 6, kind: input, shape index: {}]   ;;  %s18403_s8 = inlined_call_operand.vmem [shape: f32[1,128], index: 8, kind: input, shape index: {}]   ;;  %s18404_s10 = inlined_call_operand.vmem [shape: f32[1,128], index: 10, kind: input, shape index: {}]   ;;  %s18405_s11 = inlined_call_operand.vmem [shape: f32[8,128], index: 11, kind: output, shape index: {}]  }
   0x1   :  { %v10895_v0 = vld [vmem:[%s18394_s1 + $0x104] ss:$16 sps:$4 sm:$0xff]   ;;  %323 = vmatprep.mubr.bf16.mxu0 %v18406_v1  ;;  %394 = vmatprep.mubr.bf16.mxu1 %v18406_v1  ;;  %v10897_v2 = vld [vmem:[%s18394_s1 + $0x10c] ss:$16 sps:$4 sm:$0xff]   ;;  %v10899_v3 = vld [vmem:[%s18394_s1 + $0x100] ss:$16 sps:$4 sm:$0xff]  }
   0x2   :  { %291 = vmatprep.subr.bf16.mxu0 %v10895_v0  ;;  %v10900_v4 = vld [vmem:[%s18394_s1 + $0x108] ss:$16 sps:$4 sm:$0xff]   ;;  %362 = vmatprep.subr.bf16.mxu1 %v10897_v2  ;;  %v10901_v5 = vld [vmem:[%s18394_s1 + $0x124] ss:$16 sps:$4 sm:$0xff]   ;;  %v10903_v6 = vld [vmem:[%s18394_s1 + $0x12c] ss:$16 sps:$4 sm:$0xff]  }
   0x3   :  { %292 = vmatpush1.bf16.msra.mxu0 %v10899_v3  ;;  %363 = vmatpush1.bf16.msra.mxu1 %v10900_v4  ;;  %v10905_v7 = vld [vmem:[%s18394_s1 + $0x120] ss:$16 sps:$4 sm:$0xff]   ;;  %v10906_v8 = vld [vmem:[%s18394_s1 + $0x128] ss:$16 sps:$4 sm:$0xff]   ;;  %v10907_v9 = vld [vmem:[%s18394_s1 + $0x144] ss:$16 sps:$4 sm:$0xff]  }
   0x4   :  { %293 = vmatprep.subr.bf16.mxu0 %v10901_v5  ;;  %364 = vmatprep.subr.bf16.mxu1 %v10903_v6  ;;  %v10909_v10 = vld [vmem:[%s18394_s1 + $0x14c] ss:$16 sps:$4 sm:$0xff]   ;;  %v10911_v11 = vld [vmem:[%s18394_s1 + $0x140] ss:$16 sps:$4 sm:$0xff]   ;;  %v10912_v12 = vld [vmem:[%s18394_s1 + $0x148] ss:$16 sps:$4 sm:$0xff]  }
   0x5   :  { %v10913_v13 = vld [vmem:[%s18394_s1 + $0x164] ss:$16 sps:$4 sm:$0xff]   ;;  %v10915_v14 = vld [vmem:[%s18394_s1 + $0x16c] ss:$16 sps:$4 sm:$0xff]   ;;  %v10917_v15 = vld [vmem:[%s18394_s1 + $0x160] ss:$16 sps:$4 sm:$0xff]  }
   0x6   :  { %v10918_v16 = vld [vmem:[%s18394_s1 + $0x168] ss:$16 sps:$4 sm:$0xff]   ;;  %v10919_v17 = vld [vmem:[%s18394_s1 + $0x184] ss:$16 sps:$4 sm:$0xff]   ;;  %v10921_v18 = vld [vmem:[%s18394_s1 + $0x18c] ss:$16 sps:$4 sm:$0xff]  }
   0x7   :  { %294 = vmatpush1.bf16.msra.mxu0 %v10905_v7  ;;  %365 = vmatpush1.bf16.msra.mxu1 %v10906_v8  ;;  %v10923_v19 = vld [vmem:[%s18394_s1 + $0x180] ss:$16 sps:$4 sm:$0xff]   ;;  %v10924_v20 = vld [vmem:[%s18394_s1 + $0x188] ss:$16 sps:$4 sm:$0xff]   ;;  %v10925_v21 = vld [vmem:[%s18394_s1 + $0x1a4] ss:$16 sps:$4 sm:$0xff]  }
   0x8   :  { %295 = vmatprep.subr.bf16.mxu0 %v10907_v9  ;;  %366 = vmatprep.subr.bf16.mxu1 %v10909_v10  ;;  %v10927_v22 = vld [vmem:[%s18394_s1 + $0x1ac] ss:$16 sps:$4 sm:$0xff]   ;;  %v10929_v23 = vld [vmem:[%s18394_s1 + $0x1a0] ss:$16 sps:$4 sm:$0xff]   ;;  %v10930_v24 = vld [vmem:[%s18394_s1 + $0x1a8] ss:$16 sps:$4 sm:$0xff]  }
   0x9   :  { %v10931_v25 = vld [vmem:[%s18394_s1 + $0x1c4] ss:$16 sps:$4 sm:$0xff]   ;;  %v10933_v26 = vld [vmem:[%s18394_s1 + $0x1cc] ss:$16 sps:$4 sm:$0xff]   ;;  %v10935_v27 = vld [vmem:[%s18394_s1 + $0x1c0] ss:$16 sps:$4 sm:$0xff]  }
   0xa   :  { %v10936_v28 = vld [vmem:[%s18394_s1 + $0x1c8] ss:$16 sps:$4 sm:$0xff]   ;;  %v10937_v29 = vld [vmem:[%s18394_s1 + $0x1e4] ss:$16 sps:$4 sm:$0xff]   ;;  %v10939_v30 = vld [vmem:[%s18394_s1 + $0x1ec] ss:$16 sps:$4 sm:$0xff]  }
   0xb   :  { %296 = vmatpush1.bf16.msra.mxu0 %v10911_v11  ;;  %367 = vmatpush1.bf16.msra.mxu1 %v10912_v12  ;;  %v10941_v31 = vld [vmem:[%s18394_s1 + $0x1e0] ss:$16 sps:$4 sm:$0xff]   ;;  %v10942_v32 = vld [vmem:[%s18394_s1 + $0x1e8] ss:$16 sps:$4 sm:$0xff]   ;;  %v10943_v35 = vld [vmem:[%s18394_s1 + $0x4] ss:$16 sps:$4 sm:$0xff]  }
   0xc   :  { %297 = vmatprep.subr.bf16.mxu0 %v10913_v13  ;;  %368 = vmatprep.subr.bf16.mxu1 %v10915_v14  ;;  %v87_v33 = vld [vmem:[%s18395_s0 + $0x40] sm:$0xff]  ;;  %v88_v34 = vld [vmem:[%s18395_s0 + $0x48] sm:$0xff]  ;;  %v89_v44 = vld [vmem:[%s18395_s0 + $0x50] sm:$0xff] }
   0xd   :  { %v10945_v36 = vld [vmem:[%s18394_s1 + $0xc] ss:$16 sps:$4 sm:$0xff]   ;;  %v12356_v37 = vpack.c.bf16 %v88_v34, %v87_v33  ;;  %v10947_v38 = vld [vmem:[%s18394_s1] ss:$16 sps:$4 sm:$0xff]   ;;  %v10948_v39 = vld [vmem:[%s18394_s1 + $0x8] ss:$16 sps:$4 sm:$0xff]  }
   0xe   :  { %v10949_v40 = vld [vmem:[%s18394_s1 + $0x24] ss:$16 sps:$4 sm:$0xff]   ;;  %v10951_v41 = vld [vmem:[%s18394_s1 + $0x2c] ss:$16 sps:$4 sm:$0xff]   ;;  %v10953_v42 = vld [vmem:[%s18394_s1 + $0x20] ss:$16 sps:$4 sm:$0xff]  }
   0xf   :  { %298 = vmatpush1.bf16.msra.mxu0 %v10917_v15  ;;  %369 = vmatpush1.bf16.msra.mxu1 %v10918_v16  ;;  %v10954_v43 = vld [vmem:[%s18394_s1 + $0x28] ss:$16 sps:$4 sm:$0xff]   ;;  %v10955_v46 = vld [vmem:[%s18394_s1 + $0x44] ss:$16 sps:$4 sm:$0xff]   ;;  %v10957_v47 = vld [vmem:[%s18394_s1 + $0x4c] ss:$16 sps:$4 sm:$0xff]  }
  0x10   :  { %299 = vmatprep.subr.bf16.mxu0 %v10919_v17  ;;  %370 = vmatprep.subr.bf16.mxu1 %v10921_v18  ;;  %v90_v45 = vld [vmem:[%s18395_s0 + $0x58] sm:$0xff]  ;;  %v12397_v49 = vld [vmem:[%s18394_s1 + $0x40] ss:$16 sps:$4 sm:$0xff]   ;;  %v12407_v51 = vld [vmem:[%s18394_s1 + $0x64] ss:$16 sps:$4 sm:$0xff]  }
  0x11   :  { %v12392_v48 = vpack.c.bf16 %v90_v45, %v89_v44  ;;  %v12402_v50 = vld [vmem:[%s18394_s1 + $0x48] ss:$16 sps:$4 sm:$0xff]   ;;  %v12412_v52 = vld [vmem:[%s18394_s1 + $0x6c] ss:$16 sps:$4 sm:$0xff]   ;;  %v12419_v53 = vld [vmem:[%s18394_s1 + $0x60] ss:$16 sps:$4 sm:$0xff]  }
  0x12   :  { %v12426_v54 = vld [vmem:[%s18394_s1 + $0x68] ss:$16 sps:$4 sm:$0xff]   ;;  %v91_v55 = vld [vmem:[%s18395_s0 + $0x60] sm:$0xff]  ;;  %v12444_v58 = vld [vmem:[%s18394_s1 + $0x8c] ss:$16 sps:$4 sm:$0xff]  }
  0x13   :  { %300 = vmatpush1.bf16.msra.mxu0 %v10923_v19  ;;  %371 = vmatpush1.bf16.msra.mxu1 %v10924_v20  ;;  %v92_v56 = vld [vmem:[%s18395_s0 + $0x68] sm:$0xff]  ;;  %v12439_v57 = vld [vmem:[%s18394_s1 + $0x84] ss:$16 sps:$4 sm:$0xff]   ;;  %v12453_v60 = vld [vmem:[%s18394_s1 + $0x80] ss:$16 sps:$4 sm:$0xff]  }
  0x14   :  { %301 = vmatprep.subr.bf16.mxu0 %v10925_v21  ;;  %372 = vmatprep.subr.bf16.mxu1 %v10927_v22  ;;  %v12448_v59 = vpack.c.bf16 %v92_v56, %v91_v55  ;;  %v12458_v61 = vld [vmem:[%s18394_s1 + $0x88] ss:$16 sps:$4 sm:$0xff]   ;;  %v12465_v62 = vld [vmem:[%s18394_s1 + $0xa4] ss:$16 sps:$4 sm:$0xff]   ;;  %v12472_v63 = vld [vmem:[%s18394_s1 + $0xac] ss:$16 sps:$4 sm:$0xff]  }
  0x15   :  { %v12477_v0 = vld [vmem:[%s18394_s1 + $0xa0] ss:$16 sps:$4 sm:$0xff]   ;;  %v12482_v2 = vld [vmem:[%s18394_s1 + $0xa8] ss:$16 sps:$4 sm:$0xff]   ;;  %v12504_v7 = vld [vmem:[%s18394_s1 + $0xc4] ss:$16 sps:$4 sm:$0xff]  }
  0x16   :  { %v45_v3 = vld [vmem:[%s18395_s0 + $0x8] sm:$0xff]  ;;  %v46_v4 = vld [vmem:[%s18395_s0 + $0x10] sm:$0xff]  ;;  %v47_v14 = vld [vmem:[%s18395_s0 + $0x18] sm:$0xff] }
  0x17   :  { %302 = vmatpush1.bf16.msra.mxu0 %v10929_v23  ;;  %373 = vmatpush1.bf16.msra.mxu1 %v10930_v24  ;;  %v93_v5 = vld [vmem:[%s18395_s0 + $0x70] sm:$0xff]  ;;  %v12497_v6 = vpack.c.bf16 %v46_v4, %v45_v3  ;;  %v12509_v8 = vld [vmem:[%s18394_s1 + $0xcc] ss:$16 sps:$4 sm:$0xff]   ;;  %v12525_v11 = vld [vmem:[%s18394_s1 + $0xc8] ss:$16 sps:$4 sm:$0xff]   ;;  %v52_v34 = vpack.c.bf16 %v47_v14, %v46_v4 }
  0x18   :  { %303 = vmatprep.subr.bf16.mxu0 %v10931_v25  ;;  %374 = vmatprep.subr.bf16.mxu1 %v10933_v26  ;;  %v12513_v9 = vpack.c.bf16 %v93_v5, %v93_v5  ;;  %v12518_v10 = vld [vmem:[%s18394_s1 + $0xc0] ss:$16 sps:$4 sm:$0xff]   ;;  %v12530_v12 = vld [vmem:[%s18394_s1 + $0xe4] ss:$16 sps:$4 sm:$0xff]   ;;  %v12535_v13 = vld [vmem:[%s18394_s1 + $0xec] ss:$16 sps:$4 sm:$0xff]  }
  0x19   :  { %v48_v15 = vld [vmem:[%s18395_s0 + $0x20] sm:$0xff]  ;;  %v12557_v18 = vld [vmem:[%s18394_s1 + $0xe8] ss:$16 sps:$4 sm:$0xff]   ;;  %v12574_v21 = vld [vmem:[%s18394_s1 + $0x20c] ss:$16 sps:$4 sm:$0xff]  }
  0x1a   :  { %18687 = vst [vmem:[#allocation2_spill] sm:$0xff] %v12513_v9  ;;  %v12548_v16 = vld [vmem:[%s18394_s1 + $0xe0] ss:$16 sps:$4 sm:$0xff]   ;;  %v12550_v17 = vpack.c.bf16 %v48_v15, %v47_v14  ;;  %v12567_v20 = vld [vmem:[%s18394_s1 + $0x204] ss:$16 sps:$4 sm:$0xff]   ;;  %v49_v23 = vld [vmem:[%s18395_s0 + $0x28] sm:$0xff] }
  0x1b   :  { %304 = vmatpush1.bf16.msra.mxu0 %v10935_v27  ;;  %375 = vmatpush1.bf16.msra.mxu1 %v10936_v28  ;;  %v44_v19 = vld [vmem:[%s18395_s0] sm:$0xff]  ;;  %v50_v25 = vld [vmem:[%s18395_s0 + $0x30] sm:$0xff]  ;;  %v12594_v26 = vld [vmem:[%s18394_s1 + $0x208] ss:$16 sps:$4 sm:$0xff]   ;;  %v53_v44 = vpack.c.bf16 %v49_v23, %v48_v15 }
  0x1c   :  { %305 = vmatprep.subr.bf16.mxu0 %v10937_v29  ;;  %376 = vmatprep.subr.bf16.mxu1 %v10939_v30  ;;  %v12581_v22 = vld [vmem:[%s18394_s1 + $0x200] ss:$16 sps:$4 sm:$0xff]   ;;  %v51_v24 = vpack.c.bf16 %v45_v3, %v44_v19  ;;  %v12596_v27 = vpack.c.bf16 %v50_v25, %v49_v23  ;;  %v12603_v28 = vld [vmem:[%s18394_s1 + $0x224] ss:$16 sps:$4 sm:$0xff]   ;;  %v12608_v29 = vld [vmem:[%s18394_s1 + $0x22c] ss:$16 sps:$4 sm:$0xff]   ;;  %v54_v14 = vpack.c.bf16 %v50_v25, %v50_v25 }
  0x1d   :  { %v12615_v30 = vld [vmem:[%s18394_s1 + $0x220] ss:$16 sps:$4 sm:$0xff]   ;;  %v12632_v33 = vld [vmem:[%s18394_s1 + $0x24c] ss:$16 sps:$4 sm:$0xff]   ;;  %v12718_v3 = vld [vmem:[%s18394_s1 + $0x2a8] ss:$16 sps:$4 sm:$0xff]  }
  0x1e   :  { %v12691_v45 = vld [vmem:[%s18394_s1 + $0x280] ss:$16 sps:$4 sm:$0xff]   ;;  %v12708_v55 = vld [vmem:[%s18394_s1 + $0x2ac] ss:$16 sps:$4 sm:$0xff]   ;;  %18689 = vst [vmem:[#allocation4_spill] sm:$0xff] %v12718_v3 }
  0x1f   :  { %306 = vmatpush1.bf16.msra.mxu0 %v10941_v31  ;;  %377 = vmatpush1.bf16.msra.mxu1 %v10942_v32  ;;  %v12620_v31 = vld [vmem:[%s18394_s1 + $0x228] ss:$16 sps:$4 sm:$0xff]   ;;  %v12625_v32 = vld [vmem:[%s18394_s1 + $0x244] ss:$16 sps:$4 sm:$0xff]   ;;  %v12713_v56 = vld [vmem:[%s18394_s1 + $0x2a0] ss:$16 sps:$4 sm:$0xff]  }
  0x20   :  { %593 = vmatprep.subr.bf16.mxu0 %v10943_v35  ;;  %664 = vmatprep.subr.bf16.mxu1 %v10945_v36  ;;  %v12639_v35 = vld [vmem:[%s18394_s1 + $0x240] ss:$16 sps:$4 sm:$0xff]   ;;  %v12644_v36 = vld [vmem:[%s18394_s1 + $0x248] ss:$16 sps:$4 sm:$0xff]   ;;  %18688 = vst [vmem:[#allocation3_spill] sm:$0xff] %v12713_v56 }
  0x21   :  { %v12725_v4 = vld [vmem:[%s18394_s1 + $0x2c4] ss:$16 sps:$4 sm:$0xff]   ;;  %v12732_v5 = vld [vmem:[%s18394_s1 + $0x2cc] ss:$16 sps:$4 sm:$0xff]   ;;  %v12739_v15 = vld [vmem:[%s18394_s1 + $0x2c0] ss:$16 sps:$4 sm:$0xff]  }
  0x22   :  { %324 = vmatmul.mubr.bf16.vlgmr.msra.gmra.mrb[0].mxu0 %v12356_v37  ;;  %395 = vmatmul.mubr.bf16.vlgmr.msra.gmra.mrb[0].mxu1 %v12356_v37  ;;  %18690 = vst [vmem:[#allocation5_spill] sm:$0xff] %v12725_v4  ;;  %18691 = vst [vmem:[#allocation6_spill] sm:$0xff] %v12732_v5  ;;  %v12746_v19 = vld [vmem:[%s18394_s1 + $0x2c8] ss:$16 sps:$4 sm:$0xff]   ;;  %v12753_v23 = vld [vmem:[%s18394_s1 + $0x2e4] ss:$16 sps:$4 sm:$0xff]  }
  0x23   :  { %594 = vmatpush1.bf16.msra.mxu0 %v10947_v38  ;;  %665 = vmatpush1.bf16.msra.mxu1 %v10948_v39  ;;  %v12651_v38 = vld [vmem:[%s18394_s1 + $0x264] ss:$16 sps:$4 sm:$0xff]   ;;  %v12658_v39 = vld [vmem:[%s18394_s1 + $0x26c] ss:$16 sps:$4 sm:$0xff]   ;;  %18692 = vst [vmem:[#allocation7_spill] sm:$0xff] %v12739_v15  ;;  %18693 = vst [vmem:[#allocation8_spill] sm:$0xff] %v12746_v19 }
  0x24   :  { %595 = vmatprep.subr.bf16.mxu0 %v10949_v40  ;;  %666 = vmatprep.subr.bf16.mxu1 %v10951_v41  ;;  %v12663_v40 = vld [vmem:[%s18394_s1 + $0x260] ss:$16 sps:$4 sm:$0xff]   ;;  %v12670_v41 = vld [vmem:[%s18394_s1 + $0x268] ss:$16 sps:$4 sm:$0xff]   ;;  %18694 = vst [vmem:[#allocation9_spill] sm:$0xff] %v12753_v23 }
  0x25   :  { %333 = vmatprep.mubr.bf16.mxu0 %v18406_v1  ;;  %404 = vmatprep.mubr.bf16.mxu1 %v18406_v1  ;;  %v12763_v25 = vld [vmem:[%s18394_s1 + $0x2e0] ss:$16 sps:$4 sm:$0xff]  }
  0x26   :  { %18696 = vst [vmem:[#allocation11_spill] sm:$0xff] %v12763_v25 }
  0x27   :  { %596 = vmatpush1.bf16.msra.mxu0 %v10953_v42  ;;  %667 = vmatpush1.bf16.msra.mxu1 %v10954_v43  ;;  %v12677_v42 = vld [vmem:[%s18394_s1 + $0x284] ss:$16 sps:$4 sm:$0xff]   ;;  %v12682_v43 = vld [vmem:[%s18394_s1 + $0x28c] ss:$16 sps:$4 sm:$0xff]  }
  0x28   :  { %597 = vmatprep.subr.bf16.mxu0 %v10955_v46  ;;  %668 = vmatprep.subr.bf16.mxu1 %v10957_v47  ;;  %v12696_v46 = vld [vmem:[%s18394_s1 + $0x288] ss:$16 sps:$4 sm:$0xff]   ;;  %v12701_v47 = vld [vmem:[%s18394_s1 + $0x2a4] ss:$16 sps:$4 sm:$0xff]  }
  0x2a   :  { %334 = vmatmul.mubr.bf16.gmra.mrb[4].mxu0 %v12392_v48  ;;  %405 = vmatmul.mubr.bf16.gmra.mrb[4].mxu1 %v12392_v48 }
  0x2b   :  { %598 = vmatpush1.bf16.msra.mxu0 %v12397_v49  ;;  %669 = vmatpush1.bf16.msra.mxu1 %v12402_v50 }
  0x2c   :  { %599 = vmatprep.subr.bf16.mxu0 %v12407_v51  ;;  %670 = vmatprep.subr.bf16.mxu1 %v12412_v52 }
  0x2d   :  { %343 = vmatprep.mubr.bf16.mxu0 %v18406_v1  ;;  %414 = vmatprep.mubr.bf16.mxu1 %v18406_v1 }
  0x2f   :  { %600 = vmatpush1.bf16.msra.mxu0 %v12419_v53  ;;  %671 = vmatpush1.bf16.msra.mxu1 %v12426_v54 }
  0x30   :  { %601 = vmatprep.subr.bf16.mxu0 %v12439_v57  ;;  %672 = vmatprep.subr.bf16.mxu1 %v12444_v58 }
  0x32   :  { %344 = vmatmul.mubr.bf16.gmra.mrb[8].mxu0 %v12448_v59  ;;  %415 = vmatmul.mubr.bf16.gmra.mrb[8].mxu1 %v12448_v59 }
  0x33   :  { %602 = vmatpush1.bf16.msra.mxu0 %v12453_v60  ;;  %673 = vmatpush1.bf16.msra.mxu1 %v12458_v61 }
  0x34   :  { %603 = vmatprep.subr.bf16.mxu0 %v12465_v62  ;;  %674 = vmatprep.subr.bf16.mxu1 %v12472_v63 }
  0x35   :  { %353 = vmatprep.mubr.bf16.mxu0 %v18406_v1  ;;  %424 = vmatprep.mubr.bf16.mxu1 %v18406_v1 }
  0x37   :  { %604 = vmatpush1.bf16.msra.mxu0 %v12477_v0  ;;  %675 = vmatpush1.bf16.msra.mxu1 %v12482_v2 }
  0x38   :  { %605 = vmatprep.subr.bf16.mxu0 %v12504_v7  ;;  %676 = vmatprep.subr.bf16.mxu1 %v12509_v8 }
  0x3a   :  { %354 = vmatmul.mubr.bf16.gmra.mrb[12].mxu0 %v12513_v9  ;;  %425 = vmatmul.mubr.bf16.gmra.mrb[12].mxu1 %v12513_v9 }
  0x3b   :  { %606 = vmatpush1.bf16.msra.mxu0 %v12518_v10  ;;  %677 = vmatpush1.bf16.msra.mxu1 %v12525_v11 }
  0x3c   :  { %607 = vmatprep.subr.bf16.mxu0 %v12530_v12  ;;  %678 = vmatprep.subr.bf16.mxu1 %v12535_v13 }
  0x3d   :  { %625 = vmatprep.mubr.bf16.mxu0 %v18406_v1  ;;  %696 = vmatprep.mubr.bf16.mxu1 %v18406_v1 }
  0x3f   :  { %608 = vmatpush1.bf16.msra.mxu0 %v12548_v16  ;;  %679 = vmatpush1.bf16.msra.mxu1 %v12557_v18 }
  0x40   :  { %939 = vmatprep.subr.bf16.mxu0 %v12567_v20  ;;  %1010 = vmatprep.subr.bf16.mxu1 %v12574_v21 }
  0x42   :  { %626 = vmatmul.mubr.bf16.vlgmr.msra.gmra.mrb[0].mxu0 %v51_v24  ;;  %697 = vmatmul.mubr.bf16.vlgmr.msra.gmra.mrb[0].mxu1 %v51_v24  ;;  %v12758_v24 = vld [vmem:[%s18394_s1 + $0x2ec] ss:$16 sps:$4 sm:$0xff]  }
  0x43   :  { %940 = vmatpush1.bf16.msra.mxu0 %v12581_v22  ;;  %1011 = vmatpush1.bf16.msra.mxu1 %v12594_v26  ;;  %18695 = vst [vmem:[#allocation10_spill] sm:$0xff] %v12758_v24 }
  0x44   :  { %941 = vmatprep.subr.bf16.mxu0 %v12603_v28  ;;  %1012 = vmatprep.subr.bf16.mxu1 %v12608_v29 }
  0x45   :  { %635 = vmatprep.mubr.bf16.mxu0 %v18406_v1  ;;  %706 = vmatprep.mubr.bf16.mxu1 %v18406_v1 }
  0x47   :  { %942 = vmatpush1.bf16.msra.mxu0 %v12615_v30  ;;  %1013 = vmatpush1.bf16.msra.mxu1 %v12620_v31 }
  0x48   :  { %943 = vmatprep.subr.bf16.mxu0 %v12625_v32  ;;  %1014 = vmatprep.subr.bf16.mxu1 %v12632_v33 }
  0x4a   :  { %636 = vmatmul.mubr.bf16.gmra.mrb[4].mxu0 %v52_v34  ;;  %707 = vmatmul.mubr.bf16.gmra.mrb[4].mxu1 %v52_v34  ;;  %v12768_v34 = vld [vmem:[%s18394_s1 + $0x2e8] ss:$16 sps:$4 sm:$0xff]  }
  0x4b   :  { %944 = vmatpush1.bf16.msra.mxu0 %v12639_v35  ;;  %1015 = vmatpush1.bf16.msra.mxu1 %v12644_v36  ;;  %18697 = vst [vmem:[#allocation12_spill] sm:$0xff] %v12768_v34 }
  0x4c   :  { %945 = vmatprep.subr.bf16.mxu0 %v12651_v38  ;;  %1016 = vmatprep.subr.bf16.mxu1 %v12658_v39 }
  0x4d   :  { %645 = vmatprep.mubr.bf16.mxu0 %v18406_v1  ;;  %716 = vmatprep.mubr.bf16.mxu1 %v18406_v1 }
  0x4f   :  { %946 = vmatpush1.bf16.msra.mxu0 %v12663_v40  ;;  %1017 = vmatpush1.bf16.msra.mxu1 %v12670_v41 }
  0x50   :  { %947 = vmatprep.subr.bf16.mxu0 %v12677_v42  ;;  %1018 = vmatprep.subr.bf16.mxu1 %v12682_v43 }
  0x52   :  { %646 = vmatmul.mubr.bf16.gmra.mrb[8].mxu0 %v53_v44  ;;  %717 = vmatmul.mubr.bf16.gmra.mrb[8].mxu1 %v53_v44  ;;  %v735_v44 = vld [vmem:[%s18395_s0 + $0x80] sm:$0xff] }
  0x53   :  { %948 = vmatpush1.bf16.msra.mxu0 %v12691_v45  ;;  %1019 = vmatpush1.bf16.msra.mxu1 %v12696_v46 }
  0x54   :  { %949 = vmatprep.subr.bf16.mxu0 %v12701_v47  ;;  %1020 = vmatprep.subr.bf16.mxu1 %v12708_v55 }
  0x55   :  { %655 = vmatprep.mubr.bf16.mxu0 %v18406_v1  ;;  %726 = vmatprep.mubr.bf16.mxu1 %v18406_v1  ;;  %v12781_v1 = vld [vmem:[%s18394_s1 + $0x304] ss:$16 sps:$4 sm:$0xff]  }
  0x56   :  { %18698 = vst [vmem:[#allocation13_spill] sm:$0xff] %v12781_v1 }
  0x57   :  { %950 = vmatpush1.bf16.msra.mxu0 %v12713_v56  ;;  %1021 = vmatpush1.bf16.msra.mxu1 %v12718_v3  ;;  %v12908_v3 = vld [vmem:[%s18394_s1 + $0x38c] ss:$16 sps:$4 sm:$0xff]  }
  0x58   :  { %951 = vmatprep.subr.bf16.mxu0 %v12725_v4  ;;  %1022 = vmatprep.subr.bf16.mxu1 %v12732_v5  ;;  %v12797_v5 = vld [vmem:[%s18394_s1 + $0x300] ss:$16 sps:$4 sm:$0xff]   ;;  %v12848_v4 = vld [vmem:[%s18394_s1 + $0x34c] ss:$16 sps:$4 sm:$0xff]   ;;  %18717 = vst [vmem:[#allocation31_spill] sm:$0xff] %v12908_v3 }
  0x59   :  { %18702 = vst [vmem:[#allocation16_spill] sm:$0xff] %v12797_v5  ;;  %18709 = vst [vmem:[#allocation23_spill] sm:$0xff] %v12848_v4 }
  0x5a   :  { %656 = vmatmul.mubr.bf16.gmra.mrb[16].mxu0 %v54_v14  ;;  %727 = vmatmul.mubr.bf16.gmra.mrb[16].mxu1 %v54_v14  ;;  %v736_v14 = vld [vmem:[%s18395_s0 + $0x88] sm:$0xff] }
  0x5b   :  { %952 = vmatpush1.bf16.msra.mxu0 %v12739_v15  ;;  %1023 = vmatpush1.bf16.msra.mxu1 %v12746_v19  ;;  %v12788_v19 = vld [vmem:[%s18394_s1 + $0x30c] ss:$16 sps:$4 sm:$0xff]   ;;  %v18700_v15 = vmov 0   ;;  %v12792_v9 = vpack.c.bf16 %v736_v14, %v735_v44  ;;  %v12811_v44 = vld [vmem:[%s18394_s1 + $0x324] ss:$16 sps:$4 sm:$0xff]  }
  0x5c   :  { %953 = vmatprep.subr.bf16.mxu0 %v12753_v23  ;;  %1024 = vmatprep.subr.bf16.mxu1 %v12758_v24  ;;  %18699 = vst [vmem:[#allocation14_spill] sm:$0xff] %v12788_v19  ;;  %v12804_v24 = vld [vmem:[%s18394_s1 + $0x308] ss:$16 sps:$4 sm:$0xff]   ;;  %18704 = vst [vmem:[#allocation18_spill] sm:$0xff] %v12811_v44  ;;  %v12816_v14 = vld [vmem:[%s18394_s1 + $0x32c] ss:$16 sps:$4 sm:$0xff]  }
  0x5d   :  { %971 = vmatprep.mubr.bf16.mxu0 %v18700_v15  ;;  %1042 = vmatprep.mubr.bf16.mxu1 %v18700_v15  ;;  %18701 = vst [vmem:[#allocation15_spill] sm:$0xff] %v12792_v9  ;;  %18703 = vst [vmem:[#allocation17_spill] sm:$0xff] %v12804_v24  ;;  %v12843_v23 = vld [vmem:[%s18394_s1 + $0x344] ss:$16 sps:$4 sm:$0xff]  }
  0x5e   :  { %18705 = vst [vmem:[#allocation19_spill] sm:$0xff] %v12816_v14  ;;  %18708 = vst [vmem:[#allocation22_spill] sm:$0xff] %v12843_v23 }
  0x5f   :  { %954 = vmatpush1.bf16.msra.mxu0 %v12763_v25  ;;  %1025 = vmatpush1.bf16.msra.mxu1 %v12768_v34  ;;  %v12821_v34 = vld [vmem:[%s18394_s1 + $0x320] ss:$16 sps:$4 sm:$0xff]   ;;  %v738_v25 = vld [vmem:[%s18395_s0 + $0x98] sm:$0xff] }
  0x60   :  { %1313 = vmatprep.subr.bf16.mxu0 %v12781_v1  ;;  %1384 = vmatprep.subr.bf16.mxu1 %v12788_v19  ;;  %18706 = vst [vmem:[#allocation20_spill] sm:$0xff] %v12821_v34  ;;  %v12826_v1 = vld [vmem:[%s18394_s1 + $0x328] ss:$16 sps:$4 sm:$0xff]   ;;  %v737_v19 = vld [vmem:[%s18395_s0 + $0x90] sm:$0xff] }
  0x61   :  { %18707 = vst [vmem:[#allocation21_spill] sm:$0xff] %v12826_v1 }
  0x62   :  { %972 = vmatmul.mubr.bf16.vlgmr.msra.gmra.mrb[0].mxu0 %v12792_v9  ;;  %1043 = vmatmul.mubr.bf16.vlgmr.msra.gmra.mrb[0].mxu1 %v12792_v9 }
  0x63   :  { %1314 = vmatpush1.bf16.msra.mxu0 %v12797_v5  ;;  %1385 = vmatpush1.bf16.msra.mxu1 %v12804_v24  ;;  %v12852_v24 = vpack.c.bf16 %v738_v25, %v737_v19  ;;  %v12869_v5 = vld [vmem:[%s18394_s1 + $0x364] ss:$16 sps:$4 sm:$0xff]   ;;  %v12876_v19 = vld [vmem:[%s18394_s1 + $0x36c] ss:$16 sps:$4 sm:$0xff]   ;;  %v12881_v25 = vld [vmem:[%s18394_s1 + $0x360] ss:$16 sps:$4 sm:$0xff]  }
  0x64   :  { %1315 = vmatprep.subr.bf16.mxu0 %v12811_v44  ;;  %1386 = vmatprep.subr.bf16.mxu1 %v12816_v14  ;;  %v12859_v14 = vld [vmem:[%s18394_s1 + $0x340] ss:$16 sps:$4 sm:$0xff]   ;;  %v12864_v44 = vld [vmem:[%s18394_s1 + $0x348] ss:$16 sps:$4 sm:$0xff]   ;;  %18712 = vst [vmem:[#allocation26_spill] sm:$0xff] %v12869_v5  ;;  %18713 = vst [vmem:[#allocation27_spill] sm:$0xff] %v12876_v19 }
  0x65   :  { %981 = vmatprep.mubr.bf16.mxu0 %v18700_v15  ;;  %1052 = vmatprep.mubr.bf16.mxu1 %v18700_v15  ;;  %18710 = vst [vmem:[#allocation24_spill] sm:$0xff] %v12859_v14  ;;  %18711 = vst [vmem:[#allocation25_spill] sm:$0xff] %v12864_v44 }
  0x66   :  { %18714 = vst [vmem:[#allocation28_spill] sm:$0xff] %v12881_v25 }
  0x67   :  { %1316 = vmatpush1.bf16.msra.mxu0 %v12821_v34  ;;  %1387 = vmatpush1.bf16.msra.mxu1 %v12826_v1  ;;  %v740_v1 = vld [vmem:[%s18395_s0 + $0xa8] sm:$0xff]  ;;  %v12903_v34 = vld [vmem:[%s18394_s1 + $0x384] ss:$16 sps:$4 sm:$0xff]  }
  0x68   :  { %1317 = vmatprep.subr.bf16.mxu0 %v12843_v23  ;;  %1388 = vmatprep.subr.bf16.mxu1 %v12848_v4  ;;  %v12888_v23 = vld [vmem:[%s18394_s1 + $0x368] ss:$16 sps:$4 sm:$0xff]   ;;  %v739_v4 = vld [vmem:[%s18395_s0 + $0xa0] sm:$0xff]  ;;  %18716 = vst [vmem:[#allocation30_spill] sm:$0xff] %v12903_v34 }
  0x69   :  { %18715 = vst [vmem:[#allocation29_spill] sm:$0xff] %v12888_v23 }
  0x6a   :  { %982 = vmatmul.mubr.bf16.gmra.mrb[4].mxu0 %v12852_v24  ;;  %1053 = vmatmul.mubr.bf16.gmra.mrb[4].mxu1 %v12852_v24 }
  0x6b   :  { %1318 = vmatpush1.bf16.msra.mxu0 %v12859_v14  ;;  %1389 = vmatpush1.bf16.msra.mxu1 %v12864_v44  ;;  %v12912_v44 = vpack.c.bf16 %v740_v1, %v739_v4  ;;  %v12929_v14 = vld [vmem:[%s18394_s1 + $0x3a4] ss:$16 sps:$4 sm:$0xff]   ;;  %v12936_v1 = vld [vmem:[%s18394_s1 + $0x3ac] ss:$16 sps:$4 sm:$0xff]   ;;  %v12945_v4 = vld [vmem:[%s18394_s1 + $0x3a0] ss:$16 sps:$4 sm:$0xff]  }
  0x6c   :  { %1319 = vmatprep.subr.bf16.mxu0 %v12869_v5  ;;  %1390 = vmatprep.subr.bf16.mxu1 %v12876_v19  ;;  %v12917_v19 = vld [vmem:[%s18394_s1 + $0x380] ss:$16 sps:$4 sm:$0xff]   ;;  %v12924_v5 = vld [vmem:[%s18394_s1 + $0x388] ss:$16 sps:$4 sm:$0xff]   ;;  %18720 = vst [vmem:[#allocation34_spill] sm:$0xff] %v12929_v14  ;;  %18721 = vst [vmem:[#allocation35_spill] sm:$0xff] %v12936_v1 }
  0x6d   :  { %991 = vmatprep.mubr.bf16.mxu0 %v18700_v15  ;;  %1062 = vmatprep.mubr.bf16.mxu1 %v18700_v15  ;;  %18718 = vst [vmem:[#allocation32_spill] sm:$0xff] %v12917_v19  ;;  %18719 = vst [vmem:[#allocation33_spill] sm:$0xff] %v12924_v5 }
  0x6e   :  { %18722 = vst [vmem:[#allocation36_spill] sm:$0xff] %v12945_v4 }
  0x6f   :  { %1320 = vmatpush1.bf16.msra.mxu0 %v12881_v25  ;;  %1391 = vmatpush1.bf16.msra.mxu1 %v12888_v23  ;;  %v1110_v25 = vld [vmem:[%s18395_s0 + $0xc8] sm:$0xff] }
  0x70   :  { %1321 = vmatprep.subr.bf16.mxu0 %v12903_v34  ;;  %1392 = vmatprep.subr.bf16.mxu1 %v12908_v3  ;;  %v12950_v3 = vld [vmem:[%s18394_s1 + $0x3a8] ss:$16 sps:$4 sm:$0xff]   ;;  %v741_v34 = vld [vmem:[%s18395_s0 + $0xb0] sm:$0xff] }
  0x71   :  { %18723 = vst [vmem:[#allocation37_spill] sm:$0xff] %v12950_v3  ;;  %v12969_v23 = vpack.c.bf16 %v741_v34, %v741_v34  ;;  %v12988_v34 = vld [vmem:[%s18394_s1 + $0x3e4] ss:$16 sps:$4 sm:$0xff]  }
  0x72   :  { %992 = vmatmul.mubr.bf16.gmra.mrb[8].mxu0 %v12912_v44  ;;  %1063 = vmatmul.mubr.bf16.gmra.mrb[8].mxu1 %v12912_v44  ;;  %18728 = vst [vmem:[#allocation42_spill] sm:$0xff] %v12988_v34 }
  0x73   :  { %1322 = vmatpush1.bf16.msra.mxu0 %v12917_v19  ;;  %1393 = vmatpush1.bf16.msra.mxu1 %v12924_v5  ;;  %v12960_v5 = vld [vmem:[%s18394_s1 + $0x3c4] ss:$16 sps:$4 sm:$0xff]   ;;  %v12965_v19 = vld [vmem:[%s18394_s1 + $0x3cc] ss:$16 sps:$4 sm:$0xff]  }
  0x74   :  { %1323 = vmatprep.subr.bf16.mxu0 %v12929_v14  ;;  %1394 = vmatprep.subr.bf16.mxu1 %v12936_v1  ;;  %18724 = vst [vmem:[#allocation38_spill] sm:$0xff] %v12960_v5  ;;  %18725 = vst [vmem:[#allocation39_spill] sm:$0xff] %v12965_v19  ;;  %v12976_v1 = vld [vmem:[%s18394_s1 + $0x3c0] ss:$16 sps:$4 sm:$0xff]   ;;  %v12981_v14 = vld [vmem:[%s18394_s1 + $0x3c8] ss:$16 sps:$4 sm:$0xff]  }
  0x75   :  { %1001 = vmatprep.mubr.bf16.mxu0 %v18700_v15  ;;  %1072 = vmatprep.mubr.bf16.mxu1 %v18700_v15  ;;  %18726 = vst [vmem:[#allocation40_spill] sm:$0xff] %v12976_v1  ;;  %18727 = vst [vmem:[#allocation41_spill] sm:$0xff] %v12981_v14 }
  0x77   :  { %1324 = vmatpush1.bf16.msra.mxu0 %v12945_v4  ;;  %1395 = vmatpush1.bf16.msra.mxu1 %v12950_v3  ;;  %v12993_v3 = vld [vmem:[%s18394_s1 + $0x3ec] ss:$16 sps:$4 sm:$0xff]   ;;  %v1109_v4 = vld [vmem:[%s18395_s0 + $0xc0] sm:$0xff] }
  0x78   :  { %1325 = vmatprep.subr.bf16.mxu0 %v12960_v5  ;;  %1396 = vmatprep.subr.bf16.mxu1 %v12965_v19  ;;  %18729 = vst [vmem:[#allocation43_spill] sm:$0xff] %v12993_v3  ;;  %v13000_v5 = vld [vmem:[%s18394_s1 + $0x3e0] ss:$16 sps:$4 sm:$0xff]   ;;  %v13007_v19 = vld [vmem:[%s18394_s1 + $0x3e8] ss:$16 sps:$4 sm:$0xff]   ;;  %v13029_v56 = vpack.c.bf16 %v1110_v25, %v1109_v4 }
  0x79   :  { %18730 = vst [vmem:[#allocation44_spill] sm:$0xff] %v13000_v5  ;;  %18731 = vst [vmem:[#allocation45_spill] sm:$0xff] %v13007_v19  ;;  %v13048_v25 = vld [vmem:[%s18394_s1 + $0x424] ss:$16 sps:$4 sm:$0xff]   ;;  %v13053_v4 = vld [vmem:[%s18394_s1 + $0x42c] ss:$16 sps:$4 sm:$0xff]  }
  0x7a   :  { %1002 = vmatmul.mubr.bf16.gmra.mrb[20].mxu0 %v12969_v23  ;;  %1073 = vmatmul.mubr.bf16.gmra.mrb[20].mxu1 %v12969_v23  ;;  %18734 = vst [vmem:[#allocation48_spill] sm:$0xff] %v13029_v56  ;;  %18737 = vst [vmem:[#allocation51_spill] sm:$0xff] %v13048_v25 }
  0x7b   :  { %1326 = vmatpush1.bf16.msra.mxu0 %v12976_v1  ;;  %1397 = vmatpush1.bf16.msra.mxu1 %v12981_v14  ;;  %v13020_v14 = vld [vmem:[%s18394_s1 + $0x404] ss:$16 sps:$4 sm:$0xff]   ;;  %v13025_v1 = vld [vmem:[%s18394_s1 + $0x40c] ss:$16 sps:$4 sm:$0xff]   ;;  %18738 = vst [vmem:[#allocation52_spill] sm:$0xff] %v13053_v4 }
  0x7c   :  { %1327 = vmatprep.subr.bf16.mxu0 %v12988_v34  ;;  %1398 = vmatprep.subr.bf16.mxu1 %v12993_v3  ;;  %18732 = vst [vmem:[#allocation46_spill] sm:$0xff] %v13020_v14  ;;  %18733 = vst [vmem:[#allocation47_spill] sm:$0xff] %v13025_v1  ;;  %v13036_v3 = vld [vmem:[%s18394_s1 + $0x400] ss:$16 sps:$4 sm:$0xff]   ;;  %v13041_v34 = vld [vmem:[%s18394_s1 + $0x408] ss:$16 sps:$4 sm:$0xff]  }
  0x7d   :  { %1345 = vmatprep.mubr.bf16.mxu0 %v18700_v15  ;;  %1416 = vmatprep.mubr.bf16.mxu1 %v18700_v15  ;;  %18735 = vst [vmem:[#allocation49_spill] sm:$0xff] %v13036_v3  ;;  %18736 = vst [vmem:[#allocation50_spill] sm:$0xff] %v13041_v34 }
  0x7f   :  { %1328 = vmatpush1.bf16.msra.mxu0 %v13000_v5  ;;  %1399 = vmatpush1.bf16.msra.mxu1 %v13007_v19  ;;  %v1111_v19 = vld [vmem:[%s18395_s0 + $0xd0] sm:$0xff]  ;;  %v1112_v5 = vld [vmem:[%s18395_s0 + $0xd8] sm:$0xff] }
  0x80   :  { %1687 = vmatprep.subr.bf16.mxu0 %v13020_v14  ;;  %1758 = vmatprep.subr.bf16.mxu1 %v13025_v1  ;;  %v13060_v14 = vld [vmem:[%s18394_s1 + $0x420] ss:$16 sps:$4 sm:$0xff]   ;;  %v13067_v1 = vld [vmem:[%s18394_s1 + $0x428] ss:$16 sps:$4 sm:$0xff]  }
  0x81   :  { %18739 = vst [vmem:[#allocation53_spill] sm:$0xff] %v13060_v14  ;;  %18740 = vst [vmem:[#allocation54_spill] sm:$0xff] %v13067_v1 }
  0x82   :  { %1346 = vmatmul.mubr.bf16.vlgmr.msra.gmra.mrb[0].mxu0 %v13029_v56  ;;  %1417 = vmatmul.mubr.bf16.vlgmr.msra.gmra.mrb[0].mxu1 %v13029_v56  ;;  %v13089_v56 = vpack.c.bf16 %v1112_v5, %v1111_v19  ;;  %v13108_v5 = vld [vmem:[%s18394_s1 + $0x464] ss:$16 sps:$4 sm:$0xff]   ;;  %v13113_v19 = vld [vmem:[%s18394_s1 + $0x46c] ss:$16 sps:$4 sm:$0xff]  }
  0x83   :  { %1688 = vmatpush1.bf16.msra.mxu0 %v13036_v3  ;;  %1759 = vmatpush1.bf16.msra.mxu1 %v13041_v34  ;;  %v13080_v34 = vld [vmem:[%s18394_s1 + $0x444] ss:$16 sps:$4 sm:$0xff]   ;;  %v13085_v3 = vld [vmem:[%s18394_s1 + $0x44c] ss:$16 sps:$4 sm:$0xff]   ;;  %18746 = vst [vmem:[#allocation60_spill] sm:$0xff] %v13108_v5  ;;  %18747 = vst [vmem:[#allocation61_spill] sm:$0xff] %v13113_v19 }
  0x84   :  { %1689 = vmatprep.subr.bf16.mxu0 %v13048_v25  ;;  %1760 = vmatprep.subr.bf16.mxu1 %v13053_v4  ;;  %18741 = vst [vmem:[#allocation55_spill] sm:$0xff] %v13080_v34  ;;  %18742 = vst [vmem:[#allocation56_spill] sm:$0xff] %v13085_v3  ;;  %v13096_v4 = vld [vmem:[%s18394_s1 + $0x440] ss:$16 sps:$4 sm:$0xff]   ;;  %v13101_v25 = vld [vmem:[%s18394_s1 + $0x448] ss:$16 sps:$4 sm:$0xff]  }
  0x85   :  { %1355 = vmatprep.mubr.bf16.mxu0 %v18700_v15  ;;  %1426 = vmatprep.mubr.bf16.mxu1 %v18700_v15  ;;  %18743 = vst [vmem:[#allocation57_spill] sm:$0xff] %v13089_v56  ;;  %18744 = vst [vmem:[#allocation58_spill] sm:$0xff] %v13096_v4 }
  0x86   :  { %18745 = vst [vmem:[#allocation59_spill] sm:$0xff] %v13101_v25 }
  0x87   :  { %1690 = vmatpush1.bf16.msra.mxu0 %v13060_v14  ;;  %1761 = vmatpush1.bf16.msra.mxu1 %v13067_v1  ;;  %v1113_v1 = vld [vmem:[%s18395_s0 + $0xe0] sm:$0xff]  ;;  %v1114_v14 = vld [vmem:[%s18395_s0 + $0xe8] sm:$0xff] }
  0x88   :  { %1691 = vmatprep.subr.bf16.mxu0 %v13080_v34  ;;  %1762 = vmatprep.subr.bf16.mxu1 %v13085_v3  ;;  %v13120_v34 = vld [vmem:[%s18394_s1 + $0x460] ss:$16 sps:$4 sm:$0xff]   ;;  %v13127_v3 = vld [vmem:[%s18394_s1 + $0x468] ss:$16 sps:$4 sm:$0xff]  }
  0x89   :  { %18748 = vst [vmem:[#allocation62_spill] sm:$0xff] %v13120_v34  ;;  %18749 = vst [vmem:[#allocation63_spill] sm:$0xff] %v13127_v3 }
  0x8a   :  { %1356 = vmatmul.mubr.bf16.gmra.mrb[4].mxu0 %v13089_v56  ;;  %1427 = vmatmul.mubr.bf16.gmra.mrb[4].mxu1 %v13089_v56  ;;  %v13149_v56 = vpack.c.bf16 %v1114_v14, %v1113_v1  ;;  %v13168_v14 = vld [vmem:[%s18394_s1 + $0x4a4] ss:$16 sps:$4 sm:$0xff]   ;;  %v13173_v1 = vld [vmem:[%s18394_s1 + $0x4ac] ss:$16 sps:$4 sm:$0xff]  }
  0x8b   :  { %1692 = vmatpush1.bf16.msra.mxu0 %v13096_v4  ;;  %1763 = vmatpush1.bf16.msra.mxu1 %v13101_v25  ;;  %v13140_v25 = vld [vmem:[%s18394_s1 + $0x484] ss:$16 sps:$4 sm:$0xff]   ;;  %v13145_v4 = vld [vmem:[%s18394_s1 + $0x48c] ss:$16 sps:$4 sm:$0xff]   ;;  %18755 = vst [vmem:[#allocation69_spill] sm:$0xff] %v13168_v14  ;;  %18756 = vst [vmem:[#allocation70_spill] sm:$0xff] %v13173_v1 }
  0x8c   :  { %1693 = vmatprep.subr.bf16.mxu0 %v13108_v5  ;;  %1764 = vmatprep.subr.bf16.mxu1 %v13113_v19  ;;  %18750 = vst [vmem:[#allocation64_spill] sm:$0xff] %v13140_v25  ;;  %18751 = vst [vmem:[#allocation65_spill] sm:$0xff] %v13145_v4  ;;  %v13156_v19 = vld [vmem:[%s18394_s1 + $0x480] ss:$16 sps:$4 sm:$0xff]   ;;  %v13161_v5 = vld [vmem:[%s18394_s1 + $0x488] ss:$16 sps:$4 sm:$0xff]  }
  0x8d   :  { %1365 = vmatprep.mubr.bf16.mxu0 %v18700_v15  ;;  %1436 = vmatprep.mubr.bf16.mxu1 %v18700_v15  ;;  %18752 = vst [vmem:[#allocation66_spill] sm:$0xff] %v13149_v56  ;;  %18753 = vst [vmem:[#allocation67_spill] sm:$0xff] %v13156_v19 }
  0x8e   :  { %18754 = vst [vmem:[#allocation68_spill] sm:$0xff] %v13161_v5 }
  0x8f   :  { %1694 = vmatpush1.bf16.msra.mxu0 %v13120_v34  ;;  %1765 = vmatpush1.bf16.msra.mxu1 %v13127_v3  ;;  %v1115_v3 = vld [vmem:[%s18395_s0 + $0xf0] sm:$0xff] }
  0x90   :  { %1695 = vmatprep.subr.bf16.mxu0 %v13140_v25  ;;  %1766 = vmatprep.subr.bf16.mxu1 %v13145_v4  ;;  %v13182_v4 = vld [vmem:[%s18394_s1 + $0x4a0] ss:$16 sps:$4 sm:$0xff]   ;;  %v13187_v25 = vld [vmem:[%s18394_s1 + $0x4a8] ss:$16 sps:$4 sm:$0xff]   ;;  %v13206_v34 = vpack.c.bf16 %v1115_v3, %v1115_v3  ;;  %v13225_v3 = vld [vmem:[%s18394_s1 + $0x4e4] ss:$16 sps:$4 sm:$0xff]  }
  0x91   :  { %18757 = vst [vmem:[#allocation71_spill] sm:$0xff] %v13187_v25  ;;  %18762 = vst [vmem:[#allocation76_spill] sm:$0xff] %v13225_v3 }
  0x92   :  { %1366 = vmatmul.mubr.bf16.gmra.mrb[8].mxu0 %v13149_v56  ;;  %1437 = vmatmul.mubr.bf16.gmra.mrb[8].mxu1 %v13149_v56  ;;  %18760 = vst [vmem:[#allocation74_spill] sm:$0xff] %v13206_v34 }
  0x93   :  { %1696 = vmatpush1.bf16.msra.mxu0 %v13156_v19  ;;  %1767 = vmatpush1.bf16.msra.mxu1 %v13161_v5  ;;  %v13197_v5 = vld [vmem:[%s18394_s1 + $0x4c4] ss:$16 sps:$4 sm:$0xff]   ;;  %v13202_v19 = vld [vmem:[%s18394_s1 + $0x4cc] ss:$16 sps:$4 sm:$0xff]  }
  0x94   :  { %1697 = vmatprep.subr.bf16.mxu0 %v13168_v14  ;;  %1768 = vmatprep.subr.bf16.mxu1 %v13173_v1  ;;  %18758 = vst [vmem:[#allocation72_spill] sm:$0xff] %v13197_v5  ;;  %18759 = vst [vmem:[#allocation73_spill] sm:$0xff] %v13202_v19  ;;  %v13213_v1 = vld [vmem:[%s18394_s1 + $0x4c0] ss:$16 sps:$4 sm:$0xff]   ;;  %v13218_v14 = vld [vmem:[%s18394_s1 + $0x4c8] ss:$16 sps:$4 sm:$0xff]  }
  0x95   :  { %1375 = vmatprep.mubr.bf16.mxu0 %v18700_v15  ;;  %1446 = vmatprep.mubr.bf16.mxu1 %v18700_v15  ;;  %18761 = vst [vmem:[#allocation75_spill] sm:$0xff] %v13218_v14 }
  0x97   :  { %1698 = vmatpush1.bf16.msra.mxu0 %v13182_v4  ;;  %1769 = vmatpush1.bf16.msra.mxu1 %v13187_v25  ;;  %v13230_v25 = vld [vmem:[%s18394_s1 + $0x4ec] ss:$16 sps:$4 sm:$0xff]  }
  0x98   :  { %1699 = vmatprep.subr.bf16.mxu0 %v13197_v5  ;;  %1770 = vmatprep.subr.bf16.mxu1 %v13202_v19  ;;  %18763 = vst [vmem:[#allocation77_spill] sm:$0xff] %v13230_v25  ;;  %v13239_v19 = vld [vmem:[%s18394_s1 + $0x4e0] ss:$16 sps:$4 sm:$0xff]   ;;  %v13244_v5 = vld [vmem:[%s18394_s1 + $0x4e8] ss:$16 sps:$4 sm:$0xff]  }
  0x99   :  { %18764 = vst [vmem:[#allocation78_spill] sm:$0xff] %v13239_v19  ;;  %18765 = vst [vmem:[#allocation79_spill] sm:$0xff] %v13244_v5 }
  0x9a   :  { %1376 = vmatmul.mubr.bf16.gmra.mrb[24].mxu0 %v13206_v34  ;;  %1447 = vmatmul.mubr.bf16.gmra.mrb[24].mxu1 %v13206_v34 }
  0x9b   :  { %1700 = vmatpush1.bf16.msra.mxu0 %v13213_v1  ;;  %1771 = vmatpush1.bf16.msra.mxu1 %v13218_v14  ;;  %v13255_v14 = vld [vmem:[%s18394_s1 + $0x104] ss:$16 sps:$4 sm:$0xff]  }
  0x9c   :  { %1701 = vmatprep.subr.bf16.mxu0 %v13225_v3  ;;  %1772 = vmatprep.subr.bf16.mxu1 %v13230_v25  ;;  %18766 = vst [vmem:[#allocation80_spill] sm:$0xff] %v13255_v14  ;;  %v13261_v3 = vld [vmem:[%s18394_s1 + $0x10c] ss:$16 sps:$4 sm:$0xff]   ;;  %v13404_v25 = vld [vmem:[%s18394_s1 + $0x1a0] ss:$16 sps:$4 sm:$0xff]  }
  0x9d   :  { %1719 = vmatprep.mubr.bf16.mxu0 %v18700_v15  ;;  %1790 = vmatprep.mubr.bf16.mxu1 %v18700_v15  ;;  %18767 = vst [vmem:[#allocation81_spill] sm:$0xff] %v13261_v3  ;;  %18788 = vst [vmem:[#allocation102_spill] sm:$0xff] %v13404_v25 }
  0x9f   :  { %1702 = vmatpush1.bf16.msra.mxu0 %v13239_v19  ;;  %1773 = vmatpush1.bf16.msra.mxu1 %v13244_v5  ;;  %v13269_v5 = vld [vmem:[%s18394_s1 + $0x100] ss:$16 sps:$4 sm:$0xff]   ;;  %v13287_v19 = vld [vmem:[%s18394_s1 + $0x12c] ss:$16 sps:$4 sm:$0xff]  }
  0xa0   :  { %1934 = vmatprep.subr.bf16.mxu0 %v13255_v14  ;;  %2005 = vmatprep.subr.bf16.mxu1 %v13261_v3  ;;  %18768 = vst [vmem:[#allocation82_spill] sm:$0xff] %v13269_v5  ;;  %v13275_v14 = vld [vmem:[%s18394_s1 + $0x108] ss:$16 sps:$4 sm:$0xff]   ;;  %v13281_v3 = vld [vmem:[%s18394_s1 + $0x124] ss:$16 sps:$4 sm:$0xff]   ;;  %18771 = vst [vmem:[#allocation85_spill] sm:$0xff] %v13287_v19 }
  0xa1   :  { %18769 = vst [vmem:[#allocation83_spill] sm:$0xff] %v13275_v14  ;;  %18770 = vst [vmem:[#allocation84_spill] sm:$0xff] %v13281_v3 }
  0xa2   :  { %1720 = vmatmul.mubr.bf16.vlgmr.msra.gmra.mrb[0].mxu0 %v12497_v6  ;;  %1791 = vmatmul.mubr.bf16.vlgmr.msra.gmra.mrb[0].mxu1 %v12497_v6 }
  0xa3   :  { %1935 = vmatpush1.bf16.msra.mxu0 %v13269_v5  ;;  %2006 = vmatpush1.bf16.msra.mxu1 %v13275_v14  ;;  %v13295_v14 = vld [vmem:[%s18394_s1 + $0x120] ss:$16 sps:$4 sm:$0xff]   ;;  %v13313_v5 = vld [vmem:[%s18394_s1 + $0x14c] ss:$16 sps:$4 sm:$0xff]  }
  0xa4   :  { %1936 = vmatprep.subr.bf16.mxu0 %v13281_v3  ;;  %2007 = vmatprep.subr.bf16.mxu1 %v13287_v19  ;;  %18772 = vst [vmem:[#allocation86_spill] sm:$0xff] %v13295_v14  ;;  %v13301_v3 = vld [vmem:[%s18394_s1 + $0x128] ss:$16 sps:$4 sm:$0xff]   ;;  %v13307_v19 = vld [vmem:[%s18394_s1 + $0x144] ss:$16 sps:$4 sm:$0xff]   ;;  %18775 = vst [vmem:[#allocation89_spill] sm:$0xff] %v13313_v5 }
  0xa5   :  { %1729 = vmatprep.mubr.bf16.mxu0 %v18700_v15  ;;  %1800 = vmatprep.mubr.bf16.mxu1 %v18700_v15  ;;  %18773 = vst [vmem:[#allocation87_spill] sm:$0xff] %v13301_v3  ;;  %18774 = vst [vmem:[#allocation88_spill] sm:$0xff] %v13307_v19 }
  0xa7   :  { %1937 = vmatpush1.bf16.msra.mxu0 %v13295_v14  ;;  %2008 = vmatpush1.bf16.msra.mxu1 %v13301_v3  ;;  %v13321_v3 = vld [vmem:[%s18394_s1 + $0x140] ss:$16 sps:$4 sm:$0xff]   ;;  %v13339_v14 = vld [vmem:[%s18394_s1 + $0x16c] ss:$16 sps:$4 sm:$0xff]  }
  0xa8   :  { %1938 = vmatprep.subr.bf16.mxu0 %v13307_v19  ;;  %2009 = vmatprep.subr.bf16.mxu1 %v13313_v5  ;;  %18776 = vst [vmem:[#allocation90_spill] sm:$0xff] %v13321_v3  ;;  %v13327_v19 = vld [vmem:[%s18394_s1 + $0x148] ss:$16 sps:$4 sm:$0xff]   ;;  %v13333_v5 = vld [vmem:[%s18394_s1 + $0x164] ss:$16 sps:$4 sm:$0xff]   ;;  %18779 = vst [vmem:[#allocation93_spill] sm:$0xff] %v13339_v14 }
  0xa9   :  { %18777 = vst [vmem:[#allocation91_spill] sm:$0xff] %v13327_v19  ;;  %18778 = vst [vmem:[#allocation92_spill] sm:$0xff] %v13333_v5 }
  0xaa   :  { %1730 = vmatmul.mubr.bf16.gmra.mrb[4].mxu0 %v12550_v17  ;;  %1801 = vmatmul.mubr.bf16.gmra.mrb[4].mxu1 %v12550_v17 }
  0xab   :  { %1939 = vmatpush1.bf16.msra.mxu0 %v13321_v3  ;;  %2010 = vmatpush1.bf16.msra.mxu1 %v13327_v19  ;;  %v13347_v19 = vld [vmem:[%s18394_s1 + $0x160] ss:$16 sps:$4 sm:$0xff]   ;;  %v13365_v3 = vld [vmem:[%s18394_s1 + $0x18c] ss:$16 sps:$4 sm:$0xff]  }
  0xac   :  { %1940 = vmatprep.subr.bf16.mxu0 %v13333_v5  ;;  %2011 = vmatprep.subr.bf16.mxu1 %v13339_v14  ;;  %18780 = vst [vmem:[#allocation94_spill] sm:$0xff] %v13347_v19  ;;  %v13353_v5 = vld [vmem:[%s18394_s1 + $0x168] ss:$16 sps:$4 sm:$0xff]   ;;  %v13359_v14 = vld [vmem:[%s18394_s1 + $0x184] ss:$16 sps:$4 sm:$0xff]   ;;  %18783 = vst [vmem:[#allocation97_spill] sm:$0xff] %v13365_v3 }
  0xad   :  { %1739 = vmatprep.mubr.bf16.mxu0 %v18700_v15  ;;  %1810 = vmatprep.mubr.bf16.mxu1 %v18700_v15  ;;  %18781 = vst [vmem:[#allocation95_spill] sm:$0xff] %v13353_v5  ;;  %18782 = vst [vmem:[#allocation96_spill] sm:$0xff] %v13359_v14 }
  0xaf   :  { %1941 = vmatpush1.bf16.msra.mxu0 %v13347_v19  ;;  %2012 = vmatpush1.bf16.msra.mxu1 %v13353_v5  ;;  %v13373_v5 = vld [vmem:[%s18394_s1 + $0x180] ss:$16 sps:$4 sm:$0xff]   ;;  %v13388_v19 = vld [vmem:[%s18394_s1 + $0x1a4] ss:$16 sps:$4 sm:$0xff]  }
  0xb0   :  { %1942 = vmatprep.subr.bf16.mxu0 %v13359_v14  ;;  %2013 = vmatprep.subr.bf16.mxu1 %v13365_v3  ;;  %18784 = vst [vmem:[#allocation98_spill] sm:$0xff] %v13373_v5  ;;  %v13379_v14 = vld [vmem:[%s18394_s1 + $0x188] ss:$16 sps:$4 sm:$0xff]   ;;  %18786 = vst [vmem:[#allocation100_spill] sm:$0xff] %v13388_v19 }
  0xb1   :  { %18785 = vst [vmem:[#allocation99_spill] sm:$0xff] %v13379_v14  ;;  %v1489_v3 = vld [vmem:[%s18395_s0 + $0x38] sm:$0xff] }
  0xb2   :  { %1740 = vmatmul.mubr.bf16.gmra.mrb[8].mxu0 %v12596_v27  ;;  %1811 = vmatmul.mubr.bf16.gmra.mrb[8].mxu1 %v12596_v27 }
  0xb3   :  { %1943 = vmatpush1.bf16.msra.mxu0 %v13373_v5  ;;  %2014 = vmatpush1.bf16.msra.mxu1 %v13379_v14  ;;  %v13394_v5 = vld [vmem:[%s18394_s1 + $0x1ac] ss:$16 sps:$4 sm:$0xff]   ;;  %v13399_v14 = vpack.c.bf16 %v1489_v3, %v1489_v3 }
  0xb4   :  { %1944 = vmatprep.subr.bf16.mxu0 %v13388_v19  ;;  %18787 = vst [vmem:[#allocation101_spill] sm:$0xff] %v13394_v5  ;;  %2015 = vmatprep.subr.bf16.mxu1 %v13394_v5  ;;  %v13410_v19 = vld [vmem:[%s18394_s1 + $0x1a8] ss:$16 sps:$4 sm:$0xff]   ;;  %v13416_v5 = vld [vmem:[%s18394_s1 + $0x1c4] ss:$16 sps:$4 sm:$0xff]  }
  0xb5   :  { %1749 = vmatprep.mubr.bf16.mxu0 %v18700_v15  ;;  %1820 = vmatprep.mubr.bf16.mxu1 %v18700_v15  ;;  %18789 = vst [vmem:[#allocation103_spill] sm:$0xff] %v13410_v19  ;;  %18790 = vst [vmem:[#allocation104_spill] sm:$0xff] %v13416_v5  ;;  %v13422_v3 = vld [vmem:[%s18394_s1 + $0x1cc] ss:$16 sps:$4 sm:$0xff]  }
  0xb6   :  { %18791 = vst [vmem:[#allocation105_spill] sm:$0xff] %v13422_v3 }
  0xb7   :  { %1945 = vmatpush1.bf16.msra.mxu0 %v13404_v25  ;;  %2016 = vmatpush1.bf16.msra.mxu1 %v13410_v19  ;;  %v13430_v19 = vld [vmem:[%s18394_s1 + $0x1c0] ss:$16 sps:$4 sm:$0xff]   ;;  %v13448_v25 = vld [vmem:[%s18394_s1 + $0x1ec] ss:$16 sps:$4 sm:$0xff]  }
  0xb8   :  { %1946 = vmatprep.subr.bf16.mxu0 %v13416_v5  ;;  %2017 = vmatprep.subr.bf16.mxu1 %v13422_v3  ;;  %18792 = vst [vmem:[#allocation106_spill] sm:$0xff] %v13430_v19  ;;  %v13436_v5 = vld [vmem:[%s18394_s1 + $0x1c8] ss:$16 sps:$4 sm:$0xff]   ;;  %v13442_v3 = vld [vmem:[%s18394_s1 + $0x1e4] ss:$16 sps:$4 sm:$0xff]   ;;  %18795 = vst [vmem:[#allocation109_spill] sm:$0xff] %v13448_v25 }
  0xb9   :  { %18793 = vst [vmem:[#allocation107_spill] sm:$0xff] %v13436_v5  ;;  %18794 = vst [vmem:[#allocation108_spill] sm:$0xff] %v13442_v3 }
  0xba   :  { %1750 = vmatmul.mubr.bf16.gmra.mrb[28].mxu0 %v13399_v14  ;;  %1821 = vmatmul.mubr.bf16.gmra.mrb[28].mxu1 %v13399_v14 }
  0xbb   :  { %1947 = vmatpush1.bf16.msra.mxu0 %v13430_v19  ;;  %2018 = vmatpush1.bf16.msra.mxu1 %v13436_v5  ;;  %v13456_v5 = vld [vmem:[%s18394_s1 + $0x1e0] ss:$16 sps:$4 sm:$0xff]   ;;  %v13474_v19 = vld [vmem:[%s18394_s1 + $0xc] ss:$16 sps:$4 sm:$0xff]  }
  0xbc   :  { %1948 = vmatprep.subr.bf16.mxu0 %v13442_v3  ;;  %2019 = vmatprep.subr.bf16.mxu1 %v13448_v25  ;;  %v13462_v3 = vld [vmem:[%s18394_s1 + $0x1e8] ss:$16 sps:$4 sm:$0xff]   ;;  %v13468_v25 = vld [vmem:[%s18394_s1 + $0x4] ss:$16 sps:$4 sm:$0xff]   ;;  %18798 = vst [vmem:[#allocation112_spill] sm:$0xff] %v13474_v19 }
  0xbd   :  { %1966 = vmatprep.mubr.bf16.mxu0 %v18700_v15  ;;  %2037 = vmatprep.mubr.bf16.mxu1 %v18700_v15  ;;  %18796 = vst [vmem:[#allocation110_spill] sm:$0xff] %v13462_v3  ;;  %18797 = vst [vmem:[#allocation111_spill] sm:$0xff] %v13468_v25 }
  0xbf   :  { %1949 = vmatpush1.bf16.msra.mxu0 %v13456_v5  ;;  %2020 = vmatpush1.bf16.msra.mxu1 %v13462_v3  ;;  %v13482_v3 = vld [vmem:[%s18394_s1] ss:$16 sps:$4 sm:$0xff]  }
  0xc0   :  { %2076 = vmatprep.subr.bf16.mxu0 %v13468_v25  ;;  %2147 = vmatprep.subr.bf16.mxu1 %v13474_v19  ;;  %18799 = vst [vmem:[#allocation113_spill] sm:$0xff] %v13482_v3  ;;  %v13488_v25 = vld [vmem:[%s18394_s1 + $0x8] ss:$16 sps:$4 sm:$0xff]   ;;  %v13494_v19 = vld [vmem:[%s18394_s1 + $0x24] ss:$16 sps:$4 sm:$0xff]  }
  0xc1   :  { %18800 = vst [vmem:[#allocation114_spill] sm:$0xff] %v13488_v25  ;;  %18801 = vst [vmem:[#allocation115_spill] sm:$0xff] %v13494_v19 }
  0xc2   :  { %1967 = vmatmul.mubr.bf16.vlgmr.msra.gmra.mrb[32].mxu0 %v12792_v9  ;;  %2038 = vmatmul.mubr.bf16.vlgmr.msra.gmra.mrb[32].mxu1 %v12792_v9  ;;  %v13500_v9 = vld [vmem:[%s18394_s1 + $0x2c] ss:$16 sps:$4 sm:$0xff]  }
  0xc3   :  { %2077 = vmatpush1.bf16.msra.mxu0 %v13482_v3  ;;  %2148 = vmatpush1.bf16.msra.mxu1 %v13488_v25  ;;  %18802 = vst [vmem:[#allocation116_spill] sm:$0xff] %v13500_v9  ;;  %v13508_v25 = vld [vmem:[%s18394_s1 + $0x20] ss:$16 sps:$4 sm:$0xff]   ;;  %v13526_v3 = vld [vmem:[%s18394_s1 + $0x4c] ss:$16 sps:$4 sm:$0xff]  }
  0xc4   :  { %2078 = vmatprep.subr.bf16.mxu0 %v13494_v19  ;;  %2149 = vmatprep.subr.bf16.mxu1 %v13500_v9  ;;  %v13514_v19 = vld [vmem:[%s18394_s1 + $0x28] ss:$16 sps:$4 sm:$0xff]   ;;  %v13520_v9 = vld [vmem:[%s18394_s1 + $0x44] ss:$16 sps:$4 sm:$0xff]  }
  0xc5   :  { %1976 = vmatprep.mubr.bf16.mxu0 %v18700_v15  ;;  %2047 = vmatprep.mubr.bf16.mxu1 %v18700_v15 }
  0xc7   :  { %2079 = vmatpush1.bf16.msra.mxu0 %v13508_v25  ;;  %2150 = vmatpush1.bf16.msra.mxu1 %v13514_v19 }
  0xc8   :  { %2080 = vmatprep.subr.bf16.mxu0 %v13520_v9  ;;  %2151 = vmatprep.subr.bf16.mxu1 %v13526_v3 }
  0xca   :  { %1977 = vmatmul.mubr.bf16.gmra.mrb[36].mxu0 %v12852_v24  ;;  %2048 = vmatmul.mubr.bf16.gmra.mrb[36].mxu1 %v12852_v24 }
  0xcb   :  { %2081 = vmatpush1.bf16.msra.mxu0 %v12397_v49  ;;  %2152 = vmatpush1.bf16.msra.mxu1 %v12402_v50  ;;  %v18805_v49 = vld [vmem:[#allocation5_spill] sm:$0xff]  ;;  %v18806_v50 = vld [vmem:[#allocation6_spill] sm:$0xff] }
  0xcc   :  { %2082 = vmatprep.subr.bf16.mxu0 %v12407_v51  ;;  %2153 = vmatprep.subr.bf16.mxu1 %v12412_v52  ;;  %v18807_v51 = vld [vmem:[#allocation2_spill] sm:$0xff]  ;;  %v18808_v52 = vld [vmem:[#allocation7_spill] sm:$0xff] }
  0xcd   :  { %1986 = vmatprep.mubr.bf16.mxu0 %v18700_v15  ;;  %2057 = vmatprep.mubr.bf16.mxu1 %v18700_v15 }
  0xcf   :  { %2083 = vmatpush1.bf16.msra.mxu0 %v12419_v53  ;;  %2154 = vmatpush1.bf16.msra.mxu1 %v12426_v54  ;;  %v18809_v53 = vld [vmem:[#allocation8_spill] sm:$0xff]  ;;  %v18810_v54 = vld [vmem:[#allocation9_spill] sm:$0xff] }
  0xd0   :  { %2084 = vmatprep.subr.bf16.mxu0 %v12439_v57  ;;  %2155 = vmatprep.subr.bf16.mxu1 %v12444_v58  ;;  %v18811_v57 = vld [vmem:[#allocation10_spill] sm:$0xff]  ;;  %v18812_v58 = vld [vmem:[#allocation11_spill] sm:$0xff] }
  0xd2   :  { %1987 = vmatmul.mubr.bf16.gmra.mrb[40].mxu0 %v12912_v44  ;;  %2058 = vmatmul.mubr.bf16.gmra.mrb[40].mxu1 %v12912_v44 }
  0xd3   :  { %2085 = vmatpush1.bf16.msra.mxu0 %v12453_v60  ;;  %2156 = vmatpush1.bf16.msra.mxu1 %v12458_v61  ;;  %v18814_v60 = vld [vmem:[#allocation13_spill] sm:$0xff]  ;;  %v18815_v61 = vld [vmem:[#allocation14_spill] sm:$0xff] }
  0xd4   :  { %2086 = vmatprep.subr.bf16.mxu0 %v12465_v62  ;;  %2157 = vmatprep.subr.bf16.mxu1 %v12472_v63  ;;  %v18816_v62 = vld [vmem:[#allocation48_spill] sm:$0xff] }
  0xd5   :  { %1996 = vmatprep.mubr.bf16.mxu0 %v18700_v15  ;;  %2067 = vmatprep.mubr.bf16.mxu1 %v18700_v15  ;;  %v18817_v63 = vld [vmem:[#allocation16_spill] sm:$0xff] }
  0xd7   :  { %2087 = vmatpush1.bf16.msra.mxu0 %v12477_v0  ;;  %2158 = vmatpush1.bf16.msra.mxu1 %v12482_v2  ;;  %v18818_v0 = vld [vmem:[#allocation17_spill] sm:$0xff]  ;;  %v18819_v2 = vld [vmem:[#allocation18_spill] sm:$0xff] }
  0xd8   :  { %2088 = vmatprep.subr.bf16.mxu0 %v12504_v7  ;;  %2159 = vmatprep.subr.bf16.mxu1 %v12509_v8  ;;  %v18820_v7 = vld [vmem:[#allocation19_spill] sm:$0xff]  ;;  %v18821_v8 = vld [vmem:[#allocation20_spill] sm:$0xff] }
  0xda   :  { %1997 = vmatmul.mubr.bf16.gmra.mrb[44].mxu0 %v12969_v23  ;;  %2068 = vmatmul.mubr.bf16.gmra.mrb[44].mxu1 %v12969_v23 }
  0xdb   :  { %2089 = vmatpush1.bf16.msra.mxu0 %v12518_v10  ;;  %2160 = vmatpush1.bf16.msra.mxu1 %v12525_v11  ;;  %v18822_v10 = vld [vmem:[#allocation21_spill] sm:$0xff]  ;;  %v18823_v11 = vld [vmem:[#allocation22_spill] sm:$0xff] }
  0xdc   :  { %2090 = vmatprep.subr.bf16.mxu0 %v12530_v12  ;;  %2161 = vmatprep.subr.bf16.mxu1 %v12535_v13  ;;  %v18824_v12 = vld [vmem:[#allocation23_spill] sm:$0xff]  ;;  %v18825_v13 = vld [vmem:[#allocation57_spill] sm:$0xff] }
  0xdd   :  { %2108 = vmatprep.mubr.bf16.mxu0 %v18700_v15  ;;  %2179 = vmatprep.mubr.bf16.mxu1 %v18700_v15 }
  0xdf   :  { %2091 = vmatpush1.bf16.msra.mxu0 %v12548_v16  ;;  %2162 = vmatpush1.bf16.msra.mxu1 %v12557_v18  ;;  %v18826_v16 = vld [vmem:[#allocation24_spill] sm:$0xff]  ;;  %v18827_v18 = vld [vmem:[#allocation25_spill] sm:$0xff] }
  0xe0   :  { %2218 = vmatprep.subr.bf16.mxu0 %v12567_v20  ;;  %2289 = vmatprep.subr.bf16.mxu1 %v12574_v21  ;;  %v18828_v20 = vld [vmem:[#allocation26_spill] sm:$0xff]  ;;  %v18829_v21 = vld [vmem:[#allocation27_spill] sm:$0xff] }
  0xe2   :  { %2109 = vmatmul.mubr.bf16.vlgmr.msra.gmra.mrb[32].mxu0 %v12356_v37  ;;  %2180 = vmatmul.mubr.bf16.vlgmr.msra.gmra.mrb[32].mxu1 %v12356_v37  ;;  %v18803_v37 = vld [vmem:[#allocation3_spill] sm:$0xff] }
  0xe3   :  { %2219 = vmatpush1.bf16.msra.mxu0 %v12581_v22  ;;  %2290 = vmatpush1.bf16.msra.mxu1 %v12594_v26 }
  0xe4   :  { %2220 = vmatprep.subr.bf16.mxu0 %v12603_v28  ;;  %2291 = vmatprep.subr.bf16.mxu1 %v12608_v29 }
  0xe5   :  { %2118 = vmatprep.mubr.bf16.mxu0 %v18700_v15  ;;  %2189 = vmatprep.mubr.bf16.mxu1 %v18700_v15 }
  0xe7   :  { %2221 = vmatpush1.bf16.msra.mxu0 %v12615_v30  ;;  %2292 = vmatpush1.bf16.msra.mxu1 %v12620_v31 }
  0xe8   :  { %2222 = vmatprep.subr.bf16.mxu0 %v12625_v32  ;;  %2293 = vmatprep.subr.bf16.mxu1 %v12632_v33  ;;  %v18830_v32 = vld [vmem:[#allocation28_spill] sm:$0xff]  ;;  %v18831_v33 = vld [vmem:[#allocation29_spill] sm:$0xff] }
  0xea   :  { %2119 = vmatmul.mubr.bf16.gmra.mrb[36].mxu0 %v12392_v48  ;;  %2190 = vmatmul.mubr.bf16.gmra.mrb[36].mxu1 %v12392_v48  ;;  %v18804_v48 = vld [vmem:[#allocation4_spill] sm:$0xff] }
  0xeb   :  { %2223 = vmatpush1.bf16.msra.mxu0 %v12639_v35  ;;  %2294 = vmatpush1.bf16.msra.mxu1 %v12644_v36 }
  0xec   :  { %2224 = vmatprep.subr.bf16.mxu0 %v12651_v38  ;;  %2295 = vmatprep.subr.bf16.mxu1 %v12658_v39  ;;  %v18832_v38 = vld [vmem:[#allocation30_spill] sm:$0xff]  ;;  %v18833_v39 = vld [vmem:[#allocation31_spill] sm:$0xff] }
  0xed   :  { %2128 = vmatprep.mubr.bf16.mxu0 %v18700_v15  ;;  %2199 = vmatprep.mubr.bf16.mxu1 %v18700_v15 }
  0xef   :  { %2225 = vmatpush1.bf16.msra.mxu0 %v12663_v40  ;;  %2296 = vmatpush1.bf16.msra.mxu1 %v12670_v41  ;;  %v18834_v40 = vld [vmem:[#allocation32_spill] sm:$0xff]  ;;  %v18835_v41 = vld [vmem:[#allocation33_spill] sm:$0xff] }
  0xf0   :  { %2226 = vmatprep.subr.bf16.mxu0 %v12677_v42  ;;  %2297 = vmatprep.subr.bf16.mxu1 %v12682_v43  ;;  %v18836_v42 = vld [vmem:[#allocation34_spill] sm:$0xff]  ;;  %v18837_v43 = vld [vmem:[#allocation35_spill] sm:$0xff] }
  0xf2   :  { %2129 = vmatmul.mubr.bf16.gmra.mrb[40].mxu0 %v12448_v59  ;;  %2200 = vmatmul.mubr.bf16.gmra.mrb[40].mxu1 %v12448_v59  ;;  %v18813_v59 = vld [vmem:[#allocation12_spill] sm:$0xff] }
  0xf3   :  { %2227 = vmatpush1.bf16.msra.mxu0 %v12691_v45  ;;  %2298 = vmatpush1.bf16.msra.mxu1 %v12696_v46  ;;  %v18838_v45 = vld [vmem:[#allocation36_spill] sm:$0xff]  ;;  %v18839_v46 = vld [vmem:[#allocation37_spill] sm:$0xff] }
  0xf4   :  { %2228 = vmatprep.subr.bf16.mxu0 %v12701_v47  ;;  %2299 = vmatprep.subr.bf16.mxu1 %v12708_v55  ;;  %v18840_v47 = vld [vmem:[#allocation38_spill] sm:$0xff]  ;;  %v18841_v55 = vld [vmem:[#allocation39_spill] sm:$0xff] }
  0xf5   :  { %2138 = vmatprep.mubr.bf16.mxu0 %v18700_v15  ;;  %2209 = vmatprep.mubr.bf16.mxu1 %v18700_v15 }
  0xf7   :  { %2229 = vmatpush1.bf16.msra.mxu0 %v18803_v37  ;;  %2300 = vmatpush1.bf16.msra.mxu1 %v18804_v48  ;;  %v18842_v37 = vld [vmem:[#allocation40_spill] sm:$0xff]  ;;  %v18843_v48 = vld [vmem:[#allocation41_spill] sm:$0xff] }
  0xf8   :  { %2230 = vmatprep.subr.bf16.mxu0 %v18805_v49  ;;  %2301 = vmatprep.subr.bf16.mxu1 %v18806_v50  ;;  %v18844_v49 = vld [vmem:[#allocation42_spill] sm:$0xff]  ;;  %v18845_v50 = vld [vmem:[#allocation43_spill] sm:$0xff] }
  0xfa   :  { %2139 = vmatmul.mubr.bf16.gmra.mrb[48].mxu0 %v18807_v51  ;;  %2210 = vmatmul.mubr.bf16.gmra.mrb[48].mxu1 %v18807_v51  ;;  %v18846_v51 = vld [vmem:[#allocation44_spill] sm:$0xff] }
  0xfb   :  { %2231 = vmatpush1.bf16.msra.mxu0 %v18808_v52  ;;  %2302 = vmatpush1.bf16.msra.mxu1 %v18809_v53  ;;  %v18847_v52 = vld [vmem:[#allocation45_spill] sm:$0xff]  ;;  %v18848_v53 = vld [vmem:[#allocation46_spill] sm:$0xff] }
  0xfc   :  { %2232 = vmatprep.subr.bf16.mxu0 %v18810_v54  ;;  %2303 = vmatprep.subr.bf16.mxu1 %v18811_v57  ;;  %v18849_v54 = vld [vmem:[#allocation47_spill] sm:$0xff]  ;;  %v18850_v57 = vld [vmem:[#allocation49_spill] sm:$0xff] }
  0xfd   :  { %2250 = vmatprep.mubr.bf16.mxu0 %v18700_v15  ;;  %2321 = vmatprep.mubr.bf16.mxu1 %v18700_v15 }
  0xff   :  { %2233 = vmatpush1.bf16.msra.mxu0 %v18812_v58  ;;  %2304 = vmatpush1.bf16.msra.mxu1 %v18813_v59  ;;  %v18851_v58 = vld [vmem:[#allocation50_spill] sm:$0xff]  ;;  %v18852_v59 = vld [vmem:[#allocation51_spill] sm:$0xff] }
 0x100   :  { %2388 = vmatprep.subr.bf16.mxu0 %v18814_v60  ;;  %2459 = vmatprep.subr.bf16.mxu1 %v18815_v61  ;;  %v18853_v60 = vld [vmem:[#allocation52_spill] sm:$0xff]  ;;  %v18854_v61 = vld [vmem:[#allocation53_spill] sm:$0xff] }
 0x102   :  { %2251 = vmatmul.mubr.bf16.vlgmr.msra.gmra.mrb[32].mxu0 %v18816_v62  ;;  %2322 = vmatmul.mubr.bf16.vlgmr.msra.gmra.mrb[32].mxu1 %v18816_v62 }
 0x103   :  { %2389 = vmatpush1.bf16.msra.mxu0 %v18817_v63  ;;  %2460 = vmatpush1.bf16.msra.mxu1 %v18818_v0  ;;  %v18855_v63 = vld [vmem:[#allocation54_spill] sm:$0xff]  ;;  %v18856_v0 = vld [vmem:[#allocation55_spill] sm:$0xff] }
 0x104   :  { %2390 = vmatprep.subr.bf16.mxu0 %v18819_v2  ;;  %2461 = vmatprep.subr.bf16.mxu1 %v18820_v7  ;;  %v18857_v2 = vld [vmem:[#allocation56_spill] sm:$0xff]  ;;  %v18858_v7 = vld [vmem:[#allocation58_spill] sm:$0xff] }
 0x105   :  { %2260 = vmatprep.mubr.bf16.mxu0 %v18700_v15  ;;  %2331 = vmatprep.mubr.bf16.mxu1 %v18700_v15 }
 0x107   :  { %2391 = vmatpush1.bf16.msra.mxu0 %v18821_v8  ;;  %2462 = vmatpush1.bf16.msra.mxu1 %v18822_v10  ;;  %v18859_v8 = vld [vmem:[#allocation59_spill] sm:$0xff]  ;;  %v18860_v10 = vld [vmem:[#allocation60_spill] sm:$0xff] }
 0x108   :  { %2392 = vmatprep.subr.bf16.mxu0 %v18823_v11  ;;  %2463 = vmatprep.subr.bf16.mxu1 %v18824_v12  ;;  %v18861_v11 = vld [vmem:[#allocation61_spill] sm:$0xff] }
 0x10a   :  { %2261 = vmatmul.mubr.bf16.gmra.mrb[36].mxu0 %v18825_v13  ;;  %2332 = vmatmul.mubr.bf16.gmra.mrb[36].mxu1 %v18825_v13 }
 0x10b   :  { %2393 = vmatpush1.bf16.msra.mxu0 %v18826_v16  ;;  %2464 = vmatpush1.bf16.msra.mxu1 %v18827_v18 }
 0x10c   :  { %2394 = vmatprep.subr.bf16.mxu0 %v18828_v20  ;;  %2465 = vmatprep.subr.bf16.mxu1 %v18829_v21 }
 0x10d   :  { %v355_v22 = vpop.f32.mrb[12].mxu0  ;;  %v426_v26 = vpop.f32.mrb[12].mxu1  ;;  %2270 = vmatprep.mubr.bf16.mxu0 %v18700_v15  ;;  %2341 = vmatprep.mubr.bf16.mxu1 %v18700_v15 }
 0x10e   :  { %v357_v28 = vpop.f32.mrb[13].mxu0  ;;  %v428_v29 = vpop.f32.mrb[13].mxu1 }
 0x10f   :  { %v359_v30 = vpop.f32.mrb[14].mxu0  ;;  %v430_v31 = vpop.f32.mrb[14].mxu1  ;;  %2395 = vmatpush1.bf16.msra.mxu0 %v18830_v32  ;;  %2466 = vmatpush1.bf16.msra.mxu1 %v18831_v33 }
 0x110   :  { %v360_v35 = vpop.f32.mrb[15].mxu0  ;;  %v431_v36 = vpop.f32.mrb[15].mxu1  ;;  %2396 = vmatprep.subr.bf16.mxu0 %v18832_v38  ;;  %2467 = vmatprep.subr.bf16.mxu1 %v18833_v39  ;;  %v18863_v38 = vld [vmem:[#allocation63_spill] sm:$0xff] }
 0x111   :  { %v18862_v36 = vld [vmem:[#allocation62_spill] sm:$0xff] }
 0x112   :  { %2271 = vmatmul.mubr.bf16.gmra.mrb[40].mxu0 %v13149_v56  ;;  %2342 = vmatmul.mubr.bf16.gmra.mrb[40].mxu1 %v13149_v56 }
 0x113   :  { %2397 = vmatpush1.bf16.msra.mxu0 %v18834_v40  ;;  %2468 = vmatpush1.bf16.msra.mxu1 %v18835_v41  ;;  %v18864_v41 = vld [vmem:[#allocation64_spill] sm:$0xff] }
 0x114   :  { %2398 = vmatprep.subr.bf16.mxu0 %v18836_v42  ;;  %2469 = vmatprep.subr.bf16.mxu1 %v18837_v43  ;;  %v18869_v42 = vld [vmem:[#allocation70_spill] sm:$0xff]  ;;  %v18870_v43 = vld [vmem:[#allocation71_spill] sm:$0xff] }
 0x115   :  { %2280 = vmatprep.mubr.bf16.mxu0 %v18700_v15  ;;  %2351 = vmatprep.mubr.bf16.mxu1 %v18700_v15 }
 0x117   :  { %2399 = vmatpush1.bf16.msra.mxu0 %v18838_v45  ;;  %2470 = vmatpush1.bf16.msra.mxu1 %v18839_v46  ;;  %v18871_v45 = vld [vmem:[#allocation72_spill] sm:$0xff]  ;;  %v18872_v46 = vld [vmem:[#allocation73_spill] sm:$0xff] }
 0x118   :  { %2400 = vmatprep.subr.bf16.mxu0 %v18840_v47  ;;  %2471 = vmatprep.subr.bf16.mxu1 %v18841_v55  ;;  %v18873_v47 = vld [vmem:[#allocation75_spill] sm:$0xff] }
 0x119   :  { %v2558_v55 = vld [vmem:[%s18395_s0 + $0x48] sm:$0xff] }
 0x11a   :  { %2281 = vmatmul.mubr.bf16.gmra.mrb[52].mxu0 %v13206_v34  ;;  %2352 = vmatmul.mubr.bf16.gmra.mrb[52].mxu1 %v13206_v34 }
 0x11b   :  { %2401 = vmatpush1.bf16.msra.mxu0 %v18842_v37  ;;  %2472 = vmatpush1.bf16.msra.mxu1 %v18843_v48  ;;  %v18874_v37 = vld [vmem:[#allocation76_spill] sm:$0xff]  ;;  %v18875_v48 = vld [vmem:[#allocation77_spill] sm:$0xff] }
 0x11c   :  { %2402 = vmatprep.subr.bf16.mxu0 %v18844_v49  ;;  %2473 = vmatprep.subr.bf16.mxu1 %v18845_v50  ;;  %v18878_v50 = vld [vmem:[#allocation79_spill] sm:$0xff] }
 0x11d   :  { %2420 = vmatprep.mubr.bf16.mxu0 %v18700_v15  ;;  %2491 = vmatprep.mubr.bf16.mxu1 %v18700_v15 }
 0x11f   :  { %2403 = vmatpush1.bf16.msra.mxu0 %v18846_v51  ;;  %2474 = vmatpush1.bf16.msra.mxu1 %v18847_v52  ;;  %v18879_v51 = vld [vmem:[#allocation80_spill] sm:$0xff]  ;;  %v18880_v52 = vld [vmem:[#allocation81_spill] sm:$0xff] }
 0x120   :  { %2569 = vmatprep.subr.bf16.mxu0 %v18848_v53  ;;  %2640 = vmatprep.subr.bf16.mxu1 %v18849_v54  ;;  %v18881_v53 = vld [vmem:[#allocation82_spill] sm:$0xff]  ;;  %v18882_v54 = vld [vmem:[#allocation83_spill] sm:$0xff] }
 0x122   :  { %2421 = vmatmul.mubr.bf16.vlgmr.msra.gmra.mrb[32].mxu0 %v12497_v6  ;;  %2492 = vmatmul.mubr.bf16.vlgmr.msra.gmra.mrb[32].mxu1 %v12497_v6 }
 0x123   :  { %2570 = vmatpush1.bf16.msra.mxu0 %v18850_v57  ;;  %2641 = vmatpush1.bf16.msra.mxu1 %v18851_v58  ;;  %v2560_v57 = vld [vmem:[%s18395_s0 + $0x58] sm:$0xff]  ;;  %v2561_v58 = vld [vmem:[%s18395_s0 + $0x60] sm:$0xff] }
 0x124   :  { %2571 = vmatprep.subr.bf16.mxu0 %v18852_v59  ;;  %2642 = vmatprep.subr.bf16.mxu1 %v18853_v60  ;;  %v18883_v59 = vld [vmem:[#allocation84_spill] sm:$0xff]  ;;  %v18884_v60 = vld [vmem:[#allocation85_spill] sm:$0xff] }
 0x125   :  { %2430 = vmatprep.mubr.bf16.mxu0 %v18700_v15  ;;  %2501 = vmatprep.mubr.bf16.mxu1 %v18700_v15 }
 0x127   :  { %2572 = vmatpush1.bf16.msra.mxu0 %v18854_v61  ;;  %2643 = vmatpush1.bf16.msra.mxu1 %v18855_v63  ;;  %v13739_v61 = vpack.c.bf16 %v2561_v58, %v2560_v57  ;;  %v18886_v63 = vld [vmem:[#allocation86_spill] sm:$0xff]  ;;  %v18913_v58 = vld [vmem:[#allocation111_spill] sm:$0xff] }
 0x128   :  { %2573 = vmatprep.subr.bf16.mxu0 %v18856_v0  ;;  %2644 = vmatprep.subr.bf16.mxu1 %v18857_v2  ;;  %v18887_v0 = vld [vmem:[#allocation87_spill] sm:$0xff]  ;;  %v18888_v2 = vld [vmem:[#allocation88_spill] sm:$0xff]  ;;  %v18912_v57 = vld [vmem:[#allocation110_spill] sm:$0xff] }
 0x129   :  { %18885 = vst [vmem:[#allocation4_spill] sm:$0xff] %v13739_v61 }
 0x12a   :  { %2431 = vmatmul.mubr.bf16.gmra.mrb[36].mxu0 %v12550_v17  ;;  %2502 = vmatmul.mubr.bf16.gmra.mrb[36].mxu1 %v12550_v17 }
 0x12b   :  { %2574 = vmatpush1.bf16.msra.mxu0 %v18858_v7  ;;  %2645 = vmatpush1.bf16.msra.mxu1 %v18859_v8  ;;  %v18889_v7 = vld [vmem:[#allocation89_spill] sm:$0xff]  ;;  %v18890_v8 = vld [vmem:[#allocation90_spill] sm:$0xff] }
 0x12c   :  { %2575 = vmatprep.subr.bf16.mxu0 %v18860_v10  ;;  %2646 = vmatprep.subr.bf16.mxu1 %v18861_v11  ;;  %v18891_v10 = vld [vmem:[#allocation91_spill] sm:$0xff] }
 0x12d   :  { %v657_v12 = vpop.f32.mrb[16].mxu0  ;;  %v728_v16 = vpop.f32.mrb[16].mxu1  ;;  %2440 = vmatprep.mubr.bf16.mxu0 %v18700_v15  ;;  %2511 = vmatprep.mubr.bf16.mxu1 %v18700_v15  ;;  %v2562_v11 = vld [vmem:[%s18395_s0 + $0x68] sm:$0xff] }
 0x12e   :  { %v13681_v18 = vadd.f32 %v657_v12, %v355_v22  ;;  %v13683_v20 = vadd.f32 %v728_v16, %v426_v26  ;;  %v659_v21 = vpop.f32.mrb[17].mxu0  ;;  %v730_v30 = vpop.f32.mrb[17].mxu1  ;;  %v18865_v22 = vld [vmem:[#allocation65_spill] sm:$0xff]  ;;  %v18866_v26 = vld [vmem:[#allocation67_spill] sm:$0xff]  ;;  %v2563_v12 = vld [vmem:[%s18395_s0 + $0x70] sm:$0xff] }
 0x12f   :  { %v13685_v31 = vadd.f32 %v659_v21, %v357_v28  ;;  %v13687_v32 = vadd.f32 %v730_v30, %v428_v29  ;;  %v661_v33 = vpop.f32.mrb[18].mxu0  ;;  %v732_v35 = vpop.f32.mrb[18].mxu1  ;;  %2576 = vmatpush1.bf16.msra.mxu0 %v18862_v36  ;;  %2647 = vmatpush1.bf16.msra.mxu1 %v18863_v38  ;;  %v18867_v28 = vld [vmem:[#allocation68_spill] sm:$0xff]  ;;  %v18868_v29 = vld [vmem:[#allocation69_spill] sm:$0xff] }
 0x130   :  { %v662_v39 = vpop.f32.mrb[19].mxu0  ;;  %v733_v40 = vpop.f32.mrb[19].mxu1  ;;  %2577 = vmatprep.subr.bf16.mxu0 %v18864_v41  ;;  %2648 = vmatprep.subr.bf16.mxu1 %v18865_v22  ;;  %v18892_v16 = vld [vmem:[#allocation92_spill] sm:$0xff]  ;;  %v18893_v21 = vld [vmem:[#allocation93_spill] sm:$0xff] }
 0x131   :  { %v13765_v40 = vpack.c.bf16 %v2563_v12, %v2562_v11 }
 0x132   :  { %2441 = vmatmul.mubr.bf16.gmra.mrb[40].mxu0 %v12596_v27  ;;  %2512 = vmatmul.mubr.bf16.gmra.mrb[40].mxu1 %v12596_v27 }
 0x133   :  { %2578 = vmatpush1.bf16.msra.mxu0 %v18866_v26  ;;  %2649 = vmatpush1.bf16.msra.mxu1 %v18867_v28  ;;  %18894 = vst [vmem:[#allocation5_spill] sm:$0xff] %v13765_v40 }
 0x134   :  { %2579 = vmatprep.subr.bf16.mxu0 %v18868_v29  ;;  %2650 = vmatprep.subr.bf16.mxu1 %v18869_v42  ;;  %v18895_v29 = vld [vmem:[#allocation94_spill] sm:$0xff]  ;;  %v18896_v42 = vld [vmem:[#allocation95_spill] sm:$0xff] }
 0x135   :  { %2450 = vmatprep.mubr.bf16.mxu0 %v18700_v15  ;;  %2521 = vmatprep.mubr.bf16.mxu1 %v18700_v15 }
 0x137   :  { %2580 = vmatpush1.bf16.msra.mxu0 %v13182_v4  ;;  %2651 = vmatpush1.bf16.msra.mxu1 %v18870_v43  ;;  %v2559_v4 = vld [vmem:[%s18395_s0 + $0x50] sm:$0xff] }
 0x138   :  { %2581 = vmatprep.subr.bf16.mxu0 %v18871_v45  ;;  %2652 = vmatprep.subr.bf16.mxu1 %v18872_v46  ;;  %v13719_v49 = vpack.c.bf16 %v2559_v4, %v2558_v55  ;;  %v18898_v45 = vld [vmem:[#allocation97_spill] sm:$0xff] }
 0x139   :  { %v2564_v46 = vld [vmem:[%s18395_s0 + $0x78] sm:$0xff] }
 0x13a   :  { %2451 = vmatmul.mubr.bf16.gmra.mrb[56].mxu0 %v13399_v14  ;;  %2522 = vmatmul.mubr.bf16.gmra.mrb[56].mxu1 %v13399_v14  ;;  %18876 = vst [vmem:[#allocation3_spill] sm:$0xff] %v13719_v49  ;;  %v18902_v55 = vld [vmem:[#allocation101_spill] sm:$0xff]  ;;  %v13788_v4 = vpack.c.bf16 %v2564_v46, %v2564_v46  ;;  %v13925_v46 = vld [vmem:[%s18394_s1 + $0xa0] ss:$16 sps:$4 sm:$0xff]  }
 0x13b   :  { %2582 = vmatpush1.bf16.msra.mxu0 %v13213_v1  ;;  %2653 = vmatpush1.bf16.msra.mxu1 %v18873_v47  ;;  %v18877_v1 = vld [vmem:[#allocation78_spill] sm:$0xff]  ;;  %v18901_v47 = vld [vmem:[#allocation100_spill] sm:$0xff] }
 0x13c   :  { %2583 = vmatprep.subr.bf16.mxu0 %v18874_v37  ;;  %2654 = vmatprep.subr.bf16.mxu1 %v18875_v48  ;;  %18903 = vst [vmem:[#allocation6_spill] sm:$0xff] %v13788_v4  ;;  %v18904_v37 = vld [vmem:[#allocation102_spill] sm:$0xff]  ;;  %v18905_v48 = vld [vmem:[#allocation103_spill] sm:$0xff] }
 0x13d   :  { %2601 = vmatprep.mubr.bf16.mxu0 %v18700_v15  ;;  %2672 = vmatprep.mubr.bf16.mxu1 %v18700_v15 }
 0x13f   :  { %2584 = vmatpush1.bf16.msra.mxu0 %v18877_v1  ;;  %2655 = vmatpush1.bf16.msra.mxu1 %v18878_v50  ;;  %v18906_v1 = vld [vmem:[#allocation104_spill] sm:$0xff]  ;;  %v18907_v50 = vld [vmem:[#allocation105_spill] sm:$0xff] }
 0x140   :  { %2837 = vmatprep.subr.bf16.mxu0 %v18879_v51  ;;  %2908 = vmatprep.subr.bf16.mxu1 %v18880_v52  ;;  %v18908_v51 = vld [vmem:[#allocation106_spill] sm:$0xff]  ;;  %v18909_v52 = vld [vmem:[#allocation107_spill] sm:$0xff] }
 0x142   :  { %2602 = vmatmul.mubr.bf16.vlgmr.msra.gmra.mrb[32].mxu0 %v13719_v49  ;;  %2673 = vmatmul.mubr.bf16.vlgmr.msra.gmra.mrb[32].mxu1 %v13719_v49 }
 0x143   :  { %2838 = vmatpush1.bf16.msra.mxu0 %v18881_v53  ;;  %2909 = vmatpush1.bf16.msra.mxu1 %v18882_v54  ;;  %v18910_v53 = vld [vmem:[#allocation108_spill] sm:$0xff]  ;;  %v18911_v54 = vld [vmem:[#allocation109_spill] sm:$0xff] }
 0x144   :  { %2839 = vmatprep.subr.bf16.mxu0 %v18883_v59  ;;  %2910 = vmatprep.subr.bf16.mxu1 %v18884_v60  ;;  %v18914_v59 = vld [vmem:[#allocation112_spill] sm:$0xff]  ;;  %v18915_v60 = vld [vmem:[#allocation113_spill] sm:$0xff] }
 0x145   :  { %2611 = vmatprep.mubr.bf16.mxu0 %v18700_v15  ;;  %2682 = vmatprep.mubr.bf16.mxu1 %v18700_v15 }
 0x147   :  { %2840 = vmatpush1.bf16.msra.mxu0 %v18886_v63  ;;  %2911 = vmatpush1.bf16.msra.mxu1 %v18887_v0  ;;  %v18916_v63 = vld [vmem:[#allocation114_spill] sm:$0xff]  ;;  %v18917_v0 = vld [vmem:[#allocation115_spill] sm:$0xff] }
 0x148   :  { %2841 = vmatprep.subr.bf16.mxu0 %v18888_v2  ;;  %2912 = vmatprep.subr.bf16.mxu1 %v18889_v7  ;;  %v18918_v2 = vld [vmem:[#allocation116_spill] sm:$0xff] }
 0x14a   :  { %2612 = vmatmul.mubr.bf16.gmra.mrb[36].mxu0 %v13739_v61  ;;  %2683 = vmatmul.mubr.bf16.gmra.mrb[36].mxu1 %v13739_v61 }
 0x14b   :  { %2842 = vmatpush1.bf16.msra.mxu0 %v18890_v8  ;;  %2913 = vmatpush1.bf16.msra.mxu1 %v18891_v10 }
 0x14c   :  { %2843 = vmatprep.subr.bf16.mxu0 %v18892_v16  ;;  %2914 = vmatprep.subr.bf16.mxu1 %v18893_v21 }
 0x14d   :  { %v1003_v30 = vpop.f32.mrb[20].mxu0  ;;  %v1074_v33 = vpop.f32.mrb[20].mxu1  ;;  %2621 = vmatprep.mubr.bf16.mxu0 %v18700_v15  ;;  %2692 = vmatprep.mubr.bf16.mxu1 %v18700_v15 }
 0x14e   :  { %v13760_v35 = vadd.f32 %v1003_v30, %v13681_v18  ;;  %v13763_v36 = vadd.f32 %v1074_v33, %v13683_v20  ;;  %v1005_v38 = vpop.f32.mrb[21].mxu0  ;;  %v1076_v39 = vpop.f32.mrb[21].mxu1  ;;  %v18897_v20 = vld [vmem:[#allocation96_spill] sm:$0xff] }
 0x14f   :  { %v13768_v41 = vadd.f32 %v1005_v38, %v13685_v31  ;;  %v13771_v22 = vadd.f32 %v1076_v39, %v13687_v32  ;;  %v1007_v26 = vpop.f32.mrb[22].mxu0  ;;  %v1078_v28 = vpop.f32.mrb[22].mxu1  ;;  %2844 = vmatpush1.bf16.msra.mxu0 %v18895_v29  ;;  %2915 = vmatpush1.bf16.msra.mxu1 %v18896_v42  ;;  %v18899_v31 = vld [vmem:[#allocation98_spill] sm:$0xff]  ;;  %v18900_v32 = vld [vmem:[#allocation99_spill] sm:$0xff] }
 0x150   :  { %v1008_v18 = vpop.f32.mrb[23].mxu0  ;;  %v1079_v43 = vpop.f32.mrb[23].mxu1  ;;  %2845 = vmatprep.subr.bf16.mxu0 %v18897_v20  ;;  %2916 = vmatprep.subr.bf16.mxu1 %v18898_v45  ;;  %v13861_v38 = vld [vmem:[%s18394_s1 + $0x60] ss:$16 sps:$4 sm:$0xff]   ;;  %v13893_v28 = vld [vmem:[%s18394_s1 + $0x88] ss:$16 sps:$4 sm:$0xff]  }
 0x151   :  { %v13887_v26 = vld [vmem:[%s18394_s1 + $0x80] ss:$16 sps:$4 sm:$0xff]   ;;  %v13899_v29 = vld [vmem:[%s18394_s1 + $0xa4] ss:$16 sps:$4 sm:$0xff]   ;;  %v13905_v42 = vld [vmem:[%s18394_s1 + $0xac] ss:$16 sps:$4 sm:$0xff]  }
 0x152   :  { %2622 = vmatmul.mubr.bf16.gmra.mrb[40].mxu0 %v13765_v40  ;;  %2693 = vmatmul.mubr.bf16.gmra.mrb[40].mxu1 %v13765_v40 }
 0x153   :  { %2846 = vmatpush1.bf16.msra.mxu0 %v18899_v31  ;;  %2917 = vmatpush1.bf16.msra.mxu1 %v18900_v32 }
 0x154   :  { %2847 = vmatprep.subr.bf16.mxu0 %v18901_v47  ;;  %2918 = vmatprep.subr.bf16.mxu1 %v18902_v55  ;;  %v13931_v47 = vld [vmem:[%s18394_s1 + $0xa8] ss:$16 sps:$4 sm:$0xff]  }
 0x155   :  { %2631 = vmatprep.mubr.bf16.mxu0 %v18700_v15  ;;  %2702 = vmatprep.mubr.bf16.mxu1 %v18700_v15 }
 0x157   :  { %2848 = vmatpush1.bf16.msra.mxu0 %v18904_v37  ;;  %2919 = vmatpush1.bf16.msra.mxu1 %v18905_v48  ;;  %v13941_v48 = vld [vmem:[%s18394_s1 + $0xc4] ss:$16 sps:$4 sm:$0xff]  }
 0x158   :  { %2849 = vmatprep.subr.bf16.mxu0 %v18906_v1  ;;  %2920 = vmatprep.subr.bf16.mxu1 %v18907_v50  ;;  %18919 = vst [vmem:[#allocation2_spill] sm:$0xff] %v13941_v48  ;;  %v13947_v1 = vld [vmem:[%s18394_s1 + $0xcc] ss:$16 sps:$4 sm:$0xff]   ;;  %v13955_v50 = vld [vmem:[%s18394_s1 + $0xc0] ss:$16 sps:$4 sm:$0xff]  }
 0x159   :  { %18920 = vst [vmem:[#allocation7_spill] sm:$0xff] %v13947_v1  ;;  %18921 = vst [vmem:[#allocation8_spill] sm:$0xff] %v13955_v50 }
 0x15a   :  { %2632 = vmatmul.mubr.bf16.gmra.mrb[60].mxu0 %v13788_v4  ;;  %2703 = vmatmul.mubr.bf16.gmra.mrb[60].mxu1 %v13788_v4 }
 0x15b   :  { %2850 = vmatpush1.bf16.msra.mxu0 %v18908_v51  ;;  %2921 = vmatpush1.bf16.msra.mxu1 %v18909_v52  ;;  %v13961_v51 = vld [vmem:[%s18394_s1 + $0xc8] ss:$16 sps:$4 sm:$0xff]   ;;  %v13967_v52 = vld [vmem:[%s18394_s1 + $0xe4] ss:$16 sps:$4 sm:$0xff]  }
 0x15c   :  { %2851 = vmatprep.subr.bf16.mxu0 %v18910_v53  ;;  %2922 = vmatprep.subr.bf16.mxu1 %v18911_v54  ;;  %18922 = vst [vmem:[#allocation9_spill] sm:$0xff] %v13961_v51  ;;  %18923 = vst [vmem:[#allocation10_spill] sm:$0xff] %v13967_v52  ;;  %v13973_v53 = vld [vmem:[%s18394_s1 + $0xec] ss:$16 sps:$4 sm:$0xff]  }
 0x15d   :  { %2869 = vmatprep.mubr.bf16.mxu0 %v18700_v15  ;;  %2940 = vmatprep.mubr.bf16.mxu1 %v18700_v15  ;;  %18924 = vst [vmem:[#allocation11_spill] sm:$0xff] %v13973_v53 }
 0x15f   :  { %2852 = vmatpush1.bf16.msra.mxu0 %v13456_v5  ;;  %2923 = vmatpush1.bf16.msra.mxu1 %v18912_v57  ;;  %v13823_v5 = vld [vmem:[%s18394_s1 + $0x40] ss:$16 sps:$4 sm:$0xff]  }
 0x160   :  { %2979 = vmatprep.subr.bf16.mxu0 %v18913_v58  ;;  %3050 = vmatprep.subr.bf16.mxu1 %v18914_v59 }
 0x162   :  { %2870 = vmatmul.mubr.bf16.vlgmr.msra.gmra.mrb[64].mxu0 %v18816_v62  ;;  %2941 = vmatmul.mubr.bf16.vlgmr.msra.gmra.mrb[64].mxu1 %v18816_v62  ;;  %v14067_v62 = vld [vmem:[%s18394_s1 + $0x228] ss:$16 sps:$4 sm:$0xff]  }
 0x163   :  { %2980 = vmatpush1.bf16.msra.mxu0 %v18915_v60  ;;  %3051 = vmatpush1.bf16.msra.mxu1 %v18916_v63  ;;  %18935 = vst [vmem:[#allocation22_spill] sm:$0xff] %v14067_v62 }
 0x164   :  { %2981 = vmatprep.subr.bf16.mxu0 %v18917_v0  ;;  %3052 = vmatprep.subr.bf16.mxu1 %v18918_v2  ;;  %v13993_v0 = vld [vmem:[%s18394_s1 + $0xe0] ss:$16 sps:$4 sm:$0xff]   ;;  %v13999_v2 = vld [vmem:[%s18394_s1 + $0xe8] ss:$16 sps:$4 sm:$0xff]  }
 0x165   :  { %2879 = vmatprep.mubr.bf16.mxu0 %v18700_v15  ;;  %2950 = vmatprep.mubr.bf16.mxu1 %v18700_v15  ;;  %18925 = vst [vmem:[#allocation12_spill] sm:$0xff] %v13993_v0  ;;  %18926 = vst [vmem:[#allocation13_spill] sm:$0xff] %v13999_v2 }
 0x167   :  { %2982 = vmatpush1.bf16.msra.mxu0 %v13508_v25  ;;  %3053 = vmatpush1.bf16.msra.mxu1 %v13514_v19  ;;  %v13829_v25 = vld [vmem:[%s18394_s1 + $0x48] ss:$16 sps:$4 sm:$0xff]   ;;  %v13841_v19 = vld [vmem:[%s18394_s1 + $0x6c] ss:$16 sps:$4 sm:$0xff]  }
 0x168   :  { %2983 = vmatprep.subr.bf16.mxu0 %v13520_v9  ;;  %3054 = vmatprep.subr.bf16.mxu1 %v13526_v3  ;;  %v13835_v9 = vld [vmem:[%s18394_s1 + $0x64] ss:$16 sps:$4 sm:$0xff]  }
 0x16a   :  { %2880 = vmatmul.mubr.bf16.gmra.mrb[68].mxu0 %v18825_v13  ;;  %2951 = vmatmul.mubr.bf16.gmra.mrb[68].mxu1 %v18825_v13 }
 0x16b   :  { %2984 = vmatpush1.bf16.msra.mxu0 %v13823_v5  ;;  %3055 = vmatpush1.bf16.msra.mxu1 %v13829_v25 }
 0x16c   :  { %2985 = vmatprep.subr.bf16.mxu0 %v13835_v9  ;;  %3056 = vmatprep.subr.bf16.mxu1 %v13841_v19 }
 0x16d   :  { %v1377_v3 = vpop.f32.mrb[24].mxu0  ;;  %v1448_v7 = vpop.f32.mrb[24].mxu1  ;;  %2889 = vmatprep.mubr.bf16.mxu0 %v18700_v15  ;;  %2960 = vmatprep.mubr.bf16.mxu1 %v18700_v15 }
 0x16e   :  { %v13847_v8 = vadd.f32 %v1377_v3, %v13760_v35  ;;  %v13850_v10 = vadd.f32 %v1448_v7, %v13763_v36  ;;  %v1379_v11 = vpop.f32.mrb[25].mxu0  ;;  %v1450_v12 = vpop.f32.mrb[25].mxu1  ;;  %v13867_v35 = vld [vmem:[%s18394_s1 + $0x68] ss:$16 sps:$4 sm:$0xff]  }
 0x16f   :  { %v13853_v16 = vadd.f32 %v1379_v11, %v13768_v41  ;;  %v13856_v21 = vadd.f32 %v1450_v12, %v13771_v22  ;;  %v1381_v30 = vpop.f32.mrb[26].mxu0  ;;  %v1452_v33 = vpop.f32.mrb[26].mxu1  ;;  %2986 = vmatpush1.bf16.msra.mxu0 %v13861_v38  ;;  %3057 = vmatpush1.bf16.msra.mxu1 %v13867_v35  ;;  %v13873_v41 = vld [vmem:[%s18394_s1 + $0x84] ss:$16 sps:$4 sm:$0xff]   ;;  %v13879_v22 = vld [vmem:[%s18394_s1 + $0x8c] ss:$16 sps:$4 sm:$0xff]  }
 0x170   :  { %v1382_v36 = vpop.f32.mrb[27].mxu0  ;;  %v1453_v39 = vpop.f32.mrb[27].mxu1  ;;  %2987 = vmatprep.subr.bf16.mxu0 %v13873_v41  ;;  %3058 = vmatprep.subr.bf16.mxu1 %v13879_v22  ;;  %v14009_v11 = vld [vmem:[%s18394_s1 + $0x204] ss:$16 sps:$4 sm:$0xff]   ;;  %v14015_v12 = vld [vmem:[%s18394_s1 + $0x20c] ss:$16 sps:$4 sm:$0xff]  }
 0x171   :  { %18927 = vst [vmem:[#allocation14_spill] sm:$0xff] %v14009_v11  ;;  %18928 = vst [vmem:[#allocation16_spill] sm:$0xff] %v14015_v12  ;;  %v18929_v30 = vld [vmem:[#allocation15_spill] sm:$0xff]  ;;  %v14023_v33 = vld [vmem:[%s18394_s1 + $0x200] ss:$16 sps:$4 sm:$0xff]  }
 0x172   :  { %2890 = vmatmul.mubr.bf16.gmra.mrb[72].mxu0 %v13149_v56  ;;  %2961 = vmatmul.mubr.bf16.gmra.mrb[72].mxu1 %v13149_v56  ;;  %18930 = vst [vmem:[#allocation17_spill] sm:$0xff] %v14023_v33  ;;  %v14029_v36 = vld [vmem:[%s18394_s1 + $0x208] ss:$16 sps:$4 sm:$0xff]   ;;  %v14035_v39 = vld [vmem:[%s18394_s1 + $0x224] ss:$16 sps:$4 sm:$0xff]  }
 0x173   :  { %2988 = vmatpush1.bf16.msra.mxu0 %v13887_v26  ;;  %3059 = vmatpush1.bf16.msra.mxu1 %v13893_v28  ;;  %18931 = vst [vmem:[#allocation18_spill] sm:$0xff] %v14029_v36  ;;  %18932 = vst [vmem:[#allocation19_spill] sm:$0xff] %v14035_v39 }
 0x174   :  { %2989 = vmatprep.subr.bf16.mxu0 %v13899_v29  ;;  %3060 = vmatprep.subr.bf16.mxu1 %v13905_v42 }
 0x175   :  { %v13908_v18 = vpop.f32.mrb[0].mxu0  ;;  %v13910_v43 = vpop.f32.mrb[0].mxu1  ;;  %2899 = vmatprep.mubr.bf16.mxu0 %v18700_v15  ;;  %2970 = vmatprep.mubr.bf16.mxu1 %v18700_v15 }
 0x176   :  { %v13914_v20 = vpop.f32.mrb[1].mxu0  ;;  %v13916_v45 = vpop.f32.mrb[1].mxu1 }
 0x177   :  { %v13918_v31 = vpop.f32.mrb[2].mxu0  ;;  %v13920_v32 = vpop.f32.mrb[2].mxu1  ;;  %2990 = vmatpush1.bf16.msra.mxu0 %v13925_v46  ;;  %3061 = vmatpush1.bf16.msra.mxu1 %v13931_v47 }
 0x178   :  { %v13934_v55 = vpop.f32.mrb[3].mxu0  ;;  %v13936_v37 = vpop.f32.mrb[3].mxu1  ;;  %2991 = vmatprep.subr.bf16.mxu0 %v13941_v48  ;;  %3062 = vmatprep.subr.bf16.mxu1 %v13947_v1  ;;  %v14129_v48 = vld [vmem:[%s18394_s1 + $0x260] ss:$16 sps:$4 sm:$0xff]  }
 0x179   :  { %18942 = vst [vmem:[#allocation29_spill] sm:$0xff] %v14129_v48 }
 0x17a   :  { %2900 = vmatmul.mubr.bf16.gmra.mrb[76].mxu0 %v13206_v34  ;;  %2971 = vmatmul.mubr.bf16.gmra.mrb[76].mxu1 %v13206_v34 }
 0x17b   :  { %2992 = vmatpush1.bf16.msra.mxu0 %v13955_v50  ;;  %3063 = vmatpush1.bf16.msra.mxu1 %v13961_v51 }
 0x17c   :  { %2993 = vmatprep.subr.bf16.mxu0 %v13967_v52  ;;  %3064 = vmatprep.subr.bf16.mxu1 %v13973_v53 }
 0x17d   :  { %v13976_v54 = vpop.f32.mrb[4].mxu0  ;;  %v13978_v57 = vpop.f32.mrb[4].mxu1  ;;  %3011 = vmatprep.mubr.bf16.mxu0 %v18700_v15  ;;  %3082 = vmatprep.mubr.bf16.mxu1 %v18700_v15 }
 0x17e   :  { %v13982_v58 = vpop.f32.mrb[5].mxu0  ;;  %v13984_v59 = vpop.f32.mrb[5].mxu1 }
 0x17f   :  { %v13986_v60 = vpop.f32.mrb[6].mxu0  ;;  %v13988_v63 = vpop.f32.mrb[6].mxu1  ;;  %2994 = vmatpush1.bf16.msra.mxu0 %v13993_v0  ;;  %3065 = vmatpush1.bf16.msra.mxu1 %v13999_v2  ;;  %v14077_v2 = vld [vmem:[%s18394_s1 + $0x244] ss:$16 sps:$4 sm:$0xff]  }
 0x180   :  { %v14002_v3 = vpop.f32.mrb[7].mxu0  ;;  %v14004_v7 = vpop.f32.mrb[7].mxu1  ;;  %3121 = vmatprep.subr.bf16.mxu0 %v14009_v11  ;;  %3192 = vmatprep.subr.bf16.mxu1 %v14015_v12  ;;  %18936 = vst [vmem:[#allocation23_spill] sm:$0xff] %v14077_v2 }
 0x182   :  { %3012 = vmatmul.mubr.bf16.vlgmr.msra.gmra.mrb[64].mxu0 %v18929_v30  ;;  %3083 = vmatmul.mubr.bf16.vlgmr.msra.gmra.mrb[64].mxu1 %v18929_v30  ;;  %v14041_v30 = vld [vmem:[%s18394_s1 + $0x22c] ss:$16 sps:$4 sm:$0xff]  }
 0x183   :  { %3122 = vmatpush1.bf16.msra.mxu0 %v14023_v33  ;;  %3193 = vmatpush1.bf16.msra.mxu1 %v14029_v36  ;;  %18933 = vst [vmem:[#allocation20_spill] sm:$0xff] %v14041_v30 }
 0x184   :  { %3123 = vmatprep.subr.bf16.mxu0 %v14035_v39  ;;  %3194 = vmatprep.subr.bf16.mxu1 %v14041_v30  ;;  %v14061_v30 = vld [vmem:[%s18394_s1 + $0x220] ss:$16 sps:$4 sm:$0xff]  }
 0x185   :  { %v14044_v34 = vpop.f32.mrb[8].mxu0  ;;  %v14046_v56 = vpop.f32.mrb[8].mxu1  ;;  %3021 = vmatprep.mubr.bf16.mxu0 %v18700_v15  ;;  %3092 = vmatprep.mubr.bf16.mxu1 %v18700_v15  ;;  %18934 = vst [vmem:[#allocation21_spill] sm:$0xff] %v14061_v30 }
 0x186   :  { %v14050_v13 = vpop.f32.mrb[9].mxu0  ;;  %v14052_v36 = vpop.f32.mrb[9].mxu1 }
 0x187   :  { %v14054_v39 = vpop.f32.mrb[10].mxu0  ;;  %v14056_v33 = vpop.f32.mrb[10].mxu1  ;;  %3124 = vmatpush1.bf16.msra.mxu0 %v14061_v30  ;;  %3195 = vmatpush1.bf16.msra.mxu1 %v14067_v62  ;;  %v14083_v30 = vld [vmem:[%s18394_s1 + $0x24c] ss:$16 sps:$4 sm:$0xff]   ;;  %v14091_v62 = vld [vmem:[%s18394_s1 + $0x240] ss:$16 sps:$4 sm:$0xff]  }
 0x188   :  { %v14070_v12 = vpop.f32.mrb[11].mxu0  ;;  %v14072_v11 = vpop.f32.mrb[11].mxu1  ;;  %3125 = vmatprep.subr.bf16.mxu0 %v14077_v2  ;;  %18937 = vst [vmem:[#allocation24_spill] sm:$0xff] %v14083_v30  ;;  %3196 = vmatprep.subr.bf16.mxu1 %v14083_v30  ;;  %18938 = vst [vmem:[#allocation25_spill] sm:$0xff] %v14091_v62  ;;  %v14097_v2 = vld [vmem:[%s18394_s1 + $0x248] ss:$16 sps:$4 sm:$0xff]  }
 0x189   :  { %18939 = vst [vmem:[#allocation26_spill] sm:$0xff] %v14097_v2  ;;  %v14103_v30 = vld [vmem:[%s18394_s1 + $0x264] ss:$16 sps:$4 sm:$0xff]  }
 0x18a   :  { %3022 = vmatmul.mubr.bf16.gmra.mrb[68].mxu0 %v12852_v24  ;;  %3093 = vmatmul.mubr.bf16.gmra.mrb[68].mxu1 %v12852_v24  ;;  %18940 = vst [vmem:[#allocation27_spill] sm:$0xff] %v14103_v30  ;;  %v14109_v24 = vld [vmem:[%s18394_s1 + $0x26c] ss:$16 sps:$4 sm:$0xff]  }
 0x18b   :  { %3126 = vmatpush1.bf16.msra.mxu0 %v14091_v62  ;;  %3197 = vmatpush1.bf16.msra.mxu1 %v14097_v2  ;;  %18941 = vst [vmem:[#allocation28_spill] sm:$0xff] %v14109_v24 }
 0x18c   :  { %3127 = vmatprep.subr.bf16.mxu0 %v14103_v30  ;;  %3198 = vmatprep.subr.bf16.mxu1 %v14109_v24 }
 0x18d   :  { %v1751_v62 = vpop.f32.mrb[28].mxu0  ;;  %v1822_v0 = vpop.f32.mrb[28].mxu1  ;;  %3031 = vmatprep.mubr.bf16.mxu0 %v18700_v15  ;;  %3102 = vmatprep.mubr.bf16.mxu1 %v18700_v15 }
 0x18e   :  { %v14115_v2 = vadd.f32 %v1751_v62, %v13847_v8  ;;  %v14118_v53 = vadd.f32 %v1822_v0, %v13850_v10  ;;  %v1753_v30 = vpop.f32.mrb[29].mxu0  ;;  %v1824_v52 = vpop.f32.mrb[29].mxu1  ;;  %v14135_v62 = vld [vmem:[%s18394_s1 + $0x268] ss:$16 sps:$4 sm:$0xff]   ;;  %v14167_v0 = vld [vmem:[%s18394_s1 + $0x2a4] ss:$16 sps:$4 sm:$0xff]  }
 0x18f   :  { %v14121_v51 = vadd.f32 %v1753_v30, %v13853_v16  ;;  %v14124_v50 = vadd.f32 %v1824_v52, %v13856_v21  ;;  %v1755_v24 = vpop.f32.mrb[30].mxu0  ;;  %v1826_v1 = vpop.f32.mrb[30].mxu1  ;;  %3128 = vmatpush1.bf16.msra.mxu0 %v14129_v48  ;;  %18943 = vst [vmem:[#allocation30_spill] sm:$0xff] %v14135_v62  ;;  %3199 = vmatpush1.bf16.msra.mxu1 %v14135_v62  ;;  %v14141_v16 = vld [vmem:[%s18394_s1 + $0x284] ss:$16 sps:$4 sm:$0xff]   ;;  %18948 = vst [vmem:[#allocation35_spill] sm:$0xff] %v14167_v0 }
 0x190   :  { %v1756_v8 = vpop.f32.mrb[31].mxu0  ;;  %v1827_v10 = vpop.f32.mrb[31].mxu1  ;;  %18944 = vst [vmem:[#allocation31_spill] sm:$0xff] %v14141_v16  ;;  %3129 = vmatprep.subr.bf16.mxu0 %v14141_v16  ;;  %v14147_v21 = vld [vmem:[%s18394_s1 + $0x28c] ss:$16 sps:$4 sm:$0xff]  }
 0x191   :  { %18945 = vst [vmem:[#allocation32_spill] sm:$0xff] %v14147_v21  ;;  %3200 = vmatprep.subr.bf16.mxu1 %v14147_v21  ;;  %v14155_v1 = vld [vmem:[%s18394_s1 + $0x280] ss:$16 sps:$4 sm:$0xff]   ;;  %v14161_v52 = vld [vmem:[%s18394_s1 + $0x288] ss:$16 sps:$4 sm:$0xff]  }
 0x192   :  { %3032 = vmatmul.mubr.bf16.gmra.mrb[72].mxu0 %v12912_v44  ;;  %3103 = vmatmul.mubr.bf16.gmra.mrb[72].mxu1 %v12912_v44  ;;  %18946 = vst [vmem:[#allocation33_spill] sm:$0xff] %v14155_v1  ;;  %18947 = vst [vmem:[#allocation34_spill] sm:$0xff] %v14161_v52  ;;  %v14173_v44 = vld [vmem:[%s18394_s1 + $0x2ac] ss:$16 sps:$4 sm:$0xff]   ;;  %v14181_v30 = vld [vmem:[%s18394_s1 + $0x2a0] ss:$16 sps:$4 sm:$0xff]  }
 0x193   :  { %3130 = vmatpush1.bf16.msra.mxu0 %v14155_v1  ;;  %3201 = vmatpush1.bf16.msra.mxu1 %v14161_v52  ;;  %18949 = vst [vmem:[#allocation36_spill] sm:$0xff] %v14173_v44  ;;  %18950 = vst [vmem:[#allocation37_spill] sm:$0xff] %v14181_v30  ;;  %v14187_v24 = vld [vmem:[%s18394_s1 + $0x2a8] ss:$16 sps:$4 sm:$0xff]   ;;  %v14193_v8 = vld [vmem:[%s18394_s1 + $0x2c4] ss:$16 sps:$4 sm:$0xff]  }
 0x194   :  { %3131 = vmatprep.subr.bf16.mxu0 %v14167_v0  ;;  %3202 = vmatprep.subr.bf16.mxu1 %v14173_v44  ;;  %18951 = vst [vmem:[#allocation38_spill] sm:$0xff] %v14187_v24  ;;  %18952 = vst [vmem:[#allocation39_spill] sm:$0xff] %v14193_v8  ;;  %v14199_v10 = vld [vmem:[%s18394_s1 + $0x2cc] ss:$16 sps:$4 sm:$0xff]   ;;  %v14345_v52 = vld [vmem:[%s18394_s1 + $0x360] ss:$16 sps:$4 sm:$0xff]  }
 0x195   :  { %3041 = vmatprep.mubr.bf16.mxu0 %v18700_v15  ;;  %3112 = vmatprep.mubr.bf16.mxu1 %v18700_v15  ;;  %18953 = vst [vmem:[#allocation40_spill] sm:$0xff] %v14199_v10  ;;  %18974 = vst [vmem:[#allocation63_spill] sm:$0xff] %v14345_v52  ;;  %v14565_v48 = vld [vmem:[%s18394_s1 + $0x460] ss:$16 sps:$4 sm:$0xff]  }
 0x196   :  { %19006 = vst [vmem:[#allocation97_spill] sm:$0xff] %v14565_v48 }
 0x197   :  { %3132 = vmatpush1.bf16.msra.mxu0 %v14181_v30  ;;  %3203 = vmatpush1.bf16.msra.mxu1 %v14187_v24  ;;  %v14207_v24 = vld [vmem:[%s18394_s1 + $0x2c0] ss:$16 sps:$4 sm:$0xff]  }
 0x198   :  { %3133 = vmatprep.subr.bf16.mxu0 %v14193_v8  ;;  %3204 = vmatprep.subr.bf16.mxu1 %v14199_v10  ;;  %18954 = vst [vmem:[#allocation41_spill] sm:$0xff] %v14207_v24  ;;  %v14213_v8 = vld [vmem:[%s18394_s1 + $0x2c8] ss:$16 sps:$4 sm:$0xff]   ;;  %v14219_v10 = vld [vmem:[%s18394_s1 + $0x2e4] ss:$16 sps:$4 sm:$0xff]  }
 0x199   :  { %18955 = vst [vmem:[#allocation42_spill] sm:$0xff] %v14213_v8  ;;  %18956 = vst [vmem:[#allocation43_spill] sm:$0xff] %v14219_v10 }
 0x19a   :  { %3042 = vmatmul.mubr.bf16.gmra.mrb[80].mxu0 %v12969_v23  ;;  %3113 = vmatmul.mubr.bf16.gmra.mrb[80].mxu1 %v12969_v23  ;;  %v14225_v23 = vld [vmem:[%s18394_s1 + $0x2ec] ss:$16 sps:$4 sm:$0xff]  }
 0x19b   :  { %3134 = vmatpush1.bf16.msra.mxu0 %v14207_v24  ;;  %3205 = vmatpush1.bf16.msra.mxu1 %v14213_v8  ;;  %18957 = vst [vmem:[#allocation44_spill] sm:$0xff] %v14225_v23  ;;  %v14233_v8 = vld [vmem:[%s18394_s1 + $0x2e0] ss:$16 sps:$4 sm:$0xff]   ;;  %v14251_v24 = vld [vmem:[%s18394_s1 + $0x30c] ss:$16 sps:$4 sm:$0xff]  }
 0x19c   :  { %3135 = vmatprep.subr.bf16.mxu0 %v14219_v10  ;;  %3206 = vmatprep.subr.bf16.mxu1 %v14225_v23  ;;  %18958 = vst [vmem:[#allocation45_spill] sm:$0xff] %v14233_v8  ;;  %v14239_v10 = vld [vmem:[%s18394_s1 + $0x2e8] ss:$16 sps:$4 sm:$0xff]   ;;  %v14245_v23 = vld [vmem:[%s18394_s1 + $0x304] ss:$16 sps:$4 sm:$0xff]   ;;  %18961 = vst [vmem:[#allocation49_spill] sm:$0xff] %v14251_v24 }
 0x19d   :  { %3153 = vmatprep.mubr.bf16.mxu0 %v18700_v15  ;;  %3224 = vmatprep.mubr.bf16.mxu1 %v18700_v15  ;;  %18959 = vst [vmem:[#allocation46_spill] sm:$0xff] %v14239_v10  ;;  %18960 = vst [vmem:[#allocation47_spill] sm:$0xff] %v14245_v23 }
 0x19f   :  { %3136 = vmatpush1.bf16.msra.mxu0 %v14233_v8  ;;  %3207 = vmatpush1.bf16.msra.mxu1 %v14239_v10  ;;  %v14259_v10 = vld [vmem:[%s18394_s1 + $0x300] ss:$16 sps:$4 sm:$0xff]   ;;  %v14277_v8 = vld [vmem:[%s18394_s1 + $0x32c] ss:$16 sps:$4 sm:$0xff]  }
 0x1a0   :  { %3291 = vmatprep.subr.bf16.mxu0 %v14245_v23  ;;  %3362 = vmatprep.subr.bf16.mxu1 %v14251_v24  ;;  %18962 = vst [vmem:[#allocation50_spill] sm:$0xff] %v14259_v10  ;;  %v14265_v23 = vld [vmem:[%s18394_s1 + $0x308] ss:$16 sps:$4 sm:$0xff]   ;;  %v14271_v24 = vld [vmem:[%s18394_s1 + $0x324] ss:$16 sps:$4 sm:$0xff]   ;;  %18965 = vst [vmem:[#allocation53_spill] sm:$0xff] %v14277_v8 }
 0x1a1   :  { %18963 = vst [vmem:[#allocation51_spill] sm:$0xff] %v14265_v23  ;;  %18964 = vst [vmem:[#allocation52_spill] sm:$0xff] %v14271_v24 }
 0x1a2   :  { %3154 = vmatmul.mubr.bf16.vlgmr.msra.gmra.mrb[64].mxu0 %v12497_v6  ;;  %3225 = vmatmul.mubr.bf16.vlgmr.msra.gmra.mrb[64].mxu1 %v12497_v6 }
 0x1a3   :  { %3292 = vmatpush1.bf16.msra.mxu0 %v14259_v10  ;;  %3363 = vmatpush1.bf16.msra.mxu1 %v14265_v23  ;;  %v14285_v23 = vld [vmem:[%s18394_s1 + $0x320] ss:$16 sps:$4 sm:$0xff]   ;;  %v14303_v10 = vld [vmem:[%s18394_s1 + $0x34c] ss:$16 sps:$4 sm:$0xff]  }
 0x1a4   :  { %3293 = vmatprep.subr.bf16.mxu0 %v14271_v24  ;;  %3364 = vmatprep.subr.bf16.mxu1 %v14277_v8  ;;  %18966 = vst [vmem:[#allocation54_spill] sm:$0xff] %v14285_v23  ;;  %v14291_v24 = vld [vmem:[%s18394_s1 + $0x328] ss:$16 sps:$4 sm:$0xff]   ;;  %v14297_v8 = vld [vmem:[%s18394_s1 + $0x344] ss:$16 sps:$4 sm:$0xff]   ;;  %18969 = vst [vmem:[#allocation58_spill] sm:$0xff] %v14303_v10 }
 0x1a5   :  { %3163 = vmatprep.mubr.bf16.mxu0 %v18700_v15  ;;  %3234 = vmatprep.mubr.bf16.mxu1 %v18700_v15  ;;  %18967 = vst [vmem:[#allocation55_spill] sm:$0xff] %v14291_v24  ;;  %18968 = vst [vmem:[#allocation56_spill] sm:$0xff] %v14297_v8 }
 0x1a7   :  { %3294 = vmatpush1.bf16.msra.mxu0 %v14285_v23  ;;  %3365 = vmatpush1.bf16.msra.mxu1 %v14291_v24  ;;  %v14311_v24 = vld [vmem:[%s18394_s1 + $0x340] ss:$16 sps:$4 sm:$0xff]   ;;  %v14329_v23 = vld [vmem:[%s18394_s1 + $0x36c] ss:$16 sps:$4 sm:$0xff]  }
 0x1a8   :  { %3295 = vmatprep.subr.bf16.mxu0 %v14297_v8  ;;  %3366 = vmatprep.subr.bf16.mxu1 %v14303_v10  ;;  %18970 = vst [vmem:[#allocation59_spill] sm:$0xff] %v14311_v24  ;;  %v14317_v8 = vld [vmem:[%s18394_s1 + $0x348] ss:$16 sps:$4 sm:$0xff]   ;;  %v14323_v10 = vld [vmem:[%s18394_s1 + $0x364] ss:$16 sps:$4 sm:$0xff]   ;;  %18973 = vst [vmem:[#allocation62_spill] sm:$0xff] %v14329_v23 }
 0x1a9   :  { %18971 = vst [vmem:[#allocation60_spill] sm:$0xff] %v14317_v8  ;;  %18972 = vst [vmem:[#allocation61_spill] sm:$0xff] %v14323_v10 }
 0x1aa   :  { %3164 = vmatmul.mubr.bf16.gmra.mrb[68].mxu0 %v12550_v17  ;;  %3235 = vmatmul.mubr.bf16.gmra.mrb[68].mxu1 %v12550_v17 }
 0x1ab   :  { %3296 = vmatpush1.bf16.msra.mxu0 %v14311_v24  ;;  %3367 = vmatpush1.bf16.msra.mxu1 %v14317_v8 }
 0x1ac   :  { %3297 = vmatprep.subr.bf16.mxu0 %v14323_v10  ;;  %3368 = vmatprep.subr.bf16.mxu1 %v14329_v23  ;;  %v14351_v23 = vld [vmem:[%s18394_s1 + $0x368] ss:$16 sps:$4 sm:$0xff]  }
 0x1ad   :  { %v14332_v24 = vpop.f32.mrb[44].mxu0  ;;  %v14334_v30 = vpop.f32.mrb[44].mxu1  ;;  %3173 = vmatprep.mubr.bf16.mxu0 %v18700_v15  ;;  %3244 = vmatprep.mubr.bf16.mxu1 %v18700_v15  ;;  %18975 = vst [vmem:[#allocation64_spill] sm:$0xff] %v14351_v23 }
 0x1ae   :  { %v14338_v8 = vpop.f32.mrb[45].mxu0  ;;  %v14340_v44 = vpop.f32.mrb[45].mxu1 }
 0x1af   :  { %v2002_v10 = vpop.f32.mrb[46].mxu0  ;;  %v2073_v0 = vpop.f32.mrb[46].mxu1  ;;  %3298 = vmatpush1.bf16.msra.mxu0 %v14345_v52  ;;  %3369 = vmatpush1.bf16.msra.mxu1 %v14351_v23 }
 0x1b0   :  { %v2003_v1 = vpop.f32.mrb[47].mxu0  ;;  %v2074_v21 = vpop.f32.mrb[47].mxu1  ;;  %v14357_v0 = vld [vmem:[%s18394_s1 + $0x384] ss:$16 sps:$4 sm:$0xff]   ;;  %v14363_v10 = vld [vmem:[%s18394_s1 + $0x38c] ss:$16 sps:$4 sm:$0xff]  }
 0x1b1   :  { %18976 = vst [vmem:[#allocation65_spill] sm:$0xff] %v14357_v0  ;;  %3299 = vmatprep.subr.bf16.mxu0 %v14357_v0  ;;  %18977 = vst [vmem:[#allocation67_spill] sm:$0xff] %v14363_v10  ;;  %3370 = vmatprep.subr.bf16.mxu1 %v14363_v10  ;;  %v14371_v21 = vld [vmem:[%s18394_s1 + $0x380] ss:$16 sps:$4 sm:$0xff]   ;;  %v14377_v1 = vld [vmem:[%s18394_s1 + $0x388] ss:$16 sps:$4 sm:$0xff]  }
 0x1b2   :  { %3174 = vmatmul.mubr.bf16.gmra.mrb[72].mxu0 %v12596_v27  ;;  %3245 = vmatmul.mubr.bf16.gmra.mrb[72].mxu1 %v12596_v27  ;;  %18978 = vst [vmem:[#allocation68_spill] sm:$0xff] %v14371_v21  ;;  %18979 = vst [vmem:[#allocation69_spill] sm:$0xff] %v14377_v1  ;;  %v14383_v10 = vld [vmem:[%s18394_s1 + $0x3a4] ss:$16 sps:$4 sm:$0xff]   ;;  %v14389_v0 = vld [vmem:[%s18394_s1 + $0x3ac] ss:$16 sps:$4 sm:$0xff]  }
 0x1b3   :  { %3300 = vmatpush1.bf16.msra.mxu0 %v14371_v21  ;;  %3371 = vmatpush1.bf16.msra.mxu1 %v14377_v1  ;;  %18980 = vst [vmem:[#allocation70_spill] sm:$0xff] %v14383_v10  ;;  %18981 = vst [vmem:[#allocation71_spill] sm:$0xff] %v14389_v0  ;;  %v14397_v1 = vld [vmem:[%s18394_s1 + $0x3a0] ss:$16 sps:$4 sm:$0xff]   ;;  %v14415_v21 = vld [vmem:[%s18394_s1 + $0x3cc] ss:$16 sps:$4 sm:$0xff]  }
 0x1b4   :  { %3301 = vmatprep.subr.bf16.mxu0 %v14383_v10  ;;  %3372 = vmatprep.subr.bf16.mxu1 %v14389_v0  ;;  %18982 = vst [vmem:[#allocation72_spill] sm:$0xff] %v14397_v1  ;;  %v14403_v10 = vld [vmem:[%s18394_s1 + $0x3a8] ss:$16 sps:$4 sm:$0xff]   ;;  %v14409_v0 = vld [vmem:[%s18394_s1 + $0x3c4] ss:$16 sps:$4 sm:$0xff]   ;;  %18985 = vst [vmem:[#allocation76_spill] sm:$0xff] %v14415_v21 }
 0x1b5   :  { %3183 = vmatprep.mubr.bf16.mxu0 %v18700_v15  ;;  %3254 = vmatprep.mubr.bf16.mxu1 %v18700_v15  ;;  %18983 = vst [vmem:[#allocation73_spill] sm:$0xff] %v14403_v10  ;;  %18984 = vst [vmem:[#allocation75_spill] sm:$0xff] %v14409_v0 }
 0x1b7   :  { %3302 = vmatpush1.bf16.msra.mxu0 %v14397_v1  ;;  %3373 = vmatpush1.bf16.msra.mxu1 %v14403_v10  ;;  %v14423_v10 = vld [vmem:[%s18394_s1 + $0x3c0] ss:$16 sps:$4 sm:$0xff]   ;;  %v14441_v1 = vld [vmem:[%s18394_s1 + $0x3ec] ss:$16 sps:$4 sm:$0xff]  }
 0x1b8   :  { %3303 = vmatprep.subr.bf16.mxu0 %v14409_v0  ;;  %3374 = vmatprep.subr.bf16.mxu1 %v14415_v21  ;;  %18986 = vst [vmem:[#allocation77_spill] sm:$0xff] %v14423_v10  ;;  %v14429_v0 = vld [vmem:[%s18394_s1 + $0x3c8] ss:$16 sps:$4 sm:$0xff]   ;;  %v14435_v21 = vld [vmem:[%s18394_s1 + $0x3e4] ss:$16 sps:$4 sm:$0xff]   ;;  %18989 = vst [vmem:[#allocation80_spill] sm:$0xff] %v14441_v1 }
 0x1b9   :  { %18987 = vst [vmem:[#allocation78_spill] sm:$0xff] %v14429_v0  ;;  %18988 = vst [vmem:[#allocation79_spill] sm:$0xff] %v14435_v21 }
 0x1ba   :  { %3184 = vmatmul.mubr.bf16.gmra.mrb[84].mxu0 %v13399_v14  ;;  %3255 = vmatmul.mubr.bf16.gmra.mrb[84].mxu1 %v13399_v14 }
 0x1bb   :  { %3304 = vmatpush1.bf16.msra.mxu0 %v14423_v10  ;;  %3375 = vmatpush1.bf16.msra.mxu1 %v14429_v0  ;;  %v14449_v0 = vld [vmem:[%s18394_s1 + $0x3e0] ss:$16 sps:$4 sm:$0xff]   ;;  %v14467_v10 = vld [vmem:[%s18394_s1 + $0x40c] ss:$16 sps:$4 sm:$0xff]  }
 0x1bc   :  { %3305 = vmatprep.subr.bf16.mxu0 %v14435_v21  ;;  %3376 = vmatprep.subr.bf16.mxu1 %v14441_v1  ;;  %18990 = vst [vmem:[#allocation81_spill] sm:$0xff] %v14449_v0  ;;  %v14455_v21 = vld [vmem:[%s18394_s1 + $0x3e8] ss:$16 sps:$4 sm:$0xff]   ;;  %v14461_v1 = vld [vmem:[%s18394_s1 + $0x404] ss:$16 sps:$4 sm:$0xff]   ;;  %18993 = vst [vmem:[#allocation84_spill] sm:$0xff] %v14467_v10 }
 0x1bd   :  { %3323 = vmatprep.mubr.bf16.mxu0 %v18700_v15  ;;  %3394 = vmatprep.mubr.bf16.mxu1 %v18700_v15  ;;  %18991 = vst [vmem:[#allocation82_spill] sm:$0xff] %v14455_v21  ;;  %18992 = vst [vmem:[#allocation83_spill] sm:$0xff] %v14461_v1 }
 0x1bf   :  { %3306 = vmatpush1.bf16.msra.mxu0 %v14449_v0  ;;  %3377 = vmatpush1.bf16.msra.mxu1 %v14455_v21  ;;  %v14475_v21 = vld [vmem:[%s18394_s1 + $0x400] ss:$16 sps:$4 sm:$0xff]   ;;  %v14493_v0 = vld [vmem:[%s18394_s1 + $0x42c] ss:$16 sps:$4 sm:$0xff]  }
 0x1c0   :  { %3472 = vmatprep.subr.bf16.mxu0 %v14461_v1  ;;  %3543 = vmatprep.subr.bf16.mxu1 %v14467_v10  ;;  %18994 = vst [vmem:[#allocation85_spill] sm:$0xff] %v14475_v21  ;;  %v14481_v1 = vld [vmem:[%s18394_s1 + $0x408] ss:$16 sps:$4 sm:$0xff]   ;;  %v14487_v10 = vld [vmem:[%s18394_s1 + $0x424] ss:$16 sps:$4 sm:$0xff]   ;;  %18997 = vst [vmem:[#allocation88_spill] sm:$0xff] %v14493_v0 }
 0x1c1   :  { %18995 = vst [vmem:[#allocation86_spill] sm:$0xff] %v14481_v1  ;;  %18996 = vst [vmem:[#allocation87_spill] sm:$0xff] %v14487_v10 }
 0x1c2   :  { %3324 = vmatmul.mubr.bf16.vlgmr.msra.gmra.mrb[64].mxu0 %v13719_v49  ;;  %3395 = vmatmul.mubr.bf16.vlgmr.msra.gmra.mrb[64].mxu1 %v13719_v49 }
 0x1c3   :  { %3473 = vmatpush1.bf16.msra.mxu0 %v14475_v21  ;;  %3544 = vmatpush1.bf16.msra.mxu1 %v14481_v1  ;;  %v14501_v1 = vld [vmem:[%s18394_s1 + $0x420] ss:$16 sps:$4 sm:$0xff]   ;;  %v14519_v21 = vld [vmem:[%s18394_s1 + $0x44c] ss:$16 sps:$4 sm:$0xff]  }
 0x1c4   :  { %3474 = vmatprep.subr.bf16.mxu0 %v14487_v10  ;;  %3545 = vmatprep.subr.bf16.mxu1 %v14493_v0  ;;  %18998 = vst [vmem:[#allocation89_spill] sm:$0xff] %v14501_v1  ;;  %v14507_v10 = vld [vmem:[%s18394_s1 + $0x428] ss:$16 sps:$4 sm:$0xff]   ;;  %v14513_v0 = vld [vmem:[%s18394_s1 + $0x444] ss:$16 sps:$4 sm:$0xff]   ;;  %19001 = vst [vmem:[#allocation92_spill] sm:$0xff] %v14519_v21 }
 0x1c5   :  { %3333 = vmatprep.mubr.bf16.mxu0 %v18700_v15  ;;  %3404 = vmatprep.mubr.bf16.mxu1 %v18700_v15  ;;  %18999 = vst [vmem:[#allocation90_spill] sm:$0xff] %v14507_v10  ;;  %19000 = vst [vmem:[#allocation91_spill] sm:$0xff] %v14513_v0 }
 0x1c7   :  { %3475 = vmatpush1.bf16.msra.mxu0 %v14501_v1  ;;  %3546 = vmatpush1.bf16.msra.mxu1 %v14507_v10  ;;  %v14527_v10 = vld [vmem:[%s18394_s1 + $0x440] ss:$16 sps:$4 sm:$0xff]   ;;  %v14545_v1 = vld [vmem:[%s18394_s1 + $0x46c] ss:$16 sps:$4 sm:$0xff]  }
 0x1c8   :  { %3476 = vmatprep.subr.bf16.mxu0 %v14513_v0  ;;  %3547 = vmatprep.subr.bf16.mxu1 %v14519_v21  ;;  %19002 = vst [vmem:[#allocation93_spill] sm:$0xff] %v14527_v10  ;;  %v14533_v0 = vld [vmem:[%s18394_s1 + $0x448] ss:$16 sps:$4 sm:$0xff]   ;;  %v14539_v21 = vld [vmem:[%s18394_s1 + $0x464] ss:$16 sps:$4 sm:$0xff]   ;;  %19005 = vst [vmem:[#allocation96_spill] sm:$0xff] %v14545_v1 }
 0x1c9   :  { %19003 = vst [vmem:[#allocation94_spill] sm:$0xff] %v14533_v0  ;;  %19004 = vst [vmem:[#allocation95_spill] sm:$0xff] %v14539_v21 }
 0x1ca   :  { %3334 = vmatmul.mubr.bf16.gmra.mrb[68].mxu0 %v13739_v61  ;;  %3405 = vmatmul.mubr.bf16.gmra.mrb[68].mxu1 %v13739_v61 }
 0x1cb   :  { %3477 = vmatpush1.bf16.msra.mxu0 %v14527_v10  ;;  %3548 = vmatpush1.bf16.msra.mxu1 %v14533_v0 }
 0x1cc   :  { %3478 = vmatprep.subr.bf16.mxu0 %v14539_v21  ;;  %3549 = vmatprep.subr.bf16.mxu1 %v14545_v1 }
 0x1cd   :  { %v2140_v10 = vpop.f32.mrb[48].mxu0  ;;  %v2211_v23 = vpop.f32.mrb[48].mxu1  ;;  %3343 = vmatprep.mubr.bf16.mxu0 %v18700_v15  ;;  %3414 = vmatprep.mubr.bf16.mxu1 %v18700_v15 }
 0x1ce   :  { %v14551_v0 = vadd.f32 %v2140_v10, %v14332_v24  ;;  %v14554_v52 = vadd.f32 %v2211_v23, %v14334_v30  ;;  %v2142_v21 = vpop.f32.mrb[49].mxu0  ;;  %v2213_v61 = vpop.f32.mrb[49].mxu1  ;;  %v14571_v30 = vld [vmem:[%s18394_s1 + $0x468] ss:$16 sps:$4 sm:$0xff]   ;;  %v14603_v10 = vld [vmem:[%s18394_s1 + $0x4a4] ss:$16 sps:$4 sm:$0xff]  }
 0x1cf   :  { %v14557_v49 = vadd.f32 %v2142_v21, %v14338_v8  ;;  %v14560_v16 = vadd.f32 %v2213_v61, %v14340_v44  ;;  %v2144_v1 = vpop.f32.mrb[50].mxu0  ;;  %v2215_v62 = vpop.f32.mrb[50].mxu1  ;;  %3479 = vmatpush1.bf16.msra.mxu0 %v14565_v48  ;;  %19007 = vst [vmem:[#allocation98_spill] sm:$0xff] %v14571_v30  ;;  %3550 = vmatpush1.bf16.msra.mxu1 %v14571_v30  ;;  %v14577_v61 = vld [vmem:[%s18394_s1 + $0x484] ss:$16 sps:$4 sm:$0xff]   ;;  %19012 = vst [vmem:[#allocation103_spill] sm:$0xff] %v14603_v10 }
 0x1d0   :  { %v2145_v24 = vpop.f32.mrb[51].mxu0  ;;  %v2216_v8 = vpop.f32.mrb[51].mxu1  ;;  %19008 = vst [vmem:[#allocation99_spill] sm:$0xff] %v14577_v61  ;;  %3480 = vmatprep.subr.bf16.mxu0 %v14577_v61  ;;  %v14583_v62 = vld [vmem:[%s18394_s1 + $0x48c] ss:$16 sps:$4 sm:$0xff]  }
 0x1d1   :  { %19009 = vst [vmem:[#allocation100_spill] sm:$0xff] %v14583_v62  ;;  %3551 = vmatprep.subr.bf16.mxu1 %v14583_v62  ;;  %v14591_v44 = vld [vmem:[%s18394_s1 + $0x480] ss:$16 sps:$4 sm:$0xff]   ;;  %v14597_v23 = vld [vmem:[%s18394_s1 + $0x488] ss:$16 sps:$4 sm:$0xff]  }
 0x1d2   :  { %3344 = vmatmul.mubr.bf16.gmra.mrb[72].mxu0 %v13765_v40  ;;  %3415 = vmatmul.mubr.bf16.gmra.mrb[72].mxu1 %v13765_v40  ;;  %19010 = vst [vmem:[#allocation101_spill] sm:$0xff] %v14591_v44  ;;  %19011 = vst [vmem:[#allocation102_spill] sm:$0xff] %v14597_v23  ;;  %v14609_v21 = vld [vmem:[%s18394_s1 + $0x4ac] ss:$16 sps:$4 sm:$0xff]   ;;  %v14617_v1 = vld [vmem:[%s18394_s1 + $0x4a0] ss:$16 sps:$4 sm:$0xff]  }
 0x1d3   :  { %3481 = vmatpush1.bf16.msra.mxu0 %v14591_v44  ;;  %3552 = vmatpush1.bf16.msra.mxu1 %v14597_v23  ;;  %19013 = vst [vmem:[#allocation104_spill] sm:$0xff] %v14609_v21  ;;  %19014 = vst [vmem:[#allocation105_spill] sm:$0xff] %v14617_v1  ;;  %v14623_v24 = vld [vmem:[%s18394_s1 + $0x4a8] ss:$16 sps:$4 sm:$0xff]   ;;  %v14629_v8 = vld [vmem:[%s18394_s1 + $0x4c4] ss:$16 sps:$4 sm:$0xff]  }
 0x1d4   :  { %3482 = vmatprep.subr.bf16.mxu0 %v14603_v10  ;;  %3553 = vmatprep.subr.bf16.mxu1 %v14609_v21  ;;  %19015 = vst [vmem:[#allocation106_spill] sm:$0xff] %v14623_v24  ;;  %19016 = vst [vmem:[#allocation107_spill] sm:$0xff] %v14629_v8  ;;  %v14635_v21 = vld [vmem:[%s18394_s1 + $0x4cc] ss:$16 sps:$4 sm:$0xff]   ;;  %v14661_v10 = vld [vmem:[%s18394_s1 + $0x4e4] ss:$16 sps:$4 sm:$0xff]  }
 0x1d5   :  { %3353 = vmatprep.mubr.bf16.mxu0 %v18700_v15  ;;  %3424 = vmatprep.mubr.bf16.mxu1 %v18700_v15  ;;  %19017 = vst [vmem:[#allocation108_spill] sm:$0xff] %v14635_v21  ;;  %19020 = vst [vmem:[#allocation111_spill] sm:$0xff] %v14661_v10  ;;  %v14677_v23 = vld [vmem:[%s18394_s1 + $0x4e0] ss:$16 sps:$4 sm:$0xff]  }
 0x1d6   :  { %19023 = vst [vmem:[#allocation114_spill] sm:$0xff] %v14677_v23  ;;  %v11877_v44 = vld [vmem:[%s18394_s1 + $0x120] ss:$16 sps:$4 sm:$0xff]  }
 0x1d7   :  { %3483 = vmatpush1.bf16.msra.mxu0 %v14617_v1  ;;  %3554 = vmatpush1.bf16.msra.mxu1 %v14623_v24  ;;  %v14643_v24 = vld [vmem:[%s18394_s1 + $0x4c0] ss:$16 sps:$4 sm:$0xff]  }
 0x1d8   :  { %3484 = vmatprep.subr.bf16.mxu0 %v14629_v8  ;;  %3555 = vmatprep.subr.bf16.mxu1 %v14635_v21  ;;  %19018 = vst [vmem:[#allocation109_spill] sm:$0xff] %v14643_v24  ;;  %v14649_v8 = vld [vmem:[%s18394_s1 + $0x4c8] ss:$16 sps:$4 sm:$0xff]   ;;  %v3462_v1 = vld [vmem:[%s18395_s0 + $0x90] sm:$0xff] }
 0x1d9   :  { %19019 = vst [vmem:[#allocation110_spill] sm:$0xff] %v14649_v8  ;;  %v3461_v21 = vld [vmem:[%s18395_s0 + $0x88] sm:$0xff] }
 0x1da   :  { %3354 = vmatmul.mubr.bf16.gmra.mrb[88].mxu0 %v13788_v4  ;;  %3425 = vmatmul.mubr.bf16.gmra.mrb[88].mxu1 %v13788_v4 }
 0x1db   :  { %3485 = vmatpush1.bf16.msra.mxu0 %v14643_v24  ;;  %3556 = vmatpush1.bf16.msra.mxu1 %v14649_v8  ;;  %v14667_v24 = vld [vmem:[%s18394_s1 + $0x4ec] ss:$16 sps:$4 sm:$0xff]   ;;  %v14672_v8 = vpack.c.bf16 %v3462_v1, %v3461_v21  ;;  %v11873_v1 = vld [vmem:[%s18394_s1 + $0x100] ss:$16 sps:$4 sm:$0xff]  }
 0x1dc   :  { %3486 = vmatprep.subr.bf16.mxu0 %v14661_v10  ;;  %19021 = vst [vmem:[#allocation112_spill] sm:$0xff] %v14667_v24  ;;  %3557 = vmatprep.subr.bf16.mxu1 %v14667_v24  ;;  %v14683_v10 = vld [vmem:[%s18394_s1 + $0x4e8] ss:$16 sps:$4 sm:$0xff]   ;;  %v11871_v24 = vld [vmem:[%s18394_s1 + $0x104] ss:$16 sps:$4 sm:$0xff]  }
 0x1dd   :  { %3504 = vmatprep.mubr.bf16.mxu0 %v18700_v15  ;;  %3575 = vmatprep.mubr.bf16.mxu1 %v18700_v15  ;;  %19022 = vst [vmem:[#allocation113_spill] sm:$0xff] %v14672_v8  ;;  %19024 = vst [vmem:[#allocation115_spill] sm:$0xff] %v14683_v10  ;;  %v11872_v21 = vld [vmem:[%s18394_s1 + $0x10c] ss:$16 sps:$4 sm:$0xff]  }
 0x1df   :  { %3487 = vmatpush1.bf16.msra.mxu0 %v14677_v23  ;;  %3558 = vmatpush1.bf16.msra.mxu1 %v14683_v10  ;;  %v11874_v10 = vld [vmem:[%s18394_s1 + $0x108] ss:$16 sps:$4 sm:$0xff]   ;;  %v11875_v23 = vld [vmem:[%s18394_s1 + $0x124] ss:$16 sps:$4 sm:$0xff]  }
 0x1e0   :  { %3698 = vmatprep.subr.bf16.mxu0 %v11871_v24  ;;  %3769 = vmatprep.subr.bf16.mxu1 %v11872_v21  ;;  %v3463_v24 = vld [vmem:[%s18395_s0 + $0x98] sm:$0xff]  ;;  %v3464_v21 = vld [vmem:[%s18395_s0 + $0xa0] sm:$0xff] }
 0x1e2   :  { %3505 = vmatmul.mubr.bf16.vlgmr.msra.gmra.mrb[64].mxu0 %v14672_v8  ;;  %3576 = vmatmul.mubr.bf16.vlgmr.msra.gmra.mrb[64].mxu1 %v14672_v8 }
 0x1e3   :  { %3699 = vmatpush1.bf16.msra.mxu0 %v11873_v1  ;;  %3770 = vmatpush1.bf16.msra.mxu1 %v11874_v10  ;;  %v11876_v1 = vld [vmem:[%s18394_s1 + $0x12c] ss:$16 sps:$4 sm:$0xff]   ;;  %v14714_v10 = vpack.c.bf16 %v3464_v21, %v3463_v24  ;;  %v11882_v21 = vld [vmem:[%s18394_s1 + $0x148] ss:$16 sps:$4 sm:$0xff]  }
 0x1e4   :  { %3700 = vmatprep.subr.bf16.mxu0 %v11875_v23  ;;  %3771 = vmatprep.subr.bf16.mxu1 %v11876_v1  ;;  %v11878_v23 = vld [vmem:[%s18394_s1 + $0x128] ss:$16 sps:$4 sm:$0xff]   ;;  %v11879_v1 = vld [vmem:[%s18394_s1 + $0x144] ss:$16 sps:$4 sm:$0xff]   ;;  %v11880_v24 = vld [vmem:[%s18394_s1 + $0x14c] ss:$16 sps:$4 sm:$0xff]  }
 0x1e5   :  { %3514 = vmatprep.mubr.bf16.mxu0 %v18700_v15  ;;  %3585 = vmatprep.mubr.bf16.mxu1 %v18700_v15  ;;  %19025 = vst [vmem:[#allocation116_spill] sm:$0xff] %v14714_v10 }
 0x1e7   :  { %3701 = vmatpush1.bf16.msra.mxu0 %v11877_v44  ;;  %3772 = vmatpush1.bf16.msra.mxu1 %v11878_v23  ;;  %v11881_v44 = vld [vmem:[%s18394_s1 + $0x140] ss:$16 sps:$4 sm:$0xff]   ;;  %v3465_v23 = vld [vmem:[%s18395_s0 + $0xa8] sm:$0xff] }
 0x1e8   :  { %3702 = vmatprep.subr.bf16.mxu0 %v11879_v1  ;;  %3773 = vmatprep.subr.bf16.mxu1 %v11880_v24  ;;  %v3466_v1 = vld [vmem:[%s18395_s0 + $0xb0] sm:$0xff] }
 0x1e9   :  { %v11883_v24 = vld [vmem:[%s18394_s1 + $0x164] ss:$16 sps:$4 sm:$0xff]  }
 0x1ea   :  { %3515 = vmatmul.mubr.bf16.gmra.mrb[68].mxu0 %v14714_v10  ;;  %3586 = vmatmul.mubr.bf16.gmra.mrb[68].mxu1 %v14714_v10 }
 0x1eb   :  { %3703 = vmatpush1.bf16.msra.mxu0 %v11881_v44  ;;  %3774 = vmatpush1.bf16.msra.mxu1 %v11882_v21  ;;  %v11884_v44 = vld [vmem:[%s18394_s1 + $0x16c] ss:$16 sps:$4 sm:$0xff]  }
 0x1ec   :  { %3704 = vmatprep.subr.bf16.mxu0 %v11883_v24  ;;  %3775 = vmatprep.subr.bf16.mxu1 %v11884_v44  ;;  %v14756_v24 = vpack.c.bf16 %v3466_v1, %v3465_v23  ;;  %v11892_v1 = vld [vmem:[%s18394_s1 + $0x1ac] ss:$16 sps:$4 sm:$0xff]  }
 0x1ed   :  { %v2282_v62 = vpop.f32.mrb[52].mxu0  ;;  %v2353_v21 = vpop.f32.mrb[52].mxu1  ;;  %3524 = vmatprep.mubr.bf16.mxu0 %v18700_v15  ;;  %3595 = vmatprep.mubr.bf16.mxu1 %v18700_v15 }
 0x1ee   :  { %v14751_v61 = vadd.f32 %v2282_v62, %v14551_v0  ;;  %v14754_v30 = vadd.f32 %v2353_v21, %v14554_v52  ;;  %v2284_v48 = vpop.f32.mrb[53].mxu0  ;;  %v2355_v10 = vpop.f32.mrb[53].mxu1  ;;  %v11885_v0 = vld [vmem:[%s18394_s1 + $0x160] ss:$16 sps:$4 sm:$0xff]   ;;  %v11886_v52 = vld [vmem:[%s18394_s1 + $0x168] ss:$16 sps:$4 sm:$0xff]  }
 0x1ef   :  { %v14759_v8 = vadd.f32 %v2284_v48, %v14557_v49  ;;  %v14762_v44 = vadd.f32 %v2355_v10, %v14560_v16  ;;  %v2286_v4 = vpop.f32.mrb[54].mxu0  ;;  %v2357_v40 = vpop.f32.mrb[54].mxu1  ;;  %3705 = vmatpush1.bf16.msra.mxu0 %v11885_v0  ;;  %3776 = vmatpush1.bf16.msra.mxu1 %v11886_v52  ;;  %v11887_v49 = vld [vmem:[%s18394_s1 + $0x184] ss:$16 sps:$4 sm:$0xff]   ;;  %v11890_v48 = vld [vmem:[%s18394_s1 + $0x188] ss:$16 sps:$4 sm:$0xff]  }
 0x1f0   :  { %v2287_v62 = vpop.f32.mrb[55].mxu0  ;;  %v2358_v23 = vpop.f32.mrb[55].mxu1  ;;  %3706 = vmatprep.subr.bf16.mxu0 %v11887_v49  ;;  %v11888_v40 = vld [vmem:[%s18394_s1 + $0x18c] ss:$16 sps:$4 sm:$0xff]   ;;  %v11889_v4 = vld [vmem:[%s18394_s1 + $0x180] ss:$16 sps:$4 sm:$0xff]  }
 0x1f1   :  { %3777 = vmatprep.subr.bf16.mxu1 %v11888_v40  ;;  %v3467_v16 = vld [vmem:[%s18395_s0 + $0xb8] sm:$0xff]  ;;  %v11891_v10 = vld [vmem:[%s18394_s1 + $0x1a4] ss:$16 sps:$4 sm:$0xff]   ;;  %v11893_v0 = vld [vmem:[%s18394_s1 + $0x1a0] ss:$16 sps:$4 sm:$0xff]   ;;  %v1858_v62 = vlaneseq }
 0x1f2   :  { %3525 = vmatmul.mubr.bf16.gmra.mrb[72].mxu0 %v14756_v24  ;;  %3596 = vmatmul.mubr.bf16.gmra.mrb[72].mxu1 %v14756_v24  ;;  %v14795_v21 = vpack.c.bf16 %v3467_v16, %v3467_v16  ;;  %v11894_v52 = vld [vmem:[%s18394_s1 + $0x1a8] ss:$16 sps:$4 sm:$0xff]   ;;  %v11895_v23 = vld [vmem:[%s18394_s1 + $0x1c4] ss:$16 sps:$4 sm:$0xff]   ;;  %v11896_v49 = vld [vmem:[%s18394_s1 + $0x1cc] ss:$16 sps:$4 sm:$0xff]  }
 0x1f3   :  { %3707 = vmatpush1.bf16.msra.mxu0 %v11889_v4  ;;  %3778 = vmatpush1.bf16.msra.mxu1 %v11890_v48  ;;  %v11897_v40 = vld [vmem:[%s18394_s1 + $0x1c0] ss:$16 sps:$4 sm:$0xff]   ;;  %v11898_v4 = vld [vmem:[%s18394_s1 + $0x1c8] ss:$16 sps:$4 sm:$0xff]   ;;  %v14817_v48 = vshrl.u32 %v1858_v62, 7 }
 0x1f4   :  { %3708 = vmatprep.subr.bf16.mxu0 %v11891_v10  ;;  %3779 = vmatprep.subr.bf16.mxu1 %v11892_v1  ;;  %v11899_v16 = vld [vmem:[%s18394_s1 + $0x1e4] ss:$16 sps:$4 sm:$0xff]   ;;  %v11900_v10 = vld [vmem:[%s18394_s1 + $0x1ec] ss:$16 sps:$4 sm:$0xff]   ;;  %v11901_v1 = vld [vmem:[%s18394_s1 + $0x1e0] ss:$16 sps:$4 sm:$0xff]  }
 0x1f5   :  { %3534 = vmatprep.mubr.bf16.mxu0 %v18700_v15  ;;  %3605 = vmatprep.mubr.bf16.mxu1 %v18700_v15  ;;  %19026 = vst [vmem:[#allocation15_spill] sm:$0xff] %v14817_v48  ;;  %v11903_v62 = vld [vmem:[%s18394_s1 + $0x4] ss:$16 sps:$4 sm:$0xff]  }
 0x1f7   :  { %3709 = vmatpush1.bf16.msra.mxu0 %v11893_v0  ;;  %3780 = vmatpush1.bf16.msra.mxu1 %v11894_v52  ;;  %v11902_v0 = vld [vmem:[%s18394_s1 + $0x1e8] ss:$16 sps:$4 sm:$0xff]   ;;  %v18650_v52 = vsub.s32 0, %v14817_v48 }
 0x1f8   :  { %3710 = vmatprep.subr.bf16.mxu0 %v11895_v23  ;;  %3781 = vmatprep.subr.bf16.mxu1 %v11896_v49  ;;  %v11904_v23 = vld [vmem:[%s18394_s1 + $0xc] ss:$16 sps:$4 sm:$0xff]   ;;  %v39_v49 = vld [vmem:[%s18396_s2] sm:$0xf] }
 0x1fa   :  { %3535 = vmatmul.mubr.bf16.gmra.mrb[92].mxu0 %v14795_v21  ;;  %3606 = vmatmul.mubr.bf16.gmra.mrb[92].mxu1 %v14795_v21 }
 0x1fb   :  { %3711 = vmatpush1.bf16.msra.mxu0 %v11897_v40  ;;  %3782 = vmatpush1.bf16.msra.mxu1 %v11898_v4  ;;  %v18647_v40 = vsub.s32 2, %v14817_v48  ;;  %v18648_v4 = vsub.s32 1, %v14817_v48 }
 0x1fc   :  { %3712 = vmatprep.subr.bf16.mxu0 %v11899_v16  ;;  %3783 = vmatprep.subr.bf16.mxu1 %v11900_v10  ;;  %v18649_v16 = vsub.s32 3, %v14817_v48  ;;  %v11905_v10 = vld [vmem:[%s18394_s1] ss:$16 sps:$4 sm:$0xff]  }
 0x1fd   :  { %3730 = vmatprep.mubr.bf16.mxu0 %v18700_v15  ;;  %3801 = vmatprep.mubr.bf16.mxu1 %v18700_v15 }
 0x1ff   :  { %3713 = vmatpush1.bf16.msra.mxu0 %v11901_v1  ;;  %3784 = vmatpush1.bf16.msra.mxu1 %v11902_v0  ;;  %v11906_v1 = vld [vmem:[%s18394_s1 + $0x8] ss:$16 sps:$4 sm:$0xff]   ;;  %v14856_v0 = vrot.slane %v39_v49, %v18650_v52 }
 0x200   :  { %3840 = vmatprep.subr.bf16.mxu0 %v11903_v62  ;;  %3911 = vmatprep.subr.bf16.mxu1 %v11904_v23  ;;  %v11908_v62 = vld [vmem:[%s18394_s1 + $0x2c] ss:$16 sps:$4 sm:$0xff]   ;;  %v14866_v23 = vrot.slane %v39_v49, %v18647_v40 }
 0x201   :  { %v14886_v40 = vadd.f32 %v14856_v0, %v13908_v18 }
 0x202   :  { %3731 = vmatmul.mubr.bf16.vlgmr.msra.gmra.mrb[96].mxu0 %v12497_v6  ;;  %3802 = vmatmul.mubr.bf16.vlgmr.msra.gmra.mrb[96].mxu1 %v12497_v6  ;;  %v11907_v6 = vld [vmem:[%s18394_s1 + $0x24] ss:$16 sps:$4 sm:$0xff]   ;;  %v14961_v52 = vadd.f32 %v14866_v23, %v13988_v63 }
 0x203   :  { %3841 = vmatpush1.bf16.msra.mxu0 %v11905_v10  ;;  %3912 = vmatpush1.bf16.msra.mxu1 %v11906_v1  ;;  %v14872_v10 = vrot.slane %v39_v49, %v18648_v4  ;;  %v14876_v1 = vrot.slane %v39_v49, %v18649_v16  ;;  %v11911_v4 = vld [vmem:[%s18394_s1 + $0x44] ss:$16 sps:$4 sm:$0xff]   ;;  %v11912_v49 = vld [vmem:[%s18394_s1 + $0x4c] ss:$16 sps:$4 sm:$0xff]  }
 0x204   :  { %3842 = vmatprep.subr.bf16.mxu0 %v11907_v6  ;;  %3913 = vmatprep.subr.bf16.mxu1 %v11908_v62  ;;  %v11909_v6 = vld [vmem:[%s18394_s1 + $0x20] ss:$16 sps:$4 sm:$0xff]   ;;  %v11910_v62 = vld [vmem:[%s18394_s1 + $0x28] ss:$16 sps:$4 sm:$0xff]  }
 0x205   :  { %3740 = vmatprep.mubr.bf16.mxu0 %v18700_v15  ;;  %3811 = vmatprep.mubr.bf16.mxu1 %v18700_v15  ;;  %v14902_v18 = vadd.f32 %v14872_v10, %v13914_v20  ;;  %v14921_v20 = vadd.f32 %v14872_v10, %v13934_v55  ;;  %v14978_v63 = vadd.f32 %v14876_v1, %v14004_v7 }
 0x206   :  { %v14991_v7 = vadd.f32 %v14866_v23, %v14046_v56  ;;  %v15004_v56 = vadd.f32 %v14872_v10, %v14050_v13 }
 0x207   :  { %3843 = vmatpush1.bf16.msra.mxu0 %v11909_v6  ;;  %3914 = vmatpush1.bf16.msra.mxu1 %v11910_v62  ;;  %v14896_v6 = vadd.f32 %v14866_v23, %v13910_v43  ;;  %v14910_v62 = vadd.f32 %v14856_v0, %v13918_v31  ;;  %v1906_v43 = vmax.f32 %v14886_v40, 0.0  ;;  %v14936_v31 = vadd.f32 %v14866_v23, %v13978_v57 }
 0x208   :  { %3844 = vmatprep.subr.bf16.mxu0 %v11911_v4  ;;  %3915 = vmatprep.subr.bf16.mxu1 %v11912_v49  ;;  %v14906_v4 = vadd.f32 %v14876_v1, %v13916_v45  ;;  %v14925_v45 = vadd.f32 %v14876_v1, %v13936_v37  ;;  %v1907_v16 = vmax.f32 %v14902_v18, 0.0 }
 0x20a   :  { %3741 = vmatmul.mubr.bf16.gmra.mrb[100].mxu0 %v12550_v17  ;;  %3812 = vmatmul.mubr.bf16.gmra.mrb[100].mxu1 %v12550_v17  ;;  %v14917_v17 = vadd.f32 %v14866_v23, %v13920_v32  ;;  %v14940_v32 = vadd.f32 %v14872_v10, %v13982_v58 }
 0x20b   :  { %3845 = vmatpush1.bf16.msra.mxu0 %v13823_v5  ;;  %3916 = vmatpush1.bf16.msra.mxu1 %v13829_v25  ;;  %v14932_v25 = vadd.f32 %v14856_v0, %v13976_v54 }
 0x20c   :  { %3846 = vmatprep.subr.bf16.mxu0 %v13835_v9  ;;  %3917 = vmatprep.subr.bf16.mxu1 %v13841_v19  ;;  %v14946_v9 = vadd.f32 %v14876_v1, %v13984_v59  ;;  %v14950_v19 = vadd.f32 %v14856_v0, %v13986_v60  ;;  %v19032_v18 = vmax.f32 %v14917_v17, 0.0  ;;  %v15091_v17 = vadd.f32 %v14872_v10, %v14121_v51  ;;  %v19038_v51 = vld [vmem:[#allocation13_spill] sm:$0xff] }
 0x20d   :  { %v2452_v55 = vpop.f32.mrb[56].mxu0  ;;  %v2523_v37 = vpop.f32.mrb[56].mxu1  ;;  %3750 = vmatprep.mubr.bf16.mxu0 %v18700_v15  ;;  %3821 = vmatprep.mubr.bf16.mxu1 %v18700_v15 }
 0x20e   :  { %v14953_v54 = vadd.f32 %v2452_v55, %v14751_v61  ;;  %v14956_v57 = vadd.f32 %v2523_v37, %v14754_v30  ;;  %v2454_v58 = vpop.f32.mrb[57].mxu0  ;;  %v2525_v49 = vpop.f32.mrb[57].mxu1  ;;  %v1909_v30 = vmax.f32 %v14906_v4, 0.0  ;;  %v14974_v55 = vadd.f32 %v14872_v10, %v14002_v3  ;;  %v19028_v3 = vld [vmem:[#allocation7_spill] sm:$0xff] }
 0x20f   :  { %v14964_v59 = vadd.f32 %v2454_v58, %v14759_v8  ;;  %v14967_v60 = vadd.f32 %v2525_v49, %v14762_v44  ;;  %v2456_v5 = vpop.f32.mrb[58].mxu0  ;;  %v2527_v61 = vpop.f32.mrb[58].mxu1  ;;  %3847 = vmatpush1.bf16.msra.mxu0 %v13861_v38  ;;  %3918 = vmatpush1.bf16.msra.mxu1 %v13867_v35  ;;  %v14982_v8 = vadd.f32 %v14856_v0, %v14044_v34  ;;  %v1910_v38 = vmax.f32 %v14910_v62, 0.0  ;;  %v19034_v4 = vld [vmem:[#allocation11_spill] sm:$0xff] }
 0x210   :  { %v2457_v44 = vpop.f32.mrb[59].mxu0  ;;  %v2528_v5 = vpop.f32.mrb[59].mxu1  ;;  %3848 = vmatprep.subr.bf16.mxu0 %v13873_v41  ;;  %3919 = vmatprep.subr.bf16.mxu1 %v13879_v22  ;;  %v15013_v22 = vadd.f32 %v14876_v1, %v14052_v36  ;;  %v15045_v61 = vadd.f32 %v14866_v23, %v14118_v53  ;;  %v19027_v53 = vld [vmem:[#allocation2_spill] sm:$0xff] }
 0x212   :  { %3751 = vmatmul.mubr.bf16.gmra.mrb[104].mxu0 %v12596_v27  ;;  %3822 = vmatmul.mubr.bf16.gmra.mrb[104].mxu1 %v12596_v27  ;;  %v15028_v27 = vadd.f32 %v14872_v10, %v14070_v12 }
 0x213   :  { %3849 = vmatpush1.bf16.msra.mxu0 %v13887_v26  ;;  %3920 = vmatpush1.bf16.msra.mxu1 %v13893_v28  ;;  %v15020_v26 = vadd.f32 %v14856_v0, %v14054_v39  ;;  %v15024_v28 = vadd.f32 %v14866_v23, %v14056_v33 }
 0x214   :  { %3850 = vmatprep.subr.bf16.mxu0 %v13899_v29  ;;  %3921 = vmatprep.subr.bf16.mxu1 %v13905_v42  ;;  %v15034_v29 = vadd.f32 %v14876_v1, %v14072_v11  ;;  %v15038_v42 = vadd.f32 %v14856_v0, %v14115_v2 }
 0x215   :  { %v2603_v36 = vpop.f32.mrb[32].mxu0  ;;  %v2674_v5 = vpop.f32.mrb[32].mxu1  ;;  %3760 = vmatprep.mubr.bf16.mxu0 %v18700_v15  ;;  %3831 = vmatprep.mubr.bf16.mxu1 %v18700_v15 }
 0x216   :  { %v2739_v33 = vadd.f32 %v2603_v36, %v14856_v0  ;;  %v2741_v39 = vadd.f32 %v2674_v5, %v14866_v23  ;;  %v2605_v12 = vpop.f32.mrb[33].mxu0  ;;  %v2676_v13 = vpop.f32.mrb[33].mxu1 }
 0x217   :  { %v2740_v49 = vadd.f32 %v2605_v12, %v14872_v10  ;;  %v2742_v11 = vadd.f32 %v2676_v13, %v14876_v1  ;;  %v2607_v41 = vpop.f32.mrb[34].mxu0  ;;  %v2678_v58 = vpop.f32.mrb[34].mxu1  ;;  %3851 = vmatpush1.bf16.msra.mxu0 %v13925_v46  ;;  %3922 = vmatpush1.bf16.msra.mxu1 %v13931_v47 }
 0x218   :  { %v2767_v2 = vmax.f32 %v2739_v33, 0.0  ;;  %v2769_v5 = vmax.f32 %v2741_v39, 0.0  ;;  %v2743_v36 = vadd.f32 %v2607_v41, %v14856_v0  ;;  %v2745_v44 = vadd.f32 %v2678_v58, %v14866_v23  ;;  %v2609_v34 = vpop.f32.mrb[35].mxu0  ;;  %v2680_v37 = vpop.f32.mrb[35].mxu1  ;;  %3852 = vmatprep.subr.bf16.mxu0 %v19027_v53  ;;  %3923 = vmatprep.subr.bf16.mxu1 %v19028_v3 }
 0x219   :  { %v2768_v12 = vmax.f32 %v2740_v49, 0.0  ;;  %v2770_v13 = vmax.f32 %v2742_v11, 0.0  ;;  %v2744_v35 = vadd.f32 %v2609_v34, %v14872_v10  ;;  %v2746_v46 = vadd.f32 %v2680_v37, %v14876_v1  ;;  %v19033_v11 = vld [vmem:[#allocation10_spill] sm:$0xff] }
 0x21a   :  { %v2795_v47 = vmax.f32 %v1906_v43, %v2767_v2  ;;  %v19029_v33 = vmax.f32 %v14896_v6, 0.0  ;;  %v2771_v39 = vmax.f32 %v2743_v36, 0.0  ;;  %v2773_v58 = vmax.f32 %v2745_v44, 0.0  ;;  %3761 = vmatmul.mubr.bf16.gmra.mrb[108].mxu0 %v13399_v14  ;;  %3832 = vmatmul.mubr.bf16.gmra.mrb[108].mxu1 %v13399_v14  ;;  %v19030_v43 = vld [vmem:[#allocation8_spill] sm:$0xff]  ;;  %v19031_v6 = vld [vmem:[#allocation9_spill] sm:$0xff] }
 0x21b   :  { %v15065_v3 = vmax.f32 %v1907_v16, %v2768_v12  ;;  %v15069_v34 = vmax.f32 %v1909_v30, %v2770_v13  ;;  %v2772_v37 = vmax.f32 %v2744_v35, 0.0  ;;  %v2774_v40 = vmax.f32 %v2746_v46, 0.0  ;;  %3853 = vmatpush1.bf16.msra.mxu0 %v19030_v43  ;;  %3924 = vmatpush1.bf16.msra.mxu1 %v19031_v6 }
 0x21c   :  { %v2797_v41 = vmax.f32 %v19029_v33, %v2769_v5  ;;  %v1925_v49 = vmax.f32 %v15013_v22, 0.0  ;;  %v2799_v14 = vmax.f32 %v1910_v38, %v2771_v39  ;;  %v2801_v16 = vmax.f32 %v19032_v18, %v2773_v58  ;;  %3854 = vmatprep.subr.bf16.mxu0 %v19033_v11  ;;  %3925 = vmatprep.subr.bf16.mxu1 %v19034_v4  ;;  %v19040_v11 = vld [vmem:[#allocation16_spill] sm:$0xff]  ;;  %v19067_v22 = vld [vmem:[#allocation27_spill] sm:$0xff] }
 0x21d   :  { %v1926_v30 = vmax.f32 %v15020_v26, 0.0  ;;  %v2824_v35 = vmax.f32 %v15065_v3, %v15069_v34  ;;  %v19035_v2 = vmax.f32 %v14921_v20, 0.0  ;;  %v19036_v36 = vmax.f32 %v14925_v45, 0.0  ;;  %v2613_v62 = vpop.f32.mrb[36].mxu0  ;;  %v2684_v38 = vpop.f32.mrb[36].mxu1  ;;  %3872 = vmatprep.mubr.bf16.mxu0 %v18700_v15  ;;  %3943 = vmatprep.mubr.bf16.mxu1 %v18700_v15  ;;  %v19037_v34 = vld [vmem:[#allocation12_spill] sm:$0xff] }
 0x21e   :  { %v2823_v44 = vmax.f32 %v2795_v47, %v2797_v41  ;;  %v2825_v12 = vmax.f32 %v2799_v14, %v2801_v16  ;;  %v2747_v13 = vadd.f32 %v2613_v62, %v14856_v0  ;;  %v2749_v46 = vadd.f32 %v2684_v38, %v14866_v23  ;;  %v2615_v20 = vpop.f32.mrb[37].mxu0  ;;  %v2686_v47 = vpop.f32.mrb[37].mxu1  ;;  %v19039_v16 = vld [vmem:[#allocation14_spill] sm:$0xff] }
 0x21f   :  { %v2800_v5 = vmax.f32 %v19035_v2, %v2772_v37  ;;  %v2802_v53 = vmax.f32 %v19036_v36, %v2774_v40  ;;  %v1928_v45 = vmax.f32 %v15024_v28, 0.0  ;;  %v2748_v41 = vadd.f32 %v2615_v20, %v14872_v10  ;;  %v2617_v58 = vpop.f32.mrb[38].mxu0  ;;  %v2688_v3 = vpop.f32.mrb[38].mxu1  ;;  %3855 = vmatpush1.bf16.msra.mxu0 %v19037_v34  ;;  %3926 = vmatpush1.bf16.msra.mxu1 %v19038_v51  ;;  %v19043_v20 = vld [vmem:[#allocation48_spill] sm:$0xff]  ;;  %v19047_v51 = vld [vmem:[#allocation18_spill] sm:$0xff] }
 0x220   :  { %v2750_v39 = vadd.f32 %v2686_v47, %v14876_v1  ;;  %v15100_v37 = vpack.c.bf16 %v2825_v12, %v2823_v44  ;;  %v2775_v40 = vmax.f32 %v2747_v13, 0.0  ;;  %v2777_v43 = vmax.f32 %v2749_v46, 0.0  ;;  %v2619_v14 = vpop.f32.mrb[39].mxu0  ;;  %v2690_v18 = vpop.f32.mrb[39].mxu1  ;;  %3982 = vmatprep.subr.bf16.mxu0 %v19039_v16  ;;  %4053 = vmatprep.subr.bf16.mxu1 %v19040_v11 }
 0x221   :  { %v2826_v33 = vmax.f32 %v2800_v5, %v2802_v53  ;;  %v2751_v6 = vadd.f32 %v2617_v58, %v14856_v0  ;;  %v2776_v4 = vmax.f32 %v2748_v41, 0.0  ;;  %v2753_v5 = vadd.f32 %v2688_v3, %v14866_v23 }
 0x222   :  { %v2778_v2 = vmax.f32 %v2750_v39, 0.0  ;;  %v2752_v36 = vadd.f32 %v2619_v14, %v14872_v10  ;;  %v19041_v53 = vmax.f32 %v14932_v25, 0.0  ;;  %v19042_v62 = vmax.f32 %v14936_v31, 0.0  ;;  %3873 = vmatmul.mubr.bf16.vlgmr.msra.gmra.mrb[96].mxu0 %v19043_v20  ;;  %3944 = vmatmul.mubr.bf16.vlgmr.msra.gmra.mrb[96].mxu1 %v19043_v20  ;;  %v19046_v25 = vld [vmem:[#allocation17_spill] sm:$0xff]  ;;  %v19049_v14 = vld [vmem:[#allocation19_spill] sm:$0xff] }
 0x223   :  { %v2779_v13 = vmax.f32 %v2751_v6, 0.0  ;;  %v2754_v46 = vadd.f32 %v2690_v18, %v14876_v1  ;;  %v19044_v47 = vmax.f32 %v14940_v32, 0.0  ;;  %v19045_v39 = vmax.f32 %v14946_v9, 0.0  ;;  %3983 = vmatpush1.bf16.msra.mxu0 %v19046_v25  ;;  %4054 = vmatpush1.bf16.msra.mxu1 %v19047_v51  ;;  %v19050_v18 = vld [vmem:[#allocation20_spill] sm:$0xff]  ;;  %v19057_v25 = vld [vmem:[#allocation22_spill] sm:$0xff] }
 0x224   :  { %v2803_v44 = vmax.f32 %v19041_v53, %v2775_v40  ;;  %v2805_v38 = vmax.f32 %v19042_v62, %v2777_v43  ;;  %v2781_v3 = vmax.f32 %v2753_v5, 0.0  ;;  %v2780_v34 = vmax.f32 %v2752_v36, 0.0  ;;  %3984 = vmatprep.subr.bf16.mxu0 %v19049_v14  ;;  %4055 = vmatprep.subr.bf16.mxu1 %v19050_v18 }
 0x225   :  { %v2804_v41 = vmax.f32 %v19044_v47, %v2776_v4  ;;  %v2806_v58 = vmax.f32 %v19045_v39, %v2778_v2  ;;  %v19048_v40 = vmax.f32 %v14950_v19, 0.0  ;;  %v2782_v6 = vmax.f32 %v2754_v46, 0.0  ;;  %v2623_v36 = vpop.f32.mrb[40].mxu0  ;;  %v2694_v53 = vpop.f32.mrb[40].mxu1  ;;  %3882 = vmatprep.mubr.bf16.mxu0 %v18700_v15  ;;  %3953 = vmatprep.mubr.bf16.mxu1 %v18700_v15  ;;  %v19056_v39 = vld [vmem:[#allocation21_spill] sm:$0xff] }
 0x226   :  { %v2827_v31 = vmax.f32 %v2803_v44, %v2805_v38  ;;  %v15124_v32 = vpack.c.bf16 %v2826_v33, %v2824_v35  ;;  %v1927_v9 = vmax.f32 %v15028_v27, 0.0  ;;  %v19051_v11 = vmax.f32 %v14961_v52, 0.0  ;;  %v2625_v52 = vpop.f32.mrb[41].mxu0 }
 0x227   :  { %v2807_v43 = vmax.f32 %v19048_v40, %v2779_v13  ;;  %v2828_v16 = vmax.f32 %v2804_v41, %v2806_v58  ;;  %v19052_v2 = vmax.f32 %v14974_v55, 0.0  ;;  %v19054_v35 = vmax.f32 %v14978_v63, 0.0  ;;  %v2696_v13 = vpop.f32.mrb[41].mxu1  ;;  %v2627_v41 = vpop.f32.mrb[42].mxu0  ;;  %3985 = vmatpush1.bf16.msra.mxu0 %v19056_v39  ;;  %4056 = vmatpush1.bf16.msra.mxu1 %v19057_v25  ;;  %v19058_v40 = vld [vmem:[#allocation23_spill] sm:$0xff] }
 0x228   :  { %v2809_v4 = vmax.f32 %v19051_v11, %v2781_v3  ;;  %v15133_v19 = vpack.c.bf16 %v2827_v31, %v2825_v12  ;;  %v2755_v62 = vadd.f32 %v2623_v36, %v14856_v0  ;;  %v2757_v38 = vadd.f32 %v2694_v53, %v14866_v23  ;;  %v2698_v12 = vpop.f32.mrb[42].mxu1  ;;  %3986 = vmatprep.subr.bf16.mxu0 %v19058_v40  ;;  %v19059_v11 = vld [vmem:[#allocation24_spill] sm:$0xff] }
 0x229   :  { %v2808_v5 = vmax.f32 %v19052_v2, %v2780_v34  ;;  %v2810_v44 = vmax.f32 %v19054_v35, %v2782_v6  ;;  %v15139_v46 = vpack.c.bf16 %v2828_v16, %v2826_v33  ;;  %v2756_v20 = vadd.f32 %v2625_v52, %v14872_v10  ;;  %v2629_v33 = vpop.f32.mrb[43].mxu0  ;;  %v2700_v51 = vpop.f32.mrb[43].mxu1  ;;  %4057 = vmatprep.subr.bf16.mxu1 %v19059_v11 }
 0x22a   :  { %19053 = vst [vmem:[#allocation2_spill] sm:$0xff] %v15133_v19  ;;  %v15141_v55 = vmax.f32 %v2807_v43, %v2809_v4  ;;  %v2758_v47 = vadd.f32 %v2696_v13, %v14876_v1  ;;  %v2783_v58 = vmax.f32 %v2755_v62, 0.0  ;;  %v2785_v3 = vmax.f32 %v2757_v38, 0.0  ;;  %v19064_v13 = vld [vmem:[#allocation25_spill] sm:$0xff] }
 0x22b   :  { %19055 = vst [vmem:[#allocation7_spill] sm:$0xff] %v15139_v46  ;;  %v15146_v63 = vmax.f32 %v2808_v5, %v2810_v44  ;;  %v2759_v34 = vadd.f32 %v2627_v41, %v14856_v0  ;;  %v2784_v6 = vmax.f32 %v2756_v20, 0.0  ;;  %v2761_v18 = vadd.f32 %v2698_v12, %v14866_v23  ;;  %v19062_v44 = vld [vmem:[#allocation57_spill] sm:$0xff]  ;;  %3987 = vmatpush1.bf16.msra.mxu0 %v19064_v13 }
 0x22c   :  { %v15152_v43 = vpack.c.bf16 %v15141_v55, %v2827_v31  ;;  %v2786_v14 = vmax.f32 %v2758_v47, 0.0  ;;  %v19060_v2 = vmax.f32 %v14982_v8, 0.0  ;;  %v19061_v36 = vmax.f32 %v14991_v7, 0.0  ;;  %3883 = vmatmul.mubr.bf16.gmra.mrb[100].mxu0 %v19062_v44  ;;  %3954 = vmatmul.mubr.bf16.gmra.mrb[100].mxu1 %v19062_v44  ;;  %v19066_v47 = vld [vmem:[#allocation26_spill] sm:$0xff] }
 0x22d   :  { %v15157_v4 = vpack.c.bf16 %v15146_v63, %v2828_v16  ;;  %v2787_v35 = vmax.f32 %v2759_v34, 0.0  ;;  %v19063_v31 = vmax.f32 %v15004_v56, 0.0  ;;  %v2789_v52 = vmax.f32 %v2761_v18, 0.0  ;;  %3892 = vmatprep.mubr.bf16.mxu0 %v18700_v15  ;;  %4058 = vmatpush1.bf16.msra.mxu1 %v19066_v47  ;;  %v2633_v39 = vpop.f32.mrb[60].mxu0  ;;  %v19070_v18 = vld [vmem:[#allocation29_spill] sm:$0xff] }
 0x22e   :  { %v2811_v5 = vmax.f32 %v19060_v2, %v2783_v58  ;;  %v2813_v53 = vmax.f32 %v19061_v36, %v2785_v3  ;;  %v2814_v38 = vmax.f32 %v1925_v49, %v2786_v14  ;;  %v2760_v16 = vadd.f32 %v2629_v33, %v14872_v10  ;;  %3988 = vmatprep.subr.bf16.mxu0 %v19067_v22  ;;  %v2704_v58 = vpop.f32.mrb[60].mxu1  ;;  %v19068_v3 = vld [vmem:[#allocation28_spill] sm:$0xff]  ;;  %v19071_v2 = vld [vmem:[#allocation30_spill] sm:$0xff] }
 0x22f   :  { %v2812_v62 = vmax.f32 %v19063_v31, %v2784_v6  ;;  %v1929_v8 = vmax.f32 %v15034_v29, 0.0  ;;  %v2815_v20 = vmax.f32 %v1926_v30, %v2787_v35  ;;  %v2762_v56 = vadd.f32 %v2700_v51, %v14876_v1  ;;  %4059 = vmatprep.subr.bf16.mxu1 %v19068_v3  ;;  %3963 = vmatprep.mubr.bf16.mxu1 %v18700_v15  ;;  %v2706_v33 = vpop.f32.mrb[61].mxu1  ;;  %v19081_v22 = vld [vmem:[#allocation34_spill] sm:$0xff] }
 0x230   :  { %v15173_v7 = vmax.f32 %v2811_v5, %v2813_v53  ;;  %v1905_v49 = vadd.f32 %v14876_v1, %v14124_v50  ;;  %v2817_v12 = vmax.f32 %v1928_v45, %v2789_v52  ;;  %v2788_v29 = vmax.f32 %v2760_v16, 0.0  ;;  %v2635_v50 = vpop.f32.mrb[61].mxu0  ;;  %v2708_v14 = vpop.f32.mrb[62].mxu1  ;;  %3989 = vmatpush1.bf16.msra.mxu0 %v19070_v18  ;;  %v19074_v53 = vld [vmem:[#allocation32_spill] sm:$0xff]  ;;  %v19077_v16 = vld [vmem:[#allocation33_spill] sm:$0xff]  ;;  %v19087_v3 = vld [vmem:[#allocation38_spill] sm:$0xff] }
 0x231   :  { %v15182_v41 = vmax.f32 %v2812_v62, %v2814_v38  ;;  %v1930_v26 = vmax.f32 %v15038_v42, 0.0  ;;  %v2790_v30 = vmax.f32 %v2762_v56, 0.0  ;;  %v2735_v34 = vadd.f32 %v2633_v39, %v14953_v54  ;;  %v2637_v6 = vpop.f32.mrb[62].mxu0  ;;  %4060 = vmatpush1.bf16.msra.mxu1 %v19071_v2  ;;  %v2709_v27 = vpop.f32.mrb[63].mxu1  ;;  %v19076_v38 = vld [vmem:[#allocation66_spill] sm:$0xff]  ;;  %v19083_v39 = vld [vmem:[#allocation36_spill] sm:$0xff] }
 0x232   :  { %19065 = vst [vmem:[#allocation8_spill] sm:$0xff] %v15173_v7  ;;  %v2737_v25 = vadd.f32 %v2704_v58, %v14956_v57  ;;  %v15191_v51 = vmax.f32 %v2815_v20, %v2817_v12  ;;  %v2816_v28 = vmax.f32 %v1927_v9, %v2788_v29  ;;  %v2736_v45 = vadd.f32 %v2635_v50, %v14964_v59  ;;  %v2638_v5 = vpop.f32.mrb[63].mxu0  ;;  %v19072_v9 = vld [vmem:[#allocation31_spill] sm:$0xff]  ;;  %v19086_v58 = vld [vmem:[#allocation37_spill] sm:$0xff]  ;;  %v19092_v50 = vld [vmem:[#allocation42_spill] sm:$0xff] }
 0x233   :  { %v2738_v40 = vadd.f32 %v2706_v33, %v14967_v60  ;;  %v1932_v42 = vmax.f32 %v15045_v61, 0.0  ;;  %v2818_v54 = vmax.f32 %v1929_v8, %v2790_v30  ;;  %v2763_v57 = vadd.f32 %v2735_v34, %v14856_v0  ;;  %3990 = vmatprep.subr.bf16.mxu0 %v19072_v9  ;;  %4061 = vmatprep.subr.bf16.mxu1 %v19074_v53  ;;  %v19082_v29 = vld [vmem:[#allocation35_spill] sm:$0xff]  ;;  %v19089_v30 = vld [vmem:[#allocation40_spill] sm:$0xff]  ;;  %v19090_v34 = vld [vmem:[#allocation74_spill] sm:$0xff] }
 0x234   :  { %19069 = vst [vmem:[#allocation9_spill] sm:$0xff] %v15191_v51  ;;  %v2765_v11 = vadd.f32 %v2737_v25, %v14866_v23  ;;  %v1931_v59 = vmax.f32 %v15091_v17, 0.0  ;;  %v15206_v60 = vpack.c.bf16 %v15191_v51, %v15173_v7  ;;  %v2764_v36 = vadd.f32 %v2736_v45, %v14872_v10  ;;  %3893 = vmatmul.mubr.bf16.gmra.mrb[104].mxu0 %v19076_v38  ;;  %v19091_v25 = vld [vmem:[#allocation41_spill] sm:$0xff]  ;;  %v19093_v33 = vld [vmem:[#allocation43_spill] sm:$0xff]  ;;  %v19104_v2 = vld [vmem:[#allocation54_spill] sm:$0xff] }
 0x235   :  { %v2766_v61 = vadd.f32 %v2738_v40, %v14876_v1  ;;  %v1933_v35 = vmax.f32 %v1905_v49, 0.0  ;;  %v15211_v44 = vmax.f32 %v2816_v28, %v2818_v54  ;;  %v2791_v31 = vmax.f32 %v2763_v57, 0.0  ;;  %3964 = vmatmul.mubr.bf16.gmra.mrb[104].mxu1 %v19076_v38  ;;  %3991 = vmatpush1.bf16.msra.mxu0 %v19077_v16  ;;  %v19094_v28 = vld [vmem:[#allocation44_spill] sm:$0xff]  ;;  %v19095_v45 = vld [vmem:[#allocation45_spill] sm:$0xff]  ;;  %v19096_v40 = vld [vmem:[#allocation46_spill] sm:$0xff] }
 0x236   :  { %19073 = vst [vmem:[#allocation10_spill] sm:$0xff] %v15206_v60  ;;  %v2793_v62 = vmax.f32 %v2765_v11, 0.0  ;;  %v2792_v17 = vmax.f32 %v2764_v36, 0.0  ;;  %3902 = vmatprep.mubr.bf16.mxu0 %v18700_v15  ;;  %v15219_v13 = vpack.c.bf16 %v15182_v41, %v15146_v63  ;;  %v15223_v8 = vpack.c.bf16 %v15173_v7, %v15141_v55  ;;  %4062 = vmatpush1.bf16.msra.mxu1 %v19081_v22  ;;  %v19097_v6 = vld [vmem:[#allocation47_spill] sm:$0xff]  ;;  %v19098_v14 = vld [vmem:[#allocation49_spill] sm:$0xff]  ;;  %v19102_v57 = vld [vmem:[#allocation52_spill] sm:$0xff] }
 0x237   :  { %19075 = vst [vmem:[#allocation11_spill] sm:$0xff] %v15211_v44  ;;  %v2794_v52 = vmax.f32 %v2766_v61, 0.0  ;;  %v15227_v20 = vpack.c.bf16 %v15211_v44, %v15182_v41  ;;  %v2819_v56 = vmax.f32 %v1930_v26, %v2791_v31  ;;  %3992 = vmatprep.subr.bf16.mxu0 %v19082_v29  ;;  %4063 = vmatprep.subr.bf16.mxu1 %v19083_v39  ;;  %v19088_v26 = vld [vmem:[#allocation39_spill] sm:$0xff]  ;;  %v19103_v11 = vld [vmem:[#allocation53_spill] sm:$0xff]  ;;  %v19106_v27 = vld [vmem:[#allocation56_spill] sm:$0xff] }
 0x238   :  { %19078 = vst [vmem:[#allocation12_spill] sm:$0xff] %v15219_v13  ;;  %19079 = vst [vmem:[#allocation13_spill] sm:$0xff] %v15223_v8  ;;  %v2821_v47 = vmax.f32 %v1932_v42, %v2793_v62  ;;  %v2820_v49 = vmax.f32 %v1931_v59, %v2792_v17  ;;  %3973 = vmatprep.mubr.bf16.mxu1 %v18700_v15  ;;  %v19099_v18 = vld [vmem:[#allocation3_spill] sm:$0xff]  ;;  %v19100_v42 = vld [vmem:[#allocation50_spill] sm:$0xff] }
 0x239   :  { %19080 = vst [vmem:[#allocation14_spill] sm:$0xff] %v15227_v20  ;;  %v2822_v12 = vmax.f32 %v1933_v35, %v2794_v52  ;;  %3993 = vmatpush1.bf16.msra.mxu0 %v19086_v58  ;;  %v19101_v54 = vld [vmem:[#allocation51_spill] sm:$0xff]  ;;  %v19107_v9 = vld [vmem:[#allocation58_spill] sm:$0xff]  ;;  %v19108_v59 = vld [vmem:[#allocation4_spill] sm:$0xff] }
 0x23a   :  { %v15232_v63 = vmax.f32 %v2819_v56, %v2821_v47  ;;  %4064 = vmatpush1.bf16.msra.mxu1 %v19087_v3  ;;  %3994 = vmatprep.subr.bf16.mxu0 %v19088_v26  ;;  %v19105_v5 = vld [vmem:[#allocation55_spill] sm:$0xff]  ;;  %v19110_v61 = vld [vmem:[#allocation60_spill] sm:$0xff]  ;;  %v19111_v53 = vld [vmem:[#allocation61_spill] sm:$0xff] }
 0x23b   :  { %v15235_v55 = vmax.f32 %v2820_v49, %v2822_v12  ;;  %4065 = vmatprep.subr.bf16.mxu1 %v19089_v30  ;;  %v19109_v36 = vld [vmem:[#allocation59_spill] sm:$0xff]  ;;  %v19112_v62 = vld [vmem:[#allocation62_spill] sm:$0xff]  ;;  %v19114_v47 = vld [vmem:[#allocation64_spill] sm:$0xff] }
 0x23c   :  { %19084 = vst [vmem:[#allocation16_spill] sm:$0xff] %v15232_v63  ;;  %3903 = vmatmul.mubr.bf16.gmra.mrb[112].mxu0 %v19090_v34  ;;  %v19113_v56 = vld [vmem:[#allocation63_spill] sm:$0xff]  ;;  %v19115_v12 = vld [vmem:[#allocation65_spill] sm:$0xff]  ;;  %v19118_v58 = vld [vmem:[#allocation68_spill] sm:$0xff] }
 0x23d   :  { %19085 = vst [vmem:[#allocation48_spill] sm:$0xff] %v15235_v55  ;;  %3974 = vmatmul.mubr.bf16.gmra.mrb[112].mxu1 %v19090_v34  ;;  %3995 = vmatpush1.bf16.msra.mxu0 %v19091_v25  ;;  %v19116_v29 = vld [vmem:[#allocation67_spill] sm:$0xff]  ;;  %v19117_v39 = vld [vmem:[#allocation5_spill] sm:$0xff]  ;;  %v19120_v26 = vld [vmem:[#allocation70_spill] sm:$0xff] }
 0x23e   :  { %4014 = vmatprep.mubr.bf16.mxu0 %v18700_v15  ;;  %4066 = vmatpush1.bf16.msra.mxu1 %v19092_v50  ;;  %v19119_v3 = vld [vmem:[#allocation69_spill] sm:$0xff]  ;;  %v19121_v30 = vld [vmem:[#allocation71_spill] sm:$0xff]  ;;  %v19122_v34 = vld [vmem:[#allocation72_spill] sm:$0xff] }
 0x23f   :  { %3996 = vmatprep.subr.bf16.mxu0 %v19093_v33  ;;  %4067 = vmatprep.subr.bf16.mxu1 %v19094_v28  ;;  %v19123_v25 = vld [vmem:[#allocation73_spill] sm:$0xff]  ;;  %v19124_v50 = vld [vmem:[#allocation75_spill] sm:$0xff]  ;;  %v19125_v33 = vld [vmem:[#allocation76_spill] sm:$0xff] }
 0x240   :  { %4085 = vmatprep.mubr.bf16.mxu1 %v18700_v15  ;;  %v19126_v28 = vld [vmem:[#allocation6_spill] sm:$0xff] }
 0x241   :  { %3997 = vmatpush1.bf16.msra.mxu0 %v19095_v45  ;;  %v19127_v45 = vld [vmem:[#allocation77_spill] sm:$0xff] }
 0x242   :  { %4068 = vmatpush1.bf16.msra.mxu1 %v19096_v40  ;;  %4152 = vmatprep.subr.bf16.mxu0 %v19097_v6  ;;  %v19128_v40 = vld [vmem:[#allocation78_spill] sm:$0xff]  ;;  %v19129_v6 = vld [vmem:[#allocation79_spill] sm:$0xff] }
 0x243   :  { %4223 = vmatprep.subr.bf16.mxu1 %v19098_v14  ;;  %v19130_v14 = vld [vmem:[#allocation80_spill] sm:$0xff] }
 0x244   :  { %4015 = vmatmul.mubr.bf16.vlgmr.msra.gmra.mrb[96].mxu0 %v19099_v18 }
 0x245   :  { %4086 = vmatmul.mubr.bf16.vlgmr.msra.gmra.mrb[96].mxu1 %v19099_v18  ;;  %4153 = vmatpush1.bf16.msra.mxu0 %v19100_v42  ;;  %v19131_v18 = vld [vmem:[#allocation81_spill] sm:$0xff]  ;;  %v19132_v42 = vld [vmem:[#allocation82_spill] sm:$0xff] }
 0x246   :  { %4224 = vmatpush1.bf16.msra.mxu1 %v19101_v54  ;;  %4154 = vmatprep.subr.bf16.mxu0 %v19102_v57  ;;  %v19133_v54 = vld [vmem:[#allocation83_spill] sm:$0xff]  ;;  %v19134_v57 = vld [vmem:[#allocation84_spill] sm:$0xff] }
 0x247   :  { %4225 = vmatprep.subr.bf16.mxu1 %v19103_v11  ;;  %4024 = vmatprep.mubr.bf16.mxu0 %v18700_v15  ;;  %v19135_v11 = vld [vmem:[#allocation113_spill] sm:$0xff] }
 0x248   :  { %4095 = vmatprep.mubr.bf16.mxu1 %v18700_v15 }
 0x249   :  { %4155 = vmatpush1.bf16.msra.mxu0 %v19104_v2  ;;  %v19136_v2 = vld [vmem:[#allocation85_spill] sm:$0xff] }
 0x24a   :  { %4226 = vmatpush1.bf16.msra.mxu1 %v19105_v5  ;;  %4156 = vmatprep.subr.bf16.mxu0 %v19106_v27  ;;  %v19137_v5 = vld [vmem:[#allocation86_spill] sm:$0xff]  ;;  %v19138_v27 = vld [vmem:[#allocation87_spill] sm:$0xff] }
 0x24b   :  { %4227 = vmatprep.subr.bf16.mxu1 %v19107_v9  ;;  %v19139_v9 = vld [vmem:[#allocation88_spill] sm:$0xff] }
 0x24c   :  { %4025 = vmatmul.mubr.bf16.gmra.mrb[100].mxu0 %v19108_v59 }
 0x24d   :  { %4096 = vmatmul.mubr.bf16.gmra.mrb[100].mxu1 %v19108_v59  ;;  %4157 = vmatpush1.bf16.msra.mxu0 %v19109_v36  ;;  %v2901_v35 = vpop.f32.mrb[76].mxu0  ;;  %v2972_v31 = vpop.f32.mrb[76].mxu1  ;;  %v19140_v59 = vld [vmem:[#allocation89_spill] sm:$0xff]  ;;  %v19141_v36 = vld [vmem:[#allocation90_spill] sm:$0xff] }
 0x24e   :  { %4228 = vmatpush1.bf16.msra.mxu1 %v19110_v61  ;;  %4158 = vmatprep.subr.bf16.mxu0 %v19111_v53  ;;  %v2903_v38 = vpop.f32.mrb[77].mxu0  ;;  %v2974_v17 = vpop.f32.mrb[77].mxu1  ;;  %v19142_v61 = vld [vmem:[#allocation91_spill] sm:$0xff]  ;;  %v19143_v53 = vld [vmem:[#allocation92_spill] sm:$0xff] }
 0x24f   :  { %4229 = vmatprep.subr.bf16.mxu1 %v19112_v62  ;;  %4034 = vmatprep.mubr.bf16.mxu0 %v18700_v15  ;;  %v2905_v52 = vpop.f32.mrb[78].mxu0  ;;  %v2976_v16 = vpop.f32.mrb[78].mxu1  ;;  %v19144_v62 = vld [vmem:[#allocation116_spill] sm:$0xff] }
 0x250   :  { %4105 = vmatprep.mubr.bf16.mxu1 %v18700_v15  ;;  %v2906_v22 = vpop.f32.mrb[79].mxu0  ;;  %v2977_v49 = vpop.f32.mrb[79].mxu1  ;;  %v19145_v52 = vld [vmem:[#allocation93_spill] sm:$0xff]  ;;  %v19146_v16 = vld [vmem:[#allocation94_spill] sm:$0xff] }
 0x251   :  { %4159 = vmatpush1.bf16.msra.mxu0 %v19113_v56  ;;  %v19147_v56 = vld [vmem:[#allocation95_spill] sm:$0xff]  ;;  %v19148_v49 = vld [vmem:[#allocation96_spill] sm:$0xff] }
 0x252   :  { %4230 = vmatpush1.bf16.msra.mxu1 %v19114_v47  ;;  %4160 = vmatprep.subr.bf16.mxu0 %v19115_v12 }
 0x253   :  { %4231 = vmatprep.subr.bf16.mxu1 %v19116_v29 }
 0x254   :  { %4035 = vmatmul.mubr.bf16.gmra.mrb[104].mxu0 %v19117_v39 }
 0x255   :  { %4106 = vmatmul.mubr.bf16.gmra.mrb[104].mxu1 %v19117_v39  ;;  %4161 = vmatpush1.bf16.msra.mxu0 %v19118_v58 }
 0x256   :  { %4232 = vmatpush1.bf16.msra.mxu1 %v19119_v3  ;;  %4162 = vmatprep.subr.bf16.mxu0 %v19120_v26 }
 0x257   :  { %4233 = vmatprep.subr.bf16.mxu1 %v19121_v30  ;;  %4044 = vmatprep.mubr.bf16.mxu0 %v18700_v15 }
 0x258   :  { %4115 = vmatprep.mubr.bf16.mxu1 %v18700_v15 }
 0x259   :  { %4163 = vmatpush1.bf16.msra.mxu0 %v19122_v34 }
 0x25a   :  { %4234 = vmatpush1.bf16.msra.mxu1 %v19123_v25  ;;  %4164 = vmatprep.subr.bf16.mxu0 %v19124_v50  ;;  %v19149_v25 = vld [vmem:[#allocation97_spill] sm:$0xff]  ;;  %v19150_v50 = vld [vmem:[#allocation98_spill] sm:$0xff] }
 0x25b   :  { %4235 = vmatprep.subr.bf16.mxu1 %v19125_v33 }
 0x25c   :  { %4045 = vmatmul.mubr.bf16.gmra.mrb[116].mxu0 %v19126_v28 }
 0x25d   :  { %4116 = vmatmul.mubr.bf16.gmra.mrb[116].mxu1 %v19126_v28  ;;  %4165 = vmatpush1.bf16.msra.mxu0 %v19127_v45  ;;  %v19151_v45 = vld [vmem:[#allocation99_spill] sm:$0xff] }
 0x25e   :  { %4236 = vmatpush1.bf16.msra.mxu1 %v19128_v40  ;;  %4166 = vmatprep.subr.bf16.mxu0 %v19129_v6  ;;  %v19152_v40 = vld [vmem:[#allocation100_spill] sm:$0xff]  ;;  %v19157_v6 = vld [vmem:[#allocation105_spill] sm:$0xff] }
 0x25f   :  { %4237 = vmatprep.subr.bf16.mxu1 %v19130_v14  ;;  %4184 = vmatprep.mubr.bf16.mxu0 %v18700_v15  ;;  %v19158_v14 = vld [vmem:[#allocation106_spill] sm:$0xff] }
 0x260   :  { %4255 = vmatprep.mubr.bf16.mxu1 %v18700_v15 }
 0x261   :  { %4167 = vmatpush1.bf16.msra.mxu0 %v19131_v18  ;;  %v19159_v18 = vld [vmem:[#allocation107_spill] sm:$0xff] }
 0x262   :  { %4238 = vmatpush1.bf16.msra.mxu1 %v19132_v42  ;;  %4333 = vmatprep.subr.bf16.mxu0 %v19133_v54  ;;  %v19160_v42 = vld [vmem:[#allocation108_spill] sm:$0xff]  ;;  %v4322_v54 = vld [vmem:[%s18395_s0 + $0xc8] sm:$0xff] }
 0x263   :  { %4404 = vmatprep.subr.bf16.mxu1 %v19134_v57  ;;  %v4323_v57 = vld [vmem:[%s18395_s0 + $0xd0] sm:$0xff] }
 0x264   :  { %4185 = vmatmul.mubr.bf16.vlgmr.msra.gmra.mrb[96].mxu0 %v19135_v11 }
 0x265   :  { %4256 = vmatmul.mubr.bf16.vlgmr.msra.gmra.mrb[96].mxu1 %v19135_v11  ;;  %4334 = vmatpush1.bf16.msra.mxu0 %v19136_v2  ;;  %v19162_v11 = vld [vmem:[#allocation110_spill] sm:$0xff]  ;;  %v19163_v2 = vld [vmem:[#allocation111_spill] sm:$0xff] }
 0x266   :  { %4405 = vmatpush1.bf16.msra.mxu1 %v19137_v5  ;;  %4335 = vmatprep.subr.bf16.mxu0 %v19138_v27  ;;  %v19164_v5 = vld [vmem:[#allocation112_spill] sm:$0xff]  ;;  %v19165_v27 = vld [vmem:[#allocation114_spill] sm:$0xff] }
 0x267   :  { %4406 = vmatprep.subr.bf16.mxu1 %v19139_v9  ;;  %4194 = vmatprep.mubr.bf16.mxu0 %v18700_v15  ;;  %v19166_v9 = vld [vmem:[#allocation115_spill] sm:$0xff] }
 0x268   :  { %4265 = vmatprep.mubr.bf16.mxu1 %v18700_v15 }
 0x269   :  { %4336 = vmatpush1.bf16.msra.mxu0 %v19140_v59  ;;  %v4324_v59 = vld [vmem:[%s18395_s0 + $0xd8] sm:$0xff] }
 0x26a   :  { %4407 = vmatpush1.bf16.msra.mxu1 %v19141_v36  ;;  %4337 = vmatprep.subr.bf16.mxu0 %v19142_v61  ;;  %v4325_v36 = vld [vmem:[%s18395_s0 + $0xe0] sm:$0xff] }
 0x26b   :  { %4408 = vmatprep.subr.bf16.mxu1 %v19143_v53  ;;  %v4330_v61 = vpack.c.bf16 %v4325_v36, %v4324_v59  ;;  %v4326_v53 = vld [vmem:[%s18395_s0 + $0xe8] sm:$0xff]  ;;  %v11153_v36 = vld [vmem:[%s18397_s3 + $0x260] ss:$16 sps:$4 sm:$0xff]  }
 0x26c   :  { %4195 = vmatmul.mubr.bf16.gmra.mrb[100].mxu0 %v19144_v62 }
 0x26d   :  { %4266 = vmatmul.mubr.bf16.gmra.mrb[100].mxu1 %v19144_v62  ;;  %4338 = vmatpush1.bf16.msra.mxu0 %v19145_v52  ;;  %v3043_v47 = vpop.f32.mrb[80].mxu0  ;;  %v3114_v22 = vpop.f32.mrb[80].mxu1  ;;  %v4327_v62 = vld [vmem:[%s18395_s0 + $0xf0] sm:$0xff] }
 0x26e   :  { %4409 = vmatpush1.bf16.msra.mxu1 %v19146_v16  ;;  %4339 = vmatprep.subr.bf16.mxu0 %v19147_v56  ;;  %v3044_v12 = vadd.f32 %v3043_v47, %v2901_v35  ;;  %v3115_v29 = vadd.f32 %v3114_v22, %v2972_v31  ;;  %v3045_v39 = vpop.f32.mrb[81].mxu0  ;;  %v3116_v58 = vpop.f32.mrb[81].mxu1  ;;  %v19153_v35 = vld [vmem:[#allocation101_spill] sm:$0xff]  ;;  %v19154_v31 = vld [vmem:[#allocation102_spill] sm:$0xff] }
 0x26f   :  { %4410 = vmatprep.subr.bf16.mxu1 %v19148_v49  ;;  %4204 = vmatprep.mubr.bf16.mxu0 %v18700_v15  ;;  %v3046_v3 = vadd.f32 %v3045_v39, %v2903_v38  ;;  %v3117_v26 = vadd.f32 %v3116_v58, %v2974_v17  ;;  %v3047_v30 = vpop.f32.mrb[82].mxu0  ;;  %v3118_v34 = vpop.f32.mrb[82].mxu1  ;;  %v19155_v38 = vld [vmem:[#allocation103_spill] sm:$0xff]  ;;  %v19156_v17 = vld [vmem:[#allocation104_spill] sm:$0xff]  ;;  %v4331_v39 = vpack.c.bf16 %v4327_v62, %v4326_v53 }
 0x270   :  { %4275 = vmatprep.mubr.bf16.mxu1 %v18700_v15  ;;  %v3048_v33 = vpop.f32.mrb[83].mxu0  ;;  %v3119_v28 = vpop.f32.mrb[83].mxu1  ;;  %v11156_v53 = vld [vmem:[%s18397_s3 + $0x268] ss:$16 sps:$4 sm:$0xff]   ;;  %v11158_v62 = vld [vmem:[%s18397_s3 + $0x26c] ss:$16 sps:$4 sm:$0xff]  }
 0x271   :  { %4340 = vmatpush1.bf16.msra.mxu0 %v19149_v25  ;;  %v4328_v28 = vld [vmem:[%s18395_s0 + $0xf8] sm:$0xff] }
 0x272   :  { %4411 = vmatpush1.bf16.msra.mxu1 %v19150_v50  ;;  %4341 = vmatprep.subr.bf16.mxu0 %v19151_v45  ;;  %v11135_v45 = vld [vmem:[%s18397_s3 + $0x200] ss:$16 sps:$4 sm:$0xff]  }
 0x273   :  { %4412 = vmatprep.subr.bf16.mxu1 %v19152_v40  ;;  %v11143_v40 = vld [vmem:[%s18397_s3 + $0x224] ss:$16 sps:$4 sm:$0xff]  }
 0x274   :  { %4205 = vmatmul.mubr.bf16.gmra.mrb[104].mxu0 %v14756_v24 }
 0x275   :  { %4276 = vmatmul.mubr.bf16.gmra.mrb[104].mxu1 %v14756_v24  ;;  %4342 = vmatpush1.bf16.msra.mxu0 %v19153_v35  ;;  %v19161_v24 = vld [vmem:[#allocation109_spill] sm:$0xff] }
 0x276   :  { %4413 = vmatpush1.bf16.msra.mxu1 %v19154_v31  ;;  %4343 = vmatprep.subr.bf16.mxu0 %v19155_v38  ;;  %v11144_v35 = vld [vmem:[%s18397_s3 + $0x228] ss:$16 sps:$4 sm:$0xff]   ;;  %v4332_v31 = vpack.c.bf16 %v4328_v28, %v4328_v28  ;;  %v11147_v38 = vld [vmem:[%s18397_s3 + $0x240] ss:$16 sps:$4 sm:$0xff]  }
 0x277   :  { %4414 = vmatprep.subr.bf16.mxu1 %v19156_v17  ;;  %4214 = vmatprep.mubr.bf16.mxu0 %v18700_v15  ;;  %v11149_v17 = vld [vmem:[%s18397_s3 + $0x244] ss:$16 sps:$4 sm:$0xff]  }
 0x278   :  { %4285 = vmatprep.mubr.bf16.mxu1 %v18700_v15 }
 0x279   :  { %4344 = vmatpush1.bf16.msra.mxu0 %v19157_v6  ;;  %v11150_v6 = vld [vmem:[%s18397_s3 + $0x248] ss:$16 sps:$4 sm:$0xff]  }
 0x27a   :  { %4415 = vmatpush1.bf16.msra.mxu1 %v19158_v14  ;;  %4345 = vmatprep.subr.bf16.mxu0 %v19159_v18  ;;  %v11152_v14 = vld [vmem:[%s18397_s3 + $0x24c] ss:$16 sps:$4 sm:$0xff]  }
 0x27b   :  { %4416 = vmatprep.subr.bf16.mxu1 %v19160_v42 }
 0x27c   :  { %4215 = vmatmul.mubr.bf16.gmra.mrb[120].mxu0 %v14795_v21 }
 0x27d   :  { %4286 = vmatmul.mubr.bf16.gmra.mrb[120].mxu1 %v14795_v21  ;;  %4346 = vmatpush1.bf16.msra.mxu0 %v19161_v24  ;;  %v4329_v21 = vpack.c.bf16 %v4323_v57, %v4322_v54 }
 0x27e   :  { %4417 = vmatpush1.bf16.msra.mxu1 %v19162_v11  ;;  %4347 = vmatprep.subr.bf16.mxu0 %v19163_v2 }
 0x27f   :  { %4418 = vmatprep.subr.bf16.mxu1 %v19164_v5  ;;  %4365 = vmatprep.mubr.bf16.mxu0 %v18700_v15 }
 0x280   :  { %4436 = vmatprep.mubr.bf16.mxu1 %v18700_v15 }
 0x281   :  { %4348 = vmatpush1.bf16.msra.mxu0 %v19165_v27 }
 0x282   :  { %4419 = vmatpush1.bf16.msra.mxu1 %v19166_v9 }
 0x284   :  { %4366 = vmatmul.mubr.bf16.vlgmr.msra.gmra.mrb[96].mxu0 %v4329_v21 }
 0x285   :  { %4437 = vmatmul.mubr.bf16.vlgmr.msra.gmra.mrb[96].mxu1 %v4329_v21  ;;  %4375 = vmatprep.mubr.bf16.mxu0 %v18700_v15 }
 0x286   :  { %4446 = vmatprep.mubr.bf16.mxu1 %v18700_v15 }
 0x28c   :  { %4376 = vmatmul.mubr.bf16.gmra.mrb[100].mxu0 %v4330_v61 }
 0x28d   :  { %4447 = vmatmul.mubr.bf16.gmra.mrb[100].mxu1 %v4330_v61  ;;  %4385 = vmatprep.mubr.bf16.mxu0 %v18700_v15  ;;  %v3185_v52 = vpop.f32.mrb[84].mxu0  ;;  %v3256_v16 = vpop.f32.mrb[84].mxu1  ;;  %v11155_v61 = vld [vmem:[%s18397_s3 + $0x264] ss:$16 sps:$4 sm:$0xff]  }
 0x28e   :  { %4456 = vmatprep.mubr.bf16.mxu1 %v18700_v15  ;;  %v3287_v56 = vadd.f32 %v3185_v52, %v3044_v12  ;;  %v3289_v47 = vadd.f32 %v3256_v16, %v3115_v29  ;;  %v3187_v22 = vpop.f32.mrb[85].mxu0  ;;  %v3258_v49 = vpop.f32.mrb[85].mxu1  ;;  %v11137_v12 = vld [vmem:[%s18397_s3 + $0x204] ss:$16 sps:$4 sm:$0xff]   ;;  %v11138_v29 = vld [vmem:[%s18397_s3 + $0x208] ss:$16 sps:$4 sm:$0xff]  }
 0x28f   :  { %v3288_v58 = vadd.f32 %v3187_v22, %v3046_v3  ;;  %v3290_v30 = vadd.f32 %v3258_v49, %v3117_v26  ;;  %v3189_v34 = vpop.f32.mrb[86].mxu0  ;;  %v3260_v25 = vpop.f32.mrb[86].mxu1  ;;  %v11140_v3 = vld [vmem:[%s18397_s3 + $0x20c] ss:$16 sps:$4 sm:$0xff]   ;;  %5062 = vmatprep.subr.bf16.mxu0 %v11137_v12  ;;  %v11141_v26 = vld [vmem:[%s18397_s3 + $0x220] ss:$16 sps:$4 sm:$0xff]  }
 0x290   :  { %v3190_v50 = vpop.f32.mrb[87].mxu0  ;;  %v3261_v33 = vpop.f32.mrb[87].mxu1  ;;  %5123 = vmatprep.subr.bf16.mxu1 %v11140_v3  ;;  %5063 = vmatpush1.bf16.msra.mxu0 %v11135_v45  ;;  %v11161_v52 = vld [vmem:[%s18397_s3 + $0x284] ss:$16 sps:$4 sm:$0xff]   ;;  %v11164_v16 = vld [vmem:[%s18397_s3 + $0x28c] ss:$16 sps:$4 sm:$0xff]  }
 0x291   :  { %5124 = vmatpush1.bf16.msra.mxu1 %v11138_v29  ;;  %5064 = vmatprep.subr.bf16.mxu0 %v11143_v40  ;;  %v11167_v22 = vld [vmem:[%s18397_s3 + $0x2a4] ss:$16 sps:$4 sm:$0xff]   ;;  %v11165_v33 = vld [vmem:[%s18397_s3 + $0x2a0] ss:$16 sps:$4 sm:$0xff]   ;;  %v11168_v12 = vld [vmem:[%s18397_s3 + $0x2a8] ss:$16 sps:$4 sm:$0xff]  }
 0x292   :  { %v11173_v29 = vld [vmem:[%s18397_s3 + $0x2c4] ss:$16 sps:$4 sm:$0xff]   ;;  %v11176_v3 = vld [vmem:[%s18397_s3 + $0x2cc] ss:$16 sps:$4 sm:$0xff]   ;;  %v11174_v40 = vld [vmem:[%s18397_s3 + $0x2c8] ss:$16 sps:$4 sm:$0xff]  }
 0x294   :  { %4386 = vmatmul.mubr.bf16.gmra.mrb[104].mxu0 %v4331_v39 }
 0x295   :  { %4457 = vmatmul.mubr.bf16.gmra.mrb[104].mxu1 %v4331_v39  ;;  %4395 = vmatprep.mubr.bf16.mxu0 %v18700_v15 }
 0x296   :  { %4466 = vmatprep.mubr.bf16.mxu1 %v18700_v15  ;;  %v11146_v15 = vld [vmem:[%s18397_s3 + $0x22c] ss:$16 sps:$4 sm:$0xff]   ;;  %5065 = vmatpush1.bf16.msra.mxu0 %v11141_v26  ;;  %v11171_v26 = vld [vmem:[%s18397_s3 + $0x2c0] ss:$16 sps:$4 sm:$0xff]  }
 0x297   :  { %5125 = vmatprep.subr.bf16.mxu1 %v11146_v15  ;;  %5066 = vmatprep.subr.bf16.mxu0 %v11149_v17  ;;  %v11182_v17 = vld [vmem:[%s18397_s3 + $0x2ec] ss:$16 sps:$4 sm:$0xff]  }
 0x298   :  { %5126 = vmatpush1.bf16.msra.mxu1 %v11144_v35  ;;  %v11179_v35 = vld [vmem:[%s18397_s3 + $0x2e4] ss:$16 sps:$4 sm:$0xff]  }
 0x299   :  { %5127 = vmatprep.subr.bf16.mxu1 %v11152_v14 }
 0x29a   :  { %5067 = vmatpush1.bf16.msra.mxu0 %v11147_v38  ;;  %v11177_v38 = vld [vmem:[%s18397_s3 + $0x2e0] ss:$16 sps:$4 sm:$0xff]  }
 0x29b   :  { %5068 = vmatprep.subr.bf16.mxu0 %v11155_v61  ;;  %v11191_v61 = vld [vmem:[%s18397_s3 + $0x324] ss:$16 sps:$4 sm:$0xff]  }
 0x29c   :  { %4396 = vmatmul.mubr.bf16.gmra.mrb[124].mxu0 %v4332_v31  ;;  %5128 = vmatpush1.bf16.msra.mxu1 %v11150_v6 }
 0x29d   :  { %4467 = vmatmul.mubr.bf16.gmra.mrb[124].mxu1 %v4332_v31  ;;  %5129 = vmatprep.subr.bf16.mxu1 %v11158_v62 }
 0x29e   :  { %5069 = vmatpush1.bf16.msra.mxu0 %v11153_v36  ;;  %v11186_v36 = vld [vmem:[%s18397_s3 + $0x308] ss:$16 sps:$4 sm:$0xff]  }
 0x29f   :  { %5070 = vmatprep.subr.bf16.mxu0 %v11161_v52 }
 0x2a0   :  { %5130 = vmatpush1.bf16.msra.mxu1 %v11156_v53  ;;  %v11194_v53 = vld [vmem:[%s18397_s3 + $0x32c] ss:$16 sps:$4 sm:$0xff]  }
 0x2a1   :  { %5131 = vmatprep.subr.bf16.mxu1 %v11164_v16  ;;  %v11189_v16 = vld [vmem:[%s18397_s3 + $0x320] ss:$16 sps:$4 sm:$0xff]  }
 0x2ad   :  { %v3355_v18 = vpop.f32.mrb[88].mxu0  ;;  %v3426_v42 = vpop.f32.mrb[88].mxu1 }
 0x2ae   :  { %v15410_v24 = vadd.f32 %v3355_v18, %v3287_v56  ;;  %v15412_v54 = vadd.f32 %v3426_v42, %v3289_v47  ;;  %v3357_v57 = vpop.f32.mrb[89].mxu0  ;;  %v3428_v11 = vpop.f32.mrb[89].mxu1  ;;  %v11159_v56 = vld [vmem:[%s18397_s3 + $0x280] ss:$16 sps:$4 sm:$0xff]   ;;  %v11162_v47 = vld [vmem:[%s18397_s3 + $0x288] ss:$16 sps:$4 sm:$0xff]  }
 0x2af   :  { %v15414_v2 = vadd.f32 %v3357_v57, %v3288_v58  ;;  %v15416_v5 = vadd.f32 %v3428_v11, %v3290_v30  ;;  %v3359_v21 = vpop.f32.mrb[90].mxu0  ;;  %v3430_v27 = vpop.f32.mrb[90].mxu1  ;;  %v11170_v58 = vld [vmem:[%s18397_s3 + $0x2ac] ss:$16 sps:$4 sm:$0xff]   ;;  %5071 = vmatpush1.bf16.msra.mxu0 %v11159_v56  ;;  %5132 = vmatpush1.bf16.msra.mxu1 %v11162_v47  ;;  %v11180_v18 = vld [vmem:[%s18397_s3 + $0x2e8] ss:$16 sps:$4 sm:$0xff]  }
 0x2b0   :  { %v3360_v9 = vpop.f32.mrb[91].mxu0  ;;  %v3431_v59 = vpop.f32.mrb[91].mxu1  ;;  %5072 = vmatprep.subr.bf16.mxu0 %v11167_v22  ;;  %5133 = vmatprep.subr.bf16.mxu1 %v11170_v58  ;;  %v11185_v42 = vld [vmem:[%s18397_s3 + $0x304] ss:$16 sps:$4 sm:$0xff]   ;;  %v11192_v22 = vld [vmem:[%s18397_s3 + $0x328] ss:$16 sps:$4 sm:$0xff]  }
 0x2b1   :  { %v11188_v9 = vld [vmem:[%s18397_s3 + $0x30c] ss:$16 sps:$4 sm:$0xff]   ;;  %v11183_v59 = vld [vmem:[%s18397_s3 + $0x300] ss:$16 sps:$4 sm:$0xff]   ;;  %v11197_v58 = vld [vmem:[%s18397_s3 + $0x344] ss:$16 sps:$4 sm:$0xff]  }
 0x2b3   :  { %5073 = vmatpush1.bf16.msra.mxu0 %v11165_v33  ;;  %5134 = vmatpush1.bf16.msra.mxu1 %v11168_v12 }
 0x2b4   :  { %5074 = vmatprep.subr.bf16.mxu0 %v11173_v29  ;;  %5135 = vmatprep.subr.bf16.mxu1 %v11176_v3 }
 0x2b5   :  { %v15445_v49 = vpop.f32.mrb[64].mxu0  ;;  %v15447_v39 = vpop.f32.mrb[64].mxu1 }
 0x2b6   :  { %v15452_v30 = vpop.f32.mrb[65].mxu0  ;;  %v15454_v34 = vpop.f32.mrb[65].mxu1 }
 0x2b7   :  { %v15456_v25 = vpop.f32.mrb[66].mxu0  ;;  %v15458_v50 = vpop.f32.mrb[66].mxu1  ;;  %5075 = vmatpush1.bf16.msra.mxu0 %v11171_v26  ;;  %5136 = vmatpush1.bf16.msra.mxu1 %v11174_v40  ;;  %v11200_v26 = vld [vmem:[%s18397_s3 + $0x34c] ss:$16 sps:$4 sm:$0xff]   ;;  %v11195_v40 = vld [vmem:[%s18397_s3 + $0x340] ss:$16 sps:$4 sm:$0xff]  }
 0x2b8   :  { %v15463_v28 = vpop.f32.mrb[67].mxu0  ;;  %v15465_v45 = vpop.f32.mrb[67].mxu1  ;;  %5076 = vmatprep.subr.bf16.mxu0 %v11179_v35  ;;  %5137 = vmatprep.subr.bf16.mxu1 %v11182_v17  ;;  %v11198_v35 = vld [vmem:[%s18397_s3 + $0x348] ss:$16 sps:$4 sm:$0xff]  }
 0x2bb   :  { %5077 = vmatpush1.bf16.msra.mxu0 %v11177_v38  ;;  %5138 = vmatpush1.bf16.msra.mxu1 %v11180_v18 }
 0x2bc   :  { %5078 = vmatprep.subr.bf16.mxu0 %v11185_v42  ;;  %5139 = vmatprep.subr.bf16.mxu1 %v11188_v9 }
 0x2bd   :  { %v15485_v31 = vpop.f32.mrb[68].mxu0  ;;  %v15487_v15 = vpop.f32.mrb[68].mxu1 }
 0x2be   :  { %v15495_v6 = vpop.f32.mrb[69].mxu0  ;;  %v15497_v14 = vpop.f32.mrb[69].mxu1 }
 0x2bf   :  { %v15505_v57 = vpop.f32.mrb[70].mxu0  ;;  %v15507_v11 = vpop.f32.mrb[70].mxu1  ;;  %5079 = vmatpush1.bf16.msra.mxu0 %v11183_v59  ;;  %5140 = vmatpush1.bf16.msra.mxu1 %v11186_v36 }
 0x2c0   :  { %v15509_v21 = vpop.f32.mrb[71].mxu0  ;;  %v15511_v27 = vpop.f32.mrb[71].mxu1  ;;  %5080 = vmatprep.subr.bf16.mxu0 %v11191_v61  ;;  %5141 = vmatprep.subr.bf16.mxu1 %v11194_v53 }
 0x2c3   :  { %5081 = vmatpush1.bf16.msra.mxu0 %v11189_v16  ;;  %5142 = vmatpush1.bf16.msra.mxu1 %v11192_v22 }
 0x2c4   :  { %5082 = vmatprep.subr.bf16.mxu0 %v11197_v58  ;;  %5143 = vmatprep.subr.bf16.mxu1 %v11200_v26  ;;  %v11207_v26 = vld [vmem:[%s18397_s3 + $0x380] ss:$16 sps:$4 sm:$0xff]  }
 0x2c5   :  { %v15528_v62 = vpop.f32.mrb[72].mxu0  ;;  %v15530_v52 = vpop.f32.mrb[72].mxu1 }
 0x2c6   :  { %v15535_v56 = vpop.f32.mrb[73].mxu0  ;;  %v15537_v47 = vpop.f32.mrb[73].mxu1 }
 0x2c7   :  { %v15545_v33 = vpop.f32.mrb[74].mxu0  ;;  %v15547_v12 = vpop.f32.mrb[74].mxu1  ;;  %5083 = vmatpush1.bf16.msra.mxu0 %v11195_v40  ;;  %5144 = vmatpush1.bf16.msra.mxu1 %v11198_v35  ;;  %v11209_v40 = vld [vmem:[%s18397_s3 + $0x384] ss:$16 sps:$4 sm:$0xff]   ;;  %v11210_v35 = vld [vmem:[%s18397_s3 + $0x388] ss:$16 sps:$4 sm:$0xff]  }
 0x2c8   :  { %v15549_v29 = vpop.f32.mrb[75].mxu0  ;;  %v15551_v3 = vpop.f32.mrb[75].mxu1 }
 0x2cd   :  { %v3536_v38 = vpop.f32.mrb[92].mxu0  ;;  %v3607_v17 = vpop.f32.mrb[92].mxu1 }
 0x2ce   :  { %v15563_v18 = vadd.f32 %v3536_v38, %v15410_v24  ;;  %v15566_v42 = vadd.f32 %v3607_v17, %v15412_v54  ;;  %v3538_v9 = vpop.f32.mrb[93].mxu0  ;;  %v3609_v59 = vpop.f32.mrb[93].mxu1  ;;  %v11201_v24 = vld [vmem:[%s18397_s3 + $0x360] ss:$16 sps:$4 sm:$0xff]   ;;  %v11203_v54 = vld [vmem:[%s18397_s3 + $0x364] ss:$16 sps:$4 sm:$0xff]  }
 0x2cf   :  { %v15569_v36 = vadd.f32 %v3538_v9, %v15414_v2  ;;  %v15572_v61 = vadd.f32 %v3609_v59, %v15416_v5  ;;  %v3540_v53 = vpop.f32.mrb[94].mxu0  ;;  %v3611_v16 = vpop.f32.mrb[94].mxu1  ;;  %v11204_v2 = vld [vmem:[%s18397_s3 + $0x368] ss:$16 sps:$4 sm:$0xff]   ;;  %v11206_v5 = vld [vmem:[%s18397_s3 + $0x36c] ss:$16 sps:$4 sm:$0xff]   ;;  %5084 = vmatprep.subr.bf16.mxu0 %v11203_v54 }
 0x2d0   :  { %v3541_v22 = vpop.f32.mrb[95].mxu0  ;;  %v3612_v58 = vpop.f32.mrb[95].mxu1  ;;  %5145 = vmatprep.subr.bf16.mxu1 %v11206_v5  ;;  %5085 = vmatpush1.bf16.msra.mxu0 %v11201_v24  ;;  %v11212_v38 = vld [vmem:[%s18397_s3 + $0x38c] ss:$16 sps:$4 sm:$0xff]   ;;  %v11215_v17 = vld [vmem:[%s18397_s3 + $0x3a4] ss:$16 sps:$4 sm:$0xff]  }
 0x2d1   :  { %5146 = vmatpush1.bf16.msra.mxu1 %v11204_v2  ;;  %5086 = vmatprep.subr.bf16.mxu0 %v11209_v40  ;;  %v11218_v9 = vld [vmem:[%s18397_s3 + $0x3ac] ss:$16 sps:$4 sm:$0xff]   ;;  %v11213_v59 = vld [vmem:[%s18397_s3 + $0x3a0] ss:$16 sps:$4 sm:$0xff]   ;;  %v11216_v53 = vld [vmem:[%s18397_s3 + $0x3a8] ss:$16 sps:$4 sm:$0xff]  }
 0x2d2   :  { %5147 = vmatprep.subr.bf16.mxu1 %v11212_v38  ;;  %v11221_v16 = vld [vmem:[%s18397_s3 + $0x3c4] ss:$16 sps:$4 sm:$0xff]   ;;  %v11224_v22 = vld [vmem:[%s18397_s3 + $0x3cc] ss:$16 sps:$4 sm:$0xff]   ;;  %v11219_v58 = vld [vmem:[%s18397_s3 + $0x3c0] ss:$16 sps:$4 sm:$0xff]  }
 0x2d3   :  { %v11222_v24 = vld [vmem:[%s18397_s3 + $0x3c8] ss:$16 sps:$4 sm:$0xff]   ;;  %v11227_v54 = vld [vmem:[%s18397_s3 + $0x3e4] ss:$16 sps:$4 sm:$0xff]   ;;  %v11230_v2 = vld [vmem:[%s18397_s3 + $0x3ec] ss:$16 sps:$4 sm:$0xff]  }
 0x2d4   :  { %5087 = vmatpush1.bf16.msra.mxu0 %v11207_v26  ;;  %v11225_v5 = vld [vmem:[%s18397_s3 + $0x3e0] ss:$16 sps:$4 sm:$0xff]   ;;  %v11228_v26 = vld [vmem:[%s18397_s3 + $0x3e8] ss:$16 sps:$4 sm:$0xff]   ;;  %v11233_v40 = vld [vmem:[%s18397_s3 + $0x4] ss:$16 sps:$4 sm:$0xff]  }
 0x2d5   :  { %5148 = vmatpush1.bf16.msra.mxu1 %v11210_v35  ;;  %5088 = vmatprep.subr.bf16.mxu0 %v11215_v17  ;;  %v11236_v35 = vld [vmem:[%s18397_s3 + $0xc] ss:$16 sps:$4 sm:$0xff]  }
 0x2d6   :  { %5149 = vmatprep.subr.bf16.mxu1 %v11218_v9 }
 0x2d8   :  { %5089 = vmatpush1.bf16.msra.mxu0 %v11213_v59 }
 0x2d9   :  { %5150 = vmatpush1.bf16.msra.mxu1 %v11216_v53  ;;  %5090 = vmatprep.subr.bf16.mxu0 %v11221_v16 }
 0x2da   :  { %5151 = vmatprep.subr.bf16.mxu1 %v11224_v22 }
 0x2dc   :  { %5091 = vmatpush1.bf16.msra.mxu0 %v11219_v58 }
 0x2dd   :  { %5152 = vmatpush1.bf16.msra.mxu1 %v11222_v24  ;;  %5092 = vmatprep.subr.bf16.mxu0 %v11227_v54 }
 0x2de   :  { %5153 = vmatprep.subr.bf16.mxu1 %v11230_v2 }
 0x2e0   :  { %5093 = vmatpush1.bf16.msra.mxu0 %v11225_v5 }
 0x2e1   :  { %5154 = vmatpush1.bf16.msra.mxu1 %v11228_v26  ;;  %5504 = vmatprep.subr.bf16.mxu0 %v11233_v40 }
 0x2e2   :  { %5565 = vmatprep.subr.bf16.mxu1 %v11236_v35 }
 0x2ed   :  { %v3762_v38 = vpop.f32.mrb[108].mxu0  ;;  %v3833_v17 = vpop.f32.mrb[108].mxu1 }
 0x2ee   :  { %v3764_v9 = vpop.f32.mrb[109].mxu0  ;;  %v3835_v59 = vpop.f32.mrb[109].mxu1 }
 0x2ef   :  { %v3766_v53 = vpop.f32.mrb[110].mxu0  ;;  %v3837_v16 = vpop.f32.mrb[110].mxu1 }
 0x2f0   :  { %v3767_v22 = vpop.f32.mrb[111].mxu0  ;;  %v3838_v58 = vpop.f32.mrb[111].mxu1 }
 0x30f   :  { %v3904_v24 = vpop.f32.mrb[112].mxu0 }
 0x310   :  { %v3975_v54 = vpop.f32.mrb[112].mxu1  ;;  %v3905_v2 = vadd.f32 %v3904_v24, %v3762_v38  ;;  %v3906_v26 = vpop.f32.mrb[113].mxu0 }
 0x311   :  { %v3976_v5 = vadd.f32 %v3975_v54, %v3833_v17  ;;  %v3977_v48 = vpop.f32.mrb[113].mxu1  ;;  %v3907_v63 = vadd.f32 %v3906_v26, %v3764_v9  ;;  %v3908_v55 = vpop.f32.mrb[114].mxu0  ;;  %v15642_v9 = vadd.f32 %v15445_v49, %v14856_v0 }
 0x312   :  { %v3978_v60 = vadd.f32 %v3977_v48, %v3835_v59  ;;  %v3979_v20 = vpop.f32.mrb[114].mxu1  ;;  %v3909_v40 = vpop.f32.mrb[115].mxu0  ;;  %v15646_v48 = vadd.f32 %v15447_v39, %v14866_v23  ;;  %v15666_v55 = vadd.f32 %v15458_v50, %v14866_v23  ;;  %v15670_v39 = vadd.f32 %v15463_v28, %v14872_v10 }
 0x313   :  { %v3980_v35 = vpop.f32.mrb[115].mxu1  ;;  %v15684_v50 = vadd.f32 %v15487_v15, %v14866_v23  ;;  %v15688_v28 = vadd.f32 %v15495_v6, %v14872_v10  ;;  %v15704_v15 = vadd.f32 %v15507_v11, %v14866_v23  ;;  %v15722_v11 = vadd.f32 %v15530_v52, %v14866_v23 }
 0x314   :  { %v15710_v35 = vadd.f32 %v15509_v21, %v14872_v10  ;;  %v3675_v21 = vmax.f32 %v15670_v39, 0.0  ;;  %v15736_v52 = vadd.f32 %v15537_v47, %v14876_v1 }
 0x32f   :  { %v4046_v51 = vpop.f32.mrb[116].mxu0 }
 0x330   :  { %v4148_v8 = vadd.f32 %v4046_v51, %v3905_v2  ;;  %v4117_v44 = vpop.f32.mrb[116].mxu1  ;;  %v4048_v13 = vpop.f32.mrb[117].mxu0  ;;  %v15650_v51 = vadd.f32 %v15452_v30, %v14872_v10  ;;  %v15674_v30 = vadd.f32 %v15465_v45, %v14876_v1 }
 0x331   :  { %v4150_v53 = vadd.f32 %v4117_v44, %v3976_v5  ;;  %v4149_v16 = vadd.f32 %v4048_v13, %v3907_v63  ;;  %v4119_v22 = vpop.f32.mrb[117].mxu1  ;;  %v4050_v58 = vpop.f32.mrb[118].mxu0  ;;  %v15654_v44 = vadd.f32 %v15454_v34, %v14876_v1  ;;  %v15662_v63 = vadd.f32 %v15456_v25, %v14856_v0 }
 0x332   :  { %v4151_v19 = vadd.f32 %v4119_v22, %v3978_v60  ;;  %v4121_v46 = vpop.f32.mrb[118].mxu1  ;;  %v4051_v38 = vpop.f32.mrb[119].mxu0  ;;  %v3672_v60 = vmax.f32 %v15646_v48, 0.0  ;;  %v3671_v13 = vmax.f32 %v15650_v51, 0.0  ;;  %v15678_v34 = vadd.f32 %v15485_v31, %v14856_v0 }
 0x333   :  { %v4122_v17 = vpop.f32.mrb[119].mxu1  ;;  %v3670_v46 = vmax.f32 %v15642_v9, 0.0  ;;  %v3673_v20 = vmax.f32 %v15654_v44, 0.0  ;;  %v15700_v31 = vadd.f32 %v15505_v57, %v14856_v0  ;;  %v15718_v57 = vadd.f32 %v15528_v62, %v14856_v0 }
 0x334   :  { %v15729_v22 = vadd.f32 %v15535_v56, %v14872_v10  ;;  %v15786_v44 = vadd.f32 %v15563_v18, %v14856_v0 }
 0x34f   :  { %v4216_v49 = vpop.f32.mrb[120].mxu0 }
 0x350   :  { %v15680_v59 = vadd.f32 %v4216_v49, %v4148_v8  ;;  %v4287_v25 = vpop.f32.mrb[120].mxu1  ;;  %v4218_v24 = vpop.f32.mrb[121].mxu0  ;;  %v15696_v8 = vadd.f32 %v15497_v14, %v14876_v1  ;;  %v15714_v14 = vadd.f32 %v15511_v27, %v14876_v1  ;;  %v3677_v27 = vmax.f32 %v15674_v30, 0.0 }
 0x351   :  { %v15690_v54 = vadd.f32 %v4287_v25, %v4150_v53  ;;  %v15692_v45 = vadd.f32 %v4218_v24, %v4149_v16  ;;  %v4289_v2 = vpop.f32.mrb[121].mxu1  ;;  %v4220_v5 = vpop.f32.mrb[122].mxu0  ;;  %v3674_v53 = vmax.f32 %v15662_v63, 0.0  ;;  %v3676_v16 = vmax.f32 %v15666_v55, 0.0 }
 0x352   :  { %v15706_v6 = vadd.f32 %v4289_v2, %v4151_v19  ;;  %v4291_v26 = vpop.f32.mrb[122].mxu1  ;;  %v4221_v40 = vpop.f32.mrb[123].mxu0  ;;  %v15749_v24 = vadd.f32 %v15545_v33, %v14856_v0  ;;  %v15753_v2 = vadd.f32 %v15547_v12, %v14866_v23  ;;  %v15759_v30 = vadd.f32 %v15549_v29, %v14872_v10 }
 0x353   :  { %v4292_v19 = vpop.f32.mrb[123].mxu1  ;;  %v15765_v12 = vadd.f32 %v15551_v3, %v14876_v1 }
 0x354   :  { %v3691_v48 = vmax.f32 %v15759_v30, 0.0  ;;  %v11249_v30 = vld [vmem:[%s18397_s3 + $0x60] ss:$16 sps:$4 sm:$0xff]  }
 0x357   :  { %v4367_v25 = vpop.f32.mrb[96].mxu0 }
 0x358   :  { %v4503_v5 = vadd.f32 %v4367_v25, %v14856_v0  ;;  %v4438_v26 = vpop.f32.mrb[96].mxu1  ;;  %v4369_v40 = vpop.f32.mrb[97].mxu0 }
 0x359   :  { %v4505_v47 = vadd.f32 %v4438_v26, %v14866_v23  ;;  %v4504_v39 = vadd.f32 %v4369_v40, %v14872_v10  ;;  %v4440_v33 = vpop.f32.mrb[97].mxu1  ;;  %v4371_v49 = vpop.f32.mrb[98].mxu0 }
 0x35a   :  { %v4531_v56 = vmax.f32 %v4503_v5, 0.0  ;;  %v4506_v25 = vadd.f32 %v4440_v33, %v14876_v1  ;;  %v4507_v55 = vadd.f32 %v4371_v49, %v14856_v0  ;;  %v4442_v19 = vpop.f32.mrb[98].mxu1  ;;  %v4373_v63 = vpop.f32.mrb[99].mxu0 }
 0x35b   :  { %v4533_v17 = vmax.f32 %v4505_v47, 0.0  ;;  %v4532_v29 = vmax.f32 %v4504_v39, 0.0  ;;  %v4509_v38 = vadd.f32 %v4442_v19, %v14866_v23  ;;  %v4508_v26 = vadd.f32 %v4373_v63, %v14872_v10  ;;  %v4444_v40 = vpop.f32.mrb[99].mxu1 }
 0x35c   :  { %v4559_v58 = vmax.f32 %v3670_v46, %v4531_v56  ;;  %v4534_v62 = vmax.f32 %v4506_v25, 0.0  ;;  %v4535_v3 = vmax.f32 %v4507_v55, 0.0  ;;  %v4510_v5 = vadd.f32 %v4444_v40, %v14876_v1 }
 0x35d   :  { %v4561_v33 = vmax.f32 %v3672_v60, %v4533_v17  ;;  %v4560_v49 = vmax.f32 %v3671_v13, %v4532_v29  ;;  %v4537_v47 = vmax.f32 %v4509_v38, 0.0  ;;  %v4536_v39 = vmax.f32 %v4508_v26, 0.0 }
 0x35e   :  { %v3690_v19 = vmax.f32 %v15749_v24, 0.0  ;;  %v4562_v63 = vmax.f32 %v3673_v20, %v4534_v62  ;;  %v4563_v7 = vmax.f32 %v3674_v53, %v4535_v3  ;;  %v4538_v9 = vmax.f32 %v4510_v5, 0.0 }
 0x35f   :  { %v3692_v46 = vmax.f32 %v15753_v2, 0.0  ;;  %v4587_v55 = vmax.f32 %v4559_v58, %v4561_v33  ;;  %v4565_v56 = vmax.f32 %v3676_v16, %v4537_v47  ;;  %v4564_v25 = vmax.f32 %v3675_v21, %v4536_v39  ;;  %v4377_v40 = vpop.f32.mrb[100].mxu0 }
 0x360   :  { %v4588_v60 = vmax.f32 %v4560_v49, %v4562_v63  ;;  %v4566_v51 = vmax.f32 %v3677_v27, %v4538_v9  ;;  %v4511_v13 = vadd.f32 %v4377_v40, %v14856_v0  ;;  %v4448_v38 = vpop.f32.mrb[100].mxu1  ;;  %v4379_v17 = vpop.f32.mrb[101].mxu0  ;;  %v19167_v63 = vmax.f32 %v15678_v34, 0.0  ;;  %v11231_v40 = vld [vmem:[%s18397_s3] ss:$16 sps:$4 sm:$0xff]  }
 0x361   :  { %v4589_v20 = vmax.f32 %v4563_v7, %v4565_v56  ;;  %v4513_v53 = vadd.f32 %v4448_v38, %v14866_v23  ;;  %v4512_v62 = vadd.f32 %v4379_v17, %v14872_v10  ;;  %v4450_v16 = vpop.f32.mrb[101].mxu1  ;;  %v4381_v21 = vpop.f32.mrb[102].mxu0  ;;  %v19169_v38 = vmax.f32 %v15688_v28, 0.0  ;;  %v11242_v28 = vld [vmem:[%s18397_s3 + $0x2c] ss:$16 sps:$4 sm:$0xff]  }
 0x362   :  { %v4590_v58 = vmax.f32 %v4564_v25, %v4566_v51  ;;  %v4539_v29 = vmax.f32 %v4511_v13, 0.0  ;;  %v4514_v26 = vadd.f32 %v4450_v16, %v14876_v1  ;;  %v4515_v27 = vadd.f32 %v4381_v21, %v14856_v0  ;;  %v4452_v3 = vpop.f32.mrb[102].mxu1  ;;  %v4383_v5 = vpop.f32.mrb[103].mxu0 }
 0x363   :  { %v15792_v33 = vpack.c.bf16 %v4589_v20, %v4587_v55  ;;  %v4541_v49 = vmax.f32 %v4513_v53, 0.0  ;;  %v4540_v18 = vmax.f32 %v4512_v62, 0.0  ;;  %v4517_v7 = vadd.f32 %v4452_v3, %v14866_v23  ;;  %v4454_v47 = vpop.f32.mrb[103].mxu1  ;;  %v11234_v55 = vld [vmem:[%s18397_s3 + $0x8] ss:$16 sps:$4 sm:$0xff]  }
 0x364   :  { %v15795_v39 = vpack.c.bf16 %v4590_v58, %v4588_v60  ;;  %v4567_v9 = vmax.f32 %v19167_v63, %v4539_v29  ;;  %v4542_v56 = vmax.f32 %v4514_v26, 0.0  ;;  %v4543_v25 = vmax.f32 %v4515_v27, 0.0  ;;  %v11239_v53 = vld [vmem:[%s18397_s3 + $0x24] ss:$16 sps:$4 sm:$0xff]  }
 0x365   :  { %v19168_v51 = vmax.f32 %v15684_v50, 0.0  ;;  %v4568_v60 = vmax.f32 %v19169_v38, %v4540_v18  ;;  %v4545_v17 = vmax.f32 %v4517_v7, 0.0  ;;  %v4516_v34 = vadd.f32 %v4383_v5, %v14872_v10  ;;  %v11237_v18 = vld [vmem:[%s18397_s3 + $0x20] ss:$16 sps:$4 sm:$0xff]  }
 0x366   :  { %v3693_v62 = vmax.f32 %v15765_v12, 0.0  ;;  %v19170_v16 = vmax.f32 %v15696_v8, 0.0  ;;  %v19171_v29 = vmax.f32 %v15700_v31, 0.0  ;;  %v4518_v50 = vadd.f32 %v4454_v47, %v14876_v1  ;;  %5094 = vmatprep.mubr.bf16.mxu0 %v15795_v39  ;;  %5155 = vmatprep.mubr.bf16.mxu1 %v15795_v39 }
 0x367   :  { %v4569_v13 = vmax.f32 %v19168_v51, %v4541_v49  ;;  %v15826_v27 = vadd.f32 %v15566_v42, %v14866_v23  ;;  %v19172_v8 = vmax.f32 %v15704_v15, 0.0  ;;  %v4544_v31 = vmax.f32 %v4516_v34, 0.0  ;;  %5095 = vmatmul.mubr.bf16.vlgmr.msra.gmra.mrb[128].mxu0 %v15792_v33  ;;  %5156 = vmatmul.mubr.bf16.vlgmr.msra.gmra.mrb[128].mxu1 %v15792_v33  ;;  %v4387_v49 = vpop.f32.mrb[104].mxu0 }
 0x368   :  { %v4570_v21 = vmax.f32 %v19170_v16, %v4542_v56  ;;  %v4571_v26 = vmax.f32 %v19171_v29, %v4543_v25  ;;  %v15837_v7 = vadd.f32 %v15569_v36, %v14872_v10  ;;  %v4546_v47 = vmax.f32 %v4518_v50, 0.0  ;;  %5505 = vmatpush1.bf16.msra.mxu0 %v11231_v40  ;;  %5566 = vmatpush1.bf16.msra.mxu1 %v11234_v55  ;;  %v4458_v63 = vpop.f32.mrb[104].mxu1  ;;  %v11240_v56 = vld [vmem:[%s18397_s3 + $0x28] ss:$16 sps:$4 sm:$0xff]   ;;  %v11245_v55 = vld [vmem:[%s18397_s3 + $0x44] ss:$16 sps:$4 sm:$0xff]  }
 0x369   :  { %v4591_v3 = vmax.f32 %v4567_v9, %v4569_v13  ;;  %v4573_v5 = vmax.f32 %v19172_v8, %v4545_v17  ;;  %v4519_v15 = vadd.f32 %v4387_v49, %v14856_v0  ;;  %v4389_v9 = vpop.f32.mrb[105].mxu0  ;;  %v19173_v13 = vmax.f32 %v15710_v35, 0.0  ;;  %5506 = vmatprep.subr.bf16.mxu0 %v11239_v53  ;;  %v11248_v17 = vld [vmem:[%s18397_s3 + $0x4c] ss:$16 sps:$4 sm:$0xff]   ;;  %5567 = vmatprep.subr.bf16.mxu1 %v11242_v28 }
 0x36a   :  { %v4592_v42 = vmax.f32 %v4568_v60, %v4570_v21  ;;  %v4521_v38 = vadd.f32 %v4458_v63, %v14866_v23  ;;  %v4460_v60 = vpop.f32.mrb[105].mxu1  ;;  %v4391_v40 = vpop.f32.mrb[106].mxu0  ;;  %v19174_v34 = vmax.f32 %v15714_v14, 0.0  ;;  %v4520_v21 = vadd.f32 %v4389_v9, %v14872_v10 }
 0x36b   :  { %v15843_v25 = vpack.c.bf16 %v4591_v3, %v4589_v20  ;;  %v15845_v51 = vmax.f32 %v4571_v26, %v4573_v5  ;;  %v4572_v36 = vmax.f32 %v19173_v13, %v4544_v31  ;;  %v4547_v35 = vmax.f32 %v4519_v15, 0.0  ;;  %v4462_v29 = vpop.f32.mrb[106].mxu1  ;;  %v4393_v26 = vpop.f32.mrb[107].mxu0 }
 0x36c   :  { %v15856_v20 = vpack.c.bf16 %v4592_v42, %v4590_v58  ;;  %v4574_v16 = vmax.f32 %v19174_v34, %v4546_v47  ;;  %v4549_v50 = vmax.f32 %v4521_v38, 0.0  ;;  %v4522_v8 = vadd.f32 %v4460_v60, %v14876_v1  ;;  %v4464_v31 = vpop.f32.mrb[107].mxu1  ;;  %5507 = vmatpush1.bf16.msra.mxu0 %v11237_v18  ;;  %5568 = vmatpush1.bf16.msra.mxu1 %v11240_v56  ;;  %v11246_v18 = vld [vmem:[%s18397_s3 + $0x48] ss:$16 sps:$4 sm:$0xff]  }
 0x36d   :  { %v15862_v53 = vpack.c.bf16 %v15845_v51, %v4591_v3  ;;  %v4523_v5 = vadd.f32 %v4391_v40, %v14856_v0  ;;  %v19175_v14 = vmax.f32 %v15718_v57, 0.0  ;;  %v4548_v47 = vmax.f32 %v4520_v21, 0.0  ;;  %5508 = vmatprep.subr.bf16.mxu0 %v11245_v55  ;;  %5569 = vmatprep.subr.bf16.mxu1 %v11248_v17 }
 0x36e   :  { %v15866_v58 = vmax.f32 %v4572_v36, %v4574_v16  ;;  %v4525_v15 = vadd.f32 %v4462_v29, %v14866_v23  ;;  %v19176_v28 = vmax.f32 %v15722_v11, 0.0  ;;  %v4550_v63 = vmax.f32 %v4522_v8, 0.0  ;;  %v11243_v11 = vld [vmem:[%s18397_s3 + $0x40] ss:$16 sps:$4 sm:$0xff]   ;;  %v11251_v16 = vld [vmem:[%s18397_s3 + $0x64] ss:$16 sps:$4 sm:$0xff]  }
 0x36f   :  { %v4575_v49 = vmax.f32 %v19175_v14, %v4547_v35  ;;  %v4551_v9 = vmax.f32 %v4523_v5, 0.0  ;;  %v4524_v13 = vadd.f32 %v4393_v26, %v14872_v10  ;;  %v19177_v57 = vmax.f32 %v15729_v22, 0.0  ;;  %v4397_v34 = vpop.f32.mrb[124].mxu0  ;;  %v11254_v35 = vld [vmem:[%s18397_s3 + $0x6c] ss:$16 sps:$4 sm:$0xff]  }
 0x370   :  { %v4577_v3 = vmax.f32 %v19176_v28, %v4549_v50  ;;  %v15875_v36 = vpack.c.bf16 %v15866_v58, %v4592_v42  ;;  %v4553_v60 = vmax.f32 %v4525_v15, 0.0  ;;  %v4526_v40 = vadd.f32 %v4464_v31, %v14876_v1  ;;  %v4399_v26 = vpop.f32.mrb[125].mxu0  ;;  %5509 = vmatpush1.bf16.msra.mxu0 %v11243_v11  ;;  %5570 = vmatpush1.bf16.msra.mxu1 %v11246_v18 }
 0x371   :  { %v4576_v38 = vmax.f32 %v19177_v57, %v4548_v47  ;;  %v19178_v55 = vmax.f32 %v15736_v52, 0.0  ;;  %v4579_v22 = vmax.f32 %v3690_v19, %v4551_v9  ;;  %v4552_v17 = vmax.f32 %v4524_v13, 0.0  ;;  %v4468_v19 = vpop.f32.mrb[124].mxu1  ;;  %5510 = vmatprep.subr.bf16.mxu0 %v11251_v16  ;;  %5571 = vmatprep.subr.bf16.mxu1 %v11254_v35  ;;  %v11261_v16 = vld [vmem:[%s18397_s3 + $0xa0] ss:$16 sps:$4 sm:$0xff]  }
 0x372   :  { %v15886_v56 = vmax.f32 %v4575_v49, %v4577_v3  ;;  %v15900_v21 = vadd.f32 %v15572_v61, %v14876_v1  ;;  %v4581_v52 = vmax.f32 %v3692_v46, %v4553_v60  ;;  %v4554_v29 = vmax.f32 %v4526_v40, 0.0  ;;  %5104 = vmatprep.mubr.bf16.mxu0 %v15875_v36  ;;  %5165 = vmatprep.mubr.bf16.mxu1 %v15875_v36  ;;  %v4470_v2 = vpop.f32.mrb[125].mxu1  ;;  %v4401_v46 = vpop.f32.mrb[126].mxu0  ;;  %v11258_v60 = vld [vmem:[%s18397_s3 + $0x88] ss:$16 sps:$4 sm:$0xff]  }
 0x373   :  { %v4578_v42 = vmax.f32 %v19178_v55, %v4550_v63  ;;  %v4499_v24 = vadd.f32 %v4397_v34, %v15680_v59  ;;  %v4580_v8 = vmax.f32 %v3691_v48, %v4552_v17  ;;  %5105 = vmatmul.mubr.bf16.gmra.mrb[132].mxu0 %v15862_v53  ;;  %5166 = vmatmul.mubr.bf16.gmra.mrb[132].mxu1 %v15862_v53  ;;  %v11252_v48 = vld [vmem:[%s18397_s3 + $0x68] ss:$16 sps:$4 sm:$0xff]   ;;  %v4402_v14 = vpop.f32.mrb[127].mxu0  ;;  %v3694_v49 = vmax.f32 %v15786_v44, 0.0  ;;  %v11257_v44 = vld [vmem:[%s18397_s3 + $0x84] ss:$16 sps:$4 sm:$0xff]  }
 0x374   :  { %v4501_v61 = vadd.f32 %v4468_v19, %v15690_v54  ;;  %v15912_v5 = vmax.f32 %v4579_v22, %v4581_v52  ;;  %v4582_v31 = vmax.f32 %v3693_v62, %v4554_v29  ;;  %v4472_v54 = vpop.f32.mrb[126].mxu1  ;;  %v4500_v12 = vadd.f32 %v4399_v26, %v15692_v45  ;;  %5511 = vmatpush1.bf16.msra.mxu0 %v11249_v30  ;;  %v11263_v55 = vld [vmem:[%s18397_s3 + $0xa4] ss:$16 sps:$4 sm:$0xff]   ;;  %v11264_v35 = vld [vmem:[%s18397_s3 + $0xa8] ss:$16 sps:$4 sm:$0xff]  }
 0x375   :  { %v4596_v50 = vmax.f32 %v4576_v38, %v4578_v42  ;;  %v4527_v59 = vadd.f32 %v4499_v24, %v14856_v0  ;;  %v4502_v62 = vadd.f32 %v4470_v2, %v15706_v6  ;;  %v4473_v0 = vpop.f32.mrb[127].mxu1  ;;  %v3696_v15 = vmax.f32 %v15826_v27, 0.0  ;;  %5572 = vmatpush1.bf16.msra.mxu1 %v11252_v48  ;;  %v11255_v38 = vld [vmem:[%s18397_s3 + $0x80] ss:$16 sps:$4 sm:$0xff]   ;;  %5512 = vmatprep.subr.bf16.mxu0 %v11257_v44  ;;  %v11275_v24 = vld [vmem:[%s18397_s3 + $0xe4] ss:$16 sps:$4 sm:$0xff]  }
 0x376   :  { %v4529_v47 = vadd.f32 %v4501_v61, %v14866_v23  ;;  %v15928_v28 = vmax.f32 %v4580_v8, %v4582_v31  ;;  %v11260_v23 = vld [vmem:[%s18397_s3 + $0x8c] ss:$16 sps:$4 sm:$0xff]   ;;  %v3695_v45 = vmax.f32 %v15837_v7, 0.0  ;;  %v4528_v9 = vadd.f32 %v4500_v12, %v14872_v10  ;;  %v11267_v29 = vld [vmem:[%s18397_s3 + $0xc0] ss:$16 sps:$4 sm:$0xff]  }
 0x377   :  { %v4555_v3 = vmax.f32 %v4527_v59, 0.0  ;;  %v15930_v63 = vpack.c.bf16 %v4596_v50, %v4596_v50  ;;  %v4530_v27 = vadd.f32 %v4502_v62, %v14876_v1  ;;  %v3697_v13 = vmax.f32 %v15900_v21, 0.0  ;;  %5573 = vmatprep.subr.bf16.mxu1 %v11260_v23  ;;  %v11272_v21 = vld [vmem:[%s18397_s3 + $0xcc] ss:$16 sps:$4 sm:$0xff]   ;;  %v11273_v26 = vld [vmem:[%s18397_s3 + $0xe0] ss:$16 sps:$4 sm:$0xff]  }
 0x378   :  { %v4557_v6 = vmax.f32 %v4529_v47, 0.0  ;;  %v15950_v7 = vpack.c.bf16 %v15886_v56, %v15886_v56  ;;  %v15953_v10 = vpack.c.bf16 %v4596_v50, %v15866_v58  ;;  %v4556_v40 = vmax.f32 %v4528_v9, 0.0  ;;  %v11266_v58 = vld [vmem:[%s18397_s3 + $0xac] ss:$16 sps:$4 sm:$0xff]   ;;  %5513 = vmatpush1.bf16.msra.mxu0 %v11255_v38  ;;  %v11281_v8 = vld [vmem:[%s18397_s3 + $0x104] ss:$16 sps:$4 sm:$0xff]  }
 0x379   :  { %v4583_v57 = vmax.f32 %v3694_v49, %v4555_v3  ;;  %v4558_v11 = vmax.f32 %v4530_v27, 0.0  ;;  %5114 = vmatprep.mubr.bf16.mxu0 %v15930_v63  ;;  %5175 = vmatprep.mubr.bf16.mxu1 %v15930_v63  ;;  %v15959_v18 = vpack.c.bf16 %v15886_v56, %v15845_v51  ;;  %v15968_v42 = vpack.c.bf16 %v15928_v28, %v4596_v50  ;;  %v11278_v19 = vld [vmem:[%s18397_s3 + $0xec] ss:$16 sps:$4 sm:$0xff]   ;;  %v11276_v50 = vld [vmem:[%s18397_s3 + $0xe8] ss:$16 sps:$4 sm:$0xff]  }
 0x37a   :  { %v4585_v1 = vmax.f32 %v3696_v15, %v4557_v6  ;;  %v15972_v22 = vpack.c.bf16 %v15912_v5, %v15886_v56  ;;  %v4584_v17 = vmax.f32 %v3695_v45, %v4556_v40  ;;  %5574 = vmatpush1.bf16.msra.mxu1 %v11258_v60  ;;  %v11269_v56 = vld [vmem:[%s18397_s3 + $0xc4] ss:$16 sps:$4 sm:$0xff]   ;;  %5514 = vmatprep.subr.bf16.mxu0 %v11263_v55  ;;  %v11284_v61 = vld [vmem:[%s18397_s3 + $0x10c] ss:$16 sps:$4 sm:$0xff]   ;;  %v11279_v2 = vld [vmem:[%s18397_s3 + $0x100] ss:$16 sps:$4 sm:$0xff]  }
 0x37b   :  { %19179 = vst [vmem:[#allocation17_spill] sm:$0xff] %v15968_v42  ;;  %v4586_v51 = vmax.f32 %v3697_v13, %v4558_v11  ;;  %5115 = vmatmul.mubr.bf16.gmra.mrb[136].mxu0 %v15950_v7  ;;  %5176 = vmatmul.mubr.bf16.gmra.mrb[136].mxu1 %v15950_v7  ;;  %v11282_v46 = vld [vmem:[%s18397_s3 + $0x108] ss:$16 sps:$4 sm:$0xff]   ;;  %v11287_v31 = vld [vmem:[%s18397_s3 + $0x124] ss:$16 sps:$4 sm:$0xff]  }
 0x37c   :  { %19180 = vst [vmem:[#allocation18_spill] sm:$0xff] %v15972_v22  ;;  %v15976_v34 = vmax.f32 %v4583_v57, %v4585_v1  ;;  %5536 = vmatprep.mubr.bf16.mxu0 %v15124_v32  ;;  %5597 = vmatprep.mubr.bf16.mxu1 %v15124_v32  ;;  %v11270_v32 = vld [vmem:[%s18397_s3 + $0xc8] ss:$16 sps:$4 sm:$0xff]   ;;  %v11290_v59 = vld [vmem:[%s18397_s3 + $0x12c] ss:$16 sps:$4 sm:$0xff]  }
 0x37d   :  { %v15992_v52 = vmax.f32 %v4584_v17, %v4586_v51  ;;  %5575 = vmatprep.subr.bf16.mxu1 %v11266_v58  ;;  %5515 = vmatpush1.bf16.msra.mxu0 %v11261_v16  ;;  %v11285_v30 = vld [vmem:[%s18397_s3 + $0x120] ss:$16 sps:$4 sm:$0xff]   ;;  %v11288_v48 = vld [vmem:[%s18397_s3 + $0x128] ss:$16 sps:$4 sm:$0xff]   ;;  %v11293_v54 = vld [vmem:[%s18397_s3 + $0x144] ss:$16 sps:$4 sm:$0xff]  }
 0x37e   :  { %19181 = vst [vmem:[#allocation19_spill] sm:$0xff] %v15976_v34  ;;  %5576 = vmatpush1.bf16.msra.mxu1 %v11264_v35  ;;  %5516 = vmatprep.subr.bf16.mxu0 %v11269_v56  ;;  %v11296_v14 = vld [vmem:[%s18397_s3 + $0x14c] ss:$16 sps:$4 sm:$0xff]   ;;  %v11291_v49 = vld [vmem:[%s18397_s3 + $0x140] ss:$16 sps:$4 sm:$0xff]  }
 0x37f   :  { %19182 = vst [vmem:[#allocation20_spill] sm:$0xff] %v15992_v52  ;;  %5577 = vmatprep.subr.bf16.mxu1 %v11272_v21  ;;  %v11294_v47 = vld [vmem:[%s18397_s3 + $0x148] ss:$16 sps:$4 sm:$0xff]   ;;  %v11299_v12 = vld [vmem:[%s18397_s3 + $0x164] ss:$16 sps:$4 sm:$0xff]  }
 0x380   :  { %v11302_v62 = vld [vmem:[%s18397_s3 + $0x16c] ss:$16 sps:$4 sm:$0xff]   ;;  %v11297_v0 = vld [vmem:[%s18397_s3 + $0x160] ss:$16 sps:$4 sm:$0xff]   ;;  %v11300_v15 = vld [vmem:[%s18397_s3 + $0x168] ss:$16 sps:$4 sm:$0xff]  }
 0x381   :  { %5517 = vmatpush1.bf16.msra.mxu0 %v11267_v29  ;;  %v11305_v3 = vld [vmem:[%s18397_s3 + $0x184] ss:$16 sps:$4 sm:$0xff]   ;;  %v11308_v44 = vld [vmem:[%s18397_s3 + $0x18c] ss:$16 sps:$4 sm:$0xff]   ;;  %v11303_v23 = vld [vmem:[%s18397_s3 + $0x180] ss:$16 sps:$4 sm:$0xff]  }
 0x382   :  { %5578 = vmatpush1.bf16.msra.mxu1 %v11270_v32  ;;  %5518 = vmatprep.subr.bf16.mxu0 %v11275_v24  ;;  %v11306_v45 = vld [vmem:[%s18397_s3 + $0x188] ss:$16 sps:$4 sm:$0xff]   ;;  %v11311_v6 = vld [vmem:[%s18397_s3 + $0x1a4] ss:$16 sps:$4 sm:$0xff]   ;;  %v11314_v9 = vld [vmem:[%s18397_s3 + $0x1ac] ss:$16 sps:$4 sm:$0xff]  }
 0x383   :  { %5579 = vmatprep.subr.bf16.mxu1 %v11278_v19  ;;  %v11309_v27 = vld [vmem:[%s18397_s3 + $0x1a0] ss:$16 sps:$4 sm:$0xff]   ;;  %v11312_v13 = vld [vmem:[%s18397_s3 + $0x1a8] ss:$16 sps:$4 sm:$0xff]   ;;  %v11317_v57 = vld [vmem:[%s18397_s3 + $0x1c4] ss:$16 sps:$4 sm:$0xff]  }
 0x384   :  { %v11320_v38 = vld [vmem:[%s18397_s3 + $0x1cc] ss:$16 sps:$4 sm:$0xff]   ;;  %v11315_v60 = vld [vmem:[%s18397_s3 + $0x1c0] ss:$16 sps:$4 sm:$0xff]   ;;  %v11318_v1 = vld [vmem:[%s18397_s3 + $0x1c8] ss:$16 sps:$4 sm:$0xff]  }
 0x385   :  { %5519 = vmatpush1.bf16.msra.mxu0 %v11273_v26  ;;  %v11323_v40 = vld [vmem:[%s18397_s3 + $0x1e4] ss:$16 sps:$4 sm:$0xff]   ;;  %v11326_v11 = vld [vmem:[%s18397_s3 + $0x1ec] ss:$16 sps:$4 sm:$0xff]   ;;  %v11321_v55 = vld [vmem:[%s18397_s3 + $0x1e0] ss:$16 sps:$4 sm:$0xff]  }
 0x386   :  { %5580 = vmatpush1.bf16.msra.mxu1 %v11276_v50  ;;  %5520 = vmatprep.subr.bf16.mxu0 %v11281_v8  ;;  %v11324_v58 = vld [vmem:[%s18397_s3 + $0x1e8] ss:$16 sps:$4 sm:$0xff]   ;;  %v11329_v17 = vld [vmem:[%s18397_s3 + $0x404] ss:$16 sps:$4 sm:$0xff]   ;;  %v11332_v51 = vld [vmem:[%s18397_s3 + $0x40c] ss:$16 sps:$4 sm:$0xff]   ;;  %v4606_v50 = vpack.c.bf16 %v15182_v41, %v15182_v41 }
 0x387   :  { %5581 = vmatprep.subr.bf16.mxu1 %v11284_v61  ;;  %v11327_v16 = vld [vmem:[%s18397_s3 + $0x400] ss:$16 sps:$4 sm:$0xff]   ;;  %v11330_v35 = vld [vmem:[%s18397_s3 + $0x408] ss:$16 sps:$4 sm:$0xff]   ;;  %v11335_v56 = vld [vmem:[%s18397_s3 + $0x424] ss:$16 sps:$4 sm:$0xff]  }
 0x388   :  { %v11338_v21 = vld [vmem:[%s18397_s3 + $0x42c] ss:$16 sps:$4 sm:$0xff]   ;;  %v11333_v29 = vld [vmem:[%s18397_s3 + $0x420] ss:$16 sps:$4 sm:$0xff]   ;;  %v11336_v32 = vld [vmem:[%s18397_s3 + $0x428] ss:$16 sps:$4 sm:$0xff]  }
 0x389   :  { %5521 = vmatpush1.bf16.msra.mxu0 %v11279_v2  ;;  %v11344_v24 = vld [vmem:[%s18397_s3 + $0x44c] ss:$16 sps:$4 sm:$0xff]   ;;  %v11339_v19 = vld [vmem:[%s18397_s3 + $0x440] ss:$16 sps:$4 sm:$0xff]   ;;  %v11342_v26 = vld [vmem:[%s18397_s3 + $0x448] ss:$16 sps:$4 sm:$0xff]  }
 0x38a   :  { %5582 = vmatpush1.bf16.msra.mxu1 %v11282_v46  ;;  %5522 = vmatprep.subr.bf16.mxu0 %v11287_v31  ;;  %v11347_v8 = vld [vmem:[%s18397_s3 + $0x464] ss:$16 sps:$4 sm:$0xff]   ;;  %v11350_v61 = vld [vmem:[%s18397_s3 + $0x46c] ss:$16 sps:$4 sm:$0xff]   ;;  %v11345_v41 = vld [vmem:[%s18397_s3 + $0x460] ss:$16 sps:$4 sm:$0xff]  }
 0x38b   :  { %5583 = vmatprep.subr.bf16.mxu1 %v11290_v59  ;;  %v11348_v2 = vld [vmem:[%s18397_s3 + $0x468] ss:$16 sps:$4 sm:$0xff]   ;;  %v11353_v46 = vld [vmem:[%s18397_s3 + $0x484] ss:$16 sps:$4 sm:$0xff]   ;;  %v11356_v31 = vld [vmem:[%s18397_s3 + $0x48c] ss:$16 sps:$4 sm:$0xff]  }
 0x38c   :  { %v19183_v59 = vld [vmem:[#allocation8_spill] sm:$0xff]  ;;  %v16816_v22 = vld [vmem:[%s18397_s3 + $0x988] ss:$16 sps:$4 sm:$0xff]   ;;  %v16828_v42 = vld [vmem:[%s18397_s3 + $0x9ac] ss:$16 sps:$4 sm:$0xff]  }
 0x38d   :  { %5523 = vmatpush1.bf16.msra.mxu0 %v11285_v30  ;;  %v4605_v30 = vpack.c.bf16 %v19183_v59, %v19183_v59  ;;  %v11422_v59 = vld [vmem:[%s18397_s3 + $0x5ec] ss:$16 sps:$4 sm:$0xff]   ;;  %v16811_v34 = vld [vmem:[%s18397_s3 + $0x980] ss:$16 sps:$4 sm:$0xff]   ;;  %19200 = vst [vmem:[#allocation30_spill] sm:$0xff] %v16816_v22  ;;  %19202 = vst [vmem:[#allocation32_spill] sm:$0xff] %v16828_v42 }
 0x38e   :  { %5584 = vmatpush1.bf16.msra.mxu1 %v11288_v48  ;;  %5524 = vmatprep.subr.bf16.mxu0 %v11293_v54  ;;  %v11351_v48 = vld [vmem:[%s18397_s3 + $0x480] ss:$16 sps:$4 sm:$0xff]   ;;  %v11354_v54 = vld [vmem:[%s18397_s3 + $0x488] ss:$16 sps:$4 sm:$0xff]   ;;  %19199 = vst [vmem:[#allocation29_spill] sm:$0xff] %v16811_v34 }
 0x38f   :  { %5585 = vmatprep.subr.bf16.mxu1 %v11296_v14  ;;  %v11359_v14 = vld [vmem:[%s18397_s3 + $0x4a4] ss:$16 sps:$4 sm:$0xff]  }
 0x390   :  { %v16823_v52 = vld [vmem:[%s18397_s3 + $0x9a4] ss:$16 sps:$4 sm:$0xff]  }
 0x391   :  { %5525 = vmatpush1.bf16.msra.mxu0 %v11291_v49  ;;  %v11362_v49 = vld [vmem:[%s18397_s3 + $0x4ac] ss:$16 sps:$4 sm:$0xff]   ;;  %19201 = vst [vmem:[#allocation31_spill] sm:$0xff] %v16823_v52 }
 0x392   :  { %5586 = vmatpush1.bf16.msra.mxu1 %v11294_v47  ;;  %5526 = vmatprep.subr.bf16.mxu0 %v11299_v12  ;;  %v19184_v47 = vld [vmem:[#allocation7_spill] sm:$0xff]  ;;  %v11357_v12 = vld [vmem:[%s18397_s3 + $0x4a0] ss:$16 sps:$4 sm:$0xff]  }
 0x393   :  { %5587 = vmatprep.subr.bf16.mxu1 %v11302_v62  ;;  %v11360_v62 = vld [vmem:[%s18397_s3 + $0x4a8] ss:$16 sps:$4 sm:$0xff]  }
 0x395   :  { %5527 = vmatpush1.bf16.msra.mxu0 %v11297_v0  ;;  %v11365_v0 = vld [vmem:[%s18397_s3 + $0x4c4] ss:$16 sps:$4 sm:$0xff]  }
 0x396   :  { %5588 = vmatpush1.bf16.msra.mxu1 %v11300_v15  ;;  %5528 = vmatprep.subr.bf16.mxu0 %v11305_v3  ;;  %v11368_v15 = vld [vmem:[%s18397_s3 + $0x4cc] ss:$16 sps:$4 sm:$0xff]   ;;  %v11363_v3 = vld [vmem:[%s18397_s3 + $0x4c0] ss:$16 sps:$4 sm:$0xff]  }
 0x397   :  { %5589 = vmatprep.subr.bf16.mxu1 %v11308_v44  ;;  %v11366_v44 = vld [vmem:[%s18397_s3 + $0x4c8] ss:$16 sps:$4 sm:$0xff]  }
 0x399   :  { %5529 = vmatpush1.bf16.msra.mxu0 %v11303_v23  ;;  %v11371_v23 = vld [vmem:[%s18397_s3 + $0x4e4] ss:$16 sps:$4 sm:$0xff]  }
 0x39a   :  { %5590 = vmatpush1.bf16.msra.mxu1 %v11306_v45  ;;  %5530 = vmatprep.subr.bf16.mxu0 %v11311_v6  ;;  %v11374_v45 = vld [vmem:[%s18397_s3 + $0x4ec] ss:$16 sps:$4 sm:$0xff]   ;;  %v11369_v6 = vld [vmem:[%s18397_s3 + $0x4e0] ss:$16 sps:$4 sm:$0xff]  }
 0x39b   :  { %5591 = vmatprep.subr.bf16.mxu1 %v11314_v9  ;;  %v11372_v9 = vld [vmem:[%s18397_s3 + $0x4e8] ss:$16 sps:$4 sm:$0xff]  }
 0x39d   :  { %5531 = vmatpush1.bf16.msra.mxu0 %v11309_v27  ;;  %v11377_v27 = vld [vmem:[%s18397_s3 + $0x504] ss:$16 sps:$4 sm:$0xff]  }
 0x39e   :  { %5592 = vmatpush1.bf16.msra.mxu1 %v11312_v13  ;;  %5532 = vmatprep.subr.bf16.mxu0 %v11317_v57  ;;  %v11380_v13 = vld [vmem:[%s18397_s3 + $0x50c] ss:$16 sps:$4 sm:$0xff]   ;;  %v11375_v57 = vld [vmem:[%s18397_s3 + $0x500] ss:$16 sps:$4 sm:$0xff]  }
 0x39f   :  { %5593 = vmatprep.subr.bf16.mxu1 %v11320_v38  ;;  %v11378_v38 = vld [vmem:[%s18397_s3 + $0x508] ss:$16 sps:$4 sm:$0xff]  }
 0x3a1   :  { %5533 = vmatpush1.bf16.msra.mxu0 %v11315_v60  ;;  %v11383_v60 = vld [vmem:[%s18397_s3 + $0x524] ss:$16 sps:$4 sm:$0xff]  }
 0x3a2   :  { %5594 = vmatpush1.bf16.msra.mxu1 %v11318_v1  ;;  %5534 = vmatprep.subr.bf16.mxu0 %v11323_v40  ;;  %v11386_v1 = vld [vmem:[%s18397_s3 + $0x52c] ss:$16 sps:$4 sm:$0xff]   ;;  %v11381_v40 = vld [vmem:[%s18397_s3 + $0x520] ss:$16 sps:$4 sm:$0xff]  }
 0x3a3   :  { %5595 = vmatprep.subr.bf16.mxu1 %v11326_v11  ;;  %v11384_v11 = vld [vmem:[%s18397_s3 + $0x528] ss:$16 sps:$4 sm:$0xff]  }
 0x3a5   :  { %5535 = vmatpush1.bf16.msra.mxu0 %v11321_v55  ;;  %v11389_v55 = vld [vmem:[%s18397_s3 + $0x544] ss:$16 sps:$4 sm:$0xff]  }
 0x3a6   :  { %5596 = vmatpush1.bf16.msra.mxu1 %v11324_v58  ;;  %6017 = vmatprep.subr.bf16.mxu0 %v11329_v17  ;;  %v11392_v58 = vld [vmem:[%s18397_s3 + $0x54c] ss:$16 sps:$4 sm:$0xff]   ;;  %v11387_v17 = vld [vmem:[%s18397_s3 + $0x540] ss:$16 sps:$4 sm:$0xff]  }
 0x3a7   :  { %6078 = vmatprep.subr.bf16.mxu1 %v11332_v51  ;;  %v11390_v51 = vld [vmem:[%s18397_s3 + $0x548] ss:$16 sps:$4 sm:$0xff]  }
 0x3a8   :  { %5537 = vmatmul.mubr.bf16.vlgmr.msra.gmra.mrb[128].mxu0 %v15100_v37 }
 0x3a9   :  { %5598 = vmatmul.mubr.bf16.vlgmr.msra.gmra.mrb[128].mxu1 %v15100_v37  ;;  %5546 = vmatprep.mubr.bf16.mxu0 %v15157_v4  ;;  %v11341_v37 = vld [vmem:[%s18397_s3 + $0x444] ss:$16 sps:$4 sm:$0xff]  }
 0x3aa   :  { %5607 = vmatprep.mubr.bf16.mxu1 %v15157_v4  ;;  %6018 = vmatpush1.bf16.msra.mxu0 %v11327_v16  ;;  %v11395_v16 = vld [vmem:[%s18397_s3 + $0x564] ss:$16 sps:$4 sm:$0xff]  }
 0x3ab   :  { %6079 = vmatpush1.bf16.msra.mxu1 %v11330_v35  ;;  %6019 = vmatprep.subr.bf16.mxu0 %v11335_v56  ;;  %v11398_v35 = vld [vmem:[%s18397_s3 + $0x56c] ss:$16 sps:$4 sm:$0xff]   ;;  %v11393_v56 = vld [vmem:[%s18397_s3 + $0x560] ss:$16 sps:$4 sm:$0xff]  }
 0x3ac   :  { %6080 = vmatprep.subr.bf16.mxu1 %v11338_v21  ;;  %v11396_v21 = vld [vmem:[%s18397_s3 + $0x568] ss:$16 sps:$4 sm:$0xff]  }
 0x3ae   :  { %6020 = vmatpush1.bf16.msra.mxu0 %v11333_v29  ;;  %v11401_v29 = vld [vmem:[%s18397_s3 + $0x584] ss:$16 sps:$4 sm:$0xff]  }
 0x3af   :  { %6081 = vmatpush1.bf16.msra.mxu1 %v11336_v32  ;;  %6021 = vmatprep.subr.bf16.mxu0 %v11341_v37  ;;  %v11404_v32 = vld [vmem:[%s18397_s3 + $0x58c] ss:$16 sps:$4 sm:$0xff]   ;;  %v11399_v37 = vld [vmem:[%s18397_s3 + $0x580] ss:$16 sps:$4 sm:$0xff]  }
 0x3b0   :  { %6082 = vmatprep.subr.bf16.mxu1 %v11344_v24  ;;  %5547 = vmatmul.mubr.bf16.gmra.mrb[132].mxu0 %v15152_v43  ;;  %v11402_v24 = vld [vmem:[%s18397_s3 + $0x588] ss:$16 sps:$4 sm:$0xff]  }
 0x3b1   :  { %5608 = vmatmul.mubr.bf16.gmra.mrb[132].mxu1 %v15152_v43  ;;  %5556 = vmatprep.mubr.bf16.mxu0 %v4606_v50 }
 0x3b2   :  { %5617 = vmatprep.mubr.bf16.mxu1 %v4606_v50  ;;  %6022 = vmatpush1.bf16.msra.mxu0 %v11339_v19  ;;  %v11407_v19 = vld [vmem:[%s18397_s3 + $0x5a4] ss:$16 sps:$4 sm:$0xff]   ;;  %v11405_v50 = vld [vmem:[%s18397_s3 + $0x5a0] ss:$16 sps:$4 sm:$0xff]  }
 0x3b3   :  { %6083 = vmatpush1.bf16.msra.mxu1 %v11342_v26  ;;  %6023 = vmatprep.subr.bf16.mxu0 %v11347_v8  ;;  %v11410_v26 = vld [vmem:[%s18397_s3 + $0x5ac] ss:$16 sps:$4 sm:$0xff]   ;;  %v11408_v8 = vld [vmem:[%s18397_s3 + $0x5a8] ss:$16 sps:$4 sm:$0xff]  }
 0x3b4   :  { %6084 = vmatprep.subr.bf16.mxu1 %v11350_v61  ;;  %v11413_v61 = vld [vmem:[%s18397_s3 + $0x5c4] ss:$16 sps:$4 sm:$0xff]  }
 0x3b6   :  { %6024 = vmatpush1.bf16.msra.mxu0 %v11345_v41  ;;  %v11416_v41 = vld [vmem:[%s18397_s3 + $0x5cc] ss:$16 sps:$4 sm:$0xff]  }
 0x3b7   :  { %6085 = vmatpush1.bf16.msra.mxu1 %v11348_v2  ;;  %6025 = vmatprep.subr.bf16.mxu0 %v11353_v46  ;;  %v11411_v2 = vld [vmem:[%s18397_s3 + $0x5c0] ss:$16 sps:$4 sm:$0xff]   ;;  %v11414_v46 = vld [vmem:[%s18397_s3 + $0x5c8] ss:$16 sps:$4 sm:$0xff]  }
 0x3b8   :  { %6086 = vmatprep.subr.bf16.mxu1 %v11356_v31  ;;  %5557 = vmatmul.mubr.bf16.gmra.mrb[140].mxu0 %v4605_v30  ;;  %v11419_v31 = vld [vmem:[%s18397_s3 + $0x5e4] ss:$16 sps:$4 sm:$0xff]  }
 0x3b9   :  { %5618 = vmatmul.mubr.bf16.gmra.mrb[140].mxu1 %v4605_v30  ;;  %6049 = vmatprep.mubr.bf16.mxu0 %v19184_v47  ;;  %v11417_v30 = vld [vmem:[%s18397_s3 + $0x5e0] ss:$16 sps:$4 sm:$0xff]  }
 0x3ba   :  { %6110 = vmatprep.mubr.bf16.mxu1 %v19184_v47  ;;  %6026 = vmatpush1.bf16.msra.mxu0 %v11351_v48  ;;  %v11420_v48 = vld [vmem:[%s18397_s3 + $0x5e8] ss:$16 sps:$4 sm:$0xff]  }
 0x3bb   :  { %6087 = vmatpush1.bf16.msra.mxu1 %v11354_v54  ;;  %6027 = vmatprep.subr.bf16.mxu0 %v11359_v14  ;;  %v11425_v54 = vld [vmem:[%s18397_s3 + $0x604] ss:$16 sps:$4 sm:$0xff]   ;;  %v11428_v14 = vld [vmem:[%s18397_s3 + $0x60c] ss:$16 sps:$4 sm:$0xff]  }
 0x3bc   :  { %6088 = vmatprep.subr.bf16.mxu1 %v11362_v49  ;;  %v11423_v49 = vld [vmem:[%s18397_s3 + $0x600] ss:$16 sps:$4 sm:$0xff]  }
 0x3be   :  { %6028 = vmatpush1.bf16.msra.mxu0 %v11357_v12  ;;  %v11426_v12 = vld [vmem:[%s18397_s3 + $0x608] ss:$16 sps:$4 sm:$0xff]  }
 0x3bf   :  { %6089 = vmatpush1.bf16.msra.mxu1 %v11360_v62  ;;  %6029 = vmatprep.subr.bf16.mxu0 %v11365_v0  ;;  %v11431_v62 = vld [vmem:[%s18397_s3 + $0x624] ss:$16 sps:$4 sm:$0xff]   ;;  %v11434_v0 = vld [vmem:[%s18397_s3 + $0x62c] ss:$16 sps:$4 sm:$0xff]  }
 0x3c0   :  { %6090 = vmatprep.subr.bf16.mxu1 %v11368_v15  ;;  %v19185_v15 = vld [vmem:[#allocation2_spill] sm:$0xff] }
 0x3c2   :  { %6030 = vmatpush1.bf16.msra.mxu0 %v11363_v3  ;;  %v19186_v3 = vld [vmem:[#allocation12_spill] sm:$0xff] }
 0x3c3   :  { %6091 = vmatpush1.bf16.msra.mxu1 %v11366_v44  ;;  %6031 = vmatprep.subr.bf16.mxu0 %v11371_v23  ;;  %v11429_v44 = vld [vmem:[%s18397_s3 + $0x620] ss:$16 sps:$4 sm:$0xff]   ;;  %v11432_v23 = vld [vmem:[%s18397_s3 + $0x628] ss:$16 sps:$4 sm:$0xff]  }
 0x3c4   :  { %6092 = vmatprep.subr.bf16.mxu1 %v11374_v45  ;;  %v11437_v45 = vld [vmem:[%s18397_s3 + $0x644] ss:$16 sps:$4 sm:$0xff]  }
 0x3c6   :  { %6032 = vmatpush1.bf16.msra.mxu0 %v11369_v6  ;;  %v11440_v6 = vld [vmem:[%s18397_s3 + $0x64c] ss:$16 sps:$4 sm:$0xff]  }
 0x3c7   :  { %6093 = vmatpush1.bf16.msra.mxu1 %v11372_v9  ;;  %6033 = vmatprep.subr.bf16.mxu0 %v11377_v27  ;;  %v11435_v9 = vld [vmem:[%s18397_s3 + $0x640] ss:$16 sps:$4 sm:$0xff]   ;;  %v11438_v27 = vld [vmem:[%s18397_s3 + $0x648] ss:$16 sps:$4 sm:$0xff]  }
 0x3c8   :  { %6094 = vmatprep.subr.bf16.mxu1 %v11380_v13  ;;  %v19187_v13 = vld [vmem:[#allocation11_spill] sm:$0xff] }
 0x3ca   :  { %6034 = vmatpush1.bf16.msra.mxu0 %v11375_v57  ;;  %v16354_v57 = vpack.c.bf16 %v19187_v13, %v19187_v13  ;;  %v11495_v13 = vld [vmem:[%s18397_s3 + $0x780] ss:$16 sps:$4 sm:$0xff]  }
 0x3cb   :  { %6095 = vmatpush1.bf16.msra.mxu1 %v11378_v38  ;;  %6035 = vmatprep.subr.bf16.mxu0 %v11383_v60  ;;  %v11443_v38 = vld [vmem:[%s18397_s3 + $0x664] ss:$16 sps:$4 sm:$0xff]   ;;  %v11446_v60 = vld [vmem:[%s18397_s3 + $0x66c] ss:$16 sps:$4 sm:$0xff]  }
 0x3cc   :  { %6096 = vmatprep.subr.bf16.mxu1 %v11386_v1  ;;  %v19188_v1 = vld [vmem:[#allocation13_spill] sm:$0xff] }
 0x3ce   :  { %6036 = vmatpush1.bf16.msra.mxu0 %v11381_v40  ;;  %v11441_v40 = vld [vmem:[%s18397_s3 + $0x660] ss:$16 sps:$4 sm:$0xff]  }
 0x3cf   :  { %6097 = vmatpush1.bf16.msra.mxu1 %v11384_v11  ;;  %6037 = vmatprep.subr.bf16.mxu0 %v11389_v55  ;;  %v11444_v11 = vld [vmem:[%s18397_s3 + $0x668] ss:$16 sps:$4 sm:$0xff]   ;;  %v11449_v55 = vld [vmem:[%s18397_s3 + $0x684] ss:$16 sps:$4 sm:$0xff]  }
 0x3d0   :  { %6098 = vmatprep.subr.bf16.mxu1 %v11392_v58  ;;  %v11452_v58 = vld [vmem:[%s18397_s3 + $0x68c] ss:$16 sps:$4 sm:$0xff]  }
 0x3d2   :  { %6038 = vmatpush1.bf16.msra.mxu0 %v11387_v17  ;;  %v19189_v17 = vld [vmem:[#allocation9_spill] sm:$0xff] }
 0x3d3   :  { %6099 = vmatpush1.bf16.msra.mxu1 %v11390_v51  ;;  %6039 = vmatprep.subr.bf16.mxu0 %v11395_v16  ;;  %v16380_v51 = vpack.c.bf16 %v19189_v17, %v19189_v17  ;;  %v11447_v16 = vld [vmem:[%s18397_s3 + $0x680] ss:$16 sps:$4 sm:$0xff]   ;;  %v11512_v17 = vld [vmem:[%s18397_s3 + $0x7cc] ss:$16 sps:$4 sm:$0xff]  }
 0x3d4   :  { %6100 = vmatprep.subr.bf16.mxu1 %v11398_v35  ;;  %v11450_v35 = vld [vmem:[%s18397_s3 + $0x688] ss:$16 sps:$4 sm:$0xff]  }
 0x3d6   :  { %6040 = vmatpush1.bf16.msra.mxu0 %v11393_v56  ;;  %v11455_v56 = vld [vmem:[%s18397_s3 + $0x6a4] ss:$16 sps:$4 sm:$0xff]  }
 0x3d7   :  { %6101 = vmatpush1.bf16.msra.mxu1 %v11396_v21  ;;  %6041 = vmatprep.subr.bf16.mxu0 %v11401_v29  ;;  %v11458_v21 = vld [vmem:[%s18397_s3 + $0x6ac] ss:$16 sps:$4 sm:$0xff]   ;;  %v11453_v29 = vld [vmem:[%s18397_s3 + $0x6a0] ss:$16 sps:$4 sm:$0xff]  }
 0x3d8   :  { %6102 = vmatprep.subr.bf16.mxu1 %v11404_v32  ;;  %v11456_v32 = vld [vmem:[%s18397_s3 + $0x6a8] ss:$16 sps:$4 sm:$0xff]  }
 0x3da   :  { %6042 = vmatpush1.bf16.msra.mxu0 %v11399_v37  ;;  %v11461_v37 = vld [vmem:[%s18397_s3 + $0x6c4] ss:$16 sps:$4 sm:$0xff]  }
 0x3db   :  { %6103 = vmatpush1.bf16.msra.mxu1 %v11402_v24  ;;  %6043 = vmatprep.subr.bf16.mxu0 %v11407_v19  ;;  %v11464_v24 = vld [vmem:[%s18397_s3 + $0x6cc] ss:$16 sps:$4 sm:$0xff]   ;;  %v11459_v19 = vld [vmem:[%s18397_s3 + $0x6c0] ss:$16 sps:$4 sm:$0xff]  }
 0x3dc   :  { %6104 = vmatprep.subr.bf16.mxu1 %v11410_v26  ;;  %v11462_v26 = vld [vmem:[%s18397_s3 + $0x6c8] ss:$16 sps:$4 sm:$0xff]  }
 0x3de   :  { %6044 = vmatpush1.bf16.msra.mxu0 %v11405_v50  ;;  %v11467_v50 = vld [vmem:[%s18397_s3 + $0x6e4] ss:$16 sps:$4 sm:$0xff]  }
 0x3df   :  { %6105 = vmatpush1.bf16.msra.mxu1 %v11408_v8  ;;  %6045 = vmatprep.subr.bf16.mxu0 %v11413_v61  ;;  %v11470_v8 = vld [vmem:[%s18397_s3 + $0x6ec] ss:$16 sps:$4 sm:$0xff]   ;;  %v11465_v61 = vld [vmem:[%s18397_s3 + $0x6e0] ss:$16 sps:$4 sm:$0xff]  }
 0x3e0   :  { %6106 = vmatprep.subr.bf16.mxu1 %v11416_v41  ;;  %v11468_v41 = vld [vmem:[%s18397_s3 + $0x6e8] ss:$16 sps:$4 sm:$0xff]  }
 0x3e2   :  { %6046 = vmatpush1.bf16.msra.mxu0 %v11411_v2  ;;  %v11473_v2 = vld [vmem:[%s18397_s3 + $0x704] ss:$16 sps:$4 sm:$0xff]  }
 0x3e3   :  { %6107 = vmatpush1.bf16.msra.mxu1 %v11414_v46  ;;  %6047 = vmatprep.subr.bf16.mxu0 %v11419_v31  ;;  %v11476_v46 = vld [vmem:[%s18397_s3 + $0x70c] ss:$16 sps:$4 sm:$0xff]   ;;  %v11471_v31 = vld [vmem:[%s18397_s3 + $0x700] ss:$16 sps:$4 sm:$0xff]  }
 0x3e4   :  { %6108 = vmatprep.subr.bf16.mxu1 %v11422_v59  ;;  %v11474_v59 = vld [vmem:[%s18397_s3 + $0x708] ss:$16 sps:$4 sm:$0xff]  }
 0x3e6   :  { %6048 = vmatpush1.bf16.msra.mxu0 %v11417_v30  ;;  %v11479_v30 = vld [vmem:[%s18397_s3 + $0x724] ss:$16 sps:$4 sm:$0xff]  }
 0x3e7   :  { %6109 = vmatpush1.bf16.msra.mxu1 %v11420_v48  ;;  %6550 = vmatprep.subr.bf16.mxu0 %v11425_v54  ;;  %v11482_v48 = vld [vmem:[%s18397_s3 + $0x72c] ss:$16 sps:$4 sm:$0xff]   ;;  %v11477_v54 = vld [vmem:[%s18397_s3 + $0x720] ss:$16 sps:$4 sm:$0xff]  }
 0x3e8   :  { %6611 = vmatprep.subr.bf16.mxu1 %v11428_v14  ;;  %v11480_v14 = vld [vmem:[%s18397_s3 + $0x728] ss:$16 sps:$4 sm:$0xff]  }
 0x3e9   :  { %6050 = vmatmul.mubr.bf16.vlgmr.msra.gmra.mrb[128].mxu0 %v19185_v15 }
 0x3ea   :  { %6111 = vmatmul.mubr.bf16.vlgmr.msra.gmra.mrb[128].mxu1 %v19185_v15  ;;  %6059 = vmatprep.mubr.bf16.mxu0 %v19186_v3 }
 0x3eb   :  { %6120 = vmatprep.mubr.bf16.mxu1 %v19186_v3  ;;  %6551 = vmatpush1.bf16.msra.mxu0 %v11423_v49  ;;  %v11485_v49 = vld [vmem:[%s18397_s3 + $0x744] ss:$16 sps:$4 sm:$0xff]  }
 0x3ec   :  { %6612 = vmatpush1.bf16.msra.mxu1 %v11426_v12  ;;  %6552 = vmatprep.subr.bf16.mxu0 %v11431_v62  ;;  %v11488_v12 = vld [vmem:[%s18397_s3 + $0x74c] ss:$16 sps:$4 sm:$0xff]   ;;  %v11483_v62 = vld [vmem:[%s18397_s3 + $0x740] ss:$16 sps:$4 sm:$0xff]  }
 0x3ed   :  { %6613 = vmatprep.subr.bf16.mxu1 %v11434_v0  ;;  %v11486_v0 = vld [vmem:[%s18397_s3 + $0x748] ss:$16 sps:$4 sm:$0xff]  }
 0x3ef   :  { %6553 = vmatpush1.bf16.msra.mxu0 %v11429_v44  ;;  %v11491_v44 = vld [vmem:[%s18397_s3 + $0x764] ss:$16 sps:$4 sm:$0xff]  }
 0x3f0   :  { %6614 = vmatpush1.bf16.msra.mxu1 %v11432_v23  ;;  %6554 = vmatprep.subr.bf16.mxu0 %v11437_v45  ;;  %v11494_v23 = vld [vmem:[%s18397_s3 + $0x76c] ss:$16 sps:$4 sm:$0xff]   ;;  %v11489_v45 = vld [vmem:[%s18397_s3 + $0x760] ss:$16 sps:$4 sm:$0xff]  }
 0x3f1   :  { %6615 = vmatprep.subr.bf16.mxu1 %v11440_v6  ;;  %6060 = vmatmul.mubr.bf16.gmra.mrb[132].mxu0 %v19188_v1  ;;  %v11492_v6 = vld [vmem:[%s18397_s3 + $0x768] ss:$16 sps:$4 sm:$0xff]  }
 0x3f2   :  { %6121 = vmatmul.mubr.bf16.gmra.mrb[132].mxu1 %v19188_v1  ;;  %6069 = vmatprep.mubr.bf16.mxu0 %v16354_v57 }
 0x3f3   :  { %6130 = vmatprep.mubr.bf16.mxu1 %v16354_v57  ;;  %6555 = vmatpush1.bf16.msra.mxu0 %v11435_v9  ;;  %v11497_v9 = vld [vmem:[%s18397_s3 + $0x784] ss:$16 sps:$4 sm:$0xff]  }
 0x3f4   :  { %6616 = vmatpush1.bf16.msra.mxu1 %v11438_v27  ;;  %6556 = vmatprep.subr.bf16.mxu0 %v11443_v38  ;;  %v11500_v27 = vld [vmem:[%s18397_s3 + $0x78c] ss:$16 sps:$4 sm:$0xff]   ;;  %v11498_v38 = vld [vmem:[%s18397_s3 + $0x788] ss:$16 sps:$4 sm:$0xff]  }
 0x3f5   :  { %6617 = vmatprep.subr.bf16.mxu1 %v11446_v60  ;;  %v11503_v60 = vld [vmem:[%s18397_s3 + $0x7a4] ss:$16 sps:$4 sm:$0xff]  }
 0x3f7   :  { %6557 = vmatpush1.bf16.msra.mxu0 %v11441_v40  ;;  %v11506_v40 = vld [vmem:[%s18397_s3 + $0x7ac] ss:$16 sps:$4 sm:$0xff]  }
 0x3f8   :  { %6618 = vmatpush1.bf16.msra.mxu1 %v11444_v11  ;;  %6558 = vmatprep.subr.bf16.mxu0 %v11449_v55  ;;  %v11501_v11 = vld [vmem:[%s18397_s3 + $0x7a0] ss:$16 sps:$4 sm:$0xff]   ;;  %v11504_v55 = vld [vmem:[%s18397_s3 + $0x7a8] ss:$16 sps:$4 sm:$0xff]  }
 0x3f9   :  { %6619 = vmatprep.subr.bf16.mxu1 %v11452_v58  ;;  %6070 = vmatmul.mubr.bf16.gmra.mrb[144].mxu0 %v16380_v51  ;;  %v11509_v58 = vld [vmem:[%s18397_s3 + $0x7c4] ss:$16 sps:$4 sm:$0xff]  }
 0x3fa   :  { %6131 = vmatmul.mubr.bf16.gmra.mrb[144].mxu1 %v16380_v51  ;;  %6582 = vmatprep.mubr.bf16.mxu0 %v15856_v20 }
 0x3fb   :  { %6643 = vmatprep.mubr.bf16.mxu1 %v15856_v20  ;;  %6559 = vmatpush1.bf16.msra.mxu0 %v11447_v16  ;;  %v11507_v16 = vld [vmem:[%s18397_s3 + $0x7c0] ss:$16 sps:$4 sm:$0xff]  }
 0x3fc   :  { %6620 = vmatpush1.bf16.msra.mxu1 %v11450_v35  ;;  %6560 = vmatprep.subr.bf16.mxu0 %v11455_v56  ;;  %v11510_v35 = vld [vmem:[%s18397_s3 + $0x7c8] ss:$16 sps:$4 sm:$0xff]   ;;  %v11515_v56 = vld [vmem:[%s18397_s3 + $0x7e4] ss:$16 sps:$4 sm:$0xff]  }
 0x3fd   :  { %6621 = vmatprep.subr.bf16.mxu1 %v11458_v21  ;;  %v11518_v21 = vld [vmem:[%s18397_s3 + $0x7ec] ss:$16 sps:$4 sm:$0xff]  }
 0x3ff   :  { %6561 = vmatpush1.bf16.msra.mxu0 %v11453_v29  ;;  %v11513_v29 = vld [vmem:[%s18397_s3 + $0x7e0] ss:$16 sps:$4 sm:$0xff]  }
 0x400   :  { %6622 = vmatpush1.bf16.msra.mxu1 %v11456_v32  ;;  %6562 = vmatprep.subr.bf16.mxu0 %v11461_v37  ;;  %v11516_v32 = vld [vmem:[%s18397_s3 + $0x7e8] ss:$16 sps:$4 sm:$0xff]   ;;  %v11521_v37 = vld [vmem:[%s18397_s3 + $0x804] ss:$16 sps:$4 sm:$0xff]  }
 0x401   :  { %6623 = vmatprep.subr.bf16.mxu1 %v11464_v24  ;;  %v11524_v24 = vld [vmem:[%s18397_s3 + $0x80c] ss:$16 sps:$4 sm:$0xff]  }
 0x403   :  { %6563 = vmatpush1.bf16.msra.mxu0 %v11459_v19  ;;  %v11519_v19 = vld [vmem:[%s18397_s3 + $0x800] ss:$16 sps:$4 sm:$0xff]  }
 0x404   :  { %6624 = vmatpush1.bf16.msra.mxu1 %v11462_v26  ;;  %6564 = vmatprep.subr.bf16.mxu0 %v11467_v50  ;;  %v11522_v26 = vld [vmem:[%s18397_s3 + $0x808] ss:$16 sps:$4 sm:$0xff]   ;;  %v11527_v50 = vld [vmem:[%s18397_s3 + $0x824] ss:$16 sps:$4 sm:$0xff]  }
 0x405   :  { %6625 = vmatprep.subr.bf16.mxu1 %v11470_v8  ;;  %v11530_v8 = vld [vmem:[%s18397_s3 + $0x82c] ss:$16 sps:$4 sm:$0xff]  }
 0x407   :  { %6565 = vmatpush1.bf16.msra.mxu0 %v11465_v61  ;;  %v11525_v61 = vld [vmem:[%s18397_s3 + $0x820] ss:$16 sps:$4 sm:$0xff]  }
 0x408   :  { %6626 = vmatpush1.bf16.msra.mxu1 %v11468_v41  ;;  %6566 = vmatprep.subr.bf16.mxu0 %v11473_v2  ;;  %v11528_v41 = vld [vmem:[%s18397_s3 + $0x828] ss:$16 sps:$4 sm:$0xff]   ;;  %v11533_v2 = vld [vmem:[%s18397_s3 + $0x844] ss:$16 sps:$4 sm:$0xff]  }
 0x409   :  { %6627 = vmatprep.subr.bf16.mxu1 %v11476_v46  ;;  %v11536_v46 = vld [vmem:[%s18397_s3 + $0x84c] ss:$16 sps:$4 sm:$0xff]  }
 0x40b   :  { %6567 = vmatpush1.bf16.msra.mxu0 %v11471_v31  ;;  %v11531_v31 = vld [vmem:[%s18397_s3 + $0x840] ss:$16 sps:$4 sm:$0xff]  }
 0x40c   :  { %6628 = vmatpush1.bf16.msra.mxu1 %v11474_v59  ;;  %6568 = vmatprep.subr.bf16.mxu0 %v11479_v30  ;;  %v11534_v59 = vld [vmem:[%s18397_s3 + $0x848] ss:$16 sps:$4 sm:$0xff]   ;;  %v16566_v30 = vpack.c.bf16 %v15928_v28, %v15928_v28  ;;  %v16581_v28 = vld [vmem:[%s18397_s3 + $0x860] ss:$16 sps:$4 sm:$0xff]  }
 0x40d   :  { %6629 = vmatprep.subr.bf16.mxu1 %v11482_v48  ;;  %v11539_v48 = vld [vmem:[%s18397_s3 + $0x864] ss:$16 sps:$4 sm:$0xff]  }
 0x40f   :  { %6569 = vmatpush1.bf16.msra.mxu0 %v11477_v54  ;;  %v11542_v54 = vld [vmem:[%s18397_s3 + $0x86c] ss:$16 sps:$4 sm:$0xff]  }
 0x410   :  { %6630 = vmatpush1.bf16.msra.mxu1 %v11480_v14  ;;  %6570 = vmatprep.subr.bf16.mxu0 %v11485_v49  ;;  %v16586_v14 = vld [vmem:[%s18397_s3 + $0x868] ss:$16 sps:$4 sm:$0xff]   ;;  %v16591_v49 = vld [vmem:[%s18397_s3 + $0x884] ss:$16 sps:$4 sm:$0xff]  }
 0x411   :  { %6631 = vmatprep.subr.bf16.mxu1 %v11488_v12  ;;  %v16596_v12 = vld [vmem:[%s18397_s3 + $0x88c] ss:$16 sps:$4 sm:$0xff]  }
 0x413   :  { %6571 = vmatpush1.bf16.msra.mxu0 %v11483_v62  ;;  %v16600_v62 = vpack.c.bf16 %v15912_v5, %v15912_v5  ;;  %v16619_v5 = vld [vmem:[%s18397_s3 + $0x8a4] ss:$16 sps:$4 sm:$0xff]  }
 0x414   :  { %6632 = vmatpush1.bf16.msra.mxu1 %v11486_v0  ;;  %6572 = vmatprep.subr.bf16.mxu0 %v11491_v44  ;;  %v16607_v0 = vld [vmem:[%s18397_s3 + $0x880] ss:$16 sps:$4 sm:$0xff]   ;;  %v16612_v44 = vld [vmem:[%s18397_s3 + $0x888] ss:$16 sps:$4 sm:$0xff]  }
 0x415   :  { %6633 = vmatprep.subr.bf16.mxu1 %v11494_v23  ;;  %v16624_v23 = vld [vmem:[%s18397_s3 + $0x8ac] ss:$16 sps:$4 sm:$0xff]  }
 0x417   :  { %6573 = vmatpush1.bf16.msra.mxu0 %v11489_v45  ;;  %v16635_v45 = vld [vmem:[%s18397_s3 + $0x8a0] ss:$16 sps:$4 sm:$0xff]  }
 0x418   :  { %6634 = vmatpush1.bf16.msra.mxu1 %v11492_v6  ;;  %6574 = vmatprep.subr.bf16.mxu0 %v11497_v9  ;;  %v16640_v6 = vld [vmem:[%s18397_s3 + $0x8a8] ss:$16 sps:$4 sm:$0xff]   ;;  %v16647_v9 = vld [vmem:[%s18397_s3 + $0x8c4] ss:$16 sps:$4 sm:$0xff]  }
 0x419   :  { %6635 = vmatprep.subr.bf16.mxu1 %v11500_v27  ;;  %v16652_v27 = vld [vmem:[%s18397_s3 + $0x8cc] ss:$16 sps:$4 sm:$0xff]  }
 0x41b   :  { %6575 = vmatpush1.bf16.msra.mxu0 %v11495_v13  ;;  %v16659_v13 = vld [vmem:[%s18397_s3 + $0x8c0] ss:$16 sps:$4 sm:$0xff]  }
 0x41c   :  { %6636 = vmatpush1.bf16.msra.mxu1 %v11498_v38  ;;  %6576 = vmatprep.subr.bf16.mxu0 %v11503_v60  ;;  %v16664_v38 = vld [vmem:[%s18397_s3 + $0x8c8] ss:$16 sps:$4 sm:$0xff]   ;;  %v16671_v60 = vld [vmem:[%s18397_s3 + $0x8e4] ss:$16 sps:$4 sm:$0xff]  }
 0x41d   :  { %6637 = vmatprep.subr.bf16.mxu1 %v11506_v40  ;;  %v16676_v40 = vld [vmem:[%s18397_s3 + $0x8ec] ss:$16 sps:$4 sm:$0xff]  }
 0x41f   :  { %6577 = vmatpush1.bf16.msra.mxu0 %v11501_v11  ;;  %v16683_v11 = vld [vmem:[%s18397_s3 + $0x8e0] ss:$16 sps:$4 sm:$0xff]  }
 0x420   :  { %6638 = vmatpush1.bf16.msra.mxu1 %v11504_v55  ;;  %6578 = vmatprep.subr.bf16.mxu0 %v11509_v58  ;;  %v16688_v55 = vld [vmem:[%s18397_s3 + $0x8e8] ss:$16 sps:$4 sm:$0xff]   ;;  %v16695_v58 = vld [vmem:[%s18397_s3 + $0x904] ss:$16 sps:$4 sm:$0xff]  }
 0x421   :  { %6639 = vmatprep.subr.bf16.mxu1 %v11512_v17  ;;  %v16700_v17 = vld [vmem:[%s18397_s3 + $0x90c] ss:$16 sps:$4 sm:$0xff]  }
 0x423   :  { %6579 = vmatpush1.bf16.msra.mxu0 %v11507_v16  ;;  %v16707_v16 = vld [vmem:[%s18397_s3 + $0x900] ss:$16 sps:$4 sm:$0xff]  }
 0x424   :  { %6640 = vmatpush1.bf16.msra.mxu1 %v11510_v35  ;;  %6580 = vmatprep.subr.bf16.mxu0 %v11515_v56  ;;  %v16712_v35 = vld [vmem:[%s18397_s3 + $0x908] ss:$16 sps:$4 sm:$0xff]   ;;  %v16719_v56 = vld [vmem:[%s18397_s3 + $0x924] ss:$16 sps:$4 sm:$0xff]  }
 0x425   :  { %6641 = vmatprep.subr.bf16.mxu1 %v11518_v21  ;;  %v16724_v21 = vld [vmem:[%s18397_s3 + $0x92c] ss:$16 sps:$4 sm:$0xff]  }
 0x427   :  { %6581 = vmatpush1.bf16.msra.mxu0 %v11513_v29 }
 0x428   :  { %6642 = vmatpush1.bf16.msra.mxu1 %v11516_v32  ;;  %7081 = vmatprep.subr.bf16.mxu0 %v11521_v37  ;;  %v16735_v37 = vld [vmem:[%s18397_s3 + $0x920] ss:$16 sps:$4 sm:$0xff]  }
 0x429   :  { %7142 = vmatprep.subr.bf16.mxu1 %v11524_v24  ;;  %v16740_v24 = vld [vmem:[%s18397_s3 + $0x928] ss:$16 sps:$4 sm:$0xff]  }
 0x42a   :  { %6583 = vmatmul.mubr.bf16.vlgmr.msra.gmra.mrb[128].mxu0 %v15843_v25 }
 0x42b   :  { %6644 = vmatmul.mubr.bf16.vlgmr.msra.gmra.mrb[128].mxu1 %v15843_v25  ;;  %6592 = vmatprep.mubr.bf16.mxu0 %v15953_v10 }
 0x42c   :  { %6653 = vmatprep.mubr.bf16.mxu1 %v15953_v10  ;;  %7082 = vmatpush1.bf16.msra.mxu0 %v11519_v19 }
 0x42d   :  { %7143 = vmatpush1.bf16.msra.mxu1 %v11522_v26  ;;  %7083 = vmatprep.subr.bf16.mxu0 %v11527_v50 }
 0x42e   :  { %7144 = vmatprep.subr.bf16.mxu1 %v11530_v8 }
 0x430   :  { %7084 = vmatpush1.bf16.msra.mxu0 %v11525_v61  ;;  %v16751_v61 = vld [vmem:[%s18397_s3 + $0x944] ss:$16 sps:$4 sm:$0xff]  }
 0x431   :  { %7145 = vmatpush1.bf16.msra.mxu1 %v11528_v41  ;;  %7085 = vmatprep.subr.bf16.mxu0 %v11533_v2  ;;  %v16756_v41 = vld [vmem:[%s18397_s3 + $0x94c] ss:$16 sps:$4 sm:$0xff]  }
 0x432   :  { %7146 = vmatprep.subr.bf16.mxu1 %v11536_v46  ;;  %6593 = vmatmul.mubr.bf16.gmra.mrb[132].mxu0 %v15959_v18  ;;  %19190 = vst [vmem:[#allocation21_spill] sm:$0xff] %v16756_v41 }
 0x433   :  { %6654 = vmatmul.mubr.bf16.gmra.mrb[132].mxu1 %v15959_v18  ;;  %6602 = vmatprep.mubr.bf16.mxu0 %v16566_v30 }
 0x434   :  { %6663 = vmatprep.mubr.bf16.mxu1 %v16566_v30  ;;  %7086 = vmatpush1.bf16.msra.mxu0 %v11531_v31  ;;  %v16763_v31 = vld [vmem:[%s18397_s3 + $0x940] ss:$16 sps:$4 sm:$0xff]  }
 0x435   :  { %7147 = vmatpush1.bf16.msra.mxu1 %v11534_v59  ;;  %7087 = vmatprep.subr.bf16.mxu0 %v11539_v48  ;;  %19191 = vst [vmem:[#allocation22_spill] sm:$0xff] %v16763_v31  ;;  %v16768_v59 = vld [vmem:[%s18397_s3 + $0x948] ss:$16 sps:$4 sm:$0xff]   ;;  %v16775_v48 = vld [vmem:[%s18397_s3 + $0x964] ss:$16 sps:$4 sm:$0xff]  }
 0x436   :  { %7148 = vmatprep.subr.bf16.mxu1 %v11542_v54  ;;  %19192 = vst [vmem:[#allocation23_spill] sm:$0xff] %v16768_v59  ;;  %19193 = vst [vmem:[#allocation24_spill] sm:$0xff] %v16775_v48  ;;  %v16780_v54 = vld [vmem:[%s18397_s3 + $0x96c] ss:$16 sps:$4 sm:$0xff]  }
 0x437   :  { %19194 = vst [vmem:[#allocation57_spill] sm:$0xff] %v16780_v54 }
 0x438   :  { %7088 = vmatpush1.bf16.msra.mxu0 %v16581_v28 }
 0x439   :  { %7149 = vmatpush1.bf16.msra.mxu1 %v16586_v14  ;;  %7089 = vmatprep.subr.bf16.mxu0 %v16591_v49 }
 0x43a   :  { %7150 = vmatprep.subr.bf16.mxu1 %v16596_v12  ;;  %6603 = vmatmul.mubr.bf16.gmra.mrb[148].mxu0 %v16600_v62 }
 0x43b   :  { %6664 = vmatmul.mubr.bf16.gmra.mrb[148].mxu1 %v16600_v62  ;;  %7113 = vmatprep.mubr.bf16.mxu0 %v15157_v4 }
 0x43c   :  { %7174 = vmatprep.mubr.bf16.mxu1 %v15157_v4  ;;  %7090 = vmatpush1.bf16.msra.mxu0 %v16607_v0 }
 0x43d   :  { %7151 = vmatpush1.bf16.msra.mxu1 %v16612_v44  ;;  %7091 = vmatprep.subr.bf16.mxu0 %v16619_v5 }
 0x43e   :  { %7152 = vmatprep.subr.bf16.mxu1 %v16624_v23 }
 0x440   :  { %7092 = vmatpush1.bf16.msra.mxu0 %v16635_v45 }
 0x441   :  { %7153 = vmatpush1.bf16.msra.mxu1 %v16640_v6  ;;  %7093 = vmatprep.subr.bf16.mxu0 %v16647_v9 }
 0x442   :  { %7154 = vmatprep.subr.bf16.mxu1 %v16652_v27 }
 0x444   :  { %7094 = vmatpush1.bf16.msra.mxu0 %v16659_v13 }
 0x445   :  { %7155 = vmatpush1.bf16.msra.mxu1 %v16664_v38  ;;  %7095 = vmatprep.subr.bf16.mxu0 %v16671_v60 }
 0x446   :  { %7156 = vmatprep.subr.bf16.mxu1 %v16676_v40 }
 0x448   :  { %7096 = vmatpush1.bf16.msra.mxu0 %v16683_v11 }
 0x449   :  { %7157 = vmatpush1.bf16.msra.mxu1 %v16688_v55  ;;  %7097 = vmatprep.subr.bf16.mxu0 %v16695_v58 }
 0x44a   :  { %7158 = vmatprep.subr.bf16.mxu1 %v16700_v17 }
 0x44c   :  { %7098 = vmatpush1.bf16.msra.mxu0 %v16707_v16 }
 0x44d   :  { %7159 = vmatpush1.bf16.msra.mxu1 %v16712_v35  ;;  %7099 = vmatprep.subr.bf16.mxu0 %v16719_v56 }
 0x44e   :  { %v16726_v29 = vpop.f32.mrb[136].mxu0  ;;  %v16728_v32 = vpop.f32.mrb[136].mxu1  ;;  %7160 = vmatprep.subr.bf16.mxu1 %v16724_v21 }
 0x44f   :  { %v16742_v19 = vpop.f32.mrb[137].mxu0  ;;  %v16744_v26 = vpop.f32.mrb[137].mxu1 }
 0x450   :  { %v5120_v50 = vpop.f32.mrb[138].mxu0  ;;  %v5181_v8 = vpop.f32.mrb[138].mxu1  ;;  %7100 = vmatpush1.bf16.msra.mxu0 %v16735_v37 }
 0x451   :  { %v5121_v2 = vpop.f32.mrb[139].mxu0  ;;  %v5182_v46 = vpop.f32.mrb[139].mxu1  ;;  %7161 = vmatpush1.bf16.msra.mxu1 %v16740_v24  ;;  %7101 = vmatprep.subr.bf16.mxu0 %v16751_v61  ;;  %v16787_v50 = vld [vmem:[%s18397_s3 + $0x960] ss:$16 sps:$4 sm:$0xff]   ;;  %v16792_v8 = vld [vmem:[%s18397_s3 + $0x968] ss:$16 sps:$4 sm:$0xff]  }
 0x452   :  { %7162 = vmatprep.subr.bf16.mxu1 %v16756_v41  ;;  %19195 = vst [vmem:[#allocation25_spill] sm:$0xff] %v16787_v50  ;;  %19196 = vst [vmem:[#allocation26_spill] sm:$0xff] %v16792_v8  ;;  %v16799_v2 = vld [vmem:[%s18397_s3 + $0x984] ss:$16 sps:$4 sm:$0xff]   ;;  %v16804_v46 = vld [vmem:[%s18397_s3 + $0x98c] ss:$16 sps:$4 sm:$0xff]  }
 0x453   :  { %19197 = vst [vmem:[#allocation27_spill] sm:$0xff] %v16799_v2  ;;  %19198 = vst [vmem:[#allocation28_spill] sm:$0xff] %v16804_v46 }
 0x454   :  { %7102 = vmatpush1.bf16.msra.mxu0 %v16763_v31  ;;  %v11947_v31 = vld [vmem:[%s18397_s3 + $0x300] ss:$16 sps:$4 sm:$0xff]  }
 0x455   :  { %7163 = vmatpush1.bf16.msra.mxu1 %v16768_v59  ;;  %7103 = vmatprep.subr.bf16.mxu0 %v16775_v48 }
 0x456   :  { %7164 = vmatprep.subr.bf16.mxu1 %v16780_v54 }
 0x458   :  { %7104 = vmatpush1.bf16.msra.mxu0 %v16787_v50  ;;  %v11927_v50 = vld [vmem:[%s18397_s3 + $0x260] ss:$16 sps:$4 sm:$0xff]  }
 0x459   :  { %7165 = vmatpush1.bf16.msra.mxu1 %v16792_v8  ;;  %7105 = vmatprep.subr.bf16.mxu0 %v16799_v2  ;;  %v16835_v2 = vld [vmem:[%s18397_s3 + $0x9a0] ss:$16 sps:$4 sm:$0xff]  }
 0x45a   :  { %7166 = vmatprep.subr.bf16.mxu1 %v16804_v46  ;;  %19203 = vst [vmem:[#allocation66_spill] sm:$0xff] %v16835_v2  ;;  %v16840_v46 = vld [vmem:[%s18397_s3 + $0x9a8] ss:$16 sps:$4 sm:$0xff]  }
 0x45b   :  { %19204 = vst [vmem:[#allocation33_spill] sm:$0xff] %v16840_v46 }
 0x45c   :  { %7106 = vmatpush1.bf16.msra.mxu0 %v16811_v34  ;;  %v16847_v34 = vld [vmem:[%s18397_s3 + $0x9c4] ss:$16 sps:$4 sm:$0xff]  }
 0x45d   :  { %7167 = vmatpush1.bf16.msra.mxu1 %v16816_v22  ;;  %7107 = vmatprep.subr.bf16.mxu0 %v16823_v52  ;;  %19205 = vst [vmem:[#allocation34_spill] sm:$0xff] %v16847_v34  ;;  %v16852_v22 = vld [vmem:[%s18397_s3 + $0x9cc] ss:$16 sps:$4 sm:$0xff]   ;;  %v16859_v52 = vld [vmem:[%s18397_s3 + $0x9c0] ss:$16 sps:$4 sm:$0xff]  }
 0x45e   :  { %7168 = vmatprep.subr.bf16.mxu1 %v16828_v42  ;;  %19206 = vst [vmem:[#allocation35_spill] sm:$0xff] %v16852_v22  ;;  %19207 = vst [vmem:[#allocation36_spill] sm:$0xff] %v16859_v52  ;;  %v16864_v42 = vld [vmem:[%s18397_s3 + $0x9c8] ss:$16 sps:$4 sm:$0xff]  }
 0x45f   :  { %19208 = vst [vmem:[#allocation37_spill] sm:$0xff] %v16864_v42 }
 0x460   :  { %7108 = vmatpush1.bf16.msra.mxu0 %v16835_v2  ;;  %v16871_v2 = vld [vmem:[%s18397_s3 + $0x9e4] ss:$16 sps:$4 sm:$0xff]  }
 0x461   :  { %7169 = vmatpush1.bf16.msra.mxu1 %v16840_v46  ;;  %7109 = vmatprep.subr.bf16.mxu0 %v16847_v34  ;;  %19209 = vst [vmem:[#allocation38_spill] sm:$0xff] %v16871_v2  ;;  %v16876_v46 = vld [vmem:[%s18397_s3 + $0x9ec] ss:$16 sps:$4 sm:$0xff]   ;;  %v16883_v34 = vld [vmem:[%s18397_s3 + $0x9e0] ss:$16 sps:$4 sm:$0xff]  }
 0x462   :  { %7170 = vmatprep.subr.bf16.mxu1 %v16852_v22  ;;  %19210 = vst [vmem:[#allocation39_spill] sm:$0xff] %v16876_v46  ;;  %19211 = vst [vmem:[#allocation40_spill] sm:$0xff] %v16883_v34  ;;  %v16888_v22 = vld [vmem:[%s18397_s3 + $0x9e8] ss:$16 sps:$4 sm:$0xff]  }
 0x463   :  { %19212 = vst [vmem:[#allocation74_spill] sm:$0xff] %v16888_v22 }
 0x464   :  { %7110 = vmatpush1.bf16.msra.mxu0 %v16859_v52  ;;  %v11914_v52 = vld [vmem:[%s18397_s3 + $0x20c] ss:$16 sps:$4 sm:$0xff]  }
 0x465   :  { %7171 = vmatpush1.bf16.msra.mxu1 %v16864_v42  ;;  %7111 = vmatprep.subr.bf16.mxu0 %v16871_v2  ;;  %v11913_v42 = vld [vmem:[%s18397_s3 + $0x204] ss:$16 sps:$4 sm:$0xff]  }
 0x466   :  { %7172 = vmatprep.subr.bf16.mxu1 %v16876_v46  ;;  %v19213_v2 = vld [vmem:[#allocation14_spill] sm:$0xff] }
 0x467   :  { %v11919_v46 = vld [vmem:[%s18397_s3 + $0x220] ss:$16 sps:$4 sm:$0xff]  }
 0x468   :  { %7112 = vmatpush1.bf16.msra.mxu0 %v16883_v34  ;;  %v11918_v34 = vld [vmem:[%s18397_s3 + $0x22c] ss:$16 sps:$4 sm:$0xff]  }
 0x469   :  { %7173 = vmatpush1.bf16.msra.mxu1 %v16888_v22  ;;  %7284 = vmatprep.subr.bf16.mxu0 %v11913_v42  ;;  %v11915_v22 = vld [vmem:[%s18397_s3 + $0x200] ss:$16 sps:$4 sm:$0xff]   ;;  %v11916_v42 = vld [vmem:[%s18397_s3 + $0x208] ss:$16 sps:$4 sm:$0xff]  }
 0x46a   :  { %7345 = vmatprep.subr.bf16.mxu1 %v11914_v52  ;;  %v11917_v52 = vld [vmem:[%s18397_s3 + $0x224] ss:$16 sps:$4 sm:$0xff]  }
 0x46b   :  { %7114 = vmatmul.mubr.bf16.vlgmr.msra.gmra.mrb[128].mxu0 %v15152_v43 }
 0x46c   :  { %7175 = vmatmul.mubr.bf16.vlgmr.msra.gmra.mrb[128].mxu1 %v15152_v43  ;;  %7123 = vmatprep.mubr.bf16.mxu0 %v19213_v2 }
 0x46d   :  { %7184 = vmatprep.mubr.bf16.mxu1 %v19213_v2  ;;  %7285 = vmatpush1.bf16.msra.mxu0 %v11915_v22  ;;  %v11920_v22 = vld [vmem:[%s18397_s3 + $0x228] ss:$16 sps:$4 sm:$0xff]  }
 0x46e   :  { %7346 = vmatpush1.bf16.msra.mxu1 %v11916_v42  ;;  %7286 = vmatprep.subr.bf16.mxu0 %v11917_v52  ;;  %v11921_v42 = vld [vmem:[%s18397_s3 + $0x244] ss:$16 sps:$4 sm:$0xff]   ;;  %v11922_v52 = vld [vmem:[%s18397_s3 + $0x24c] ss:$16 sps:$4 sm:$0xff]  }
 0x46f   :  { %7347 = vmatprep.subr.bf16.mxu1 %v11918_v34  ;;  %v19214_v34 = vld [vmem:[#allocation48_spill] sm:$0xff] }
 0x470   :  { %v16930_v8 = vpack.c.bf16 %v19214_v34, %v19214_v34  ;;  %v11926_v34 = vld [vmem:[%s18397_s3 + $0x26c] ss:$16 sps:$4 sm:$0xff]  }
 0x471   :  { %7287 = vmatpush1.bf16.msra.mxu0 %v11919_v46  ;;  %v19215_v46 = vld [vmem:[#allocation10_spill] sm:$0xff] }
 0x472   :  { %7348 = vmatpush1.bf16.msra.mxu1 %v11920_v22  ;;  %7288 = vmatprep.subr.bf16.mxu0 %v11921_v42  ;;  %v11923_v22 = vld [vmem:[%s18397_s3 + $0x240] ss:$16 sps:$4 sm:$0xff]   ;;  %v11924_v42 = vld [vmem:[%s18397_s3 + $0x248] ss:$16 sps:$4 sm:$0xff]  }
 0x473   :  { %7349 = vmatprep.subr.bf16.mxu1 %v11922_v52  ;;  %7124 = vmatmul.mubr.bf16.gmra.mrb[132].mxu0 %v19215_v46  ;;  %v11925_v52 = vld [vmem:[%s18397_s3 + $0x264] ss:$16 sps:$4 sm:$0xff]  }
 0x474   :  { %7185 = vmatmul.mubr.bf16.gmra.mrb[132].mxu1 %v19215_v46  ;;  %7133 = vmatprep.mubr.bf16.mxu0 %v16930_v8 }
 0x475   :  { %7194 = vmatprep.mubr.bf16.mxu1 %v16930_v8  ;;  %7289 = vmatpush1.bf16.msra.mxu0 %v11923_v22  ;;  %v11928_v22 = vld [vmem:[%s18397_s3 + $0x268] ss:$16 sps:$4 sm:$0xff]  }
 0x476   :  { %7350 = vmatpush1.bf16.msra.mxu1 %v11924_v42  ;;  %7290 = vmatprep.subr.bf16.mxu0 %v11925_v52  ;;  %v19216_v42 = vld [vmem:[#allocation16_spill] sm:$0xff] }
 0x477   :  { %7351 = vmatprep.subr.bf16.mxu1 %v11926_v34  ;;  %v16956_v54 = vpack.c.bf16 %v19216_v42, %v19216_v42  ;;  %v11929_v52 = vld [vmem:[%s18397_s3 + $0x284] ss:$16 sps:$4 sm:$0xff]   ;;  %v11930_v34 = vld [vmem:[%s18397_s3 + $0x28c] ss:$16 sps:$4 sm:$0xff]  }
 0x478   :  { %v11933_v42 = vld [vmem:[%s18397_s3 + $0x2a4] ss:$16 sps:$4 sm:$0xff]  }
 0x479   :  { %7291 = vmatpush1.bf16.msra.mxu0 %v11927_v50  ;;  %v11931_v50 = vld [vmem:[%s18397_s3 + $0x280] ss:$16 sps:$4 sm:$0xff]  }
 0x47a   :  { %7352 = vmatpush1.bf16.msra.mxu1 %v11928_v22  ;;  %7292 = vmatprep.subr.bf16.mxu0 %v11929_v52  ;;  %v11932_v22 = vld [vmem:[%s18397_s3 + $0x288] ss:$16 sps:$4 sm:$0xff]   ;;  %v11934_v52 = vld [vmem:[%s18397_s3 + $0x2ac] ss:$16 sps:$4 sm:$0xff]  }
 0x47b   :  { %7353 = vmatprep.subr.bf16.mxu1 %v11930_v34  ;;  %7134 = vmatmul.mubr.bf16.gmra.mrb[152].mxu0 %v16956_v54  ;;  %v11936_v34 = vld [vmem:[%s18397_s3 + $0x2a8] ss:$16 sps:$4 sm:$0xff]  }
 0x47c   :  { %7195 = vmatmul.mubr.bf16.gmra.mrb[152].mxu1 %v16956_v54  ;;  %7316 = vmatprep.mubr.bf16.mxu0 %v19184_v47 }
 0x47d   :  { %7377 = vmatprep.mubr.bf16.mxu1 %v19184_v47  ;;  %7293 = vmatpush1.bf16.msra.mxu0 %v11931_v50  ;;  %v11935_v47 = vld [vmem:[%s18397_s3 + $0x2a0] ss:$16 sps:$4 sm:$0xff]   ;;  %v11937_v50 = vld [vmem:[%s18397_s3 + $0x2c4] ss:$16 sps:$4 sm:$0xff]  }
 0x47e   :  { %7354 = vmatpush1.bf16.msra.mxu1 %v11932_v22  ;;  %7294 = vmatprep.subr.bf16.mxu0 %v11933_v42  ;;  %v11938_v22 = vld [vmem:[%s18397_s3 + $0x2cc] ss:$16 sps:$4 sm:$0xff]   ;;  %v11939_v42 = vld [vmem:[%s18397_s3 + $0x2c0] ss:$16 sps:$4 sm:$0xff]  }
 0x47f   :  { %7355 = vmatprep.subr.bf16.mxu1 %v11934_v52  ;;  %v11940_v52 = vld [vmem:[%s18397_s3 + $0x2c8] ss:$16 sps:$4 sm:$0xff]  }
 0x481   :  { %7295 = vmatpush1.bf16.msra.mxu0 %v11935_v47  ;;  %v11941_v47 = vld [vmem:[%s18397_s3 + $0x2e4] ss:$16 sps:$4 sm:$0xff]  }
 0x482   :  { %7356 = vmatpush1.bf16.msra.mxu1 %v11936_v34  ;;  %7296 = vmatprep.subr.bf16.mxu0 %v11937_v50  ;;  %v11942_v34 = vld [vmem:[%s18397_s3 + $0x2ec] ss:$16 sps:$4 sm:$0xff]   ;;  %v11943_v50 = vld [vmem:[%s18397_s3 + $0x2e0] ss:$16 sps:$4 sm:$0xff]  }
 0x483   :  { %7357 = vmatprep.subr.bf16.mxu1 %v11938_v22  ;;  %v11944_v22 = vld [vmem:[%s18397_s3 + $0x2e8] ss:$16 sps:$4 sm:$0xff]  }
 0x485   :  { %7297 = vmatpush1.bf16.msra.mxu0 %v11939_v42  ;;  %v11945_v42 = vld [vmem:[%s18397_s3 + $0x304] ss:$16 sps:$4 sm:$0xff]  }
 0x486   :  { %7358 = vmatpush1.bf16.msra.mxu1 %v11940_v52  ;;  %7298 = vmatprep.subr.bf16.mxu0 %v11941_v47  ;;  %v11946_v52 = vld [vmem:[%s18397_s3 + $0x30c] ss:$16 sps:$4 sm:$0xff]  }
 0x487   :  { %7359 = vmatprep.subr.bf16.mxu1 %v11942_v34 }
 0x489   :  { %7299 = vmatpush1.bf16.msra.mxu0 %v11943_v50 }
 0x48a   :  { %7360 = vmatpush1.bf16.msra.mxu1 %v11944_v22  ;;  %7300 = vmatprep.subr.bf16.mxu0 %v11945_v42  ;;  %v11948_v42 = vld [vmem:[%s18397_s3 + $0x308] ss:$16 sps:$4 sm:$0xff]  }
 0x48b   :  { %7361 = vmatprep.subr.bf16.mxu1 %v11946_v52  ;;  %v5558_v47 = vpop.f32.mrb[140].mxu0 }
 0x48c   :  { %v5619_v34 = vpop.f32.mrb[140].mxu1  ;;  %v17017_v48 = vadd.f32 %v5558_v47, %v16726_v29  ;;  %v5560_v59 = vpop.f32.mrb[141].mxu0 }
 0x48d   :  { %v17020_v50 = vadd.f32 %v5619_v34, %v16728_v32  ;;  %v5621_v22 = vpop.f32.mrb[141].mxu1  ;;  %7301 = vmatpush1.bf16.msra.mxu0 %v11947_v31  ;;  %v17029_v52 = vadd.f32 %v5560_v59, %v16742_v19  ;;  %v5562_v32 = vpop.f32.mrb[142].mxu0  ;;  %v11949_v34 = vld [vmem:[%s18397_s3 + $0x324] ss:$16 sps:$4 sm:$0xff]   ;;  %v11950_v31 = vld [vmem:[%s18397_s3 + $0x32c] ss:$16 sps:$4 sm:$0xff]  }
 0x48e   :  { %7362 = vmatpush1.bf16.msra.mxu1 %v11948_v42  ;;  %v17032_v29 = vadd.f32 %v5621_v22, %v16744_v26  ;;  %v5623_v47 = vpop.f32.mrb[142].mxu1  ;;  %7302 = vmatprep.subr.bf16.mxu0 %v11949_v34  ;;  %v5563_v41 = vpop.f32.mrb[143].mxu0  ;;  %v11951_v19 = vld [vmem:[%s18397_s3 + $0x320] ss:$16 sps:$4 sm:$0xff]   ;;  %v11952_v26 = vld [vmem:[%s18397_s3 + $0x328] ss:$16 sps:$4 sm:$0xff]  }
 0x48f   :  { %7363 = vmatprep.subr.bf16.mxu1 %v11950_v31  ;;  %v5624_v42 = vpop.f32.mrb[143].mxu1  ;;  %v11953_v59 = vld [vmem:[%s18397_s3 + $0x344] ss:$16 sps:$4 sm:$0xff]   ;;  %v11954_v41 = vld [vmem:[%s18397_s3 + $0x34c] ss:$16 sps:$4 sm:$0xff]  }
 0x490   :  { %v11955_v22 = vld [vmem:[%s18397_s3 + $0x340] ss:$16 sps:$4 sm:$0xff]   ;;  %v11956_v32 = vld [vmem:[%s18397_s3 + $0x348] ss:$16 sps:$4 sm:$0xff]   ;;  %v11957_v47 = vld [vmem:[%s18397_s3 + $0x364] ss:$16 sps:$4 sm:$0xff]  }
 0x491   :  { %7303 = vmatpush1.bf16.msra.mxu0 %v11951_v19  ;;  %v11958_v34 = vld [vmem:[%s18397_s3 + $0x36c] ss:$16 sps:$4 sm:$0xff]   ;;  %v11959_v31 = vld [vmem:[%s18397_s3 + $0x360] ss:$16 sps:$4 sm:$0xff]   ;;  %v11960_v42 = vld [vmem:[%s18397_s3 + $0x368] ss:$16 sps:$4 sm:$0xff]  }
 0x492   :  { %7364 = vmatpush1.bf16.msra.mxu1 %v11952_v26  ;;  %7304 = vmatprep.subr.bf16.mxu0 %v11953_v59  ;;  %v11961_v19 = vld [vmem:[%s18397_s3 + $0x384] ss:$16 sps:$4 sm:$0xff]   ;;  %v11962_v26 = vld [vmem:[%s18397_s3 + $0x38c] ss:$16 sps:$4 sm:$0xff]   ;;  %v11963_v59 = vld [vmem:[%s18397_s3 + $0x380] ss:$16 sps:$4 sm:$0xff]  }
 0x493   :  { %7365 = vmatprep.subr.bf16.mxu1 %v11954_v41  ;;  %v11964_v41 = vld [vmem:[%s18397_s3 + $0x388] ss:$16 sps:$4 sm:$0xff]  }
 0x495   :  { %7305 = vmatpush1.bf16.msra.mxu0 %v11955_v22  ;;  %v11965_v22 = vld [vmem:[%s18397_s3 + $0x3a4] ss:$16 sps:$4 sm:$0xff]  }
 0x496   :  { %7366 = vmatpush1.bf16.msra.mxu1 %v11956_v32  ;;  %7306 = vmatprep.subr.bf16.mxu0 %v11957_v47  ;;  %v11966_v32 = vld [vmem:[%s18397_s3 + $0x3ac] ss:$16 sps:$4 sm:$0xff]   ;;  %v11967_v47 = vld [vmem:[%s18397_s3 + $0x3a0] ss:$16 sps:$4 sm:$0xff]  }
 0x497   :  { %7367 = vmatprep.subr.bf16.mxu1 %v11958_v34  ;;  %v11968_v34 = vld [vmem:[%s18397_s3 + $0x3a8] ss:$16 sps:$4 sm:$0xff]  }
 0x499   :  { %7307 = vmatpush1.bf16.msra.mxu0 %v11959_v31  ;;  %v11969_v31 = vld [vmem:[%s18397_s3 + $0x3c4] ss:$16 sps:$4 sm:$0xff]  }
 0x49a   :  { %7368 = vmatpush1.bf16.msra.mxu1 %v11960_v42  ;;  %7308 = vmatprep.subr.bf16.mxu0 %v11961_v19  ;;  %v11970_v42 = vld [vmem:[%s18397_s3 + $0x3cc] ss:$16 sps:$4 sm:$0xff]   ;;  %v11971_v19 = vld [vmem:[%s18397_s3 + $0x3c0] ss:$16 sps:$4 sm:$0xff]  }
 0x49b   :  { %7369 = vmatprep.subr.bf16.mxu1 %v11962_v26  ;;  %v11972_v26 = vld [vmem:[%s18397_s3 + $0x3c8] ss:$16 sps:$4 sm:$0xff]  }
 0x49d   :  { %7309 = vmatpush1.bf16.msra.mxu0 %v11963_v59  ;;  %v11973_v59 = vld [vmem:[%s18397_s3 + $0x3e4] ss:$16 sps:$4 sm:$0xff]  }
 0x49e   :  { %7370 = vmatpush1.bf16.msra.mxu1 %v11964_v41  ;;  %7310 = vmatprep.subr.bf16.mxu0 %v11965_v22  ;;  %v11974_v41 = vld [vmem:[%s18397_s3 + $0x3ec] ss:$16 sps:$4 sm:$0xff]   ;;  %v11975_v22 = vld [vmem:[%s18397_s3 + $0x3e0] ss:$16 sps:$4 sm:$0xff]  }
 0x49f   :  { %7371 = vmatprep.subr.bf16.mxu1 %v11966_v32  ;;  %v11976_v32 = vld [vmem:[%s18397_s3 + $0x3e8] ss:$16 sps:$4 sm:$0xff]  }
 0x4a1   :  { %7311 = vmatpush1.bf16.msra.mxu0 %v11967_v47  ;;  %v11977_v47 = vld [vmem:[%s18397_s3 + $0x4] ss:$16 sps:$4 sm:$0xff]  }
 0x4a2   :  { %7372 = vmatpush1.bf16.msra.mxu1 %v11968_v34  ;;  %7312 = vmatprep.subr.bf16.mxu0 %v11969_v31  ;;  %v11978_v34 = vld [vmem:[%s18397_s3 + $0xc] ss:$16 sps:$4 sm:$0xff]   ;;  %v11979_v31 = vld [vmem:[%s18397_s3] ss:$16 sps:$4 sm:$0xff]  }
 0x4a3   :  { %7373 = vmatprep.subr.bf16.mxu1 %v11970_v42  ;;  %v11980_v42 = vld [vmem:[%s18397_s3 + $0x8] ss:$16 sps:$4 sm:$0xff]  }
 0x4a5   :  { %7313 = vmatpush1.bf16.msra.mxu0 %v11971_v19  ;;  %v11981_v19 = vld [vmem:[%s18397_s3 + $0x24] ss:$16 sps:$4 sm:$0xff]  }
 0x4a6   :  { %7374 = vmatpush1.bf16.msra.mxu1 %v11972_v26  ;;  %7314 = vmatprep.subr.bf16.mxu0 %v11973_v59  ;;  %v11984_v26 = vld [vmem:[%s18397_s3 + $0x28] ss:$16 sps:$4 sm:$0xff]   ;;  %v11985_v59 = vld [vmem:[%s18397_s3 + $0x44] ss:$16 sps:$4 sm:$0xff]  }
 0x4a7   :  { %7375 = vmatprep.subr.bf16.mxu1 %v11974_v41  ;;  %v11986_v41 = vld [vmem:[%s18397_s3 + $0x4c] ss:$16 sps:$4 sm:$0xff]  }
 0x4a9   :  { %7315 = vmatpush1.bf16.msra.mxu0 %v11975_v22  ;;  %v11987_v22 = vld [vmem:[%s18397_s3 + $0x40] ss:$16 sps:$4 sm:$0xff]  }
 0x4aa   :  { %7376 = vmatpush1.bf16.msra.mxu1 %v11976_v32  ;;  %7406 = vmatprep.subr.bf16.mxu0 %v11977_v47  ;;  %v11988_v32 = vld [vmem:[%s18397_s3 + $0x48] ss:$16 sps:$4 sm:$0xff]   ;;  %v11989_v47 = vld [vmem:[%s18397_s3 + $0x64] ss:$16 sps:$4 sm:$0xff]  }
 0x4ab   :  { %7467 = vmatprep.subr.bf16.mxu1 %v11978_v34  ;;  %v11992_v34 = vld [vmem:[%s18397_s3 + $0x68] ss:$16 sps:$4 sm:$0xff]  }
 0x4ac   :  { %7317 = vmatmul.mubr.bf16.vlgmr.msra.gmra.mrb[156].mxu0 %v19185_v15 }
 0x4ad   :  { %7378 = vmatmul.mubr.bf16.vlgmr.msra.gmra.mrb[156].mxu1 %v19185_v15  ;;  %7326 = vmatprep.mubr.bf16.mxu0 %v19186_v3  ;;  %v11982_v15 = vld [vmem:[%s18397_s3 + $0x2c] ss:$16 sps:$4 sm:$0xff]  }
 0x4ae   :  { %7387 = vmatprep.mubr.bf16.mxu1 %v19186_v3  ;;  %7407 = vmatpush1.bf16.msra.mxu0 %v11979_v31  ;;  %v11983_v3 = vld [vmem:[%s18397_s3 + $0x20] ss:$16 sps:$4 sm:$0xff]   ;;  %v11993_v31 = vld [vmem:[%s18397_s3 + $0x84] ss:$16 sps:$4 sm:$0xff]  }
 0x4af   :  { %7468 = vmatpush1.bf16.msra.mxu1 %v11980_v42  ;;  %7408 = vmatprep.subr.bf16.mxu0 %v11981_v19  ;;  %v11994_v42 = vld [vmem:[%s18397_s3 + $0x8c] ss:$16 sps:$4 sm:$0xff]   ;;  %v11995_v19 = vld [vmem:[%s18397_s3 + $0x80] ss:$16 sps:$4 sm:$0xff]  }
 0x4b0   :  { %7469 = vmatprep.subr.bf16.mxu1 %v11982_v15  ;;  %v11996_v15 = vld [vmem:[%s18397_s3 + $0x88] ss:$16 sps:$4 sm:$0xff]  }
 0x4b2   :  { %7409 = vmatpush1.bf16.msra.mxu0 %v11983_v3  ;;  %v11997_v3 = vld [vmem:[%s18397_s3 + $0xa4] ss:$16 sps:$4 sm:$0xff]  }
 0x4b3   :  { %7470 = vmatpush1.bf16.msra.mxu1 %v11984_v26  ;;  %7410 = vmatprep.subr.bf16.mxu0 %v11985_v59  ;;  %v12000_v26 = vld [vmem:[%s18397_s3 + $0xa8] ss:$16 sps:$4 sm:$0xff]   ;;  %v12001_v59 = vld [vmem:[%s18397_s3 + $0xc4] ss:$16 sps:$4 sm:$0xff]  }
 0x4b4   :  { %7471 = vmatprep.subr.bf16.mxu1 %v11986_v41  ;;  %7327 = vmatmul.mubr.bf16.gmra.mrb[160].mxu0 %v19188_v1  ;;  %v12002_v41 = vld [vmem:[%s18397_s3 + $0xcc] ss:$16 sps:$4 sm:$0xff]  }
 0x4b5   :  { %7388 = vmatmul.mubr.bf16.gmra.mrb[160].mxu1 %v19188_v1  ;;  %7336 = vmatprep.mubr.bf16.mxu0 %v16354_v57  ;;  %v11990_v1 = vld [vmem:[%s18397_s3 + $0x6c] ss:$16 sps:$4 sm:$0xff]  }
 0x4b6   :  { %7397 = vmatprep.mubr.bf16.mxu1 %v16354_v57  ;;  %7411 = vmatpush1.bf16.msra.mxu0 %v11987_v22  ;;  %v11991_v57 = vld [vmem:[%s18397_s3 + $0x60] ss:$16 sps:$4 sm:$0xff]  }
 0x4b7   :  { %7472 = vmatpush1.bf16.msra.mxu1 %v11988_v32  ;;  %7412 = vmatprep.subr.bf16.mxu0 %v11989_v47  ;;  %v12003_v22 = vld [vmem:[%s18397_s3 + $0xc0] ss:$16 sps:$4 sm:$0xff]   ;;  %v12004_v32 = vld [vmem:[%s18397_s3 + $0xc8] ss:$16 sps:$4 sm:$0xff]   ;;  %v12005_v47 = vld [vmem:[%s18397_s3 + $0xe4] ss:$16 sps:$4 sm:$0xff]  }
 0x4b8   :  { %7473 = vmatprep.subr.bf16.mxu1 %v11990_v1  ;;  %v12006_v1 = vld [vmem:[%s18397_s3 + $0xec] ss:$16 sps:$4 sm:$0xff]  }
 0x4ba   :  { %7413 = vmatpush1.bf16.msra.mxu0 %v11991_v57  ;;  %v12007_v57 = vld [vmem:[%s18397_s3 + $0xe0] ss:$16 sps:$4 sm:$0xff]  }
 0x4bb   :  { %7474 = vmatpush1.bf16.msra.mxu1 %v11992_v34  ;;  %7414 = vmatprep.subr.bf16.mxu0 %v11993_v31  ;;  %v12008_v34 = vld [vmem:[%s18397_s3 + $0xe8] ss:$16 sps:$4 sm:$0xff]   ;;  %v12009_v31 = vld [vmem:[%s18397_s3 + $0x104] ss:$16 sps:$4 sm:$0xff]  }
 0x4bc   :  { %7475 = vmatprep.subr.bf16.mxu1 %v11994_v42  ;;  %7337 = vmatmul.mubr.bf16.gmra.mrb[164].mxu0 %v16380_v51  ;;  %v12010_v42 = vld [vmem:[%s18397_s3 + $0x10c] ss:$16 sps:$4 sm:$0xff]  }
 0x4bd   :  { %7398 = vmatmul.mubr.bf16.gmra.mrb[164].mxu1 %v16380_v51  ;;  %7438 = vmatprep.mubr.bf16.mxu0 %v15795_v39  ;;  %v11998_v51 = vld [vmem:[%s18397_s3 + $0xac] ss:$16 sps:$4 sm:$0xff]  }
 0x4be   :  { %7499 = vmatprep.mubr.bf16.mxu1 %v15795_v39  ;;  %7415 = vmatpush1.bf16.msra.mxu0 %v11995_v19  ;;  %v11999_v39 = vld [vmem:[%s18397_s3 + $0xa0] ss:$16 sps:$4 sm:$0xff]  }
 0x4bf   :  { %7476 = vmatpush1.bf16.msra.mxu1 %v11996_v15  ;;  %7416 = vmatprep.subr.bf16.mxu0 %v11997_v3 }
 0x4c0   :  { %7477 = vmatprep.subr.bf16.mxu1 %v11998_v51 }
 0x4c2   :  { %7417 = vmatpush1.bf16.msra.mxu0 %v11999_v39 }
 0x4c3   :  { %7478 = vmatpush1.bf16.msra.mxu1 %v12000_v26  ;;  %7418 = vmatprep.subr.bf16.mxu0 %v12001_v59  ;;  %v12011_v59 = vld [vmem:[%s18397_s3 + $0x100] ss:$16 sps:$4 sm:$0xff]  }
 0x4c4   :  { %7479 = vmatprep.subr.bf16.mxu1 %v12002_v41  ;;  %v12012_v41 = vld [vmem:[%s18397_s3 + $0x108] ss:$16 sps:$4 sm:$0xff]  }
 0x4c6   :  { %7419 = vmatpush1.bf16.msra.mxu0 %v12003_v22 }
 0x4c7   :  { %7480 = vmatpush1.bf16.msra.mxu1 %v12004_v32  ;;  %7420 = vmatprep.subr.bf16.mxu0 %v12005_v47  ;;  %v12013_v47 = vld [vmem:[%s18397_s3 + $0x124] ss:$16 sps:$4 sm:$0xff]  }
 0x4c8   :  { %7481 = vmatprep.subr.bf16.mxu1 %v12006_v1  ;;  %v12014_v1 = vld [vmem:[%s18397_s3 + $0x12c] ss:$16 sps:$4 sm:$0xff]  }
 0x4ca   :  { %7421 = vmatpush1.bf16.msra.mxu0 %v12007_v57 }
 0x4cb   :  { %7482 = vmatpush1.bf16.msra.mxu1 %v12008_v34  ;;  %7422 = vmatprep.subr.bf16.mxu0 %v12009_v31  ;;  %v12017_v31 = vld [vmem:[%s18397_s3 + $0x144] ss:$16 sps:$4 sm:$0xff]  }
 0x4cc   :  { %7483 = vmatprep.subr.bf16.mxu1 %v12010_v42  ;;  %v6071_v19 = vpop.f32.mrb[144].mxu0  ;;  %v12018_v42 = vld [vmem:[%s18397_s3 + $0x14c] ss:$16 sps:$4 sm:$0xff]  }
 0x4cd   :  { %v6132_v15 = vpop.f32.mrb[144].mxu1  ;;  %v17233_v3 = vadd.f32 %v6071_v19, %v17017_v48  ;;  %v6073_v39 = vpop.f32.mrb[145].mxu0  ;;  %v12019_v19 = vld [vmem:[%s18397_s3 + $0x140] ss:$16 sps:$4 sm:$0xff]  }
 0x4ce   :  { %v17236_v51 = vadd.f32 %v6132_v15, %v17020_v50  ;;  %v6134_v26 = vpop.f32.mrb[145].mxu1  ;;  %7423 = vmatpush1.bf16.msra.mxu0 %v12011_v59  ;;  %v17245_v22 = vadd.f32 %v6073_v39, %v17029_v52  ;;  %v6075_v50 = vpop.f32.mrb[146].mxu0  ;;  %v12015_v52 = vld [vmem:[%s18397_s3 + $0x120] ss:$16 sps:$4 sm:$0xff]   ;;  %v12020_v15 = vld [vmem:[%s18397_s3 + $0x148] ss:$16 sps:$4 sm:$0xff]  }
 0x4cf   :  { %7484 = vmatpush1.bf16.msra.mxu1 %v12012_v41  ;;  %v17248_v48 = vadd.f32 %v6134_v26, %v17032_v29  ;;  %v6136_v32 = vpop.f32.mrb[146].mxu1  ;;  %7424 = vmatprep.subr.bf16.mxu0 %v12013_v47  ;;  %v6076_v57 = vpop.f32.mrb[147].mxu0  ;;  %v12016_v29 = vld [vmem:[%s18397_s3 + $0x128] ss:$16 sps:$4 sm:$0xff]   ;;  %v12021_v39 = vld [vmem:[%s18397_s3 + $0x164] ss:$16 sps:$4 sm:$0xff]  }
 0x4d0   :  { %7485 = vmatprep.subr.bf16.mxu1 %v12014_v1  ;;  %v6137_v34 = vpop.f32.mrb[147].mxu1  ;;  %v12022_v26 = vld [vmem:[%s18397_s3 + $0x16c] ss:$16 sps:$4 sm:$0xff]   ;;  %v12023_v59 = vld [vmem:[%s18397_s3 + $0x160] ss:$16 sps:$4 sm:$0xff]  }
 0x4d1   :  { %v12024_v41 = vld [vmem:[%s18397_s3 + $0x168] ss:$16 sps:$4 sm:$0xff]   ;;  %v12025_v50 = vld [vmem:[%s18397_s3 + $0x184] ss:$16 sps:$4 sm:$0xff]   ;;  %v12026_v32 = vld [vmem:[%s18397_s3 + $0x18c] ss:$16 sps:$4 sm:$0xff]  }
 0x4d2   :  { %7425 = vmatpush1.bf16.msra.mxu0 %v12015_v52  ;;  %v12027_v47 = vld [vmem:[%s18397_s3 + $0x180] ss:$16 sps:$4 sm:$0xff]   ;;  %v12028_v1 = vld [vmem:[%s18397_s3 + $0x188] ss:$16 sps:$4 sm:$0xff]   ;;  %v12029_v57 = vld [vmem:[%s18397_s3 + $0x1a4] ss:$16 sps:$4 sm:$0xff]  }
 0x4d3   :  { %7486 = vmatpush1.bf16.msra.mxu1 %v12016_v29  ;;  %7426 = vmatprep.subr.bf16.mxu0 %v12017_v31  ;;  %v12030_v34 = vld [vmem:[%s18397_s3 + $0x1ac] ss:$16 sps:$4 sm:$0xff]   ;;  %v12031_v52 = vld [vmem:[%s18397_s3 + $0x1a0] ss:$16 sps:$4 sm:$0xff]   ;;  %v12032_v29 = vld [vmem:[%s18397_s3 + $0x1a8] ss:$16 sps:$4 sm:$0xff]  }
 0x4d4   :  { %7487 = vmatprep.subr.bf16.mxu1 %v12018_v42  ;;  %v12033_v31 = vld [vmem:[%s18397_s3 + $0x1c4] ss:$16 sps:$4 sm:$0xff]   ;;  %v12034_v42 = vld [vmem:[%s18397_s3 + $0x1cc] ss:$16 sps:$4 sm:$0xff]  }
 0x4d6   :  { %7427 = vmatpush1.bf16.msra.mxu0 %v12019_v19  ;;  %v12035_v19 = vld [vmem:[%s18397_s3 + $0x1c0] ss:$16 sps:$4 sm:$0xff]  }
 0x4d7   :  { %7488 = vmatpush1.bf16.msra.mxu1 %v12020_v15  ;;  %7428 = vmatprep.subr.bf16.mxu0 %v12021_v39  ;;  %v12036_v15 = vld [vmem:[%s18397_s3 + $0x1c8] ss:$16 sps:$4 sm:$0xff]   ;;  %v12037_v39 = vld [vmem:[%s18397_s3 + $0x1e4] ss:$16 sps:$4 sm:$0xff]  }
 0x4d8   :  { %7489 = vmatprep.subr.bf16.mxu1 %v12022_v26  ;;  %v12038_v26 = vld [vmem:[%s18397_s3 + $0x1ec] ss:$16 sps:$4 sm:$0xff]  }
 0x4da   :  { %7429 = vmatpush1.bf16.msra.mxu0 %v12023_v59  ;;  %v12039_v59 = vld [vmem:[%s18397_s3 + $0x1e0] ss:$16 sps:$4 sm:$0xff]  }
 0x4db   :  { %7490 = vmatpush1.bf16.msra.mxu1 %v12024_v41  ;;  %7430 = vmatprep.subr.bf16.mxu0 %v12025_v50  ;;  %v12040_v41 = vld [vmem:[%s18397_s3 + $0x1e8] ss:$16 sps:$4 sm:$0xff]   ;;  %v12041_v50 = vld [vmem:[%s18397_s3 + $0x404] ss:$16 sps:$4 sm:$0xff]  }
 0x4dc   :  { %7491 = vmatprep.subr.bf16.mxu1 %v12026_v32  ;;  %v12042_v32 = vld [vmem:[%s18397_s3 + $0x40c] ss:$16 sps:$4 sm:$0xff]  }
 0x4de   :  { %7431 = vmatpush1.bf16.msra.mxu0 %v12027_v47  ;;  %v12043_v47 = vld [vmem:[%s18397_s3 + $0x400] ss:$16 sps:$4 sm:$0xff]  }
 0x4df   :  { %7492 = vmatpush1.bf16.msra.mxu1 %v12028_v1  ;;  %7432 = vmatprep.subr.bf16.mxu0 %v12029_v57  ;;  %v12044_v1 = vld [vmem:[%s18397_s3 + $0x408] ss:$16 sps:$4 sm:$0xff]   ;;  %v12045_v57 = vld [vmem:[%s18397_s3 + $0x424] ss:$16 sps:$4 sm:$0xff]  }
 0x4e0   :  { %7493 = vmatprep.subr.bf16.mxu1 %v12030_v34  ;;  %v12047_v34 = vld [vmem:[%s18397_s3 + $0x420] ss:$16 sps:$4 sm:$0xff]  }
 0x4e2   :  { %7433 = vmatpush1.bf16.msra.mxu0 %v12031_v52  ;;  %v12048_v52 = vld [vmem:[%s18397_s3 + $0x428] ss:$16 sps:$4 sm:$0xff]  }
 0x4e3   :  { %7494 = vmatpush1.bf16.msra.mxu1 %v12032_v29  ;;  %7434 = vmatprep.subr.bf16.mxu0 %v12033_v31  ;;  %v12049_v29 = vld [vmem:[%s18397_s3 + $0x444] ss:$16 sps:$4 sm:$0xff]   ;;  %v12050_v31 = vld [vmem:[%s18397_s3 + $0x44c] ss:$16 sps:$4 sm:$0xff]  }
 0x4e4   :  { %7495 = vmatprep.subr.bf16.mxu1 %v12034_v42  ;;  %v12051_v42 = vld [vmem:[%s18397_s3 + $0x440] ss:$16 sps:$4 sm:$0xff]  }
 0x4e6   :  { %7435 = vmatpush1.bf16.msra.mxu0 %v12035_v19  ;;  %v12052_v19 = vld [vmem:[%s18397_s3 + $0x448] ss:$16 sps:$4 sm:$0xff]  }
 0x4e7   :  { %7496 = vmatpush1.bf16.msra.mxu1 %v12036_v15  ;;  %7436 = vmatprep.subr.bf16.mxu0 %v12037_v39  ;;  %v12053_v15 = vld [vmem:[%s18397_s3 + $0x464] ss:$16 sps:$4 sm:$0xff]   ;;  %v12054_v39 = vld [vmem:[%s18397_s3 + $0x46c] ss:$16 sps:$4 sm:$0xff]  }
 0x4e8   :  { %7497 = vmatprep.subr.bf16.mxu1 %v12038_v26  ;;  %v12056_v26 = vld [vmem:[%s18397_s3 + $0x468] ss:$16 sps:$4 sm:$0xff]  }
 0x4ea   :  { %7437 = vmatpush1.bf16.msra.mxu0 %v12039_v59  ;;  %v12057_v59 = vld [vmem:[%s18397_s3 + $0x484] ss:$16 sps:$4 sm:$0xff]  }
 0x4eb   :  { %7498 = vmatpush1.bf16.msra.mxu1 %v12040_v41  ;;  %7528 = vmatprep.subr.bf16.mxu0 %v12041_v50  ;;  %v12058_v41 = vld [vmem:[%s18397_s3 + $0x48c] ss:$16 sps:$4 sm:$0xff]   ;;  %v12059_v50 = vld [vmem:[%s18397_s3 + $0x480] ss:$16 sps:$4 sm:$0xff]  }
 0x4ec   :  { %7589 = vmatprep.subr.bf16.mxu1 %v12042_v32  ;;  %v12060_v32 = vld [vmem:[%s18397_s3 + $0x488] ss:$16 sps:$4 sm:$0xff]  }
 0x4ed   :  { %7439 = vmatmul.mubr.bf16.vlgmr.msra.gmra.mrb[156].mxu0 %v15792_v33 }
 0x4ee   :  { %7500 = vmatmul.mubr.bf16.vlgmr.msra.gmra.mrb[156].mxu1 %v15792_v33  ;;  %7448 = vmatprep.mubr.bf16.mxu0 %v15875_v36  ;;  %v12046_v33 = vld [vmem:[%s18397_s3 + $0x42c] ss:$16 sps:$4 sm:$0xff]  }
 0x4ef   :  { %7509 = vmatprep.mubr.bf16.mxu1 %v15875_v36  ;;  %7529 = vmatpush1.bf16.msra.mxu0 %v12043_v47  ;;  %v12061_v47 = vld [vmem:[%s18397_s3 + $0x4a4] ss:$16 sps:$4 sm:$0xff]  }
 0x4f0   :  { %7590 = vmatpush1.bf16.msra.mxu1 %v12044_v1  ;;  %7530 = vmatprep.subr.bf16.mxu0 %v12045_v57  ;;  %v12064_v1 = vld [vmem:[%s18397_s3 + $0x4a8] ss:$16 sps:$4 sm:$0xff]   ;;  %v12065_v57 = vld [vmem:[%s18397_s3 + $0x4c4] ss:$16 sps:$4 sm:$0xff]  }
 0x4f1   :  { %7591 = vmatprep.subr.bf16.mxu1 %v12046_v33  ;;  %v12066_v33 = vld [vmem:[%s18397_s3 + $0x4cc] ss:$16 sps:$4 sm:$0xff]  }
 0x4f3   :  { %7531 = vmatpush1.bf16.msra.mxu0 %v12047_v34  ;;  %v12067_v34 = vld [vmem:[%s18397_s3 + $0x4c0] ss:$16 sps:$4 sm:$0xff]  }
 0x4f4   :  { %7592 = vmatpush1.bf16.msra.mxu1 %v12048_v52  ;;  %7532 = vmatprep.subr.bf16.mxu0 %v12049_v29  ;;  %v12068_v52 = vld [vmem:[%s18397_s3 + $0x4c8] ss:$16 sps:$4 sm:$0xff]   ;;  %v12069_v29 = vld [vmem:[%s18397_s3 + $0x4e4] ss:$16 sps:$4 sm:$0xff]  }
 0x4f5   :  { %7593 = vmatprep.subr.bf16.mxu1 %v12050_v31  ;;  %7449 = vmatmul.mubr.bf16.gmra.mrb[160].mxu0 %v15862_v53  ;;  %v12070_v31 = vld [vmem:[%s18397_s3 + $0x4ec] ss:$16 sps:$4 sm:$0xff]  }
 0x4f6   :  { %7510 = vmatmul.mubr.bf16.gmra.mrb[160].mxu1 %v15862_v53  ;;  %7458 = vmatprep.mubr.bf16.mxu0 %v15930_v63 }
 0x4f7   :  { %7519 = vmatprep.mubr.bf16.mxu1 %v15930_v63  ;;  %7533 = vmatpush1.bf16.msra.mxu0 %v12051_v42  ;;  %v12055_v63 = vld [vmem:[%s18397_s3 + $0x460] ss:$16 sps:$4 sm:$0xff]  }
 0x4f8   :  { %7594 = vmatpush1.bf16.msra.mxu1 %v12052_v19  ;;  %7534 = vmatprep.subr.bf16.mxu0 %v12053_v15  ;;  %v12071_v42 = vld [vmem:[%s18397_s3 + $0x4e0] ss:$16 sps:$4 sm:$0xff]   ;;  %v12072_v19 = vld [vmem:[%s18397_s3 + $0x4e8] ss:$16 sps:$4 sm:$0xff]   ;;  %v12073_v15 = vld [vmem:[%s18397_s3 + $0x504] ss:$16 sps:$4 sm:$0xff]  }
 0x4f9   :  { %7595 = vmatprep.subr.bf16.mxu1 %v12054_v39  ;;  %v12074_v39 = vld [vmem:[%s18397_s3 + $0x50c] ss:$16 sps:$4 sm:$0xff]  }
 0x4fb   :  { %7535 = vmatpush1.bf16.msra.mxu0 %v12055_v63 }
 0x4fc   :  { %7596 = vmatpush1.bf16.msra.mxu1 %v12056_v26  ;;  %7536 = vmatprep.subr.bf16.mxu0 %v12057_v59 }
 0x4fd   :  { %7597 = vmatprep.subr.bf16.mxu1 %v12058_v41  ;;  %7459 = vmatmul.mubr.bf16.gmra.mrb[168].mxu0 %v15950_v7 }
 0x4fe   :  { %7520 = vmatmul.mubr.bf16.gmra.mrb[168].mxu1 %v15950_v7  ;;  %7560 = vmatprep.mubr.bf16.mxu0 %v15856_v20  ;;  %v12062_v7 = vld [vmem:[%s18397_s3 + $0x4ac] ss:$16 sps:$4 sm:$0xff]  }
 0x4ff   :  { %7621 = vmatprep.mubr.bf16.mxu1 %v15856_v20  ;;  %7537 = vmatpush1.bf16.msra.mxu0 %v12059_v50  ;;  %v12063_v20 = vld [vmem:[%s18397_s3 + $0x4a0] ss:$16 sps:$4 sm:$0xff]  }
 0x500   :  { %7598 = vmatpush1.bf16.msra.mxu1 %v12060_v32  ;;  %7538 = vmatprep.subr.bf16.mxu0 %v12061_v47  ;;  %v12075_v47 = vld [vmem:[%s18397_s3 + $0x500] ss:$16 sps:$4 sm:$0xff]  }
 0x501   :  { %7599 = vmatprep.subr.bf16.mxu1 %v12062_v7  ;;  %v12076_v7 = vld [vmem:[%s18397_s3 + $0x508] ss:$16 sps:$4 sm:$0xff]  }
 0x503   :  { %7539 = vmatpush1.bf16.msra.mxu0 %v12063_v20 }
 0x504   :  { %7600 = vmatpush1.bf16.msra.mxu1 %v12064_v1  ;;  %7540 = vmatprep.subr.bf16.mxu0 %v12065_v57  ;;  %v12077_v57 = vld [vmem:[%s18397_s3 + $0x524] ss:$16 sps:$4 sm:$0xff]  }
 0x505   :  { %7601 = vmatprep.subr.bf16.mxu1 %v12066_v33  ;;  %v12078_v33 = vld [vmem:[%s18397_s3 + $0x52c] ss:$16 sps:$4 sm:$0xff]  }
 0x507   :  { %7541 = vmatpush1.bf16.msra.mxu0 %v12067_v34 }
 0x508   :  { %7602 = vmatpush1.bf16.msra.mxu1 %v12068_v52  ;;  %7542 = vmatprep.subr.bf16.mxu0 %v12069_v29  ;;  %v12081_v29 = vld [vmem:[%s18397_s3 + $0x544] ss:$16 sps:$4 sm:$0xff]  }
 0x509   :  { %7603 = vmatprep.subr.bf16.mxu1 %v12070_v31  ;;  %v12082_v31 = vld [vmem:[%s18397_s3 + $0x54c] ss:$16 sps:$4 sm:$0xff]  }
 0x50b   :  { %7543 = vmatpush1.bf16.msra.mxu0 %v12071_v42  ;;  %v12083_v42 = vld [vmem:[%s18397_s3 + $0x540] ss:$16 sps:$4 sm:$0xff]  }
 0x50c   :  { %7604 = vmatpush1.bf16.msra.mxu1 %v12072_v19  ;;  %7544 = vmatprep.subr.bf16.mxu0 %v12073_v15  ;;  %v12084_v19 = vld [vmem:[%s18397_s3 + $0x548] ss:$16 sps:$4 sm:$0xff]   ;;  %v12085_v15 = vld [vmem:[%s18397_s3 + $0x564] ss:$16 sps:$4 sm:$0xff]  }
 0x50d   :  { %7605 = vmatprep.subr.bf16.mxu1 %v12074_v39  ;;  %v6604_v63 = vpop.f32.mrb[148].mxu0  ;;  %v12086_v39 = vld [vmem:[%s18397_s3 + $0x56c] ss:$16 sps:$4 sm:$0xff]  }
 0x50e   :  { %v6665_v26 = vpop.f32.mrb[148].mxu1  ;;  %v17449_v59 = vadd.f32 %v6604_v63, %v17233_v3  ;;  %v6606_v50 = vpop.f32.mrb[149].mxu0  ;;  %v12087_v63 = vld [vmem:[%s18397_s3 + $0x560] ss:$16 sps:$4 sm:$0xff]  }
 0x50f   :  { %v17452_v41 = vadd.f32 %v6665_v26, %v17236_v51  ;;  %v6667_v32 = vpop.f32.mrb[149].mxu1  ;;  %7545 = vmatpush1.bf16.msra.mxu0 %v12075_v47  ;;  %v17461_v20 = vadd.f32 %v6606_v50, %v17245_v22  ;;  %v6608_v51 = vpop.f32.mrb[150].mxu0  ;;  %v12079_v22 = vld [vmem:[%s18397_s3 + $0x520] ss:$16 sps:$4 sm:$0xff]   ;;  %v12088_v26 = vld [vmem:[%s18397_s3 + $0x568] ss:$16 sps:$4 sm:$0xff]  }
 0x510   :  { %7606 = vmatpush1.bf16.msra.mxu1 %v12076_v7  ;;  %v17464_v3 = vadd.f32 %v6667_v32, %v17248_v48  ;;  %v6669_v1 = vpop.f32.mrb[150].mxu1  ;;  %7546 = vmatprep.subr.bf16.mxu0 %v12077_v57  ;;  %v6609_v34 = vpop.f32.mrb[151].mxu0  ;;  %v12080_v48 = vld [vmem:[%s18397_s3 + $0x528] ss:$16 sps:$4 sm:$0xff]   ;;  %v12089_v50 = vld [vmem:[%s18397_s3 + $0x584] ss:$16 sps:$4 sm:$0xff]  }
 0x511   :  { %7607 = vmatprep.subr.bf16.mxu1 %v12078_v33  ;;  %v6670_v52 = vpop.f32.mrb[151].mxu1  ;;  %v12090_v32 = vld [vmem:[%s18397_s3 + $0x58c] ss:$16 sps:$4 sm:$0xff]   ;;  %v12091_v47 = vld [vmem:[%s18397_s3 + $0x580] ss:$16 sps:$4 sm:$0xff]  }
 0x512   :  { %v12092_v7 = vld [vmem:[%s18397_s3 + $0x588] ss:$16 sps:$4 sm:$0xff]   ;;  %v12093_v51 = vld [vmem:[%s18397_s3 + $0x5a4] ss:$16 sps:$4 sm:$0xff]   ;;  %v12094_v1 = vld [vmem:[%s18397_s3 + $0x5ac] ss:$16 sps:$4 sm:$0xff]  }
 0x513   :  { %7547 = vmatpush1.bf16.msra.mxu0 %v12079_v22  ;;  %v12095_v57 = vld [vmem:[%s18397_s3 + $0x5a0] ss:$16 sps:$4 sm:$0xff]   ;;  %v12096_v33 = vld [vmem:[%s18397_s3 + $0x5a8] ss:$16 sps:$4 sm:$0xff]   ;;  %v12097_v34 = vld [vmem:[%s18397_s3 + $0x5c4] ss:$16 sps:$4 sm:$0xff]  }
 0x514   :  { %7608 = vmatpush1.bf16.msra.mxu1 %v12080_v48  ;;  %7548 = vmatprep.subr.bf16.mxu0 %v12081_v29  ;;  %v12098_v52 = vld [vmem:[%s18397_s3 + $0x5cc] ss:$16 sps:$4 sm:$0xff]   ;;  %v12099_v22 = vld [vmem:[%s18397_s3 + $0x5c0] ss:$16 sps:$4 sm:$0xff]   ;;  %v12100_v48 = vld [vmem:[%s18397_s3 + $0x5c8] ss:$16 sps:$4 sm:$0xff]  }
 0x515   :  { %7609 = vmatprep.subr.bf16.mxu1 %v12082_v31  ;;  %v12101_v29 = vld [vmem:[%s18397_s3 + $0x5e4] ss:$16 sps:$4 sm:$0xff]   ;;  %v12102_v31 = vld [vmem:[%s18397_s3 + $0x5ec] ss:$16 sps:$4 sm:$0xff]  }
 0x517   :  { %7549 = vmatpush1.bf16.msra.mxu0 %v12083_v42  ;;  %v12103_v42 = vld [vmem:[%s18397_s3 + $0x5e0] ss:$16 sps:$4 sm:$0xff]  }
 0x518   :  { %7610 = vmatpush1.bf16.msra.mxu1 %v12084_v19  ;;  %7550 = vmatprep.subr.bf16.mxu0 %v12085_v15  ;;  %v12104_v19 = vld [vmem:[%s18397_s3 + $0x5e8] ss:$16 sps:$4 sm:$0xff]   ;;  %v12105_v15 = vld [vmem:[%s18397_s3 + $0x604] ss:$16 sps:$4 sm:$0xff]  }
 0x519   :  { %7611 = vmatprep.subr.bf16.mxu1 %v12086_v39  ;;  %v12106_v39 = vld [vmem:[%s18397_s3 + $0x60c] ss:$16 sps:$4 sm:$0xff]  }
 0x51b   :  { %7551 = vmatpush1.bf16.msra.mxu0 %v12087_v63  ;;  %v12107_v63 = vld [vmem:[%s18397_s3 + $0x600] ss:$16 sps:$4 sm:$0xff]  }
 0x51c   :  { %7612 = vmatpush1.bf16.msra.mxu1 %v12088_v26  ;;  %7552 = vmatprep.subr.bf16.mxu0 %v12089_v50  ;;  %v12108_v26 = vld [vmem:[%s18397_s3 + $0x608] ss:$16 sps:$4 sm:$0xff]   ;;  %v12109_v50 = vld [vmem:[%s18397_s3 + $0x624] ss:$16 sps:$4 sm:$0xff]  }
 0x51d   :  { %7613 = vmatprep.subr.bf16.mxu1 %v12090_v32  ;;  %v12112_v32 = vld [vmem:[%s18397_s3 + $0x628] ss:$16 sps:$4 sm:$0xff]  }
 0x51f   :  { %7553 = vmatpush1.bf16.msra.mxu0 %v12091_v47  ;;  %v12113_v47 = vld [vmem:[%s18397_s3 + $0x644] ss:$16 sps:$4 sm:$0xff]  }
 0x520   :  { %7614 = vmatpush1.bf16.msra.mxu1 %v12092_v7  ;;  %7554 = vmatprep.subr.bf16.mxu0 %v12093_v51  ;;  %v12114_v7 = vld [vmem:[%s18397_s3 + $0x64c] ss:$16 sps:$4 sm:$0xff]   ;;  %v12115_v51 = vld [vmem:[%s18397_s3 + $0x640] ss:$16 sps:$4 sm:$0xff]  }
 0x521   :  { %7615 = vmatprep.subr.bf16.mxu1 %v12094_v1  ;;  %v12116_v1 = vld [vmem:[%s18397_s3 + $0x648] ss:$16 sps:$4 sm:$0xff]  }
 0x523   :  { %7555 = vmatpush1.bf16.msra.mxu0 %v12095_v57  ;;  %v12117_v57 = vld [vmem:[%s18397_s3 + $0x664] ss:$16 sps:$4 sm:$0xff]  }
 0x524   :  { %7616 = vmatpush1.bf16.msra.mxu1 %v12096_v33  ;;  %7556 = vmatprep.subr.bf16.mxu0 %v12097_v34  ;;  %v12120_v33 = vld [vmem:[%s18397_s3 + $0x668] ss:$16 sps:$4 sm:$0xff]   ;;  %v12121_v34 = vld [vmem:[%s18397_s3 + $0x684] ss:$16 sps:$4 sm:$0xff]  }
 0x525   :  { %7617 = vmatprep.subr.bf16.mxu1 %v12098_v52  ;;  %v12122_v52 = vld [vmem:[%s18397_s3 + $0x68c] ss:$16 sps:$4 sm:$0xff]  }
 0x527   :  { %7557 = vmatpush1.bf16.msra.mxu0 %v12099_v22 }
 0x528   :  { %7618 = vmatpush1.bf16.msra.mxu1 %v12100_v48  ;;  %7558 = vmatprep.subr.bf16.mxu0 %v12101_v29 }
 0x529   :  { %7619 = vmatprep.subr.bf16.mxu1 %v12102_v31 }
 0x52b   :  { %7559 = vmatpush1.bf16.msra.mxu0 %v12103_v42  ;;  %v12123_v42 = vld [vmem:[%s18397_s3 + $0x680] ss:$16 sps:$4 sm:$0xff]  }
 0x52c   :  { %7620 = vmatpush1.bf16.msra.mxu1 %v12104_v19  ;;  %7670 = vmatprep.subr.bf16.mxu0 %v12105_v15 }
 0x52d   :  { %7731 = vmatprep.subr.bf16.mxu1 %v12106_v39  ;;  %v12126_v39 = vld [vmem:[%s18397_s3 + $0x6ac] ss:$16 sps:$4 sm:$0xff]  }
 0x52e   :  { %7561 = vmatmul.mubr.bf16.vlgmr.msra.gmra.mrb[156].mxu0 %v15843_v25 }
 0x52f   :  { %7622 = vmatmul.mubr.bf16.vlgmr.msra.gmra.mrb[156].mxu1 %v15843_v25  ;;  %7570 = vmatprep.mubr.bf16.mxu0 %v15953_v10  ;;  %v12110_v25 = vld [vmem:[%s18397_s3 + $0x62c] ss:$16 sps:$4 sm:$0xff]  }
 0x530   :  { %7631 = vmatprep.mubr.bf16.mxu1 %v15953_v10  ;;  %7671 = vmatpush1.bf16.msra.mxu0 %v12107_v63  ;;  %v12111_v10 = vld [vmem:[%s18397_s3 + $0x620] ss:$16 sps:$4 sm:$0xff]  }
 0x531   :  { %7732 = vmatpush1.bf16.msra.mxu1 %v12108_v26  ;;  %7672 = vmatprep.subr.bf16.mxu0 %v12109_v50  ;;  %v12127_v50 = vld [vmem:[%s18397_s3 + $0x6a0] ss:$16 sps:$4 sm:$0xff]  }
 0x532   :  { %7733 = vmatprep.subr.bf16.mxu1 %v12110_v25  ;;  %v12128_v25 = vld [vmem:[%s18397_s3 + $0x6a8] ss:$16 sps:$4 sm:$0xff]  }
 0x534   :  { %7673 = vmatpush1.bf16.msra.mxu0 %v12111_v10  ;;  %v12129_v10 = vld [vmem:[%s18397_s3 + $0x6c4] ss:$16 sps:$4 sm:$0xff]  }
 0x535   :  { %7734 = vmatpush1.bf16.msra.mxu1 %v12112_v32  ;;  %7674 = vmatprep.subr.bf16.mxu0 %v12113_v47  ;;  %v12130_v32 = vld [vmem:[%s18397_s3 + $0x6cc] ss:$16 sps:$4 sm:$0xff]  }
 0x536   :  { %7735 = vmatprep.subr.bf16.mxu1 %v12114_v7  ;;  %7571 = vmatmul.mubr.bf16.gmra.mrb[160].mxu0 %v15959_v18 }
 0x537   :  { %7632 = vmatmul.mubr.bf16.gmra.mrb[160].mxu1 %v15959_v18  ;;  %7580 = vmatprep.mubr.bf16.mxu0 %v16566_v30  ;;  %v12118_v18 = vld [vmem:[%s18397_s3 + $0x66c] ss:$16 sps:$4 sm:$0xff]  }
 0x538   :  { %7641 = vmatprep.mubr.bf16.mxu1 %v16566_v30  ;;  %7675 = vmatpush1.bf16.msra.mxu0 %v12115_v51  ;;  %v12119_v30 = vld [vmem:[%s18397_s3 + $0x660] ss:$16 sps:$4 sm:$0xff]  }
 0x539   :  { %7736 = vmatpush1.bf16.msra.mxu1 %v12116_v1  ;;  %7676 = vmatprep.subr.bf16.mxu0 %v12117_v57  ;;  %v12131_v57 = vld [vmem:[%s18397_s3 + $0x6c0] ss:$16 sps:$4 sm:$0xff]  }
 0x53a   :  { %7737 = vmatprep.subr.bf16.mxu1 %v12118_v18  ;;  %v12132_v18 = vld [vmem:[%s18397_s3 + $0x6c8] ss:$16 sps:$4 sm:$0xff]  }
 0x53c   :  { %7677 = vmatpush1.bf16.msra.mxu0 %v12119_v30 }
 0x53d   :  { %7738 = vmatpush1.bf16.msra.mxu1 %v12120_v33  ;;  %7678 = vmatprep.subr.bf16.mxu0 %v12121_v34  ;;  %v12133_v34 = vld [vmem:[%s18397_s3 + $0x6e4] ss:$16 sps:$4 sm:$0xff]  }
 0x53e   :  { %7739 = vmatprep.subr.bf16.mxu1 %v12122_v52  ;;  %7581 = vmatmul.mubr.bf16.gmra.mrb[172].mxu0 %v16600_v62  ;;  %v17614_v22 = vpop.f32.mrb[128].mxu0  ;;  %v12134_v52 = vld [vmem:[%s18397_s3 + $0x6ec] ss:$16 sps:$4 sm:$0xff]  }
 0x53f   :  { %7642 = vmatmul.mubr.bf16.gmra.mrb[172].mxu1 %v16600_v62  ;;  %v17616_v48 = vpop.f32.mrb[128].mxu1  ;;  %7702 = vmatprep.mubr.bf16.mxu0 %v15157_v4  ;;  %v17620_v29 = vpop.f32.mrb[129].mxu0  ;;  %v12124_v62 = vld [vmem:[%s18397_s3 + $0x688] ss:$16 sps:$4 sm:$0xff]  }
 0x540   :  { %7763 = vmatprep.mubr.bf16.mxu1 %v15157_v4  ;;  %v17622_v31 = vpop.f32.mrb[129].mxu1  ;;  %7679 = vmatpush1.bf16.msra.mxu0 %v12123_v42  ;;  %v17630_v19 = vpop.f32.mrb[130].mxu0  ;;  %v12125_v4 = vld [vmem:[%s18397_s3 + $0x6a4] ss:$16 sps:$4 sm:$0xff]  }
 0x541   :  { %7740 = vmatpush1.bf16.msra.mxu1 %v12124_v62  ;;  %v17632_v15 = vpop.f32.mrb[130].mxu1  ;;  %7680 = vmatprep.subr.bf16.mxu0 %v12125_v4  ;;  %v17640_v63 = vpop.f32.mrb[131].mxu0  ;;  %v12135_v4 = vld [vmem:[%s18397_s3 + $0x6e0] ss:$16 sps:$4 sm:$0xff]  }
 0x542   :  { %7741 = vmatprep.subr.bf16.mxu1 %v12126_v39  ;;  %v17642_v26 = vpop.f32.mrb[131].mxu1  ;;  %v12136_v39 = vld [vmem:[%s18397_s3 + $0x6e8] ss:$16 sps:$4 sm:$0xff]  }
 0x544   :  { %7681 = vmatpush1.bf16.msra.mxu0 %v12127_v50  ;;  %v12137_v50 = vld [vmem:[%s18397_s3 + $0x704] ss:$16 sps:$4 sm:$0xff]  }
 0x545   :  { %7742 = vmatpush1.bf16.msra.mxu1 %v12128_v25  ;;  %7682 = vmatprep.subr.bf16.mxu0 %v12129_v10  ;;  %v12138_v25 = vld [vmem:[%s18397_s3 + $0x70c] ss:$16 sps:$4 sm:$0xff]  }
 0x546   :  { %7743 = vmatprep.subr.bf16.mxu1 %v12130_v32  ;;  %v17656_v47 = vpop.f32.mrb[132].mxu0 }
 0x547   :  { %v17658_v7 = vpop.f32.mrb[132].mxu1  ;;  %v17660_v51 = vpop.f32.mrb[133].mxu0 }
 0x548   :  { %v17662_v1 = vpop.f32.mrb[133].mxu1  ;;  %7683 = vmatpush1.bf16.msra.mxu0 %v12131_v57  ;;  %v17670_v30 = vpop.f32.mrb[134].mxu0 }
 0x549   :  { %7744 = vmatpush1.bf16.msra.mxu1 %v12132_v18  ;;  %v17672_v33 = vpop.f32.mrb[134].mxu1  ;;  %7684 = vmatprep.subr.bf16.mxu0 %v12133_v34  ;;  %v17680_v42 = vpop.f32.mrb[135].mxu0 }
 0x54a   :  { %7745 = vmatprep.subr.bf16.mxu1 %v12134_v52  ;;  %v17682_v62 = vpop.f32.mrb[135].mxu1 }
 0x54c   :  { %7685 = vmatpush1.bf16.msra.mxu0 %v12135_v4  ;;  %v12139_v4 = vld [vmem:[%s18397_s3 + $0x700] ss:$16 sps:$4 sm:$0xff]  }
 0x54d   :  { %7746 = vmatpush1.bf16.msra.mxu1 %v12136_v39  ;;  %7686 = vmatprep.subr.bf16.mxu0 %v12137_v50  ;;  %v12140_v39 = vld [vmem:[%s18397_s3 + $0x708] ss:$16 sps:$4 sm:$0xff]  }
 0x54e   :  { %7747 = vmatprep.subr.bf16.mxu1 %v12138_v25  ;;  %v7135_v10 = vpop.f32.mrb[152].mxu0 }
 0x54f   :  { %v7196_v32 = vpop.f32.mrb[152].mxu1  ;;  %v17697_v57 = vadd.f32 %v7135_v10, %v17449_v59  ;;  %v7137_v34 = vpop.f32.mrb[153].mxu0  ;;  %v12141_v10 = vld [vmem:[%s18397_s3 + $0x724] ss:$16 sps:$4 sm:$0xff]  }
 0x550   :  { %v17700_v18 = vadd.f32 %v7196_v32, %v17452_v41  ;;  %v7198_v52 = vpop.f32.mrb[153].mxu1  ;;  %7687 = vmatpush1.bf16.msra.mxu0 %v12139_v4  ;;  %v17709_v50 = vadd.f32 %v7137_v34, %v17461_v20  ;;  %v7139_v41 = vpop.f32.mrb[154].mxu0  ;;  %v12142_v32 = vld [vmem:[%s18397_s3 + $0x72c] ss:$16 sps:$4 sm:$0xff]   ;;  %v12143_v20 = vld [vmem:[%s18397_s3 + $0x720] ss:$16 sps:$4 sm:$0xff]  }
 0x551   :  { %7748 = vmatpush1.bf16.msra.mxu1 %v12140_v39  ;;  %v17712_v59 = vadd.f32 %v7198_v52, %v17464_v3  ;;  %v7200_v25 = vpop.f32.mrb[154].mxu1  ;;  %7688 = vmatprep.subr.bf16.mxu0 %v12141_v10  ;;  %v7140_v4 = vpop.f32.mrb[155].mxu0  ;;  %v12144_v3 = vld [vmem:[%s18397_s3 + $0x728] ss:$16 sps:$4 sm:$0xff]   ;;  %v12145_v34 = vld [vmem:[%s18397_s3 + $0x744] ss:$16 sps:$4 sm:$0xff]  }
 0x552   :  { %7749 = vmatprep.subr.bf16.mxu1 %v12142_v32  ;;  %v7201_v39 = vpop.f32.mrb[155].mxu1  ;;  %v12146_v52 = vld [vmem:[%s18397_s3 + $0x74c] ss:$16 sps:$4 sm:$0xff]   ;;  %v12147_v41 = vld [vmem:[%s18397_s3 + $0x740] ss:$16 sps:$4 sm:$0xff]  }
 0x553   :  { %v12148_v25 = vld [vmem:[%s18397_s3 + $0x748] ss:$16 sps:$4 sm:$0xff]   ;;  %v12149_v10 = vld [vmem:[%s18397_s3 + $0x764] ss:$16 sps:$4 sm:$0xff]   ;;  %v12150_v32 = vld [vmem:[%s18397_s3 + $0x76c] ss:$16 sps:$4 sm:$0xff]  }
 0x554   :  { %7689 = vmatpush1.bf16.msra.mxu0 %v12143_v20  ;;  %v12151_v4 = vld [vmem:[%s18397_s3 + $0x760] ss:$16 sps:$4 sm:$0xff]   ;;  %v12152_v39 = vld [vmem:[%s18397_s3 + $0x768] ss:$16 sps:$4 sm:$0xff]   ;;  %v12153_v20 = vld [vmem:[%s18397_s3 + $0x784] ss:$16 sps:$4 sm:$0xff]  }
 0x555   :  { %7750 = vmatpush1.bf16.msra.mxu1 %v12144_v3  ;;  %7690 = vmatprep.subr.bf16.mxu0 %v12145_v34  ;;  %v12154_v3 = vld [vmem:[%s18397_s3 + $0x78c] ss:$16 sps:$4 sm:$0xff]   ;;  %v12155_v34 = vld [vmem:[%s18397_s3 + $0x780] ss:$16 sps:$4 sm:$0xff]  }
 0x556   :  { %7751 = vmatprep.subr.bf16.mxu1 %v12146_v52  ;;  %v12156_v52 = vld [vmem:[%s18397_s3 + $0x788] ss:$16 sps:$4 sm:$0xff]  }
 0x558   :  { %7691 = vmatpush1.bf16.msra.mxu0 %v12147_v41  ;;  %v12157_v41 = vld [vmem:[%s18397_s3 + $0x7a4] ss:$16 sps:$4 sm:$0xff]  }
 0x559   :  { %7752 = vmatpush1.bf16.msra.mxu1 %v12148_v25  ;;  %7692 = vmatprep.subr.bf16.mxu0 %v12149_v10  ;;  %v12158_v25 = vld [vmem:[%s18397_s3 + $0x7ac] ss:$16 sps:$4 sm:$0xff]   ;;  %v12159_v10 = vld [vmem:[%s18397_s3 + $0x7a0] ss:$16 sps:$4 sm:$0xff]  }
 0x55a   :  { %7753 = vmatprep.subr.bf16.mxu1 %v12150_v32  ;;  %v12160_v32 = vld [vmem:[%s18397_s3 + $0x7a8] ss:$16 sps:$4 sm:$0xff]  }
 0x55c   :  { %7693 = vmatpush1.bf16.msra.mxu0 %v12151_v4  ;;  %v12161_v4 = vld [vmem:[%s18397_s3 + $0x7c4] ss:$16 sps:$4 sm:$0xff]  }
 0x55d   :  { %7754 = vmatpush1.bf16.msra.mxu1 %v12152_v39  ;;  %7694 = vmatprep.subr.bf16.mxu0 %v12153_v20  ;;  %v12162_v39 = vld [vmem:[%s18397_s3 + $0x7cc] ss:$16 sps:$4 sm:$0xff]   ;;  %v12163_v20 = vld [vmem:[%s18397_s3 + $0x7c0] ss:$16 sps:$4 sm:$0xff]  }
 0x55e   :  { %7755 = vmatprep.subr.bf16.mxu1 %v12154_v3  ;;  %v12164_v3 = vld [vmem:[%s18397_s3 + $0x7c8] ss:$16 sps:$4 sm:$0xff]  }
 0x560   :  { %7695 = vmatpush1.bf16.msra.mxu0 %v12155_v34  ;;  %v12165_v34 = vld [vmem:[%s18397_s3 + $0x7e4] ss:$16 sps:$4 sm:$0xff]  }
 0x561   :  { %7756 = vmatpush1.bf16.msra.mxu1 %v12156_v52  ;;  %7696 = vmatprep.subr.bf16.mxu0 %v12157_v41  ;;  %v12166_v52 = vld [vmem:[%s18397_s3 + $0x7ec] ss:$16 sps:$4 sm:$0xff]   ;;  %v12167_v41 = vld [vmem:[%s18397_s3 + $0x7e0] ss:$16 sps:$4 sm:$0xff]  }
 0x562   :  { %7757 = vmatprep.subr.bf16.mxu1 %v12158_v25  ;;  %v12168_v25 = vld [vmem:[%s18397_s3 + $0x7e8] ss:$16 sps:$4 sm:$0xff]  }
 0x564   :  { %7697 = vmatpush1.bf16.msra.mxu0 %v12159_v10  ;;  %v12169_v10 = vld [vmem:[%s18397_s3 + $0x804] ss:$16 sps:$4 sm:$0xff]  }
 0x565   :  { %7758 = vmatpush1.bf16.msra.mxu1 %v12160_v32  ;;  %7698 = vmatprep.subr.bf16.mxu0 %v12161_v4  ;;  %v12170_v32 = vld [vmem:[%s18397_s3 + $0x80c] ss:$16 sps:$4 sm:$0xff]   ;;  %v12171_v4 = vld [vmem:[%s18397_s3 + $0x800] ss:$16 sps:$4 sm:$0xff]  }
 0x566   :  { %7759 = vmatprep.subr.bf16.mxu1 %v12162_v39  ;;  %v12172_v39 = vld [vmem:[%s18397_s3 + $0x808] ss:$16 sps:$4 sm:$0xff]  }
 0x568   :  { %7699 = vmatpush1.bf16.msra.mxu0 %v12163_v20  ;;  %v12173_v20 = vld [vmem:[%s18397_s3 + $0x824] ss:$16 sps:$4 sm:$0xff]  }
 0x569   :  { %7760 = vmatpush1.bf16.msra.mxu1 %v12164_v3  ;;  %7700 = vmatprep.subr.bf16.mxu0 %v12165_v34  ;;  %v12176_v3 = vld [vmem:[%s18397_s3 + $0x828] ss:$16 sps:$4 sm:$0xff]   ;;  %v12177_v34 = vld [vmem:[%s18397_s3 + $0x844] ss:$16 sps:$4 sm:$0xff]  }
 0x56a   :  { %7761 = vmatprep.subr.bf16.mxu1 %v12166_v52  ;;  %v12178_v52 = vld [vmem:[%s18397_s3 + $0x84c] ss:$16 sps:$4 sm:$0xff]  }
 0x56c   :  { %7701 = vmatpush1.bf16.msra.mxu0 %v12167_v41  ;;  %v12179_v41 = vld [vmem:[%s18397_s3 + $0x840] ss:$16 sps:$4 sm:$0xff]  }
 0x56d   :  { %7762 = vmatpush1.bf16.msra.mxu1 %v12168_v25  ;;  %7816 = vmatprep.subr.bf16.mxu0 %v12169_v10  ;;  %v12180_v25 = vld [vmem:[%s18397_s3 + $0x848] ss:$16 sps:$4 sm:$0xff]   ;;  %v12181_v10 = vld [vmem:[%s18397_s3 + $0x864] ss:$16 sps:$4 sm:$0xff]  }
 0x56e   :  { %7877 = vmatprep.subr.bf16.mxu1 %v12170_v32  ;;  %v19239_v32 = vld [vmem:[#allocation74_spill] sm:$0xff] }
 0x56f   :  { %7703 = vmatmul.mubr.bf16.vlgmr.msra.gmra.mrb[156].mxu0 %v15152_v43 }
 0x570   :  { %7764 = vmatmul.mubr.bf16.vlgmr.msra.gmra.mrb[156].mxu1 %v15152_v43  ;;  %7712 = vmatprep.mubr.bf16.mxu0 %v19213_v2  ;;  %v12174_v43 = vld [vmem:[%s18397_s3 + $0x82c] ss:$16 sps:$4 sm:$0xff]  }
 0x571   :  { %7773 = vmatprep.mubr.bf16.mxu1 %v19213_v2  ;;  %7817 = vmatpush1.bf16.msra.mxu0 %v12171_v4  ;;  %v12175_v2 = vld [vmem:[%s18397_s3 + $0x820] ss:$16 sps:$4 sm:$0xff]   ;;  %v19240_v4 = vld [vmem:[#allocation17_spill] sm:$0xff] }
 0x572   :  { %7878 = vmatpush1.bf16.msra.mxu1 %v12172_v39  ;;  %7818 = vmatprep.subr.bf16.mxu0 %v12173_v20  ;;  %v19241_v39 = vld [vmem:[#allocation20_spill] sm:$0xff] }
 0x573   :  { %7879 = vmatprep.subr.bf16.mxu1 %v12174_v43  ;;  %v7815_v20 = vpack.c.bf16 %v19241_v39, %v19241_v39  ;;  %v19242_v43 = vld [vmem:[#allocation18_spill] sm:$0xff]  ;;  %v11642_v39 = vld [vmem:[%s18398_s5 + $0xb0] sm:$0xff]  }
 0x575   :  { %7819 = vmatpush1.bf16.msra.mxu0 %v12175_v2  ;;  %v19243_v2 = vld [vmem:[#allocation19_spill] sm:$0xff] }
 0x576   :  { %7880 = vmatpush1.bf16.msra.mxu1 %v12176_v3  ;;  %7820 = vmatprep.subr.bf16.mxu0 %v12177_v34  ;;  %v7814_v3 = vpack.c.bf16 %v19243_v2, %v19243_v2  ;;  %v11645_v2 = vld [vmem:[%s18398_s5 + $0xf8] sm:$0xff]  }
 0x577   :  { %7881 = vmatprep.subr.bf16.mxu1 %v12178_v52  ;;  %7713 = vmatmul.mubr.bf16.gmra.mrb[160].mxu0 %v19215_v46 }
 0x578   :  { %7774 = vmatmul.mubr.bf16.gmra.mrb[160].mxu1 %v19215_v46  ;;  %7722 = vmatprep.mubr.bf16.mxu0 %v16930_v8  ;;  %v12182_v46 = vld [vmem:[%s18397_s3 + $0x86c] ss:$16 sps:$4 sm:$0xff]  }
 0x579   :  { %7783 = vmatprep.mubr.bf16.mxu1 %v16930_v8  ;;  %7821 = vmatpush1.bf16.msra.mxu0 %v12179_v41  ;;  %v19238_v8 = vld [vmem:[#allocation40_spill] sm:$0xff] }
 0x57a   :  { %7882 = vmatpush1.bf16.msra.mxu1 %v12180_v25  ;;  %7822 = vmatprep.subr.bf16.mxu0 %v12181_v10 }
 0x57b   :  { %7883 = vmatprep.subr.bf16.mxu1 %v12182_v46 }
 0x57d   :  { %7823 = vmatpush1.bf16.msra.mxu0 %v16581_v28 }
 0x57e   :  { %7884 = vmatpush1.bf16.msra.mxu1 %v16586_v14  ;;  %7824 = vmatprep.subr.bf16.mxu0 %v16591_v49 }
 0x57f   :  { %7885 = vmatprep.subr.bf16.mxu1 %v16596_v12  ;;  %7723 = vmatmul.mubr.bf16.gmra.mrb[176].mxu0 %v16956_v54 }
 0x580   :  { %7784 = vmatmul.mubr.bf16.gmra.mrb[176].mxu1 %v16956_v54  ;;  %7848 = vmatprep.mubr.bf16.mxu0 %v15875_v36  ;;  %v19237_v54 = vld [vmem:[#allocation39_spill] sm:$0xff] }
 0x581   :  { %7909 = vmatprep.mubr.bf16.mxu1 %v15875_v36  ;;  %7825 = vmatpush1.bf16.msra.mxu0 %v16607_v0 }
 0x582   :  { %7886 = vmatpush1.bf16.msra.mxu1 %v16612_v44  ;;  %7826 = vmatprep.subr.bf16.mxu0 %v16619_v5 }
 0x583   :  { %7887 = vmatprep.subr.bf16.mxu1 %v16624_v23  ;;  %v19217_v23 = vld [vmem:[#allocation21_spill] sm:$0xff] }
 0x585   :  { %7827 = vmatpush1.bf16.msra.mxu0 %v16635_v45  ;;  %v19218_v45 = vld [vmem:[#allocation22_spill] sm:$0xff] }
 0x586   :  { %7888 = vmatpush1.bf16.msra.mxu1 %v16640_v6  ;;  %7828 = vmatprep.subr.bf16.mxu0 %v16647_v9  ;;  %v19219_v6 = vld [vmem:[#allocation23_spill] sm:$0xff]  ;;  %v19220_v9 = vld [vmem:[#allocation24_spill] sm:$0xff] }
 0x587   :  { %7889 = vmatprep.subr.bf16.mxu1 %v16652_v27  ;;  %v19221_v27 = vld [vmem:[#allocation57_spill] sm:$0xff] }
 0x589   :  { %7829 = vmatpush1.bf16.msra.mxu0 %v16659_v13  ;;  %v19222_v13 = vld [vmem:[#allocation25_spill] sm:$0xff] }
 0x58a   :  { %7890 = vmatpush1.bf16.msra.mxu1 %v16664_v38  ;;  %7830 = vmatprep.subr.bf16.mxu0 %v16671_v60  ;;  %v19223_v38 = vld [vmem:[#allocation26_spill] sm:$0xff]  ;;  %v19224_v60 = vld [vmem:[#allocation27_spill] sm:$0xff] }
 0x58b   :  { %7891 = vmatprep.subr.bf16.mxu1 %v16676_v40  ;;  %v19225_v40 = vld [vmem:[#allocation28_spill] sm:$0xff] }
 0x58d   :  { %7831 = vmatpush1.bf16.msra.mxu0 %v16683_v11  ;;  %v19226_v11 = vld [vmem:[#allocation29_spill] sm:$0xff] }
 0x58e   :  { %7892 = vmatpush1.bf16.msra.mxu1 %v16688_v55  ;;  %7832 = vmatprep.subr.bf16.mxu0 %v16695_v58  ;;  %v19227_v55 = vld [vmem:[#allocation30_spill] sm:$0xff]  ;;  %v19228_v58 = vld [vmem:[#allocation31_spill] sm:$0xff] }
 0x58f   :  { %7893 = vmatprep.subr.bf16.mxu1 %v16700_v17  ;;  %v7338_v36 = vpop.f32.mrb[164].mxu0  ;;  %v19229_v17 = vld [vmem:[#allocation32_spill] sm:$0xff] }
 0x590   :  { %v7399_v28 = vpop.f32.mrb[164].mxu1  ;;  %v7340_v14 = vpop.f32.mrb[165].mxu0 }
 0x591   :  { %v7401_v49 = vpop.f32.mrb[165].mxu1  ;;  %7833 = vmatpush1.bf16.msra.mxu0 %v16707_v16  ;;  %v7342_v12 = vpop.f32.mrb[166].mxu0  ;;  %v19230_v16 = vld [vmem:[#allocation66_spill] sm:$0xff] }
 0x592   :  { %7894 = vmatpush1.bf16.msra.mxu1 %v16712_v35  ;;  %v7403_v0 = vpop.f32.mrb[166].mxu1  ;;  %7834 = vmatprep.subr.bf16.mxu0 %v16719_v56  ;;  %v7343_v44 = vpop.f32.mrb[167].mxu0  ;;  %v19231_v35 = vld [vmem:[#allocation33_spill] sm:$0xff]  ;;  %v19232_v56 = vld [vmem:[#allocation34_spill] sm:$0xff] }
 0x593   :  { %7895 = vmatprep.subr.bf16.mxu1 %v16724_v21  ;;  %v7404_v5 = vpop.f32.mrb[167].mxu1  ;;  %v19233_v21 = vld [vmem:[#allocation35_spill] sm:$0xff] }
 0x595   :  { %7835 = vmatpush1.bf16.msra.mxu0 %v16735_v37  ;;  %v19234_v37 = vld [vmem:[#allocation36_spill] sm:$0xff] }
 0x596   :  { %7896 = vmatpush1.bf16.msra.mxu1 %v16740_v24  ;;  %7836 = vmatprep.subr.bf16.mxu0 %v16751_v61  ;;  %v19235_v24 = vld [vmem:[#allocation37_spill] sm:$0xff]  ;;  %v19236_v61 = vld [vmem:[#allocation38_spill] sm:$0xff] }
 0x597   :  { %7897 = vmatprep.subr.bf16.mxu1 %v19217_v23 }
 0x599   :  { %7837 = vmatpush1.bf16.msra.mxu0 %v19218_v45  ;;  %v11615_v45 = vld [vmem:[%s18398_s5 + $0x40] sm:$0xff]  }
 0x59a   :  { %7898 = vmatpush1.bf16.msra.mxu1 %v19219_v6  ;;  %7838 = vmatprep.subr.bf16.mxu0 %v19220_v9  ;;  %v11620_v6 = vld [vmem:[%s18398_s5 + $0x8] sm:$0xff]  }
 0x59b   :  { %7899 = vmatprep.subr.bf16.mxu1 %v19221_v27  ;;  %v11621_v9 = vld [vmem:[%s18398_s5 + $0xc8] sm:$0xff]  }
 0x59c   :  { %v11622_v27 = vld [vmem:[%s18398_s5 + $0x88] sm:$0xff]  }
 0x59d   :  { %7839 = vmatpush1.bf16.msra.mxu0 %v19222_v13  ;;  %v11623_v13 = vld [vmem:[%s18398_s5 + $0x50] sm:$0xff]  }
 0x59e   :  { %7900 = vmatpush1.bf16.msra.mxu1 %v19223_v38  ;;  %7840 = vmatprep.subr.bf16.mxu0 %v19224_v60  ;;  %v11624_v38 = vld [vmem:[%s18398_s5 + $0x10] sm:$0xff]  }
 0x59f   :  { %7901 = vmatprep.subr.bf16.mxu1 %v19225_v40  ;;  %v11625_v60 = vld [vmem:[%s18398_s5 + $0xd0] sm:$0xff]  }
 0x5a0   :  { %v11626_v40 = vld [vmem:[%s18398_s5 + $0x90] sm:$0xff]  }
 0x5a1   :  { %7841 = vmatpush1.bf16.msra.mxu0 %v19226_v11  ;;  %v11627_v11 = vld [vmem:[%s18398_s5 + $0x58] sm:$0xff]  }
 0x5a2   :  { %7902 = vmatpush1.bf16.msra.mxu1 %v19227_v55  ;;  %7842 = vmatprep.subr.bf16.mxu0 %v19228_v58  ;;  %v11628_v55 = vld [vmem:[%s18398_s5 + $0x18] sm:$0xff]  }
 0x5a3   :  { %7903 = vmatprep.subr.bf16.mxu1 %v19229_v17  ;;  %v11629_v58 = vld [vmem:[%s18398_s5 + $0xd8] sm:$0xff]  }
 0x5a4   :  { %v11630_v17 = vld [vmem:[%s18398_s5 + $0x98] sm:$0xff]  }
 0x5a5   :  { %7843 = vmatpush1.bf16.msra.mxu0 %v19230_v16  ;;  %v11631_v16 = vld [vmem:[%s18398_s5 + $0x60] sm:$0xff]  }
 0x5a6   :  { %7904 = vmatpush1.bf16.msra.mxu1 %v19231_v35  ;;  %7844 = vmatprep.subr.bf16.mxu0 %v19232_v56  ;;  %v11632_v35 = vld [vmem:[%s18398_s5 + $0x20] sm:$0xff]  }
 0x5a7   :  { %7905 = vmatprep.subr.bf16.mxu1 %v19233_v21  ;;  %v11633_v56 = vld [vmem:[%s18398_s5 + $0xe0] sm:$0xff]  }
 0x5a8   :  { %v11634_v21 = vld [vmem:[%s18398_s5 + $0xa0] sm:$0xff]  }
 0x5a9   :  { %7845 = vmatpush1.bf16.msra.mxu0 %v19234_v37  ;;  %v11635_v37 = vld [vmem:[%s18398_s5 + $0x68] sm:$0xff]  }
 0x5aa   :  { %7906 = vmatpush1.bf16.msra.mxu1 %v19235_v24  ;;  %7846 = vmatprep.subr.bf16.mxu0 %v19236_v61  ;;  %v11636_v24 = vld [vmem:[%s18398_s5 + $0x28] sm:$0xff]  }
 0x5ab   :  { %7907 = vmatprep.subr.bf16.mxu1 %v19237_v54  ;;  %v11637_v61 = vld [vmem:[%s18398_s5 + $0xe8] sm:$0xff]  }
 0x5ac   :  { %v11638_v54 = vld [vmem:[%s18398_s5 + $0xa8] sm:$0xff]  }
 0x5ad   :  { %7847 = vmatpush1.bf16.msra.mxu0 %v19238_v8  ;;  %v11639_v8 = vld [vmem:[%s18398_s5 + $0x70] sm:$0xff]  }
 0x5ae   :  { %7908 = vmatpush1.bf16.msra.mxu1 %v19239_v32  ;;  %v11640_v32 = vld [vmem:[%s18398_s5 + $0x30] sm:$0xff]  }
 0x5af   :  { %10234 = vmatprep.subr.bf16.mxu1 %v11615_v45 }
 0x5b0   :  { %7849 = vmatmul.mubr.bf16.vlgmr.msra.gmra.mrb[156].mxu0 %v15862_v53 }
 0x5b1   :  { %7910 = vmatmul.mubr.bf16.vlgmr.msra.gmra.mrb[156].mxu1 %v15862_v53  ;;  %7858 = vmatprep.mubr.bf16.mxu0 %v19240_v4 }
 0x5b2   :  { %7919 = vmatprep.mubr.bf16.mxu1 %v19240_v4  ;;  %v11641_v4 = vld [vmem:[%s18398_s5 + $0xf0] sm:$0xff]  }
 0x5b8   :  { %7859 = vmatmul.mubr.bf16.gmra.mrb[160].mxu0 %v19242_v43 }
 0x5b9   :  { %7920 = vmatmul.mubr.bf16.gmra.mrb[160].mxu1 %v19242_v43  ;;  %7868 = vmatprep.mubr.bf16.mxu0 %v7815_v20  ;;  %v11644_v43 = vld [vmem:[%s18398_s5 + $0x38] sm:$0xff]  }
 0x5ba   :  { %7929 = vmatprep.mubr.bf16.mxu1 %v7815_v20  ;;  %v11643_v20 = vld [vmem:[%s18398_s5 + $0x78] sm:$0xff]  }
 0x5c0   :  { %7869 = vmatmul.mubr.bf16.gmra.mrb[180].mxu0 %v7814_v3 }
 0x5c1   :  { %7930 = vmatmul.mubr.bf16.gmra.mrb[180].mxu1 %v7814_v3  ;;  %v11646_v3 = vld [vmem:[%s18398_s5 + $0xb8] sm:$0xff]  }
 0x5d0   :  { %v7460_v34 = vpop.f32.mrb[168].mxu0 }
 0x5d1   :  { %v7521_v53 = vpop.f32.mrb[168].mxu1  ;;  %v17912_v52 = vadd.f32 %v7460_v34, %v7338_v36  ;;  %v7462_v25 = vpop.f32.mrb[169].mxu0  ;;  %v11616_v36 = vld [vmem:[%s18398_s5] sm:$0xff]  }
 0x5d2   :  { %v17914_v41 = vadd.f32 %v7521_v53, %v7399_v28  ;;  %v7523_v10 = vpop.f32.mrb[169].mxu1  ;;  %v17916_v46 = vadd.f32 %v7462_v25, %v7340_v14  ;;  %v7464_v0 = vpop.f32.mrb[170].mxu0  ;;  %v11617_v28 = vld [vmem:[%s18398_s5 + $0xc0] sm:$0xff]   ;;  %10235 = vmatpush3.bf16.msra.mxu1 %v11616_v36 }
 0x5d3   :  { %v17918_v12 = vadd.f32 %v7523_v10, %v7401_v49  ;;  %v7525_v44 = vpop.f32.mrb[170].mxu1  ;;  %v7465_v5 = vpop.f32.mrb[171].mxu0  ;;  %v11618_v14 = vld [vmem:[%s18398_s5 + $0x80] sm:$0xff]   ;;  %10212 = vmatprep.subr.bf16.mxu0 %v11617_v28  ;;  %v11619_v49 = vld [vmem:[%s18398_s5 + $0x48] sm:$0xff]  }
 0x5d4   :  { %v7526_v23 = vpop.f32.mrb[171].mxu1  ;;  %10213 = vmatpush3.bf16.msra.mxu0 %v11618_v14  ;;  %10236 = vmatprep.subr.bf16.mxu1 %v11619_v49  ;;  %v11647_v34 = vld [vmem:[%s18398_s5 + $0x1c0] sm:$0xff]  }
 0x5d5   :  { %10214 = vmatprep.subr.bf16.mxu0 %v11621_v9  ;;  %v11649_v23 = vld [vmem:[%s18398_s5 + $0x140] sm:$0xff]  }
 0x5d6   :  { %10237 = vmatpush3.bf16.msra.mxu1 %v11620_v6 }
 0x5d7   :  { %10238 = vmatprep.subr.bf16.mxu1 %v11623_v13 }
 0x5d8   :  { %10215 = vmatpush3.bf16.msra.mxu0 %v11622_v27 }
 0x5d9   :  { %10216 = vmatprep.subr.bf16.mxu0 %v11625_v60 }
 0x5da   :  { %10239 = vmatpush3.bf16.msra.mxu1 %v11624_v38 }
 0x5db   :  { %10240 = vmatprep.subr.bf16.mxu1 %v11627_v11 }
 0x5dc   :  { %10217 = vmatpush3.bf16.msra.mxu0 %v11626_v40 }
 0x5dd   :  { %10218 = vmatprep.subr.bf16.mxu0 %v11629_v58  ;;  %v40_v58 = vld [vmem:[%s18399_s4] sm:$0xf] }
 0x5de   :  { %10241 = vmatpush3.bf16.msra.mxu1 %v11628_v55 }
 0x5df   :  { %10242 = vmatprep.subr.bf16.mxu1 %v11631_v16 }
 0x5e0   :  { %10219 = vmatpush3.bf16.msra.mxu0 %v11630_v17  ;;  %v19244_v17 = vld [vmem:[#allocation15_spill] sm:$0xff] }
 0x5e1   :  { %10220 = vmatprep.subr.bf16.mxu0 %v11633_v56  ;;  %v19245_v16 = vsub.s32 0, %v19244_v17  ;;  %v19246_v56 = vsub.s32 2, %v19244_v17 }
 0x5e2   :  { %10243 = vmatpush3.bf16.msra.mxu1 %v11632_v35 }
 0x5e3   :  { %10244 = vmatprep.subr.bf16.mxu1 %v11635_v37  ;;  %v18039_v35 = vrot.slane %v40_v58, %v19245_v16  ;;  %v19247_v37 = vsub.s32 1, %v19244_v17 }
 0x5e4   :  { %10221 = vmatpush3.bf16.msra.mxu0 %v11634_v21  ;;  %v18043_v21 = vrot.slane %v40_v58, %v19246_v56 }
 0x5e5   :  { %10222 = vmatprep.subr.bf16.mxu0 %v11637_v61  ;;  %v19248_v61 = vsub.s32 3, %v19244_v17 }
 0x5e6   :  { %10245 = vmatpush3.bf16.msra.mxu1 %v11636_v24  ;;  %v18047_v24 = vrot.slane %v40_v58, %v19247_v37 }
 0x5e7   :  { %10246 = vmatprep.subr.bf16.mxu1 %v11639_v8  ;;  %v7244_v8 = vadd.f32 %v18039_v35, %v17614_v22 }
 0x5e8   :  { %10223 = vmatpush3.bf16.msra.mxu0 %v11638_v54  ;;  %v18051_v54 = vrot.slane %v40_v58, %v19248_v61 }
 0x5e9   :  { %10224 = vmatprep.subr.bf16.mxu0 %v11641_v4  ;;  %v7245_v4 = vadd.f32 %v18047_v24, %v17620_v29  ;;  %v18075_v29 = vadd.f32 %v18043_v21, %v17658_v7 }
 0x5ea   :  { %10247 = vmatpush3.bf16.msra.mxu1 %v11640_v32  ;;  %v7246_v32 = vadd.f32 %v18043_v21, %v17616_v48  ;;  %v7251_v22 = vadd.f32 %v18051_v54, %v17642_v26  ;;  %v18071_v48 = vadd.f32 %v18039_v35, %v17656_v47  ;;  %v18087_v26 = vadd.f32 %v18039_v35, %v17670_v30 }
 0x5eb   :  { %10248 = vmatprep.subr.bf16.mxu1 %v11643_v20  ;;  %v7248_v20 = vadd.f32 %v18039_v35, %v17630_v19  ;;  %v18083_v19 = vadd.f32 %v18051_v54, %v17662_v1  ;;  %v18091_v47 = vadd.f32 %v18043_v21, %v17672_v33  ;;  %v7265_v7 = vmax.f32 %v7245_v4, 0.0 }
 0x5ec   :  { %10225 = vmatpush3.bf16.msra.mxu0 %v11642_v39  ;;  %v7247_v39 = vadd.f32 %v18051_v54, %v17622_v31  ;;  %v18079_v31 = vadd.f32 %v18047_v24, %v17660_v51  ;;  %v18095_v51 = vadd.f32 %v18047_v24, %v17680_v42  ;;  %v18099_v1 = vadd.f32 %v18051_v54, %v17682_v62 }
 0x5ed   :  { %10226 = vmatprep.subr.bf16.mxu0 %v11645_v2  ;;  %v7249_v2 = vadd.f32 %v18047_v24, %v17640_v63  ;;  %v7266_v63 = vmax.f32 %v7246_v32, 0.0  ;;  %v7272_v30 = vmax.f32 %v18071_v48, 0.0  ;;  %v7276_v42 = vmax.f32 %v18087_v26, 0.0  ;;  %v11652_v48 = vld [vmem:[%s18398_s5 + $0x188] sm:$0xff]  }
 0x5ee   :  { %10249 = vmatpush3.bf16.msra.mxu1 %v11644_v43  ;;  %v7250_v43 = vadd.f32 %v18043_v21, %v17632_v15  ;;  %v7264_v15 = vmax.f32 %v7244_v8, 0.0  ;;  %v7273_v33 = vmax.f32 %v18079_v31, 0.0  ;;  %v11650_v31 = vld [vmem:[%s18398_s5 + $0x100] sm:$0xff]  }
 0x5ef   :  { %10278 = vmatprep.subr.bf16.mxu1 %v11647_v34  ;;  %v7268_v34 = vmax.f32 %v7248_v20, 0.0 }
 0x5f0   :  { %10227 = vmatpush3.bf16.msra.mxu0 %v11646_v3  ;;  %v7267_v3 = vmax.f32 %v7247_v39, 0.0 }
 0x5f1   :  { %10256 = vmatprep.subr.bf16.mxu0 %v11649_v23 }
 0x611   :  { %v7582_v53 = vpop.f32.mrb[172].mxu0 }
 0x612   :  { %v7643_v25 = vpop.f32.mrb[172].mxu1  ;;  %v7666_v10 = vadd.f32 %v7582_v53, %v17912_v52  ;;  %v7584_v44 = vpop.f32.mrb[173].mxu0  ;;  %v7270_v53 = vmax.f32 %v7250_v43, 0.0 }
 0x613   :  { %v7668_v0 = vadd.f32 %v7643_v25, %v17914_v41  ;;  %v7645_v5 = vpop.f32.mrb[173].mxu1  ;;  %v7667_v45 = vadd.f32 %v7584_v44, %v17916_v46  ;;  %v7586_v28 = vpop.f32.mrb[174].mxu0  ;;  %v7269_v25 = vmax.f32 %v7249_v2, 0.0  ;;  %v7275_v44 = vmax.f32 %v18083_v19, 0.0  ;;  %v11655_v19 = vld [vmem:[%s18398_s5 + $0x1d0] sm:$0xff]  }
 0x614   :  { %v7669_v36 = vadd.f32 %v7645_v5, %v17918_v12  ;;  %v7647_v14 = vpop.f32.mrb[174].mxu1  ;;  %v7587_v49 = vpop.f32.mrb[175].mxu0 }
 0x615   :  { %v7648_v6 = vpop.f32.mrb[175].mxu1  ;;  %v7277_v49 = vmax.f32 %v18095_v51, 0.0 }
 0x616   :  { %v7279_v6 = vmax.f32 %v18099_v1, 0.0  ;;  %v11656_v1 = vld [vmem:[%s18398_s5 + $0x190] sm:$0xff]  }
 0x652   :  { %v7724_v9 = vpop.f32.mrb[176].mxu0 }
 0x653   :  { %v7785_v27 = vpop.f32.mrb[176].mxu1  ;;  %v18026_v52 = vadd.f32 %v7724_v9, %v7666_v10  ;;  %v7726_v13 = vpop.f32.mrb[177].mxu0  ;;  %v7271_v10 = vmax.f32 %v7251_v22, 0.0 }
 0x654   :  { %v18028_v41 = vadd.f32 %v7785_v27, %v7668_v0  ;;  %v7787_v38 = vpop.f32.mrb[177].mxu1  ;;  %v18030_v60 = vadd.f32 %v7726_v13, %v7667_v45  ;;  %v7728_v46 = vpop.f32.mrb[178].mxu0  ;;  %v7274_v0 = vmax.f32 %v18075_v29, 0.0  ;;  %v7278_v45 = vmax.f32 %v18091_v47, 0.0 }
 0x655   :  { %v18032_v40 = vadd.f32 %v7787_v38, %v7669_v36  ;;  %v7789_v11 = vpop.f32.mrb[178].mxu1  ;;  %v7729_v12 = vpop.f32.mrb[179].mxu0 }
 0x656   :  { %v7790_v55 = vpop.f32.mrb[179].mxu1 }
 0x683   :  { %v7850_v5 = vpop.f32.mrb[156].mxu0 }
 0x684   :  { %v7911_v23 = vpop.f32.mrb[156].mxu1  ;;  %v7958_v62 = vadd.f32 %v7850_v5, %v18039_v35  ;;  %v7852_v28 = vpop.f32.mrb[157].mxu0  ;;  %v18119_v5 = vadd.f32 %v18039_v35, %v17697_v57 }
 0x685   :  { %v7960_v36 = vadd.f32 %v7911_v23, %v18043_v21  ;;  %v7913_v14 = vpop.f32.mrb[157].mxu1  ;;  %v7959_v9 = vadd.f32 %v7852_v28, %v18047_v24  ;;  %v7854_v13 = vpop.f32.mrb[158].mxu0  ;;  %v18123_v28 = vadd.f32 %v18043_v21, %v17700_v18 }
 0x686   :  { %v7961_v27 = vadd.f32 %v7913_v14, %v18051_v54  ;;  %v7915_v38 = vpop.f32.mrb[158].mxu1  ;;  %v7978_v46 = vmax.f32 %v7958_v62, 0.0  ;;  %v7962_v12 = vadd.f32 %v7854_v13, %v18039_v35  ;;  %v7856_v58 = vpop.f32.mrb[159].mxu0 }
 0x687   :  { %v7980_v11 = vmax.f32 %v7960_v36, 0.0  ;;  %v7964_v55 = vadd.f32 %v7915_v38, %v18043_v21  ;;  %v7917_v17 = vpop.f32.mrb[159].mxu1  ;;  %v7979_v16 = vmax.f32 %v7959_v9, 0.0  ;;  %v7963_v37 = vadd.f32 %v7856_v58, %v18047_v24 }
 0x688   :  { %v7981_v56 = vmax.f32 %v7961_v27, 0.0  ;;  %v7965_v61 = vadd.f32 %v7917_v17, %v18051_v54  ;;  %v7998_v8 = vmax.f32 %v7264_v15, %v7978_v46  ;;  %v7982_v4 = vmax.f32 %v7962_v12, 0.0 }
 0x689   :  { %v8000_v32 = vmax.f32 %v7266_v63, %v7980_v11  ;;  %v7984_v39 = vmax.f32 %v7964_v55, 0.0  ;;  %v7999_v20 = vmax.f32 %v7265_v7, %v7979_v16  ;;  %v7983_v2 = vmax.f32 %v7963_v37, 0.0  ;;  %v11648_v11 = vld [vmem:[%s18398_s5 + $0x180] sm:$0xff]   ;;  %v11651_v37 = vld [vmem:[%s18398_s5 + $0x1c8] sm:$0xff]  }
 0x68a   :  { %v8001_v43 = vmax.f32 %v7267_v3, %v7981_v56  ;;  %v7985_v22 = vmax.f32 %v7965_v61, 0.0  ;;  %v8002_v62 = vmax.f32 %v7268_v34, %v7982_v4  ;;  %v18127_v7 = vadd.f32 %v18047_v24, %v17709_v50 }
 0x68b   :  { %v8018_v23 = vmax.f32 %v7998_v8, %v8000_v32  ;;  %v8004_v36 = vmax.f32 %v7270_v53, %v7984_v39  ;;  %v8003_v14 = vmax.f32 %v7269_v25, %v7983_v2  ;;  %v7860_v63 = vpop.f32.mrb[160].mxu0 }
 0x68c   :  { %v8005_v15 = vmax.f32 %v7271_v10, %v7985_v22  ;;  %v7921_v9 = vpop.f32.mrb[160].mxu1  ;;  %v8019_v27 = vmax.f32 %v7999_v20, %v8001_v43  ;;  %v7966_v57 = vadd.f32 %v7860_v63, %v18039_v35  ;;  %v7862_v34 = vpop.f32.mrb[161].mxu0  ;;  %v11653_v63 = vld [vmem:[%s18398_s5 + $0x148] sm:$0xff]  }
 0x68d   :  { %v8020_v3 = vmax.f32 %v8002_v62, %v8004_v36  ;;  %v7968_v13 = vadd.f32 %v7921_v9, %v18043_v21  ;;  %v7923_v53 = vpop.f32.mrb[161].mxu1  ;;  %v7967_v38 = vadd.f32 %v7862_v34, %v18047_v24  ;;  %v7864_v25 = vpop.f32.mrb[162].mxu0  ;;  %v8028_v12 = vpack.c.bf16 %v8018_v23, %v8018_v23 }
 0x68e   :  { %v7969_v18 = vadd.f32 %v7923_v53, %v18051_v54  ;;  %v7925_v10 = vpop.f32.mrb[162].mxu1  ;;  %v8029_v46 = vpack.c.bf16 %v8019_v27, %v8019_v27  ;;  %v8021_v50 = vmax.f32 %v8003_v14, %v8005_v15  ;;  %v7986_v55 = vmax.f32 %v7966_v57, 0.0  ;;  %v7866_v16 = vpop.f32.mrb[163].mxu0 }
 0x68f   :  { %v7988_v58 = vmax.f32 %v7968_v13, 0.0  ;;  %v7970_v17 = vadd.f32 %v7864_v25, %v18039_v35  ;;  %v7927_v56 = vpop.f32.mrb[163].mxu1  ;;  %v7987_v61 = vmax.f32 %v7967_v38, 0.0  ;;  %v7972_v32 = vadd.f32 %v7925_v10, %v18043_v21 }
 0x690   :  { %v7989_v8 = vmax.f32 %v7969_v18, 0.0  ;;  %v7971_v4 = vadd.f32 %v7866_v16, %v18047_v24  ;;  %8361 = vmatprep.mubr.bf16.mxu1 %v8029_v46  ;;  %v8006_v39 = vmax.f32 %v7272_v30, %v7986_v55  ;;  %v7973_v2 = vadd.f32 %v7927_v56, %v18051_v54 }
 0x691   :  { %v8008_v20 = vmax.f32 %v7274_v0, %v7988_v58  ;;  %v7990_v43 = vmax.f32 %v7970_v17, 0.0  ;;  %8362 = vmatmul.mubr.bf16.vlgmr.msra.gmra.mrb[184].mxu1 %v8028_v12  ;;  %v8007_v22 = vmax.f32 %v7273_v33, %v7987_v61  ;;  %v7992_v62 = vmax.f32 %v7972_v32, 0.0 }
 0x692   :  { %v8009_v23 = vmax.f32 %v7275_v44, %v7989_v8  ;;  %v7991_v36 = vmax.f32 %v7971_v4, 0.0  ;;  %10279 = vmatpush3.bf16.msra.mxu1 %v11648_v11  ;;  %v7993_v0 = vmax.f32 %v7973_v2, 0.0  ;;  %v8063_v14 = vpack.c.bf16 %v8021_v50, %v8021_v50  ;;  %v11661_v8 = vld [vmem:[%s18398_s5 + $0x158] sm:$0xff]   ;;  %v11664_v4 = vld [vmem:[%s18398_s5 + $0x1a0] sm:$0xff]  }
 0x693   :  { %v18154_v30 = vmax.f32 %v8006_v39, %v8008_v20  ;;  %v8010_v29 = vmax.f32 %v7276_v42, %v7990_v43  ;;  %10280 = vmatprep.subr.bf16.mxu1 %v11651_v37  ;;  %v8062_v33 = vpack.c.bf16 %v8020_v3, %v8020_v3  ;;  %v8012_v44 = vmax.f32 %v7278_v45, %v7992_v62  ;;  %v7870_v26 = vpop.f32.mrb[180].mxu0  ;;  %v11662_v20 = vld [vmem:[%s18398_s5 + $0x118] sm:$0xff]   ;;  %v11667_v43 = vld [vmem:[%s18398_s5 + $0x1e8] sm:$0xff]   ;;  %v11665_v2 = vld [vmem:[%s18398_s5 + $0x160] sm:$0xff]  }
 0x694   :  { %v8011_v15 = vmax.f32 %v7277_v49, %v7991_v36  ;;  %v7931_v42 = vpop.f32.mrb[180].mxu1  ;;  %v8023_v9 = vmax.f32 %v8007_v22, %v8009_v23  ;;  %v7263_v27 = vadd.f32 %v18051_v54, %v17712_v59  ;;  %v8013_v57 = vmax.f32 %v7279_v6, %v7993_v0  ;;  %8225 = vmatprep.mubr.bf16.mxu0 %v8063_v14  ;;  %v7872_v51 = vpop.f32.mrb[181].mxu0  ;;  %v11668_v22 = vld [vmem:[%s18398_s5 + $0x1a8] sm:$0xff]   ;;  %v11666_v23 = vld [vmem:[%s18398_s5 + $0x120] sm:$0xff]   ;;  %v11671_v62 = vld [vmem:[%s18398_s5 + $0x1f0] sm:$0xff]  }
 0x695   :  { %v7954_v47 = vadd.f32 %v7870_v26, %v18026_v52  ;;  %v7956_v45 = vadd.f32 %v7931_v42, %v18028_v41  ;;  %v7933_v49 = vpop.f32.mrb[181].mxu1  ;;  %v18177_v3 = vmax.f32 %v8010_v29, %v8012_v44  ;;  %8226 = vmatmul.mubr.bf16.vlgmr.msra.gmra.mrb[184].mxu0 %v8062_v33  ;;  %v7955_v13 = vadd.f32 %v7872_v51, %v18030_v60  ;;  %v7874_v53 = vpop.f32.mrb[182].mxu0  ;;  %v11654_v60 = vld [vmem:[%s18398_s5 + $0x108] sm:$0xff]   ;;  %v11675_v0 = vld [vmem:[%s18398_s5 + $0x1f8] sm:$0xff]   ;;  %v11673_v14 = vld [vmem:[%s18398_s5 + $0x170] sm:$0xff]  }
 0x696   :  { %v7957_v34 = vadd.f32 %v7933_v49, %v18032_v40  ;;  %10281 = vmatpush3.bf16.msra.mxu1 %v11652_v48  ;;  %v7935_v59 = vpop.f32.mrb[182].mxu1  ;;  %10257 = vmatpush3.bf16.msra.mxu0 %v11650_v31  ;;  %v7875_v6 = vpop.f32.mrb[183].mxu0  ;;  %v8370_v18 = vpack.c.bf16 %v8023_v9, %v8023_v9  ;;  %v11659_v40 = vld [vmem:[%s18398_s5 + $0x1d8] sm:$0xff]   ;;  %v7280_v25 = vmax.f32 %v18119_v5, 0.0  ;;  %v8025_v46 = vmax.f32 %v8011_v15, %v8013_v57  ;;  %v11669_v36 = vld [vmem:[%s18398_s5 + $0x168] sm:$0xff]   ;;  %v11672_v48 = vld [vmem:[%s18398_s5 + $0x1b0] sm:$0xff]  }
 0x697   :  { %v7974_v52 = vadd.f32 %v7954_v47, %v18039_v35  ;;  %v7976_v41 = vadd.f32 %v7956_v45, %v18043_v21  ;;  %v7936_v38 = vpop.f32.mrb[183].mxu1  ;;  %10282 = vmatprep.subr.bf16.mxu1 %v11655_v19  ;;  %v7975_v10 = vadd.f32 %v7955_v13, %v18047_v24  ;;  %10258 = vmatprep.subr.bf16.mxu0 %v11653_v63  ;;  %v11657_v21 = vld [vmem:[%s18398_s5 + $0x150] sm:$0xff]   ;;  %v7282_v11 = vmax.f32 %v18123_v28, 0.0  ;;  %v11670_v29 = vld [vmem:[%s18398_s5 + $0x128] sm:$0xff]   ;;  %v11676_v31 = vld [vmem:[%s18398_s5 + $0x1b8] sm:$0xff]  }
 0x698   :  { %v7977_v35 = vadd.f32 %v7957_v34, %v18051_v54  ;;  %v7281_v50 = vmax.f32 %v18127_v7, 0.0  ;;  %8532 = vmatprep.mubr.bf16.mxu0 %v8370_v18  ;;  %v7283_v58 = vmax.f32 %v7263_v27, 0.0  ;;  %v8542_v24 = vpack.c.bf16 %v8025_v46, %v8025_v46  ;;  %v11660_v54 = vld [vmem:[%s18398_s5 + $0x198] sm:$0xff]   ;;  %v11658_v28 = vld [vmem:[%s18398_s5 + $0x110] sm:$0xff]   ;;  %v11663_v7 = vld [vmem:[%s18398_s5 + $0x1e0] sm:$0xff]  }
 0x699   :  { %v7994_v12 = vmax.f32 %v7974_v52, 0.0  ;;  %v7996_v55 = vmax.f32 %v7976_v41, 0.0  ;;  %v7995_v17 = vmax.f32 %v7975_v10, 0.0  ;;  %v11674_v19 = vld [vmem:[%s18398_s5 + $0x130] sm:$0xff]   ;;  %v11677_v33 = vld [vmem:[%s18398_s5 + $0x178] sm:$0xff]   ;;  %v8541_v44 = vpack.c.bf16 %v18177_v3, %v18177_v3  ;;  %v11679_v26 = vld [vmem:[%s18398_s5 + $0x240] sm:$0xff]  }
 0x69a   :  { %v7997_v5 = vmax.f32 %v7977_v35, 0.0  ;;  %10283 = vmatpush3.bf16.msra.mxu1 %v11656_v1  ;;  %10259 = vmatpush3.bf16.msra.mxu0 %v11654_v60  ;;  %v11678_v15 = vld [vmem:[%s18398_s5 + $0x138] sm:$0xff]   ;;  %v11680_v42 = vld [vmem:[%s18398_s5 + $0x200] sm:$0xff]   ;;  %v8369_v63 = vpack.c.bf16 %v18154_v30, %v18154_v30  ;;  %v11681_v9 = vld [vmem:[%s18398_s5 + $0x248] sm:$0xff]   ;;  %v12184_v6 = vmov 0.0  }
 0x69b   :  { %v8014_v16 = vmax.f32 %v7280_v25, %v7994_v12  ;;  %v8016_v56 = vmax.f32 %v7282_v11, %v7996_v55  ;;  %10284 = vmatprep.subr.bf16.mxu1 %v11659_v40  ;;  %v8015_v37 = vmax.f32 %v7281_v50, %v7995_v17  ;;  %10260 = vmatprep.subr.bf16.mxu0 %v11657_v21  ;;  %v11682_v57 = vld [vmem:[%s18398_s5 + $0x208] sm:$0xff]   ;;  %v11683_v47 = vld [vmem:[%s18398_s5 + $0x250] sm:$0xff]   ;;  %v11685_v45 = vld [vmem:[%s18398_s5 + $0x258] sm:$0xff]  }
 0x69c   :  { %v8017_v61 = vmax.f32 %v7283_v58, %v7997_v5  ;;  %8704 = vmatprep.mubr.bf16.mxu1 %v8542_v24  ;;  %v11684_v30 = vld [vmem:[%s18398_s5 + $0x210] sm:$0xff]   ;;  %v11686_v51 = vld [vmem:[%s18398_s5 + $0x218] sm:$0xff]   ;;  %v11687_v49 = vld [vmem:[%s18398_s5 + $0x260] sm:$0xff]  }
 0x69d   :  { %v18212_v32 = vmax.f32 %v8014_v16, %v8016_v56  ;;  %v11688_v3 = vld [vmem:[%s18398_s5 + $0x220] sm:$0xff]   ;;  %v11689_v13 = vld [vmem:[%s18398_s5 + $0x268] sm:$0xff]   ;;  %v11691_v53 = vld [vmem:[%s18398_s5 + $0x270] sm:$0xff]  }
 0x69e   :  { %10285 = vmatpush3.bf16.msra.mxu1 %v11660_v54  ;;  %v8027_v39 = vmax.f32 %v8015_v37, %v8017_v61  ;;  %10261 = vmatpush3.bf16.msra.mxu0 %v11658_v28  ;;  %v11690_v34 = vld [vmem:[%s18398_s5 + $0x228] sm:$0xff]   ;;  %v11692_v59 = vld [vmem:[%s18398_s5 + $0x230] sm:$0xff]   ;;  %v11693_v1 = vld [vmem:[%s18398_s5 + $0x278] sm:$0xff]  }
 0x69f   :  { %10286 = vmatprep.subr.bf16.mxu1 %v11663_v7  ;;  %10262 = vmatprep.subr.bf16.mxu0 %v11661_v8  ;;  %v11694_v52 = vld [vmem:[%s18398_s5 + $0x238] sm:$0xff]   ;;  %v8713_v41 = vpack.c.bf16 %v18212_v32, %v18212_v32  ;;  %v11695_v38 = vld [vmem:[%s18400_s7] sm:$0xff]   ;;  %v11696_v60 = vld [vmem:[%s18400_s7 + $0x8] sm:$0xff]  }
 0x6a0   :  { %v8714_v27 = vpack.c.bf16 %v8027_v39, %v8027_v39  ;;  %v11697_v18 = vld [vmem:[%s18400_s7 + $0x10] sm:$0xff]   ;;  %v11698_v40 = vld [vmem:[%s18400_s7 + $0x18] sm:$0xff]   ;;  %v11699_v25 = vld [vmem:[%s18400_s7 + $0x20] sm:$0xff]  }
 0x6a1   :  { %v11700_v10 = vld [vmem:[%s18400_s7 + $0x28] sm:$0xff]   ;;  %v11701_v35 = vld [vmem:[%s18400_s7 + $0x30] sm:$0xff]   ;;  %v11702_v21 = vld [vmem:[%s18400_s7 + $0x38] sm:$0xff]  }
 0x6a2   :  { %10287 = vmatpush3.bf16.msra.mxu1 %v11664_v4  ;;  %10263 = vmatpush3.bf16.msra.mxu0 %v11662_v20  ;;  %v11703_v46 = vld [vmem:[%s18401_s9] sm:$0xff]   ;;  %v11704_v11 = vld [vmem:[%s18401_s9 + $0x8] sm:$0xff]   ;;  %v11705_v50 = vld [vmem:[%s18401_s9 + $0x10] sm:$0xff]  }
 0x6a3   :  { %10288 = vmatprep.subr.bf16.mxu1 %v11667_v43  ;;  %10264 = vmatprep.subr.bf16.mxu0 %v11665_v2  ;;  %v11706_v12 = vld [vmem:[%s18401_s9 + $0x18] sm:$0xff]   ;;  %v11707_v55 = vld [vmem:[%s18401_s9 + $0x20] sm:$0xff]   ;;  %v11708_v58 = vld [vmem:[%s18401_s9 + $0x28] sm:$0xff]  }
 0x6a6   :  { %10289 = vmatpush3.bf16.msra.mxu1 %v11668_v22  ;;  %10265 = vmatpush3.bf16.msra.mxu0 %v11666_v23 }
 0x6a7   :  { %10290 = vmatprep.subr.bf16.mxu1 %v11671_v62  ;;  %10266 = vmatprep.subr.bf16.mxu0 %v11669_v36 }
 0x6aa   :  { %10291 = vmatpush3.bf16.msra.mxu1 %v11672_v48  ;;  %10267 = vmatpush3.bf16.msra.mxu0 %v11670_v29 }
 0x6ab   :  { %10292 = vmatprep.subr.bf16.mxu1 %v11675_v0  ;;  %10268 = vmatprep.subr.bf16.mxu0 %v11673_v14 }
 0x6ae   :  { %10293 = vmatpush3.bf16.msra.mxu1 %v11676_v31  ;;  %10269 = vmatpush3.bf16.msra.mxu0 %v11674_v19 }
 0x6af   :  { %10270 = vmatprep.subr.bf16.mxu0 %v11677_v33  ;;  %10340 = vmatprep.subr.bf16.mxu1 %v12184_v6  ;;  %v10193_v33 = vld [vmem:[%s18402_s6] ss:$0 sm:$0xff] }
 0x6b1   :  { %8705 = vmatmul.mubr.bf16.vlgmr.msra.gmra.mrb[188].mxu1 %v8541_v44 }
 0x6b2   :  { %10271 = vmatpush3.bf16.msra.mxu0 %v11678_v15  ;;  %10341 = vmatpush3.bf16.msra.mxu1 %v11695_v38 }
 0x6b3   :  { %10300 = vmatprep.subr.bf16.mxu0 %v11679_v26  ;;  %10342 = vmatprep.subr.bf16.mxu1 %v12184_v6 }
 0x6b4   :  { %10356 = vmatprep.mubr.msk.bf16.mxu1 %vm12185_vm0, %v12184_v6 }
 0x6b5   :  { %8533 = vmatmul.mubr.bf16.vlgmr.msra.gmra.mrb[188].mxu0 %v8369_v63 }
 0x6b6   :  { %10301 = vmatpush3.bf16.msra.mxu0 %v11680_v42  ;;  %8876 = vmatprep.mubr.bf16.mxu0 %v8714_v27  ;;  %v11710_v27 = vld [vmem:[%s18401_s9 + $0x38] sm:$0xff]  }
 0x6b7   :  { %10302 = vmatprep.subr.bf16.mxu0 %v11681_v9  ;;  %10343 = vmatpush3.bf16.msra.mxu1 %v11696_v60  ;;  %v11709_v9 = vld [vmem:[%s18401_s9 + $0x30] sm:$0xff]  }
 0x6b8   :  { %10344 = vmatprep.subr.bf16.mxu1 %v12184_v6 }
 0x6ba   :  { %10303 = vmatpush3.bf16.msra.mxu0 %v11682_v57  ;;  %v10194_v57 = vld [vmem:[%s18403_s8] ss:$0 sm:$0xff] }
 0x6bb   :  { %10304 = vmatprep.subr.bf16.mxu0 %v11683_v47  ;;  %10345 = vmatpush3.bf16.msra.mxu1 %v11697_v18 }
 0x6bc   :  { %10346 = vmatprep.subr.bf16.mxu1 %v12184_v6 }
 0x6be   :  { %10305 = vmatpush3.bf16.msra.mxu0 %v11684_v30 }
 0x6bf   :  { %10306 = vmatprep.subr.bf16.mxu0 %v11685_v45  ;;  %10347 = vmatpush3.bf16.msra.mxu1 %v11698_v40 }
 0x6c0   :  { %10348 = vmatprep.subr.bf16.mxu1 %v12184_v6 }
 0x6c2   :  { %10307 = vmatpush3.bf16.msra.mxu0 %v11686_v51 }
 0x6c3   :  { %10308 = vmatprep.subr.bf16.mxu0 %v11687_v49  ;;  %10349 = vmatpush3.bf16.msra.mxu1 %v11699_v25 }
 0x6c4   :  { %10350 = vmatprep.subr.bf16.mxu1 %v12184_v6 }
 0x6c6   :  { %10309 = vmatpush3.bf16.msra.mxu0 %v11688_v3 }
 0x6c7   :  { %10310 = vmatprep.subr.bf16.mxu0 %v11689_v13  ;;  %10351 = vmatpush3.bf16.msra.mxu1 %v11700_v10 }
 0x6c8   :  { %10352 = vmatprep.subr.bf16.mxu1 %v12184_v6 }
 0x6ca   :  { %10311 = vmatpush3.bf16.msra.mxu0 %v11690_v34  ;;  %v10203_v34 = vld [vmem:[%s18404_s10] ss:$0 sm:$0xff] }
 0x6cb   :  { %10312 = vmatprep.subr.bf16.mxu0 %v11691_v53  ;;  %10353 = vmatpush3.bf16.msra.mxu1 %v11701_v35 }
 0x6cc   :  { %10354 = vmatprep.subr.bf16.mxu1 %v12184_v6 }
 0x6ce   :  { %10313 = vmatpush3.bf16.msra.mxu0 %v11692_v59 }
 0x6cf   :  { %10314 = vmatprep.subr.bf16.mxu0 %v11693_v1  ;;  %10355 = vmatpush3.bf16.msra.mxu1 %v11702_v21 }
 0x6d2   :  { %10315 = vmatpush3.bf16.msra.mxu0 %v11694_v52 }
 0x6d3   :  { %10360 = vmatprep.subr.bf16.mxu0 %v12184_v6 }
 0x6d5   :  { %8877 = vmatmul.mubr.bf16.vlgmr.msra.gmra.mrb[192].mxu0 %v8713_v41 }
 0x6d6   :  { %10376 = vmatprep.mubr.msk.bf16.mxu0 %vm12185_vm0, %v12184_v6  ;;  %10361 = vmatpush3.bf16.msra.mxu0 %v11703_v46 }
 0x6d7   :  { %10362 = vmatprep.subr.bf16.mxu0 %v12184_v6 }
 0x6da   :  { %10363 = vmatpush3.bf16.msra.mxu0 %v11704_v11 }
 0x6db   :  { %10364 = vmatprep.subr.bf16.mxu0 %v12184_v6 }
 0x6de   :  { %10365 = vmatpush3.bf16.msra.mxu0 %v11705_v50 }
 0x6df   :  { %10366 = vmatprep.subr.bf16.mxu0 %v12184_v6 }
 0x6e2   :  { %10367 = vmatpush3.bf16.msra.mxu0 %v11706_v12 }
 0x6e3   :  { %10368 = vmatprep.subr.bf16.mxu0 %v12184_v6 }
 0x6e6   :  { %10369 = vmatpush3.bf16.msra.mxu0 %v11707_v55 }
 0x6e7   :  { %10370 = vmatprep.subr.bf16.mxu0 %v12184_v6 }
 0x6ea   :  { %10371 = vmatpush3.bf16.msra.mxu0 %v11708_v58 }
 0x6eb   :  { %10372 = vmatprep.subr.bf16.mxu0 %v12184_v6 }
 0x6ee   :  { %10373 = vmatpush3.bf16.msra.mxu0 %v11709_v9 }
 0x6ef   :  { %10374 = vmatprep.subr.bf16.mxu0 %v12184_v6 }
 0x6f2   :  { %10375 = vmatpush3.bf16.msra.mxu0 %v11710_v27 }
 0x764   :  { %v10250_v17 = vpop.f32.mrb[184].mxu1 }
 0x765   :  { %v10251_v5 = vpop.f32.mrb[185].mxu1 }
 0x766   :  { %v10252_v24 = vadd.f32 %v10251_v5, %v10250_v17  ;;  %v10253_v54 = vpop.f32.mrb[186].mxu1 }
 0x767   :  { %v10254_v16 = vpop.f32.mrb[187].mxu1 }
 0x768   :  { %v10228_v56 = vpop.f32.mrb[184].mxu0 }
 0x769   :  { %v10229_v28 = vpop.f32.mrb[185].mxu0 }
 0x76a   :  { %v10230_v7 = vadd.f32 %v10229_v28, %v10228_v56  ;;  %v10231_v37 = vpop.f32.mrb[186].mxu0 }
 0x76b   :  { %v10232_v61 = vpop.f32.mrb[187].mxu0 }
 0x76c   :  { %v8364_v8 = vadd.f32 %v10252_v24, %v10230_v7 }
 0x784   :  { %v10294_v32 = vpop.f32.mrb[188].mxu1 }
 0x785   :  { %v10295_v4 = vpop.f32.mrb[189].mxu1 }
 0x786   :  { %v10296_v39 = vadd.f32 %v10295_v4, %v10294_v32  ;;  %v10297_v20 = vpop.f32.mrb[190].mxu1 }
 0x787   :  { %v10298_v43 = vpop.f32.mrb[191].mxu1 }
 0x788   :  { %v10272_v2 = vpop.f32.mrb[188].mxu0 }
 0x789   :  { %v10273_v22 = vpop.f32.mrb[189].mxu0 }
 0x78a   :  { %v10274_v23 = vadd.f32 %v10273_v22, %v10272_v2  ;;  %v10275_v62 = vpop.f32.mrb[190].mxu0 }
 0x78b   :  { %v10276_v36 = vpop.f32.mrb[191].mxu0 }
 0x78c   :  { %v8540_v48 = vadd.f32 %v10274_v23, %v8364_v8 }
 0x78e   :  { %v8712_v29 = vadd.f32 %v10296_v39, %v8540_v48 }
 0x7a8   :  { %v10316_v0 = vpop.f32.mrb[192].mxu0 }
 0x7a9   :  { %v10317_v14 = vpop.f32.mrb[193].mxu0 }
 0x7aa   :  { %v10318_v31 = vadd.f32 %v10317_v14, %v10316_v0  ;;  %v10319_v19 = vpop.f32.mrb[194].mxu0 }
 0x7ab   :  { %v10320_v44 = vpop.f32.mrb[195].mxu0 }
 0x7ac   :  { %v8884_v15 = vadd.f32 %v10318_v31, %v8712_v29 }
 0x7ae   :  { %v8891_v26 = vadd.f32 %v10193_v33, %v8884_v15 }
 0x7b0   :  { %v8892_v42 = vmax.f32 %v8891_v26, 0.0 }
 0x7b2   :  { %v8893_v63 = vpack.c.bf16 %v8892_v42, %v8892_v42 }
 0x7b4   :  { %10357 = vmatmul.mubr.bf16.vlgmr.msra.gmra.mrb[192].mxu1 %v8893_v63 }
 0x887   :  { %v8998_v47 = vpop.f32.mrb[192].mxu1 }
 0x888   :  { %v8999_v30 = vadd.f32 %v10194_v57, %v8998_v47  ;;  %v10358_v45 = vpop.f32.mrb[193].mxu1 }
 0x889   :  { %v9001_v51 = vpop.f32.mrb[194].mxu1 }
 0x88a   :  { %v9004_v49 = vmax.f32 %v8999_v30, 0.0  ;;  %v10359_v3 = vpop.f32.mrb[195].mxu1 }
 0x88c   :  { %v9005_v13 = vpack.c.bf16 %v9004_v49, %v9004_v49 }
 0x88e   :  { %10377 = vmatmul.mubr.bf16.vlgmr.msra.gmra.mrb[196].mxu0 %v9005_v13 }
 0x961   :  { %v9110_v53 = vpop.f32.mrb[196].mxu0 }
 0x962   :  { %v9111_v59 = vadd.f32 %v10203_v34, %v9110_v53  ;;  %v10378_v1 = vpop.f32.mrb[197].mxu0 }
 0x963   :  { %v9113_v52 = vpop.f32.mrb[198].mxu0 }
 0x964   :  { %9116 = vst [vmem:[%s18405_s11] sm:$0xff] %v9111_v59  ;;  %v10379_v41 = vpop.f32.mrb[199].mxu0 }

</bundles_post_ra>
